<compile_context>
chip_gen: v7x
topology: tpu7x:2x2x1
jax: 0.10.0
libtpu: 0.0.40
codegen_flags: <defaults>
</compile_context>

<pallas_src>
import functools

import jax
import jax.numpy as jnp
from jax.experimental import pallas as pl
from jax.experimental.pallas import tpu as pltpu

_IN_EPS = 1e-5  # torch.nn.InstanceNorm2d default eps


def _round_up(v, m):
    return (v + m - 1) // m * m


def _pick_tk(k_pad, cap=1024):
    """Largest multiple-of-128 divisor of k_pad that is <= cap (k_pad itself if small)."""
    if k_pad <= cap:
        return k_pad
    units = k_pad // 128
    for m in range(cap // 128, 0, -1):
        if units % m == 0:
            return m * 128
    return 128


def _pick_hw_chunk(hw, target=4096):
    """Divisor of hw that is a multiple of 8 and <= target (hw itself if none/small)."""
    if hw <= target:
        return hw
    d = target - (target % 8)
    while d >= 8:
        if hw % d == 0:
            return d
        d -= 8
    return hw


# ---------------------------------------------------------------------------
# Pallas kernel 1: tiled matmul + bias (bf16 inputs, f32 accumulation)
# ---------------------------------------------------------------------------
def _matmul_bias_kernel(a_ref, w_ref, b_ref, o_ref, acc_ref):
    k = pl.program_id(2)

    @pl.when(k == 0)
    def _():
        acc_ref[...] = jnp.zeros_like(acc_ref)

    acc_ref[...] += jnp.dot(
        a_ref[...], w_ref[...], preferred_element_type=jnp.float32
    )

    @pl.when(k == pl.num_programs(2) - 1)
    def _():
        o_ref[...] = acc_ref[...] + b_ref[...]


def _matmul_bias(a, w, b):
    """a: (M, K), w: (K, N), b: (N,) -> (M, N) f32.  a/w cast to bf16, f32 accum."""
    M, K = a.shape
    K2, N = w.shape
    assert K == K2

    a = a.astype(jnp.bfloat16)
    w = w.astype(jnp.bfloat16)

    tn = 128
    n_pad = _round_up(N, tn)
    k_pad = _round_up(K, 128)
    tk = _pick_tk(k_pad)
    tm = min(256, _round_up(M, 32))
    m_pad = _round_up(M, tm)

    if (m_pad, k_pad) != (M, K):
        a = jnp.pad(a, ((0, m_pad - M), (0, k_pad - K)))
    if (k_pad, n_pad) != (K, N):
        w = jnp.pad(w, ((0, k_pad - K), (0, n_pad - N)))
    b = jnp.pad(b.astype(jnp.float32), (0, n_pad - N)).reshape(1, n_pad)

    grid = (m_pad // tm, n_pad // tn, k_pad // tk)
    out = pl.pallas_call(
        _matmul_bias_kernel,
        out_shape=jax.ShapeDtypeStruct((m_pad, n_pad), jnp.float32),
        grid_spec=pltpu.PrefetchScalarGridSpec(
            num_scalar_prefetch=0,
            grid=grid,
            in_specs=[
                pl.BlockSpec((tm, tk), lambda i, j, k: (i, k)),
                pl.BlockSpec((tk, tn), lambda i, j, k: (k, j)),
                pl.BlockSpec((1, tn), lambda i, j, k: (0, j)),
            ],
            out_specs=pl.BlockSpec((tm, tn), lambda i, j, k: (i, j)),
            scratch_shapes=[pltpu.VMEM((tm, tn), jnp.float32)],
        ),
        compiler_params=pltpu.CompilerParams(
            dimension_semantics=("parallel", "parallel", "arbitrary"),
            vmem_limit_bytes=32 * 1024 * 1024,
        ),
    )(a, w, b)
    return out[:M, :N]


# ---------------------------------------------------------------------------
# Pallas kernel 2/3: chunked InstanceNorm (stats pass + apply pass)
# ---------------------------------------------------------------------------
def _in_stats_kernel(x_ref, mean_ref, rstd_ref, sum_ref, sq_ref, *, inv_hw):
    h = pl.program_id(1)

    @pl.when(h == 0)
    def _():
        sum_ref[...] = jnp.zeros_like(sum_ref)
        sq_ref[...] = jnp.zeros_like(sq_ref)

    x = x_ref[...]                                  # (hw_chunk, C)
    sum_ref[...] += jnp.sum(x, axis=0, keepdims=True)
    sq_ref[...] += jnp.sum(x * x, axis=0, keepdims=True)

    @pl.when(h == pl.num_programs(1) - 1)
    def _():
        m = sum_ref[...] * inv_hw
        var = jnp.maximum(sq_ref[...] * inv_hw - m * m, 0.0)
        mean_ref[...] = m
        rstd_ref[...] = jax.lax.rsqrt(var + _IN_EPS)


def _in_apply_kernel(*refs, relu, has_res):
    if has_res:
        x_ref, mean_ref, rstd_ref, g_ref, b_ref, res_ref, o_ref = refs
    else:
        x_ref, mean_ref, rstd_ref, g_ref, b_ref, o_ref = refs
        res_ref = None
    y = (x_ref[...] - mean_ref[...]) * (rstd_ref[...] * g_ref[...]) + b_ref[...]
    if relu:
        y = jnp.maximum(y, 0.0)
    if has_res:
        y = y + res_ref[...]
    o_ref[...] = y


def _instance_norm(x_nhwc, gamma, beta, relu=False, residual=None):
    """InstanceNorm2d(affine) [+ ReLU] [+ residual add], chunked over H*W."""
    N, H, W, C = x_nhwc.shape
    HW = H * W
    x3 = x_nhwc.reshape(N, HW, C)
    hwc = _pick_hw_chunk(HW)
    n_chunks = HW // hwc

    # Pass 1: per-(n, c) mean / rstd via single-pass sum & sum-of-squares.
    stats_kern = functools.partial(_in_stats_kernel, inv_hw=1.0 / float(HW))
    mean, rstd = pl.pallas_call(
        stats_kern,
        out_shape=(
            jax.ShapeDtypeStruct((N, 1, C), jnp.float32),
            jax.ShapeDtypeStruct((N, 1, C), jnp.float32),
        ),
        grid_spec=pltpu.PrefetchScalarGridSpec(
            num_scalar_prefetch=0,
            grid=(N, n_chunks),
            in_specs=[pl.BlockSpec((None, hwc, C), lambda n, h: (n, h, 0))],
            out_specs=[
                pl.BlockSpec((None, 1, C), lambda n, h: (n, 0, 0)),
                pl.BlockSpec((None, 1, C), lambda n, h: (n, 0, 0)),
            ],
            scratch_shapes=[
                pltpu.VMEM((1, C), jnp.float32),
                pltpu.VMEM((1, C), jnp.float32),
            ],
        ),
        compiler_params=pltpu.CompilerParams(
            dimension_semantics=("parallel", "arbitrary"),
            vmem_limit_bytes=32 * 1024 * 1024,
        ),
    )(x3)

    # Pass 2: normalize + affine (+ ReLU) (+ residual add), fused.
    has_res = residual is not None
    apply_kern = functools.partial(_in_apply_kernel, relu=relu, has_res=has_res)
    in_specs = [
        pl.BlockSpec((None, hwc, C), lambda n, h: (n, h, 0)),   # x
        pl.BlockSpec((None, 1, C), lambda n, h: (n, 0, 0)),     # mean
        pl.BlockSpec((None, 1, C), lambda n, h: (n, 0, 0)),     # rstd
        pl.BlockSpec((None, 1, C), lambda n, h: (0, 0, 0)),     # gamma
        pl.BlockSpec((None, 1, C), lambda n, h: (0, 0, 0)),     # beta
    ]
    args = [x3, mean, rstd, gamma.reshape(1, 1, C), beta.reshape(1, 1, C)]
    if has_res:
        in_specs.append(pl.BlockSpec((None, hwc, C), lambda n, h: (n, h, 0)))
        args.append(residual.reshape(N, HW, C))

    y = pl.pallas_call(
        apply_kern,
        out_shape=jax.ShapeDtypeStruct((N, HW, C), jnp.float32),
        grid_spec=pltpu.PrefetchScalarGridSpec(
            num_scalar_prefetch=0,
            grid=(N, n_chunks),
            in_specs=in_specs,
            out_specs=pl.BlockSpec((None, hwc, C), lambda n, h: (n, h, 0)),
        ),
        compiler_params=pltpu.CompilerParams(
            dimension_semantics=("parallel", "parallel"),
            vmem_limit_bytes=32 * 1024 * 1024,
        ),
    )(*args)
    return y.reshape(N, H, W, C)


# ---------------------------------------------------------------------------
# Layer glue (im2col, reflection pad, nearest upsample) — plain JAX
# ---------------------------------------------------------------------------
def _conv2d_reflect(x, w_hwio, b, stride):
    """ConvLayer: ReflectionPad2d(k//2) + Conv2d(stride). x: NHWC, w: (K,K,Cin,Cout)."""
    K = w_hwio.shape[0]
    Cout = w_hwio.shape[-1]
    pad = K // 2
    xp = jnp.pad(
        x.astype(jnp.bfloat16), ((0, 0), (pad, pad), (pad, pad), (0, 0)), mode="reflect"
    )
    N, Hp, Wp, Cin = xp.shape
    Ho = (Hp - K) // stride + 1
    Wo = (Wp - K) // stride + 1
    # TODO(synk): express the (kh, kw) tap shift via the matmul kernel's index_map
    # (tap as reduction grid axis over xp) to avoid materializing K*K shifted copies.
    cols = []
    for kh in range(K):
        for kw in range(K):
            cols.append(
                jax.lax.slice(
                    xp,
                    (0, kh, kw, 0),
                    (N, kh + (Ho - 1) * stride + 1, kw + (Wo - 1) * stride + 1, Cin),
                    (1, stride, stride, 1),
                )
            )
    patches = jnp.stack(cols, axis=-2)                       # (N, Ho, Wo, K*K, Cin) bf16
    A = patches.reshape(N * Ho * Wo, K * K * Cin)            # (kh, kw, ci) ordering
    Wm = w_hwio.astype(jnp.bfloat16).reshape(K * K * Cin, Cout)
    out = _matmul_bias(A, Wm, b)                             # tiled Pallas MXU matmul
    return out.reshape(N, Ho, Wo, Cout)


def _upsample_nearest(x, factor):
    # TODO(synk): fold the nearest upsample into the following conv's im2col/index_map.
    x = jnp.repeat(x, factor, axis=1)
    x = jnp.repeat(x, factor, axis=2)
    return x


# ---------------------------------------------------------------------------
# Blocks
# ---------------------------------------------------------------------------
def _residual_block(p, x):
    out = _conv2d_reflect(x, p["conv1"]["w"], p["conv1"]["b"], 1)
    out = _instance_norm(out, p["in1"]["g"], p["in1"]["b"], relu=True)
    out = _conv2d_reflect(out, p["conv2"]["w"], p["conv2"]["b"], 1)
    # residual add fused into the InstanceNorm apply kernel
    out = _instance_norm(out, p["in2"]["g"], p["in2"]["b"], relu=False, residual=x)
    return out


def _tuning_block(p, x):
    out = _conv2d_reflect(x, p["conv0"]["w"], p["conv0"]["b"], 1)
    out = _instance_norm(out, p["in0"]["g"], p["in0"]["b"], relu=True)
    out = _conv2d_reflect(out, p["conv1"]["w"], p["conv1"]["b"], 1)
    return out


def _main_forward(m, x):
    out = _instance_norm(_conv2d_reflect(x, m["conv1"]["w"], m["conv1"]["b"], 1),
                         m["in1"]["g"], m["in1"]["b"], relu=True)
    out = _instance_norm(_conv2d_reflect(out, m["conv2"]["w"], m["conv2"]["b"], 2),
                         m["in2"]["g"], m["in2"]["b"], relu=True)
    out = _instance_norm(_conv2d_reflect(out, m["conv3"]["w"], m["conv3"]["b"], 2),
                         m["in3"]["g"], m["in3"]["b"], relu=True)
    for r in ("res1", "res2", "res3", "res4", "res5"):
        out = _residual_block(m[r], out)
    out = _instance_norm(
        _conv2d_reflect(_upsample_nearest(out, 2), m["deconv1"]["w"], m["deconv1"]["b"], 1),
        m["in4"]["g"], m["in4"]["b"], relu=True)
    out = _instance_norm(
        _conv2d_reflect(_upsample_nearest(out, 2), m["deconv2"]["w"], m["deconv2"]["b"], 1),
        m["in5"]["g"], m["in5"]["b"], relu=True)
    out = _conv2d_reflect(out, m["deconv3"]["w"], m["deconv3"]["b"], 1)
    return out


def dynamic_style_transfer_dual_forward(params, x_nchw, alpha_0=0.0, alpha_1=None, alpha_2=None):
    """Exact forward semantics of DynamicStyleTransferDual (alphas are Python floats)."""
    if alpha_1 is None or alpha_2 is None:
        alpha_1 = alpha_0
        alpha_2 = alpha_0
    m = params["main"]
    tl = params["lower"]
    th = params["higher"]
    x = jnp.transpose(x_nchw, (0, 2, 3, 1)).astype(jnp.float32)   # NCHW -> NHWC

    if alpha_0 == 0 and alpha_1 == 0 and alpha_2 == 0:
        return jnp.transpose(_main_forward(m, x), (0, 3, 1, 2))

    out = _instance_norm(_conv2d_reflect(x, m["conv1"]["w"], m["conv1"]["b"], 1),
                         m["in1"]["g"], m["in1"]["b"], relu=True)
    out = _instance_norm(_conv2d_reflect(out, m["conv2"]["w"], m["conv2"]["b"], 2),
                         m["in2"]["g"], m["in2"]["b"], relu=True)
    out = _instance_norm(_conv2d_reflect(out, m["conv3"]["w"], m["conv3"]["b"], 2),
                         m["in3"]["g"], m["in3"]["b"], relu=True)
    out = _residual_block(m["res1"], out)
    out = _residual_block(m["res2"], out)
    if alpha_0 > 0:
        out = _residual_block(m["res3"], out + alpha_0 * _tuning_block(th["block0"], out))
    elif alpha_0 < 0:
        out = _residual_block(m["res3"], out - alpha_0 * _tuning_block(tl["block0"], out))
    else:  # zero coefficient: skip the (numerically no-op) tuning block
        out = _residual_block(m["res3"], out)
    out = _residual_block(m["res4"], out)
    out = _residual_block(m["res5"], out)
    if alpha_1 > 0:
        t = out + alpha_1 * _tuning_block(th["block1"], out)
    elif alpha_1 < 0:
        t = out - alpha_1 * _tuning_block(tl["block1"], out)
    else:
        t = out
    out = _instance_norm(
        _conv2d_reflect(_upsample_nearest(t, 2), m["deconv1"]["w"], m["deconv1"]["b"], 1),
        m["in4"]["g"], m["in4"]["b"], relu=True)
    out = _instance_norm(
        _conv2d_reflect(_upsample_nearest(out, 2), m["deconv2"]["w"], m["deconv2"]["b"], 1),
        m["in5"]["g"], m["in5"]["b"], relu=True)
    if alpha_2 > 0:
        t = out + alpha_2 * _tuning_block(th["block2"], out)
    elif alpha_2 < 0:
        t = out - alpha_2 * _tuning_block(tl["block2"], out)
    else:
        t = out
    out = _conv2d_reflect(t, m["deconv3"]["w"], m["deconv3"]["b"], 1)
    return jnp.transpose(out, (0, 3, 1, 2))                       # back to NCHW


# ---------------------------------------------------------------------------
# Deterministic synthetic parameter init (shapes from the module __init__)
# ---------------------------------------------------------------------------
def init_params(key):
    keys = iter(jax.random.split(key, 64))

    def conv(cin, cout, k):
        kw, kb = jax.random.split(next(keys))
        fan_in = cin * k * k
        return {
            "w": jax.random.normal(kw, (k, k, cin, cout), jnp.float32) / jnp.sqrt(fan_in),
            "b": 0.01 * jax.random.normal(kb, (cout,), jnp.float32),
        }

    def inorm(c):
        kg, kb = jax.random.split(next(keys))
        return {
            "g": 1.0 + 0.1 * jax.random.normal(kg, (c,), jnp.float32),
            "b": 0.1 * jax.random.normal(kb, (c,), jnp.float32),
        }

    def resblock(c):
        return {"conv1": conv(c, c, 3), "in1": inorm(c),
                "conv2": conv(c, c, 3), "in2": inorm(c)}

    def tuning_block(c):
        return {"conv0": conv(c, c, 3), "in0": inorm(c), "conv1": conv(c, c, 3)}

    def tuning_module(b0, b1, b2):
        return {"block0": tuning_block(b0),
                "block1": tuning_block(b1),
                "block2": tuning_block(b2)}

    res_size = 128
    deconv2_output_size = 32
    main = {
        "conv1": conv(3, 32, 9),   "in1": inorm(32),
        "conv2": conv(32, 64, 3),  "in2": inorm(64),
        "conv3": conv(64, 128, 3), "in3": inorm(128),
        "res1": resblock(128), "res2": resblock(128), "res3": resblock(128),
        "res4": resblock(128), "res5": resblock(128),
        "deconv1": conv(128, 64, 3), "in4": inorm(64),
        "deconv2": conv(64, 32, 3),  "in5": inorm(32),
        "deconv3": conv(32, 3, 9),
    }
    return {
        "main": main,
        "lower": tuning_module(res_size, res_size, deconv2_output_size),
        "higher": tuning_module(res_size, res_size, deconv2_output_size),
    }


if __name__ == "__main__":
    key = jax.random.PRNGKey(0)
    pkey, xkey = jax.random.split(key)
    params = init_params(pkey)

    # small deterministic input (NCHW like PyTorch): batch=2, 3 channels, 16x16
    x = jax.random.normal(xkey, (2, 3, 16, 16), jnp.float32)

    alpha_0, alpha_1, alpha_2 = 0.5, -0.25, 0.75  # exercises higher+lower tuning paths
    fwd = jax.jit(lambda p, xi: dynamic_style_transfer_dual_forward(
        p, xi, alpha_0=alpha_0, alpha_1=alpha_1, alpha_2=alpha_2))

    out = fwd(params, x)
    jax.block_until_ready(out)
    assert out.shape == (2, 3, 16, 16) and out.dtype == jnp.float32
    assert bool(jnp.all(jnp.isfinite(out)))
    print("KERNEL_OK")
</pallas_src>

<mosaic_0001>
module attributes {stable_mosaic.version = 11 : i64} {
  func.func @_matmul_bias_kernel(%arg0: i32, %arg1: i32, %arg2: i32, %arg3: memref<256x256xbf16, #tpu.memory_space<vmem>>, %arg4: memref<256x128xbf16, #tpu.memory_space<vmem>>, %arg5: memref<1x128xf32, #tpu.memory_space<vmem>>, %arg6: memref<256x128xf32, #tpu.memory_space<vmem>>, %arg7: memref<256x128xf32, #tpu.memory_space<vmem>>) attributes {dimension_semantics = [#tpu.dimension_semantics<parallel>, #tpu.dimension_semantics<parallel>, #tpu.dimension_semantics<arbitrary>], iteration_bounds = array<i64: 2, 1, 1>, scalar_prefetch = 0 : i64, scratch_operands = 1 : i64, tpu.core_type = #tpu.core_type<tc>, window_params = [{transform_indices = @transform_0, window_bounds = array<i64: 256, 256>}, {transform_indices = @transform_1, window_bounds = array<i64: 256, 128>}, {transform_indices = @transform_2, window_bounds = array<i64: 1, 128>}, {transform_indices = @transform_3, window_bounds = array<i64: 256, 128>}]} {
    %c0_i32 = arith.constant 0 : i32
    %0 = arith.cmpi eq, %arg2, %c0_i32 : i32
    %1 = arith.extui %0 : i1 to i32
    %c0_i32_0 = arith.constant 0 : i32
    %2 = arith.cmpi ne, %1, %c0_i32_0 : i32
    scf.if %2 {
      %cst_10 = arith.constant 0.000000e+00 : f32
      %12 = vector.broadcast %cst_10 : f32 to vector<256x128xf32>
      %c0_11 = arith.constant 0 : index
      %c0_12 = arith.constant 0 : index
      %13 = vector.load %arg7[%c0_11, %c0_12] : memref<256x128xf32, #tpu.memory_space<vmem>>, vector<256x128xf32>
      tpu.vector_store %arg7[%c0_11, %c0_12], %12 {strides = array<i32>} : memref<256x128xf32, #tpu.memory_space<vmem>>, vector<256x128xf32>,
    } else {
    }
    %c0 = arith.constant 0 : index
    %c0_1 = arith.constant 0 : index
    %3 = vector.load %arg7[%c0, %c0_1] : memref<256x128xf32, #tpu.memory_space<vmem>>, vector<256x128xf32>
    %c0_2 = arith.constant 0 : index
    %c0_3 = arith.constant 0 : index
    %4 = vector.load %arg3[%c0_2, %c0_3] : memref<256x256xbf16, #tpu.memory_space<vmem>>, vector<256x256xbf16>
    %c0_4 = arith.constant 0 : index
    %c0_5 = arith.constant 0 : index
    %5 = vector.load %arg4[%c0_4, %c0_5] : memref<256x128xbf16, #tpu.memory_space<vmem>>, vector<256x128xbf16>
    %cst = arith.constant dense<0.000000e+00> : vector<256x128xf32>
    %6 = tpu.matmul %4, %5, %cst {dimension_numbers = #tpu.dot_dimension_numbers<[1], [0], [0], [1], [0, 0, 1, 1], [], []>} : vector<256x256xbf16>, vector<256x128xbf16>, vector<256x128xf32> -> vector<256x128xf32>
    %7 = arith.addf %3, %6 : vector<256x128xf32>
    %c0_6 = arith.constant 0 : index
    %c0_7 = arith.constant 0 : index
    %8 = vector.load %arg7[%c0_6, %c0_7] : memref<256x128xf32, #tpu.memory_space<vmem>>, vector<256x128xf32>
    tpu.vector_store %arg7[%c0_6, %c0_7], %7 {strides = array<i32>} : memref<256x128xf32, #tpu.memory_space<vmem>>, vector<256x128xf32>,
    %c0_i32_8 = arith.constant 0 : i32
    %9 = arith.cmpi eq, %arg2, %c0_i32_8 : i32
    %10 = arith.extui %9 : i1 to i32
    %c0_i32_9 = arith.constant 0 : i32
    %11 = arith.cmpi ne, %10, %c0_i32_9 : i32
    scf.if %11 {
      %c0_10 = arith.constant 0 : index
      %c0_11 = arith.constant 0 : index
      %12 = vector.load %arg7[%c0_10, %c0_11] : memref<256x128xf32, #tpu.memory_space<vmem>>, vector<256x128xf32>
      %c0_12 = arith.constant 0 : index
      %c0_13 = arith.constant 0 : index
      %13 = vector.load %arg5[%c0_12, %c0_13] : memref<1x128xf32, #tpu.memory_space<vmem>>, vector<1x128xf32>
      %14 = vector.broadcast %13 : vector<1x128xf32> to vector<256x128xf32>
      %15 = arith.addf %12, %14 : vector<256x128xf32>
      %c0_14 = arith.constant 0 : index
      %c0_15 = arith.constant 0 : index
      %16 = vector.load %arg6[%c0_14, %c0_15] : memref<256x128xf32, #tpu.memory_space<vmem>>, vector<256x128xf32>
      tpu.vector_store %arg6[%c0_14, %c0_15], %15 {strides = array<i32>} : memref<256x128xf32, #tpu.memory_space<vmem>>, vector<256x128xf32>,
    } else {
    }
    return
  }
  func.func @transform_0(%arg0: i32, %arg1: i32, %arg2: i32) -> (i32, i32) {
    %c0_i32 = arith.constant 0 : i32
    return %arg0, %arg2 : i32, i32
  }
  func.func @transform_1(%arg0: i32, %arg1: i32, %arg2: i32) -> (i32, i32) {
    %c0_i32 = arith.constant 0 : i32
    return %arg2, %arg1 : i32, i32
  }
  func.func @transform_2(%arg0: i32, %arg1: i32, %arg2: i32) -> (i32, i32) {
    %c0_i32 = arith.constant 0 : i32
    %c0_i32_0 = arith.constant 0 : i32
    return %c0_i32, %arg1 : i32, i32
  }
  func.func @transform_3(%arg0: i32, %arg1: i32, %arg2: i32) -> (i32, i32) {
    %c0_i32 = arith.constant 0 : i32
    return %arg0, %arg1 : i32, i32
  }
}

module attributes {stable_mosaic.version = 11 : i64} {
  func.func @_in_stats_kernel(%arg0: i32, %arg1: i32, %arg2: memref<1x256x32xf32, #tpu.memory_space<vmem>>, %arg3: memref<1x1x32xf32, #tpu.memory_space<vmem>>, %arg4: memref<1x1x32xf32, #tpu.memory_space<vmem>>, %arg5: memref<1x32xf32, #tpu.memory_space<vmem>>, %arg6: memref<1x32xf32, #tpu.memory_space<vmem>>) attributes {dimension_semantics = [#tpu.dimension_semantics<parallel>, #tpu.dimension_semantics<arbitrary>], iteration_bounds = array<i64: 2, 1>, scalar_prefetch = 0 : i64, scratch_operands = 2 : i64, tpu.core_type = #tpu.core_type<tc>, window_params = [{transform_indices = @transform_0, window_bounds = array<i64: 1, 256, 32>}, {transform_indices = @transform_1, window_bounds = array<i64: 1, 1, 32>}, {transform_indices = @transform_2, window_bounds = array<i64: 1, 1, 32>}]} {
    %c0_i32 = arith.constant 0 : i32
    %0 = arith.cmpi eq, %arg1, %c0_i32 : i32
    %1 = arith.extui %0 : i1 to i32
    %c0_i32_0 = arith.constant 0 : i32
    %2 = arith.cmpi ne, %1, %c0_i32_0 : i32
    scf.if %2 {
      %cst_14 = arith.constant 0.000000e+00 : f32
      %19 = vector.broadcast %cst_14 : f32 to vector<1x32xf32>
      %c0_15 = arith.constant 0 : index
      %c0_16 = arith.constant 0 : index
      %20 = vector.load %arg5[%c0_15, %c0_16] : memref<1x32xf32, #tpu.memory_space<vmem>>, vector<1x32xf32>
      tpu.vector_store %arg5[%c0_15, %c0_16], %19 {strides = array<i32>} : memref<1x32xf32, #tpu.memory_space<vmem>>, vector<1x32xf32>,
      %cst_17 = arith.constant 0.000000e+00 : f32
      %21 = vector.broadcast %cst_17 : f32 to vector<1x32xf32>
      %c0_18 = arith.constant 0 : index
      %c0_19 = arith.constant 0 : index
      %22 = vector.load %arg6[%c0_18, %c0_19] : memref<1x32xf32, #tpu.memory_space<vmem>>, vector<1x32xf32>
      tpu.vector_store %arg6[%c0_18, %c0_19], %21 {strides = array<i32>} : memref<1x32xf32, #tpu.memory_space<vmem>>, vector<1x32xf32>,
    } else {
    }
    %c0 = arith.constant 0 : index
    %c0_1 = arith.constant 0 : index
    %c0_2 = arith.constant 0 : index
    %3 = vector.load %arg2[%c0, %c0_1, %c0_2] : memref<1x256x32xf32, #tpu.memory_space<vmem>>, vector<1x256x32xf32>
    %4 = vector.shape_cast %3 : vector<1x256x32xf32> to vector<256x32xf32>
    %c0_3 = arith.constant 0 : index
    %c0_4 = arith.constant 0 : index
    %5 = vector.load %arg5[%c0_3, %c0_4] : memref<1x32xf32, #tpu.memory_space<vmem>>, vector<1x32xf32>
    %cst = arith.constant dense<0.000000e+00> : vector<32xf32>
    %6 = vector.multi_reduction <add>, %4, %cst [0] : vector<256x32xf32> to vector<32xf32>
    %7 = vector.shape_cast %6 : vector<32xf32> to vector<1x32xf32>
    %8 = arith.addf %5, %7 : vector<1x32xf32>
    %c0_5 = arith.constant 0 : index
    %c0_6 = arith.constant 0 : index
    %9 = vector.load %arg5[%c0_5, %c0_6] : memref<1x32xf32, #tpu.memory_space<vmem>>, vector<1x32xf32>
    tpu.vector_store %arg5[%c0_5, %c0_6], %8 {strides = array<i32>} : memref<1x32xf32, #tpu.memory_space<vmem>>, vector<1x32xf32>,
    %c0_7 = arith.constant 0 : index
    %c0_8 = arith.constant 0 : index
    %10 = vector.load %arg6[%c0_7, %c0_8] : memref<1x32xf32, #tpu.memory_space<vmem>>, vector<1x32xf32>
    %11 = arith.mulf %4, %4 : vector<256x32xf32>
    %cst_9 = arith.constant dense<0.000000e+00> : vector<32xf32>
    %12 = vector.multi_reduction <add>, %11, %cst_9 [0] : vector<256x32xf32> to vector<32xf32>
    %13 = vector.shape_cast %12 : vector<32xf32> to vector<1x32xf32>
    %14 = arith.addf %10, %13 : vector<1x32xf32>
    %c0_10 = arith.constant 0 : index
    %c0_11 = arith.constant 0 : index
    %15 = vector.load %arg6[%c0_10, %c0_11] : memref<1x32xf32, #tpu.memory_space<vmem>>, vector<1x32xf32>
    tpu.vector_store %arg6[%c0_10, %c0_11], %14 {strides = array<i32>} : memref<1x32xf32, #tpu.memory_space<vmem>>, vector<1x32xf32>,
    %c0_i32_12 = arith.constant 0 : i32
    %16 = arith.cmpi eq, %arg1, %c0_i32_12 : i32
    %17 = arith.extui %16 : i1 to i32
    %c0_i32_13 = arith.constant 0 : i32
    %18 = arith.cmpi ne, %17, %c0_i32_13 : i32
    scf.if %18 {
      %c0_14 = arith.constant 0 : index
      %c0_15 = arith.constant 0 : index
      %19 = vector.load %arg5[%c0_14, %c0_15] : memref<1x32xf32, #tpu.memory_space<vmem>>, vector<1x32xf32>
      %cst_16 = arith.constant 3.906250e-03 : f32
      %20 = vector.broadcast %cst_16 : f32 to vector<1x32xf32>
      %21 = arith.mulf %19, %20 : vector<1x32xf32>
      %c0_17 = arith.constant 0 : index
      %c0_18 = arith.constant 0 : index
      %22 = vector.load %arg6[%c0_17, %c0_18] : memref<1x32xf32, #tpu.memory_space<vmem>>, vector<1x32xf32>
      %cst_19 = arith.constant 3.906250e-03 : f32
      %23 = vector.broadcast %cst_19 : f32 to vector<1x32xf32>
      %24 = arith.mulf %22, %23 : vector<1x32xf32>
      %25 = arith.mulf %21, %21 : vector<1x32xf32>
      %26 = arith.subf %24, %25 : vector<1x32xf32>
      %cst_20 = arith.constant 0.000000e+00 : f32
      %27 = vector.broadcast %cst_20 : f32 to vector<1x32xf32>
      %28 = arith.maximumf %26, %27 : vector<1x32xf32>
      %c0_21 = arith.constant 0 : index
      %c0_22 = arith.constant 0 : index
      %c0_23 = arith.constant 0 : index
      %29 = vector.load %arg3[%c0_21, %c0_22, %c0_23] : memref<1x1x32xf32, #tpu.memory_space<vmem>>, vector<1x1x32xf32>
      %30 = vector.shape_cast %29 : vector<1x1x32xf32> to vector<1x32xf32>
      %31 = vector.shape_cast %21 : vector<1x32xf32> to vector<1x1x32xf32>
      tpu.vector_store %arg3[%c0_21, %c0_22, %c0_23], %31 {strides = array<i32>} : memref<1x1x32xf32, #tpu.memory_space<vmem>>, vector<1x1x32xf32>,
      %cst_24 = arith.constant 9.99999974E-6 : f32
      %32 = vector.broadcast %cst_24 : f32 to vector<1x32xf32>
      %33 = arith.addf %28, %32 : vector<1x32xf32>
      %34 = math.rsqrt %33 : vector<1x32xf32>
      %c0_25 = arith.constant 0 : index
      %c0_26 = arith.constant 0 : index
      %c0_27 = arith.constant 0 : index
      %35 = vector.load %arg4[%c0_25, %c0_26, %c0_27] : memref<1x1x32xf32, #tpu.memory_space<vmem>>, vector<1x1x32xf32>
      %36 = vector.shape_cast %35 : vector<1x1x32xf32> to vector<1x32xf32>
      %37 = vector.shape_cast %34 : vector<1x32xf32> to vector<1x1x32xf32>
      tpu.vector_store %arg4[%c0_25, %c0_26, %c0_27], %37 {strides = array<i32>} : memref<1x1x32xf32, #tpu.memory_space<vmem>>, vector<1x1x32xf32>,
    } else {
    }
    return
  }
  func.func @transform_0(%arg0: i32, %arg1: i32) -> (i32, i32, i32) {
    %c0_i32 = arith.constant 0 : i32
    %c0_i32_0 = arith.constant 0 : i32
    return %arg0, %arg1, %c0_i32 : i32, i32, i32
  }
  func.func @transform_1(%arg0: i32, %arg1: i32) -> (i32, i32, i32) {
    %c0_i32 = arith.constant 0 : i32
    %c0_i32_0 = arith.constant 0 : i32
    %c0_i32_1 = arith.constant 0 : i32
    return %arg0, %c0_i32, %c0_i32_0 : i32, i32, i32
  }
  func.func @transform_2(%arg0: i32, %arg1: i32) -> (i32, i32, i32) {
    %c0_i32 = arith.constant 0 : i32
    %c0_i32_0 = arith.constant 0 : i32
    %c0_i32_1 = arith.constant 0 : i32
    return %arg0, %c0_i32, %c0_i32_0 : i32, i32, i32
  }
}

module attributes {stable_mosaic.version = 11 : i64} {
  func.func @_in_apply_kernel(%arg0: i32, %arg1: i32, %arg2: memref<1x256x32xf32, #tpu.memory_space<vmem>>, %arg3: memref<1x1x32xf32, #tpu.memory_space<vmem>>, %arg4: memref<1x1x32xf32, #tpu.memory_space<vmem>>, %arg5: memref<1x1x32xf32, #tpu.memory_space<vmem>>, %arg6: memref<1x1x32xf32, #tpu.memory_space<vmem>>, %arg7: memref<1x256x32xf32, #tpu.memory_space<vmem>>) attributes {dimension_semantics = [#tpu.dimension_semantics<parallel>, #tpu.dimension_semantics<parallel>], iteration_bounds = array<i64: 2, 1>, scalar_prefetch = 0 : i64, scratch_operands = 0 : i64, tpu.core_type = #tpu.core_type<tc>, window_params = [{transform_indices = @transform_0, window_bounds = array<i64: 1, 256, 32>}, {transform_indices = @transform_1, window_bounds = array<i64: 1, 1, 32>}, {transform_indices = @transform_2, window_bounds = array<i64: 1, 1, 32>}, {pipeline_mode = #tpu.pipeline_mode<synchronous>, transform_indices = @transform_3, window_bounds = array<i64: 1, 1, 32>}, {pipeline_mode = #tpu.pipeline_mode<synchronous>, transform_indices = @transform_4, window_bounds = array<i64: 1, 1, 32>}, {transform_indices = @transform_5, window_bounds = array<i64: 1, 256, 32>}]} {
    %c0 = arith.constant 0 : index
    %c0_0 = arith.constant 0 : index
    %c0_1 = arith.constant 0 : index
    %0 = vector.load %arg2[%c0, %c0_0, %c0_1] : memref<1x256x32xf32, #tpu.memory_space<vmem>>, vector<1x256x32xf32>
    %1 = vector.shape_cast %0 : vector<1x256x32xf32> to vector<256x32xf32>
    %c0_2 = arith.constant 0 : index
    %c0_3 = arith.constant 0 : index
    %c0_4 = arith.constant 0 : index
    %2 = vector.load %arg3[%c0_2, %c0_3, %c0_4] : memref<1x1x32xf32, #tpu.memory_space<vmem>>, vector<1x1x32xf32>
    %3 = vector.shape_cast %2 : vector<1x1x32xf32> to vector<1x32xf32>
    %4 = vector.broadcast %3 : vector<1x32xf32> to vector<256x32xf32>
    %5 = arith.subf %1, %4 : vector<256x32xf32>
    %c0_5 = arith.constant 0 : index
    %c0_6 = arith.constant 0 : index
    %c0_7 = arith.constant 0 : index
    %6 = vector.load %arg4[%c0_5, %c0_6, %c0_7] : memref<1x1x32xf32, #tpu.memory_space<vmem>>, vector<1x1x32xf32>
    %7 = vector.shape_cast %6 : vector<1x1x32xf32> to vector<1x32xf32>
    %c0_8 = arith.constant 0 : index
    %c0_9 = arith.constant 0 : index
    %c0_10 = arith.constant 0 : index
    %8 = vector.load %arg5[%c0_8, %c0_9, %c0_10] : memref<1x1x32xf32, #tpu.memory_space<vmem>>, vector<1x1x32xf32>
    %9 = vector.shape_cast %8 : vector<1x1x32xf32> to vector<1x32xf32>
    %10 = arith.mulf %7, %9 : vector<1x32xf32>
    %11 = vector.broadcast %10 : vector<1x32xf32> to vector<256x32xf32>
    %12 = arith.mulf %5, %11 : vector<256x32xf32>
    %c0_11 = arith.constant 0 : index
    %c0_12 = arith.constant 0 : index
    %c0_13 = arith.constant 0 : index
    %13 = vector.load %arg6[%c0_11, %c0_12, %c0_13] : memref<1x1x32xf32, #tpu.memory_space<vmem>>, vector<1x1x32xf32>
    %14 = vector.shape_cast %13 : vector<1x1x32xf32> to vector<1x32xf32>
    %15 = vector.broadcast %14 : vector<1x32xf32> to vector<256x32xf32>
    %16 = arith.addf %12, %15 : vector<256x32xf32>
    %cst = arith.constant 0.000000e+00 : f32
    %17 = vector.broadcast %cst : f32 to vector<256x32xf32>
    %18 = arith.maximumf %16, %17 : vector<256x32xf32>
    %c0_14 = arith.constant 0 : index
    %c0_15 = arith.constant 0 : index
    %c0_16 = arith.constant 0 : index
    %19 = vector.load %arg7[%c0_14, %c0_15, %c0_16] : memref<1x256x32xf32, #tpu.memory_space<vmem>>, vector<1x256x32xf32>
    %20 = vector.shape_cast %19 : vector<1x256x32xf32> to vector<256x32xf32>
    %21 = vector.shape_cast %18 : vector<256x32xf32> to vector<1x256x32xf32>
    tpu.vector_store %arg7[%c0_14, %c0_15, %c0_16], %21 {strides = array<i32>} : memref<1x256x32xf32, #tpu.memory_space<vmem>>, vector<1x256x32xf32>,
    return
  }
  func.func @transform_0(%arg0: i32, %arg1: i32) -> (i32, i32, i32) {
    %c0_i32 = arith.constant 0 : i32
    %c0_i32_0 = arith.constant 0 : i32
    return %arg0, %arg1, %c0_i32 : i32, i32, i32
  }
  func.func @transform_1(%arg0: i32, %arg1: i32) -> (i32, i32, i32) {
    %c0_i32 = arith.constant 0 : i32
    %c0_i32_0 = arith.constant 0 : i32
    %c0_i32_1 = arith.constant 0 : i32
    return %arg0, %c0_i32, %c0_i32_0 : i32, i32, i32
  }
  func.func @transform_2(%arg0: i32, %arg1: i32) -> (i32, i32, i32) {
    %c0_i32 = arith.constant 0 : i32
    %c0_i32_0 = arith.constant 0 : i32
    %c0_i32_1 = arith.constant 0 : i32
    return %arg0, %c0_i32, %c0_i32_0 : i32, i32, i32
  }
  func.func @transform_3(%arg0: i32, %arg1: i32) -> (i32, i32, i32) {
    %c0_i32 = arith.constant 0 : i32
    %c0_i32_0 = arith.constant 0 : i32
    %c0_i32_1 = arith.constant 0 : i32
    %c0_i32_2 = arith.constant 0 : i32
    return %c0_i32, %c0_i32_0, %c0_i32_1 : i32, i32, i32
  }
  func.func @transform_4(%arg0: i32, %arg1: i32) -> (i32, i32, i32) {
    %c0_i32 = arith.constant 0 : i32
    %c0_i32_0 = arith.constant 0 : i32
    %c0_i32_1 = arith.constant 0 : i32
    %c0_i32_2 = arith.constant 0 : i32
    return %c0_i32, %c0_i32_0, %c0_i32_1 : i32, i32, i32
  }
  func.func @transform_5(%arg0: i32, %arg1: i32) -> (i32, i32, i32) {
    %c0_i32 = arith.constant 0 : i32
    %c0_i32_0 = arith.constant 0 : i32
    return %arg0, %arg1, %c0_i32 : i32, i32, i32
  }
}

module attributes {stable_mosaic.version = 11 : i64} {
  func.func @_matmul_bias_kernel(%arg0: i32, %arg1: i32, %arg2: i32, %arg3: memref<128x384xbf16, #tpu.memory_space<vmem>>, %arg4: memref<384x128xbf16, #tpu.memory_space<vmem>>, %arg5: memref<1x128xf32, #tpu.memory_space<vmem>>, %arg6: memref<128x128xf32, #tpu.memory_space<vmem>>, %arg7: memref<128x128xf32, #tpu.memory_space<vmem>>) attributes {dimension_semantics = [#tpu.dimension_semantics<parallel>, #tpu.dimension_semantics<parallel>, #tpu.dimension_semantics<arbitrary>], iteration_bounds = array<i64: 1, 1, 1>, scalar_prefetch = 0 : i64, scratch_operands = 1 : i64, tpu.core_type = #tpu.core_type<tc>, window_params = [{transform_indices = @transform_0, window_bounds = array<i64: 128, 384>}, {transform_indices = @transform_1, window_bounds = array<i64: 384, 128>}, {transform_indices = @transform_2, window_bounds = array<i64: 1, 128>}, {transform_indices = @transform_3, window_bounds = array<i64: 128, 128>}]} {
    %c0_i32 = arith.constant 0 : i32
    %0 = arith.cmpi eq, %arg2, %c0_i32 : i32
    %1 = arith.extui %0 : i1 to i32
    %c0_i32_0 = arith.constant 0 : i32
    %2 = arith.cmpi ne, %1, %c0_i32_0 : i32
    scf.if %2 {
      %cst_10 = arith.constant 0.000000e+00 : f32
      %12 = vector.broadcast %cst_10 : f32 to vector<128x128xf32>
      %c0_11 = arith.constant 0 : index
      %c0_12 = arith.constant 0 : index
      %13 = vector.load %arg7[%c0_11, %c0_12] : memref<128x128xf32, #tpu.memory_space<vmem>>, vector<128x128xf32>
      tpu.vector_store %arg7[%c0_11, %c0_12], %12 {strides = array<i32>} : memref<128x128xf32, #tpu.memory_space<vmem>>, vector<128x128xf32>,
    } else {
    }
    %c0 = arith.constant 0 : index
    %c0_1 = arith.constant 0 : index
    %3 = vector.load %arg7[%c0, %c0_1] : memref<128x128xf32, #tpu.memory_space<vmem>>, vector<128x128xf32>
    %c0_2 = arith.constant 0 : index
    %c0_3 = arith.constant 0 : index
    %4 = vector.load %arg3[%c0_2, %c0_3] : memref<128x384xbf16, #tpu.memory_space<vmem>>, vector<128x384xbf16>
    %c0_4 = arith.constant 0 : index
    %c0_5 = arith.constant 0 : index
    %5 = vector.load %arg4[%c0_4, %c0_5] : memref<384x128xbf16, #tpu.memory_space<vmem>>, vector<384x128xbf16>
    %cst = arith.constant dense<0.000000e+00> : vector<128x128xf32>
    %6 = tpu.matmul %4, %5, %cst {dimension_numbers = #tpu.dot_dimension_numbers<[1], [0], [0], [1], [0, 0, 1, 1], [], []>} : vector<128x384xbf16>, vector<384x128xbf16>, vector<128x128xf32> -> vector<128x128xf32>
    %7 = arith.addf %3, %6 : vector<128x128xf32>
    %c0_6 = arith.constant 0 : index
    %c0_7 = arith.constant 0 : index
    %8 = vector.load %arg7[%c0_6, %c0_7] : memref<128x128xf32, #tpu.memory_space<vmem>>, vector<128x128xf32>
    tpu.vector_store %arg7[%c0_6, %c0_7], %7 {strides = array<i32>} : memref<128x128xf32, #tpu.memory_space<vmem>>, vector<128x128xf32>,
    %c0_i32_8 = arith.constant 0 : i32
    %9 = arith.cmpi eq, %arg2, %c0_i32_8 : i32
    %10 = arith.extui %9 : i1 to i32
    %c0_i32_9 = arith.constant 0 : i32
    %11 = arith.cmpi ne, %10, %c0_i32_9 : i32
    scf.if %11 {
      %c0_10 = arith.constant 0 : index
      %c0_11 = arith.constant 0 : index
      %12 = vector.load %arg7[%c0_10, %c0_11] : memref<128x128xf32, #tpu.memory_space<vmem>>, vector<128x128xf32>
      %c0_12 = arith.constant 0 : index
      %c0_13 = arith.constant 0 : index
      %13 = vector.load %arg5[%c0_12, %c0_13] : memref<1x128xf32, #tpu.memory_space<vmem>>, vector<1x128xf32>
      %14 = vector.broadcast %13 : vector<1x128xf32> to vector<128x128xf32>
      %15 = arith.addf %12, %14 : vector<128x128xf32>
      %c0_14 = arith.constant 0 : index
      %c0_15 = arith.constant 0 : index
      %16 = vector.load %arg6[%c0_14, %c0_15] : memref<128x128xf32, #tpu.memory_space<vmem>>, vector<128x128xf32>
      tpu.vector_store %arg6[%c0_14, %c0_15], %15 {strides = array<i32>} : memref<128x128xf32, #tpu.memory_space<vmem>>, vector<128x128xf32>,
    } else {
    }
    return
  }
  func.func @transform_0(%arg0: i32, %arg1: i32, %arg2: i32) -> (i32, i32) {
    %c0_i32 = arith.constant 0 : i32
    return %arg0, %arg2 : i32, i32
  }
  func.func @transform_1(%arg0: i32, %arg1: i32, %arg2: i32) -> (i32, i32) {
    %c0_i32 = arith.constant 0 : i32
    return %arg2, %arg1 : i32, i32
  }
  func.func @transform_2(%arg0: i32, %arg1: i32, %arg2: i32) -> (i32, i32) {
    %c0_i32 = arith.constant 0 : i32
    %c0_i32_0 = arith.constant 0 : i32
    return %c0_i32, %arg1 : i32, i32
  }
  func.func @transform_3(%arg0: i32, %arg1: i32, %arg2: i32) -> (i32, i32) {
    %c0_i32 = arith.constant 0 : i32
    return %arg0, %arg1 : i32, i32
  }
}

module attributes {stable_mosaic.version = 11 : i64} {
  func.func @_in_stats_kernel(%arg0: i32, %arg1: i32, %arg2: memref<1x64x64xf32, #tpu.memory_space<vmem>>, %arg3: memref<1x1x64xf32, #tpu.memory_space<vmem>>, %arg4: memref<1x1x64xf32, #tpu.memory_space<vmem>>, %arg5: memref<1x64xf32, #tpu.memory_space<vmem>>, %arg6: memref<1x64xf32, #tpu.memory_space<vmem>>) attributes {dimension_semantics = [#tpu.dimension_semantics<parallel>, #tpu.dimension_semantics<arbitrary>], iteration_bounds = array<i64: 2, 1>, scalar_prefetch = 0 : i64, scratch_operands = 2 : i64, tpu.core_type = #tpu.core_type<tc>, window_params = [{transform_indices = @transform_0, window_bounds = array<i64: 1, 64, 64>}, {transform_indices = @transform_1, window_bounds = array<i64: 1, 1, 64>}, {transform_indices = @transform_2, window_bounds = array<i64: 1, 1, 64>}]} {
    %c0_i32 = arith.constant 0 : i32
    %0 = arith.cmpi eq, %arg1, %c0_i32 : i32
    %1 = arith.extui %0 : i1 to i32
    %c0_i32_0 = arith.constant 0 : i32
    %2 = arith.cmpi ne, %1, %c0_i32_0 : i32
    scf.if %2 {
      %cst_14 = arith.constant 0.000000e+00 : f32
      %19 = vector.broadcast %cst_14 : f32 to vector<1x64xf32>
      %c0_15 = arith.constant 0 : index
      %c0_16 = arith.constant 0 : index
      %20 = vector.load %arg5[%c0_15, %c0_16] : memref<1x64xf32, #tpu.memory_space<vmem>>, vector<1x64xf32>
      tpu.vector_store %arg5[%c0_15, %c0_16], %19 {strides = array<i32>} : memref<1x64xf32, #tpu.memory_space<vmem>>, vector<1x64xf32>,
      %cst_17 = arith.constant 0.000000e+00 : f32
      %21 = vector.broadcast %cst_17 : f32 to vector<1x64xf32>
      %c0_18 = arith.constant 0 : index
      %c0_19 = arith.constant 0 : index
      %22 = vector.load %arg6[%c0_18, %c0_19] : memref<1x64xf32, #tpu.memory_space<vmem>>, vector<1x64xf32>
      tpu.vector_store %arg6[%c0_18, %c0_19], %21 {strides = array<i32>} : memref<1x64xf32, #tpu.memory_space<vmem>>, vector<1x64xf32>,
    } else {
    }
    %c0 = arith.constant 0 : index
    %c0_1 = arith.constant 0 : index
    %c0_2 = arith.constant 0 : index
    %3 = vector.load %arg2[%c0, %c0_1, %c0_2] : memref<1x64x64xf32, #tpu.memory_space<vmem>>, vector<1x64x64xf32>
    %4 = vector.shape_cast %3 : vector<1x64x64xf32> to vector<64x64xf32>
    %c0_3 = arith.constant 0 : index
    %c0_4 = arith.constant 0 : index
    %5 = vector.load %arg5[%c0_3, %c0_4] : memref<1x64xf32, #tpu.memory_space<vmem>>, vector<1x64xf32>
    %cst = arith.constant dense<0.000000e+00> : vector<64xf32>
    %6 = vector.multi_reduction <add>, %4, %cst [0] : vector<64x64xf32> to vector<64xf32>
    %7 = vector.shape_cast %6 : vector<64xf32> to vector<1x64xf32>
    %8 = arith.addf %5, %7 : vector<1x64xf32>
    %c0_5 = arith.constant 0 : index
    %c0_6 = arith.constant 0 : index
    %9 = vector.load %arg5[%c0_5, %c0_6] : memref<1x64xf32, #tpu.memory_space<vmem>>, vector<1x64xf32>
    tpu.vector_store %arg5[%c0_5, %c0_6], %8 {strides = array<i32>} : memref<1x64xf32, #tpu.memory_space<vmem>>, vector<1x64xf32>,
    %c0_7 = arith.constant 0 : index
    %c0_8 = arith.constant 0 : index
    %10 = vector.load %arg6[%c0_7, %c0_8] : memref<1x64xf32, #tpu.memory_space<vmem>>, vector<1x64xf32>
    %11 = arith.mulf %4, %4 : vector<64x64xf32>
    %cst_9 = arith.constant dense<0.000000e+00> : vector<64xf32>
    %12 = vector.multi_reduction <add>, %11, %cst_9 [0] : vector<64x64xf32> to vector<64xf32>
    %13 = vector.shape_cast %12 : vector<64xf32> to vector<1x64xf32>
    %14 = arith.addf %10, %13 : vector<1x64xf32>
    %c0_10 = arith.constant 0 : index
    %c0_11 = arith.constant 0 : index
    %15 = vector.load %arg6[%c0_10, %c0_11] : memref<1x64xf32, #tpu.memory_space<vmem>>, vector<1x64xf32>
    tpu.vector_store %arg6[%c0_10, %c0_11], %14 {strides = array<i32>} : memref<1x64xf32, #tpu.memory_space<vmem>>, vector<1x64xf32>,
    %c0_i32_12 = arith.constant 0 : i32
    %16 = arith.cmpi eq, %arg1, %c0_i32_12 : i32
    %17 = arith.extui %16 : i1 to i32
    %c0_i32_13 = arith.constant 0 : i32
    %18 = arith.cmpi ne, %17, %c0_i32_13 : i32
    scf.if %18 {
      %c0_14 = arith.constant 0 : index
      %c0_15 = arith.constant 0 : index
      %19 = vector.load %arg5[%c0_14, %c0_15] : memref<1x64xf32, #tpu.memory_space<vmem>>, vector<1x64xf32>
      %cst_16 = arith.constant 1.562500e-02 : f32
      %20 = vector.broadcast %cst_16 : f32 to vector<1x64xf32>
      %21 = arith.mulf %19, %20 : vector<1x64xf32>
      %c0_17 = arith.constant 0 : index
      %c0_18 = arith.constant 0 : index
      %22 = vector.load %arg6[%c0_17, %c0_18] : memref<1x64xf32, #tpu.memory_space<vmem>>, vector<1x64xf32>
      %cst_19 = arith.constant 1.562500e-02 : f32
      %23 = vector.broadcast %cst_19 : f32 to vector<1x64xf32>
      %24 = arith.mulf %22, %23 : vector<1x64xf32>
      %25 = arith.mulf %21, %21 : vector<1x64xf32>
      %26 = arith.subf %24, %25 : vector<1x64xf32>
      %cst_20 = arith.constant 0.000000e+00 : f32
      %27 = vector.broadcast %cst_20 : f32 to vector<1x64xf32>
      %28 = arith.maximumf %26, %27 : vector<1x64xf32>
      %c0_21 = arith.constant 0 : index
      %c0_22 = arith.constant 0 : index
      %c0_23 = arith.constant 0 : index
      %29 = vector.load %arg3[%c0_21, %c0_22, %c0_23] : memref<1x1x64xf32, #tpu.memory_space<vmem>>, vector<1x1x64xf32>
      %30 = vector.shape_cast %29 : vector<1x1x64xf32> to vector<1x64xf32>
      %31 = vector.shape_cast %21 : vector<1x64xf32> to vector<1x1x64xf32>
      tpu.vector_store %arg3[%c0_21, %c0_22, %c0_23], %31 {strides = array<i32>} : memref<1x1x64xf32, #tpu.memory_space<vmem>>, vector<1x1x64xf32>,
      %cst_24 = arith.constant 9.99999974E-6 : f32
      %32 = vector.broadcast %cst_24 : f32 to vector<1x64xf32>
      %33 = arith.addf %28, %32 : vector<1x64xf32>
      %34 = math.rsqrt %33 : vector<1x64xf32>
      %c0_25 = arith.constant 0 : index
      %c0_26 = arith.constant 0 : index
      %c0_27 = arith.constant 0 : index
      %35 = vector.load %arg4[%c0_25, %c0_26, %c0_27] : memref<1x1x64xf32, #tpu.memory_space<vmem>>, vector<1x1x64xf32>
      %36 = vector.shape_cast %35 : vector<1x1x64xf32> to vector<1x64xf32>
      %37 = vector.shape_cast %34 : vector<1x64xf32> to vector<1x1x64xf32>
      tpu.vector_store %arg4[%c0_25, %c0_26, %c0_27], %37 {strides = array<i32>} : memref<1x1x64xf32, #tpu.memory_space<vmem>>, vector<1x1x64xf32>,
    } else {
    }
    return
  }
  func.func @transform_0(%arg0: i32, %arg1: i32) -> (i32, i32, i32) {
    %c0_i32 = arith.constant 0 : i32
    %c0_i32_0 = arith.constant 0 : i32
    return %arg0, %arg1, %c0_i32 : i32, i32, i32
  }
  func.func @transform_1(%arg0: i32, %arg1: i32) -> (i32, i32, i32) {
    %c0_i32 = arith.constant 0 : i32
    %c0_i32_0 = arith.constant 0 : i32
    %c0_i32_1 = arith.constant 0 : i32
    return %arg0, %c0_i32, %c0_i32_0 : i32, i32, i32
  }
  func.func @transform_2(%arg0: i32, %arg1: i32) -> (i32, i32, i32) {
    %c0_i32 = arith.constant 0 : i32
    %c0_i32_0 = arith.constant 0 : i32
    %c0_i32_1 = arith.constant 0 : i32
    return %arg0, %c0_i32, %c0_i32_0 : i32, i32, i32
  }
}

module attributes {stable_mosaic.version = 11 : i64} {
  func.func @_in_apply_kernel(%arg0: i32, %arg1: i32, %arg2: memref<1x64x64xf32, #tpu.memory_space<vmem>>, %arg3: memref<1x1x64xf32, #tpu.memory_space<vmem>>, %arg4: memref<1x1x64xf32, #tpu.memory_space<vmem>>, %arg5: memref<1x1x64xf32, #tpu.memory_space<vmem>>, %arg6: memref<1x1x64xf32, #tpu.memory_space<vmem>>, %arg7: memref<1x64x64xf32, #tpu.memory_space<vmem>>) attributes {dimension_semantics = [#tpu.dimension_semantics<parallel>, #tpu.dimension_semantics<parallel>], iteration_bounds = array<i64: 2, 1>, scalar_prefetch = 0 : i64, scratch_operands = 0 : i64, tpu.core_type = #tpu.core_type<tc>, window_params = [{transform_indices = @transform_0, window_bounds = array<i64: 1, 64, 64>}, {transform_indices = @transform_1, window_bounds = array<i64: 1, 1, 64>}, {transform_indices = @transform_2, window_bounds = array<i64: 1, 1, 64>}, {pipeline_mode = #tpu.pipeline_mode<synchronous>, transform_indices = @transform_3, window_bounds = array<i64: 1, 1, 64>}, {pipeline_mode = #tpu.pipeline_mode<synchronous>, transform_indices = @transform_4, window_bounds = array<i64: 1, 1, 64>}, {transform_indices = @transform_5, window_bounds = array<i64: 1, 64, 64>}]} {
    %c0 = arith.constant 0 : index
    %c0_0 = arith.constant 0 : index
    %c0_1 = arith.constant 0 : index
    %0 = vector.load %arg2[%c0, %c0_0, %c0_1] : memref<1x64x64xf32, #tpu.memory_space<vmem>>, vector<1x64x64xf32>
    %1 = vector.shape_cast %0 : vector<1x64x64xf32> to vector<64x64xf32>
    %c0_2 = arith.constant 0 : index
    %c0_3 = arith.constant 0 : index
    %c0_4 = arith.constant 0 : index
    %2 = vector.load %arg3[%c0_2, %c0_3, %c0_4] : memref<1x1x64xf32, #tpu.memory_space<vmem>>, vector<1x1x64xf32>
    %3 = vector.shape_cast %2 : vector<1x1x64xf32> to vector<1x64xf32>
    %4 = vector.broadcast %3 : vector<1x64xf32> to vector<64x64xf32>
    %5 = arith.subf %1, %4 : vector<64x64xf32>
    %c0_5 = arith.constant 0 : index
    %c0_6 = arith.constant 0 : index
    %c0_7 = arith.constant 0 : index
    %6 = vector.load %arg4[%c0_5, %c0_6, %c0_7] : memref<1x1x64xf32, #tpu.memory_space<vmem>>, vector<1x1x64xf32>
    %7 = vector.shape_cast %6 : vector<1x1x64xf32> to vector<1x64xf32>
    %c0_8 = arith.constant 0 : index
    %c0_9 = arith.constant 0 : index
    %c0_10 = arith.constant 0 : index
    %8 = vector.load %arg5[%c0_8, %c0_9, %c0_10] : memref<1x1x64xf32, #tpu.memory_space<vmem>>, vector<1x1x64xf32>
    %9 = vector.shape_cast %8 : vector<1x1x64xf32> to vector<1x64xf32>
    %10 = arith.mulf %7, %9 : vector<1x64xf32>
    %11 = vector.broadcast %10 : vector<1x64xf32> to vector<64x64xf32>
    %12 = arith.mulf %5, %11 : vector<64x64xf32>
    %c0_11 = arith.constant 0 : index
    %c0_12 = arith.constant 0 : index
    %c0_13 = arith.constant 0 : index
    %13 = vector.load %arg6[%c0_11, %c0_12, %c0_13] : memref<1x1x64xf32, #tpu.memory_space<vmem>>, vector<1x1x64xf32>
    %14 = vector.shape_cast %13 : vector<1x1x64xf32> to vector<1x64xf32>
    %15 = vector.broadcast %14 : vector<1x64xf32> to vector<64x64xf32>
    %16 = arith.addf %12, %15 : vector<64x64xf32>
    %cst = arith.constant 0.000000e+00 : f32
    %17 = vector.broadcast %cst : f32 to vector<64x64xf32>
    %18 = arith.maximumf %16, %17 : vector<64x64xf32>
    %c0_14 = arith.constant 0 : index
    %c0_15 = arith.constant 0 : index
    %c0_16 = arith.constant 0 : index
    %19 = vector.load %arg7[%c0_14, %c0_15, %c0_16] : memref<1x64x64xf32, #tpu.memory_space<vmem>>, vector<1x64x64xf32>
    %20 = vector.shape_cast %19 : vector<1x64x64xf32> to vector<64x64xf32>
    %21 = vector.shape_cast %18 : vector<64x64xf32> to vector<1x64x64xf32>
    tpu.vector_store %arg7[%c0_14, %c0_15, %c0_16], %21 {strides = array<i32>} : memref<1x64x64xf32, #tpu.memory_space<vmem>>, vector<1x64x64xf32>,
    return
  }
  func.func @transform_0(%arg0: i32, %arg1: i32) -> (i32, i32, i32) {
    %c0_i32 = arith.constant 0 : i32
    %c0_i32_0 = arith.constant 0 : i32
    return %arg0, %arg1, %c0_i32 : i32, i32, i32
  }
  func.func @transform_1(%arg0: i32, %arg1: i32) -> (i32, i32, i32) {
    %c0_i32 = arith.constant 0 : i32
    %c0_i32_0 = arith.constant 0 : i32
    %c0_i32_1 = arith.constant 0 : i32
    return %arg0, %c0_i32, %c0_i32_0 : i32, i32, i32
  }
  func.func @transform_2(%arg0: i32, %arg1: i32) -> (i32, i32, i32) {
    %c0_i32 = arith.constant 0 : i32
    %c0_i32_0 = arith.constant 0 : i32
    %c0_i32_1 = arith.constant 0 : i32
    return %arg0, %c0_i32, %c0_i32_0 : i32, i32, i32
  }
  func.func @transform_3(%arg0: i32, %arg1: i32) -> (i32, i32, i32) {
    %c0_i32 = arith.constant 0 : i32
    %c0_i32_0 = arith.constant 0 : i32
    %c0_i32_1 = arith.constant 0 : i32
    %c0_i32_2 = arith.constant 0 : i32
    return %c0_i32, %c0_i32_0, %c0_i32_1 : i32, i32, i32
  }
  func.func @transform_4(%arg0: i32, %arg1: i32) -> (i32, i32, i32) {
    %c0_i32 = arith.constant 0 : i32
    %c0_i32_0 = arith.constant 0 : i32
    %c0_i32_1 = arith.constant 0 : i32
    %c0_i32_2 = arith.constant 0 : i32
    return %c0_i32, %c0_i32_0, %c0_i32_1 : i32, i32, i32
  }
  func.func @transform_5(%arg0: i32, %arg1: i32) -> (i32, i32, i32) {
    %c0_i32 = arith.constant 0 : i32
    %c0_i32_0 = arith.constant 0 : i32
    return %arg0, %arg1, %c0_i32 : i32, i32, i32
  }
}

module attributes {stable_mosaic.version = 11 : i64} {
  func.func @_matmul_bias_kernel(%arg0: i32, %arg1: i32, %arg2: i32, %arg3: memref<32x640xbf16, #tpu.memory_space<vmem>>, %arg4: memref<640x128xbf16, #tpu.memory_space<vmem>>, %arg5: memref<1x128xf32, #tpu.memory_space<vmem>>, %arg6: memref<32x128xf32, #tpu.memory_space<vmem>>, %arg7: memref<32x128xf32, #tpu.memory_space<vmem>>) attributes {dimension_semantics = [#tpu.dimension_semantics<parallel>, #tpu.dimension_semantics<parallel>, #tpu.dimension_semantics<arbitrary>], iteration_bounds = array<i64: 1, 1, 1>, scalar_prefetch = 0 : i64, scratch_operands = 1 : i64, tpu.core_type = #tpu.core_type<tc>, window_params = [{transform_indices = @transform_0, window_bounds = array<i64: 32, 640>}, {transform_indices = @transform_1, window_bounds = array<i64: 640, 128>}, {transform_indices = @transform_2, window_bounds = array<i64: 1, 128>}, {transform_indices = @transform_3, window_bounds = array<i64: 32, 128>}]} {
    %c0_i32 = arith.constant 0 : i32
    %0 = arith.cmpi eq, %arg2, %c0_i32 : i32
    %1 = arith.extui %0 : i1 to i32
    %c0_i32_0 = arith.constant 0 : i32
    %2 = arith.cmpi ne, %1, %c0_i32_0 : i32
    scf.if %2 {
      %cst_10 = arith.constant 0.000000e+00 : f32
      %12 = vector.broadcast %cst_10 : f32 to vector<32x128xf32>
      %c0_11 = arith.constant 0 : index
      %c0_12 = arith.constant 0 : index
      %13 = vector.load %arg7[%c0_11, %c0_12] : memref<32x128xf32, #tpu.memory_space<vmem>>, vector<32x128xf32>
      tpu.vector_store %arg7[%c0_11, %c0_12], %12 {strides = array<i32>} : memref<32x128xf32, #tpu.memory_space<vmem>>, vector<32x128xf32>,
    } else {
    }
    %c0 = arith.constant 0 : index
    %c0_1 = arith.constant 0 : index
    %3 = vector.load %arg7[%c0, %c0_1] : memref<32x128xf32, #tpu.memory_space<vmem>>, vector<32x128xf32>
    %c0_2 = arith.constant 0 : index
    %c0_3 = arith.constant 0 : index
    %4 = vector.load %arg3[%c0_2, %c0_3] : memref<32x640xbf16, #tpu.memory_space<vmem>>, vector<32x640xbf16>
    %c0_4 = arith.constant 0 : index
    %c0_5 = arith.constant 0 : index
    %5 = vector.load %arg4[%c0_4, %c0_5] : memref<640x128xbf16, #tpu.memory_space<vmem>>, vector<640x128xbf16>
    %cst = arith.constant dense<0.000000e+00> : vector<32x128xf32>
    %6 = tpu.matmul %4, %5, %cst {dimension_numbers = #tpu.dot_dimension_numbers<[1], [0], [0], [1], [0, 0, 1, 1], [], []>} : vector<32x640xbf16>, vector<640x128xbf16>, vector<32x128xf32> -> vector<32x128xf32>
    %7 = arith.addf %3, %6 : vector<32x128xf32>
    %c0_6 = arith.constant 0 : index
    %c0_7 = arith.constant 0 : index
    %8 = vector.load %arg7[%c0_6, %c0_7] : memref<32x128xf32, #tpu.memory_space<vmem>>, vector<32x128xf32>
    tpu.vector_store %arg7[%c0_6, %c0_7], %7 {strides = array<i32>} : memref<32x128xf32, #tpu.memory_space<vmem>>, vector<32x128xf32>,
    %c0_i32_8 = arith.constant 0 : i32
    %9 = arith.cmpi eq, %arg2, %c0_i32_8 : i32
    %10 = arith.extui %9 : i1 to i32
    %c0_i32_9 = arith.constant 0 : i32
    %11 = arith.cmpi ne, %10, %c0_i32_9 : i32
    scf.if %11 {
      %c0_10 = arith.constant 0 : index
      %c0_11 = arith.constant 0 : index
      %12 = vector.load %arg7[%c0_10, %c0_11] : memref<32x128xf32, #tpu.memory_space<vmem>>, vector<32x128xf32>
      %c0_12 = arith.constant 0 : index
      %c0_13 = arith.constant 0 : index
      %13 = vector.load %arg5[%c0_12, %c0_13] : memref<1x128xf32, #tpu.memory_space<vmem>>, vector<1x128xf32>
      %14 = vector.broadcast %13 : vector<1x128xf32> to vector<32x128xf32>
      %15 = arith.addf %12, %14 : vector<32x128xf32>
      %c0_14 = arith.constant 0 : index
      %c0_15 = arith.constant 0 : index
      %16 = vector.load %arg6[%c0_14, %c0_15] : memref<32x128xf32, #tpu.memory_space<vmem>>, vector<32x128xf32>
      tpu.vector_store %arg6[%c0_14, %c0_15], %15 {strides = array<i32>} : memref<32x128xf32, #tpu.memory_space<vmem>>, vector<32x128xf32>,
    } else {
    }
    return
  }
  func.func @transform_0(%arg0: i32, %arg1: i32, %arg2: i32) -> (i32, i32) {
    %c0_i32 = arith.constant 0 : i32
    return %arg0, %arg2 : i32, i32
  }
  func.func @transform_1(%arg0: i32, %arg1: i32, %arg2: i32) -> (i32, i32) {
    %c0_i32 = arith.constant 0 : i32
    return %arg2, %arg1 : i32, i32
  }
  func.func @transform_2(%arg0: i32, %arg1: i32, %arg2: i32) -> (i32, i32) {
    %c0_i32 = arith.constant 0 : i32
    %c0_i32_0 = arith.constant 0 : i32
    return %c0_i32, %arg1 : i32, i32
  }
  func.func @transform_3(%arg0: i32, %arg1: i32, %arg2: i32) -> (i32, i32) {
    %c0_i32 = arith.constant 0 : i32
    return %arg0, %arg1 : i32, i32
  }
}

module attributes {stable_mosaic.version = 11 : i64} {
  func.func @_in_stats_kernel(%arg0: i32, %arg1: i32, %arg2: memref<1x16x128xf32, #tpu.memory_space<vmem>>, %arg3: memref<1x1x128xf32, #tpu.memory_space<vmem>>, %arg4: memref<1x1x128xf32, #tpu.memory_space<vmem>>, %arg5: memref<1x128xf32, #tpu.memory_space<vmem>>, %arg6: memref<1x128xf32, #tpu.memory_space<vmem>>) attributes {dimension_semantics = [#tpu.dimension_semantics<parallel>, #tpu.dimension_semantics<arbitrary>], iteration_bounds = array<i64: 2, 1>, scalar_prefetch = 0 : i64, scratch_operands = 2 : i64, tpu.core_type = #tpu.core_type<tc>, window_params = [{transform_indices = @transform_0, window_bounds = array<i64: 1, 16, 128>}, {transform_indices = @transform_1, window_bounds = array<i64: 1, 1, 128>}, {transform_indices = @transform_2, window_bounds = array<i64: 1, 1, 128>}]} {
    %c0_i32 = arith.constant 0 : i32
    %0 = arith.cmpi eq, %arg1, %c0_i32 : i32
    %1 = arith.extui %0 : i1 to i32
    %c0_i32_0 = arith.constant 0 : i32
    %2 = arith.cmpi ne, %1, %c0_i32_0 : i32
    scf.if %2 {
      %cst_14 = arith.constant 0.000000e+00 : f32
      %19 = vector.broadcast %cst_14 : f32 to vector<1x128xf32>
      %c0_15 = arith.constant 0 : index
      %c0_16 = arith.constant 0 : index
      %20 = vector.load %arg5[%c0_15, %c0_16] : memref<1x128xf32, #tpu.memory_space<vmem>>, vector<1x128xf32>
      tpu.vector_store %arg5[%c0_15, %c0_16], %19 {strides = array<i32>} : memref<1x128xf32, #tpu.memory_space<vmem>>, vector<1x128xf32>,
      %cst_17 = arith.constant 0.000000e+00 : f32
      %21 = vector.broadcast %cst_17 : f32 to vector<1x128xf32>
      %c0_18 = arith.constant 0 : index
      %c0_19 = arith.constant 0 : index
      %22 = vector.load %arg6[%c0_18, %c0_19] : memref<1x128xf32, #tpu.memory_space<vmem>>, vector<1x128xf32>
      tpu.vector_store %arg6[%c0_18, %c0_19], %21 {strides = array<i32>} : memref<1x128xf32, #tpu.memory_space<vmem>>, vector<1x128xf32>,
    } else {
    }
    %c0 = arith.constant 0 : index
    %c0_1 = arith.constant 0 : index
    %c0_2 = arith.constant 0 : index
    %3 = vector.load %arg2[%c0, %c0_1, %c0_2] : memref<1x16x128xf32, #tpu.memory_space<vmem>>, vector<1x16x128xf32>
    %4 = vector.shape_cast %3 : vector<1x16x128xf32> to vector<16x128xf32>
    %c0_3 = arith.constant 0 : index
    %c0_4 = arith.constant 0 : index
    %5 = vector.load %arg5[%c0_3, %c0_4] : memref<1x128xf32, #tpu.memory_space<vmem>>, vector<1x128xf32>
    %cst = arith.constant dense<0.000000e+00> : vector<128xf32>
    %6 = vector.multi_reduction <add>, %4, %cst [0] : vector<16x128xf32> to vector<128xf32>
    %7 = vector.shape_cast %6 : vector<128xf32> to vector<1x128xf32>
    %8 = arith.addf %5, %7 : vector<1x128xf32>
    %c0_5 = arith.constant 0 : index
    %c0_6 = arith.constant 0 : index
    %9 = vector.load %arg5[%c0_5, %c0_6] : memref<1x128xf32, #tpu.memory_space<vmem>>, vector<1x128xf32>
    tpu.vector_store %arg5[%c0_5, %c0_6], %8 {strides = array<i32>} : memref<1x128xf32, #tpu.memory_space<vmem>>, vector<1x128xf32>,
    %c0_7 = arith.constant 0 : index
    %c0_8 = arith.constant 0 : index
    %10 = vector.load %arg6[%c0_7, %c0_8] : memref<1x128xf32, #tpu.memory_space<vmem>>, vector<1x128xf32>
    %11 = arith.mulf %4, %4 : vector<16x128xf32>
    %cst_9 = arith.constant dense<0.000000e+00> : vector<128xf32>
    %12 = vector.multi_reduction <add>, %11, %cst_9 [0] : vector<16x128xf32> to vector<128xf32>
    %13 = vector.shape_cast %12 : vector<128xf32> to vector<1x128xf32>
    %14 = arith.addf %10, %13 : vector<1x128xf32>
    %c0_10 = arith.constant 0 : index
    %c0_11 = arith.constant 0 : index
    %15 = vector.load %arg6[%c0_10, %c0_11] : memref<1x128xf32, #tpu.memory_space<vmem>>, vector<1x128xf32>
    tpu.vector_store %arg6[%c0_10, %c0_11], %14 {strides = array<i32>} : memref<1x128xf32, #tpu.memory_space<vmem>>, vector<1x128xf32>,
    %c0_i32_12 = arith.constant 0 : i32
    %16 = arith.cmpi eq, %arg1, %c0_i32_12 : i32
    %17 = arith.extui %16 : i1 to i32
    %c0_i32_13 = arith.constant 0 : i32
    %18 = arith.cmpi ne, %17, %c0_i32_13 : i32
    scf.if %18 {
      %c0_14 = arith.constant 0 : index
      %c0_15 = arith.constant 0 : index
      %19 = vector.load %arg5[%c0_14, %c0_15] : memref<1x128xf32, #tpu.memory_space<vmem>>, vector<1x128xf32>
      %cst_16 = arith.constant 6.250000e-02 : f32
      %20 = vector.broadcast %cst_16 : f32 to vector<1x128xf32>
      %21 = arith.mulf %19, %20 : vector<1x128xf32>
      %c0_17 = arith.constant 0 : index
      %c0_18 = arith.constant 0 : index
      %22 = vector.load %arg6[%c0_17, %c0_18] : memref<1x128xf32, #tpu.memory_space<vmem>>, vector<1x128xf32>
      %cst_19 = arith.constant 6.250000e-02 : f32
      %23 = vector.broadcast %cst_19 : f32 to vector<1x128xf32>
      %24 = arith.mulf %22, %23 : vector<1x128xf32>
      %25 = arith.mulf %21, %21 : vector<1x128xf32>
      %26 = arith.subf %24, %25 : vector<1x128xf32>
      %cst_20 = arith.constant 0.000000e+00 : f32
      %27 = vector.broadcast %cst_20 : f32 to vector<1x128xf32>
      %28 = arith.maximumf %26, %27 : vector<1x128xf32>
      %c0_21 = arith.constant 0 : index
      %c0_22 = arith.constant 0 : index
      %c0_23 = arith.constant 0 : index
      %29 = vector.load %arg3[%c0_21, %c0_22, %c0_23] : memref<1x1x128xf32, #tpu.memory_space<vmem>>, vector<1x1x128xf32>
      %30 = vector.shape_cast %29 : vector<1x1x128xf32> to vector<1x128xf32>
      %31 = vector.shape_cast %21 : vector<1x128xf32> to vector<1x1x128xf32>
      tpu.vector_store %arg3[%c0_21, %c0_22, %c0_23], %31 {strides = array<i32>} : memref<1x1x128xf32, #tpu.memory_space<vmem>>, vector<1x1x128xf32>,
      %cst_24 = arith.constant 9.99999974E-6 : f32
      %32 = vector.broadcast %cst_24 : f32 to vector<1x128xf32>
      %33 = arith.addf %28, %32 : vector<1x128xf32>
      %34 = math.rsqrt %33 : vector<1x128xf32>
      %c0_25 = arith.constant 0 : index
      %c0_26 = arith.constant 0 : index
      %c0_27 = arith.constant 0 : index
      %35 = vector.load %arg4[%c0_25, %c0_26, %c0_27] : memref<1x1x128xf32, #tpu.memory_space<vmem>>, vector<1x1x128xf32>
      %36 = vector.shape_cast %35 : vector<1x1x128xf32> to vector<1x128xf32>
      %37 = vector.shape_cast %34 : vector<1x128xf32> to vector<1x1x128xf32>
      tpu.vector_store %arg4[%c0_25, %c0_26, %c0_27], %37 {strides = array<i32>} : memref<1x1x128xf32, #tpu.memory_space<vmem>>, vector<1x1x128xf32>,
    } else {
    }
    return
  }
  func.func @transform_0(%arg0: i32, %arg1: i32) -> (i32, i32, i32) {
    %c0_i32 = arith.constant 0 : i32
    %c0_i32_0 = arith.constant 0 : i32
    return %arg0, %arg1, %c0_i32 : i32, i32, i32
  }
  func.func @transform_1(%arg0: i32, %arg1: i32) -> (i32, i32, i32) {
    %c0_i32 = arith.constant 0 : i32
    %c0_i32_0 = arith.constant 0 : i32
    %c0_i32_1 = arith.constant 0 : i32
    return %arg0, %c0_i32, %c0_i32_0 : i32, i32, i32
  }
  func.func @transform_2(%arg0: i32, %arg1: i32) -> (i32, i32, i32) {
    %c0_i32 = arith.constant 0 : i32
    %c0_i32_0 = arith.constant 0 : i32
    %c0_i32_1 = arith.constant 0 : i32
    return %arg0, %c0_i32, %c0_i32_0 : i32, i32, i32
  }
}

module attributes {stable_mosaic.version = 11 : i64} {
  func.func @_in_apply_kernel(%arg0: i32, %arg1: i32, %arg2: memref<1x16x128xf32, #tpu.memory_space<vmem>>, %arg3: memref<1x1x128xf32, #tpu.memory_space<vmem>>, %arg4: memref<1x1x128xf32, #tpu.memory_space<vmem>>, %arg5: memref<1x1x128xf32, #tpu.memory_space<vmem>>, %arg6: memref<1x1x128xf32, #tpu.memory_space<vmem>>, %arg7: memref<1x16x128xf32, #tpu.memory_space<vmem>>) attributes {dimension_semantics = [#tpu.dimension_semantics<parallel>, #tpu.dimension_semantics<parallel>], iteration_bounds = array<i64: 2, 1>, scalar_prefetch = 0 : i64, scratch_operands = 0 : i64, tpu.core_type = #tpu.core_type<tc>, window_params = [{transform_indices = @transform_0, window_bounds = array<i64: 1, 16, 128>}, {transform_indices = @transform_1, window_bounds = array<i64: 1, 1, 128>}, {transform_indices = @transform_2, window_bounds = array<i64: 1, 1, 128>}, {pipeline_mode = #tpu.pipeline_mode<synchronous>, transform_indices = @transform_3, window_bounds = array<i64: 1, 1, 128>}, {pipeline_mode = #tpu.pipeline_mode<synchronous>, transform_indices = @transform_4, window_bounds = array<i64: 1, 1, 128>}, {transform_indices = @transform_5, window_bounds = array<i64: 1, 16, 128>}]} {
    %c0 = arith.constant 0 : index
    %c0_0 = arith.constant 0 : index
    %c0_1 = arith.constant 0 : index
    %0 = vector.load %arg2[%c0, %c0_0, %c0_1] : memref<1x16x128xf32, #tpu.memory_space<vmem>>, vector<1x16x128xf32>
    %1 = vector.shape_cast %0 : vector<1x16x128xf32> to vector<16x128xf32>
    %c0_2 = arith.constant 0 : index
    %c0_3 = arith.constant 0 : index
    %c0_4 = arith.constant 0 : index
    %2 = vector.load %arg3[%c0_2, %c0_3, %c0_4] : memref<1x1x128xf32, #tpu.memory_space<vmem>>, vector<1x1x128xf32>
    %3 = vector.shape_cast %2 : vector<1x1x128xf32> to vector<1x128xf32>
    %4 = vector.broadcast %3 : vector<1x128xf32> to vector<16x128xf32>
    %5 = arith.subf %1, %4 : vector<16x128xf32>
    %c0_5 = arith.constant 0 : index
    %c0_6 = arith.constant 0 : index
    %c0_7 = arith.constant 0 : index
    %6 = vector.load %arg4[%c0_5, %c0_6, %c0_7] : memref<1x1x128xf32, #tpu.memory_space<vmem>>, vector<1x1x128xf32>
    %7 = vector.shape_cast %6 : vector<1x1x128xf32> to vector<1x128xf32>
    %c0_8 = arith.constant 0 : index
    %c0_9 = arith.constant 0 : index
    %c0_10 = arith.constant 0 : index
    %8 = vector.load %arg5[%c0_8, %c0_9, %c0_10] : memref<1x1x128xf32, #tpu.memory_space<vmem>>, vector<1x1x128xf32>
    %9 = vector.shape_cast %8 : vector<1x1x128xf32> to vector<1x128xf32>
    %10 = arith.mulf %7, %9 : vector<1x128xf32>
    %11 = vector.broadcast %10 : vector<1x128xf32> to vector<16x128xf32>
    %12 = arith.mulf %5, %11 : vector<16x128xf32>
    %c0_11 = arith.constant 0 : index
    %c0_12 = arith.constant 0 : index
    %c0_13 = arith.constant 0 : index
    %13 = vector.load %arg6[%c0_11, %c0_12, %c0_13] : memref<1x1x128xf32, #tpu.memory_space<vmem>>, vector<1x1x128xf32>
    %14 = vector.shape_cast %13 : vector<1x1x128xf32> to vector<1x128xf32>
    %15 = vector.broadcast %14 : vector<1x128xf32> to vector<16x128xf32>
    %16 = arith.addf %12, %15 : vector<16x128xf32>
    %cst = arith.constant 0.000000e+00 : f32
    %17 = vector.broadcast %cst : f32 to vector<16x128xf32>
    %18 = arith.maximumf %16, %17 : vector<16x128xf32>
    %c0_14 = arith.constant 0 : index
    %c0_15 = arith.constant 0 : index
    %c0_16 = arith.constant 0 : index
    %19 = vector.load %arg7[%c0_14, %c0_15, %c0_16] : memref<1x16x128xf32, #tpu.memory_space<vmem>>, vector<1x16x128xf32>
    %20 = vector.shape_cast %19 : vector<1x16x128xf32> to vector<16x128xf32>
    %21 = vector.shape_cast %18 : vector<16x128xf32> to vector<1x16x128xf32>
    tpu.vector_store %arg7[%c0_14, %c0_15, %c0_16], %21 {strides = array<i32>} : memref<1x16x128xf32, #tpu.memory_space<vmem>>, vector<1x16x128xf32>,
    return
  }
  func.func @transform_0(%arg0: i32, %arg1: i32) -> (i32, i32, i32) {
    %c0_i32 = arith.constant 0 : i32
    %c0_i32_0 = arith.constant 0 : i32
    return %arg0, %arg1, %c0_i32 : i32, i32, i32
  }
  func.func @transform_1(%arg0: i32, %arg1: i32) -> (i32, i32, i32) {
    %c0_i32 = arith.constant 0 : i32
    %c0_i32_0 = arith.constant 0 : i32
    %c0_i32_1 = arith.constant 0 : i32
    return %arg0, %c0_i32, %c0_i32_0 : i32, i32, i32
  }
  func.func @transform_2(%arg0: i32, %arg1: i32) -> (i32, i32, i32) {
    %c0_i32 = arith.constant 0 : i32
    %c0_i32_0 = arith.constant 0 : i32
    %c0_i32_1 = arith.constant 0 : i32
    return %arg0, %c0_i32, %c0_i32_0 : i32, i32, i32
  }
  func.func @transform_3(%arg0: i32, %arg1: i32) -> (i32, i32, i32) {
    %c0_i32 = arith.constant 0 : i32
    %c0_i32_0 = arith.constant 0 : i32
    %c0_i32_1 = arith.constant 0 : i32
    %c0_i32_2 = arith.constant 0 : i32
    return %c0_i32, %c0_i32_0, %c0_i32_1 : i32, i32, i32
  }
  func.func @transform_4(%arg0: i32, %arg1: i32) -> (i32, i32, i32) {
    %c0_i32 = arith.constant 0 : i32
    %c0_i32_0 = arith.constant 0 : i32
    %c0_i32_1 = arith.constant 0 : i32
    %c0_i32_2 = arith.constant 0 : i32
    return %c0_i32, %c0_i32_0, %c0_i32_1 : i32, i32, i32
  }
  func.func @transform_5(%arg0: i32, %arg1: i32) -> (i32, i32, i32) {
    %c0_i32 = arith.constant 0 : i32
    %c0_i32_0 = arith.constant 0 : i32
    return %arg0, %arg1, %c0_i32 : i32, i32, i32
  }
}

module attributes {stable_mosaic.version = 11 : i64} {
  func.func @_matmul_bias_kernel(%arg0: i32, %arg1: i32, %arg2: i32, %arg3: memref<32x384xbf16, #tpu.memory_space<vmem>>, %arg4: memref<384x128xbf16, #tpu.memory_space<vmem>>, %arg5: memref<1x128xf32, #tpu.memory_space<vmem>>, %arg6: memref<32x128xf32, #tpu.memory_space<vmem>>, %arg7: memref<32x128xf32, #tpu.memory_space<vmem>>) attributes {dimension_semantics = [#tpu.dimension_semantics<parallel>, #tpu.dimension_semantics<parallel>, #tpu.dimension_semantics<arbitrary>], iteration_bounds = array<i64: 1, 1, 3>, scalar_prefetch = 0 : i64, scratch_operands = 1 : i64, tpu.core_type = #tpu.core_type<tc>, window_params = [{transform_indices = @transform_0, window_bounds = array<i64: 32, 384>}, {transform_indices = @transform_1, window_bounds = array<i64: 384, 128>}, {transform_indices = @transform_2, window_bounds = array<i64: 1, 128>}, {transform_indices = @transform_3, window_bounds = array<i64: 32, 128>}]} {
    %c0_i32 = arith.constant 0 : i32
    %0 = arith.cmpi eq, %arg2, %c0_i32 : i32
    %1 = arith.extui %0 : i1 to i32
    %c0_i32_0 = arith.constant 0 : i32
    %2 = arith.cmpi ne, %1, %c0_i32_0 : i32
    scf.if %2 {
      %cst_9 = arith.constant 0.000000e+00 : f32
      %12 = vector.broadcast %cst_9 : f32 to vector<32x128xf32>
      %c0_10 = arith.constant 0 : index
      %c0_11 = arith.constant 0 : index
      %13 = vector.load %arg7[%c0_10, %c0_11] : memref<32x128xf32, #tpu.memory_space<vmem>>, vector<32x128xf32>
      tpu.vector_store %arg7[%c0_10, %c0_11], %12 {strides = array<i32>} : memref<32x128xf32, #tpu.memory_space<vmem>>, vector<32x128xf32>,
    } else {
    }
    %c0 = arith.constant 0 : index
    %c0_1 = arith.constant 0 : index
    %3 = vector.load %arg7[%c0, %c0_1] : memref<32x128xf32, #tpu.memory_space<vmem>>, vector<32x128xf32>
    %c0_2 = arith.constant 0 : index
    %c0_3 = arith.constant 0 : index
    %4 = vector.load %arg3[%c0_2, %c0_3] : memref<32x384xbf16, #tpu.memory_space<vmem>>, vector<32x384xbf16>
    %c0_4 = arith.constant 0 : index
    %c0_5 = arith.constant 0 : index
    %5 = vector.load %arg4[%c0_4, %c0_5] : memref<384x128xbf16, #tpu.memory_space<vmem>>, vector<384x128xbf16>
    %cst = arith.constant dense<0.000000e+00> : vector<32x128xf32>
    %6 = tpu.matmul %4, %5, %cst {dimension_numbers = #tpu.dot_dimension_numbers<[1], [0], [0], [1], [0, 0, 1, 1], [], []>} : vector<32x384xbf16>, vector<384x128xbf16>, vector<32x128xf32> -> vector<32x128xf32>
    %7 = arith.addf %3, %6 : vector<32x128xf32>
    %c0_6 = arith.constant 0 : index
    %c0_7 = arith.constant 0 : index
    %8 = vector.load %arg7[%c0_6, %c0_7] : memref<32x128xf32, #tpu.memory_space<vmem>>, vector<32x128xf32>
    tpu.vector_store %arg7[%c0_6, %c0_7], %7 {strides = array<i32>} : memref<32x128xf32, #tpu.memory_space<vmem>>, vector<32x128xf32>,
    %c2_i32 = arith.constant 2 : i32
    %9 = arith.cmpi eq, %arg2, %c2_i32 : i32
    %10 = arith.extui %9 : i1 to i32
    %c0_i32_8 = arith.constant 0 : i32
    %11 = arith.cmpi ne, %10, %c0_i32_8 : i32
    scf.if %11 {
      %c0_9 = arith.constant 0 : index
      %c0_10 = arith.constant 0 : index
      %12 = vector.load %arg7[%c0_9, %c0_10] : memref<32x128xf32, #tpu.memory_space<vmem>>, vector<32x128xf32>
      %c0_11 = arith.constant 0 : index
      %c0_12 = arith.constant 0 : index
      %13 = vector.load %arg5[%c0_11, %c0_12] : memref<1x128xf32, #tpu.memory_space<vmem>>, vector<1x128xf32>
      %14 = vector.broadcast %13 : vector<1x128xf32> to vector<32x128xf32>
      %15 = arith.addf %12, %14 : vector<32x128xf32>
      %c0_13 = arith.constant 0 : index
      %c0_14 = arith.constant 0 : index
      %16 = vector.load %arg6[%c0_13, %c0_14] : memref<32x128xf32, #tpu.memory_space<vmem>>, vector<32x128xf32>
      tpu.vector_store %arg6[%c0_13, %c0_14], %15 {strides = array<i32>} : memref<32x128xf32, #tpu.memory_space<vmem>>, vector<32x128xf32>,
    } else {
    }
    return
  }
  func.func @transform_0(%arg0: i32, %arg1: i32, %arg2: i32) -> (i32, i32) {
    %c0_i32 = arith.constant 0 : i32
    return %arg0, %arg2 : i32, i32
  }
  func.func @transform_1(%arg0: i32, %arg1: i32, %arg2: i32) -> (i32, i32) {
    %c0_i32 = arith.constant 0 : i32
    return %arg2, %arg1 : i32, i32
  }
  func.func @transform_2(%arg0: i32, %arg1: i32, %arg2: i32) -> (i32, i32) {
    %c0_i32 = arith.constant 0 : i32
    %c0_i32_0 = arith.constant 0 : i32
    return %c0_i32, %arg1 : i32, i32
  }
  func.func @transform_3(%arg0: i32, %arg1: i32, %arg2: i32) -> (i32, i32) {
    %c0_i32 = arith.constant 0 : i32
    return %arg0, %arg1 : i32, i32
  }
}

module attributes {stable_mosaic.version = 11 : i64} {
  func.func @_in_apply_kernel(%arg0: i32, %arg1: i32, %arg2: memref<1x16x128xf32, #tpu.memory_space<vmem>>, %arg3: memref<1x1x128xf32, #tpu.memory_space<vmem>>, %arg4: memref<1x1x128xf32, #tpu.memory_space<vmem>>, %arg5: memref<1x1x128xf32, #tpu.memory_space<vmem>>, %arg6: memref<1x1x128xf32, #tpu.memory_space<vmem>>, %arg7: memref<1x16x128xf32, #tpu.memory_space<vmem>>, %arg8: memref<1x16x128xf32, #tpu.memory_space<vmem>>) attributes {dimension_semantics = [#tpu.dimension_semantics<parallel>, #tpu.dimension_semantics<parallel>], iteration_bounds = array<i64: 2, 1>, scalar_prefetch = 0 : i64, scratch_operands = 0 : i64, tpu.core_type = #tpu.core_type<tc>, window_params = [{transform_indices = @transform_0, window_bounds = array<i64: 1, 16, 128>}, {transform_indices = @transform_1, window_bounds = array<i64: 1, 1, 128>}, {transform_indices = @transform_2, window_bounds = array<i64: 1, 1, 128>}, {pipeline_mode = #tpu.pipeline_mode<synchronous>, transform_indices = @transform_3, window_bounds = array<i64: 1, 1, 128>}, {pipeline_mode = #tpu.pipeline_mode<synchronous>, transform_indices = @transform_4, window_bounds = array<i64: 1, 1, 128>}, {transform_indices = @transform_5, window_bounds = array<i64: 1, 16, 128>}, {transform_indices = @transform_6, window_bounds = array<i64: 1, 16, 128>}]} {
    %c0 = arith.constant 0 : index
    %c0_0 = arith.constant 0 : index
    %c0_1 = arith.constant 0 : index
    %0 = vector.load %arg2[%c0, %c0_0, %c0_1] : memref<1x16x128xf32, #tpu.memory_space<vmem>>, vector<1x16x128xf32>
    %1 = vector.shape_cast %0 : vector<1x16x128xf32> to vector<16x128xf32>
    %c0_2 = arith.constant 0 : index
    %c0_3 = arith.constant 0 : index
    %c0_4 = arith.constant 0 : index
    %2 = vector.load %arg3[%c0_2, %c0_3, %c0_4] : memref<1x1x128xf32, #tpu.memory_space<vmem>>, vector<1x1x128xf32>
    %3 = vector.shape_cast %2 : vector<1x1x128xf32> to vector<1x128xf32>
    %4 = vector.broadcast %3 : vector<1x128xf32> to vector<16x128xf32>
    %5 = arith.subf %1, %4 : vector<16x128xf32>
    %c0_5 = arith.constant 0 : index
    %c0_6 = arith.constant 0 : index
    %c0_7 = arith.constant 0 : index
    %6 = vector.load %arg4[%c0_5, %c0_6, %c0_7] : memref<1x1x128xf32, #tpu.memory_space<vmem>>, vector<1x1x128xf32>
    %7 = vector.shape_cast %6 : vector<1x1x128xf32> to vector<1x128xf32>
    %c0_8 = arith.constant 0 : index
    %c0_9 = arith.constant 0 : index
    %c0_10 = arith.constant 0 : index
    %8 = vector.load %arg5[%c0_8, %c0_9, %c0_10] : memref<1x1x128xf32, #tpu.memory_space<vmem>>, vector<1x1x128xf32>
    %9 = vector.shape_cast %8 : vector<1x1x128xf32> to vector<1x128xf32>
    %10 = arith.mulf %7, %9 : vector<1x128xf32>
    %11 = vector.broadcast %10 : vector<1x128xf32> to vector<16x128xf32>
    %12 = arith.mulf %5, %11 : vector<16x128xf32>
    %c0_11 = arith.constant 0 : index
    %c0_12 = arith.constant 0 : index
    %c0_13 = arith.constant 0 : index
    %13 = vector.load %arg6[%c0_11, %c0_12, %c0_13] : memref<1x1x128xf32, #tpu.memory_space<vmem>>, vector<1x1x128xf32>
    %14 = vector.shape_cast %13 : vector<1x1x128xf32> to vector<1x128xf32>
    %15 = vector.broadcast %14 : vector<1x128xf32> to vector<16x128xf32>
    %16 = arith.addf %12, %15 : vector<16x128xf32>
    %c0_14 = arith.constant 0 : index
    %c0_15 = arith.constant 0 : index
    %c0_16 = arith.constant 0 : index
    %17 = vector.load %arg7[%c0_14, %c0_15, %c0_16] : memref<1x16x128xf32, #tpu.memory_space<vmem>>, vector<1x16x128xf32>
    %18 = vector.shape_cast %17 : vector<1x16x128xf32> to vector<16x128xf32>
    %19 = arith.addf %16, %18 : vector<16x128xf32>
    %c0_17 = arith.constant 0 : index
    %c0_18 = arith.constant 0 : index
    %c0_19 = arith.constant 0 : index
    %20 = vector.load %arg8[%c0_17, %c0_18, %c0_19] : memref<1x16x128xf32, #tpu.memory_space<vmem>>, vector<1x16x128xf32>
    %21 = vector.shape_cast %20 : vector<1x16x128xf32> to vector<16x128xf32>
    %22 = vector.shape_cast %19 : vector<16x128xf32> to vector<1x16x128xf32>
    tpu.vector_store %arg8[%c0_17, %c0_18, %c0_19], %22 {strides = array<i32>} : memref<1x16x128xf32, #tpu.memory_space<vmem>>, vector<1x16x128xf32>,
    return
  }
  func.func @transform_0(%arg0: i32, %arg1: i32) -> (i32, i32, i32) {
    %c0_i32 = arith.constant 0 : i32
    %c0_i32_0 = arith.constant 0 : i32
    return %arg0, %arg1, %c0_i32 : i32, i32, i32
  }
  func.func @transform_1(%arg0: i32, %arg1: i32) -> (i32, i32, i32) {
    %c0_i32 = arith.constant 0 : i32
    %c0_i32_0 = arith.constant 0 : i32
    %c0_i32_1 = arith.constant 0 : i32
    return %arg0, %c0_i32, %c0_i32_0 : i32, i32, i32
  }
  func.func @transform_2(%arg0: i32, %arg1: i32) -> (i32, i32, i32) {
    %c0_i32 = arith.constant 0 : i32
    %c0_i32_0 = arith.constant 0 : i32
    %c0_i32_1 = arith.constant 0 : i32
    return %arg0, %c0_i32, %c0_i32_0 : i32, i32, i32
  }
  func.func @transform_3(%arg0: i32, %arg1: i32) -> (i32, i32, i32) {
    %c0_i32 = arith.constant 0 : i32
    %c0_i32_0 = arith.constant 0 : i32
    %c0_i32_1 = arith.constant 0 : i32
    %c0_i32_2 = arith.constant 0 : i32
    return %c0_i32, %c0_i32_0, %c0_i32_1 : i32, i32, i32
  }
  func.func @transform_4(%arg0: i32, %arg1: i32) -> (i32, i32, i32) {
    %c0_i32 = arith.constant 0 : i32
    %c0_i32_0 = arith.constant 0 : i32
    %c0_i32_1 = arith.constant 0 : i32
    %c0_i32_2 = arith.constant 0 : i32
    return %c0_i32, %c0_i32_0, %c0_i32_1 : i32, i32, i32
  }
  func.func @transform_5(%arg0: i32, %arg1: i32) -> (i32, i32, i32) {
    %c0_i32 = arith.constant 0 : i32
    %c0_i32_0 = arith.constant 0 : i32
    return %arg0, %arg1, %c0_i32 : i32, i32, i32
  }
  func.func @transform_6(%arg0: i32, %arg1: i32) -> (i32, i32, i32) {
    %c0_i32 = arith.constant 0 : i32
    %c0_i32_0 = arith.constant 0 : i32
    return %arg0, %arg1, %c0_i32 : i32, i32, i32
  }
}

module attributes {stable_mosaic.version = 11 : i64} {
  func.func @_matmul_bias_kernel(%arg0: i32, %arg1: i32, %arg2: i32, %arg3: memref<128x384xbf16, #tpu.memory_space<vmem>>, %arg4: memref<384x128xbf16, #tpu.memory_space<vmem>>, %arg5: memref<1x128xf32, #tpu.memory_space<vmem>>, %arg6: memref<128x128xf32, #tpu.memory_space<vmem>>, %arg7: memref<128x128xf32, #tpu.memory_space<vmem>>) attributes {dimension_semantics = [#tpu.dimension_semantics<parallel>, #tpu.dimension_semantics<parallel>, #tpu.dimension_semantics<arbitrary>], iteration_bounds = array<i64: 1, 1, 3>, scalar_prefetch = 0 : i64, scratch_operands = 1 : i64, tpu.core_type = #tpu.core_type<tc>, window_params = [{transform_indices = @transform_0, window_bounds = array<i64: 128, 384>}, {transform_indices = @transform_1, window_bounds = array<i64: 384, 128>}, {transform_indices = @transform_2, window_bounds = array<i64: 1, 128>}, {transform_indices = @transform_3, window_bounds = array<i64: 128, 128>}]} {
    %c0_i32 = arith.constant 0 : i32
    %0 = arith.cmpi eq, %arg2, %c0_i32 : i32
    %1 = arith.extui %0 : i1 to i32
    %c0_i32_0 = arith.constant 0 : i32
    %2 = arith.cmpi ne, %1, %c0_i32_0 : i32
    scf.if %2 {
      %cst_9 = arith.constant 0.000000e+00 : f32
      %12 = vector.broadcast %cst_9 : f32 to vector<128x128xf32>
      %c0_10 = arith.constant 0 : index
      %c0_11 = arith.constant 0 : index
      %13 = vector.load %arg7[%c0_10, %c0_11] : memref<128x128xf32, #tpu.memory_space<vmem>>, vector<128x128xf32>
      tpu.vector_store %arg7[%c0_10, %c0_11], %12 {strides = array<i32>} : memref<128x128xf32, #tpu.memory_space<vmem>>, vector<128x128xf32>,
    } else {
    }
    %c0 = arith.constant 0 : index
    %c0_1 = arith.constant 0 : index
    %3 = vector.load %arg7[%c0, %c0_1] : memref<128x128xf32, #tpu.memory_space<vmem>>, vector<128x128xf32>
    %c0_2 = arith.constant 0 : index
    %c0_3 = arith.constant 0 : index
    %4 = vector.load %arg3[%c0_2, %c0_3] : memref<128x384xbf16, #tpu.memory_space<vmem>>, vector<128x384xbf16>
    %c0_4 = arith.constant 0 : index
    %c0_5 = arith.constant 0 : index
    %5 = vector.load %arg4[%c0_4, %c0_5] : memref<384x128xbf16, #tpu.memory_space<vmem>>, vector<384x128xbf16>
    %cst = arith.constant dense<0.000000e+00> : vector<128x128xf32>
    %6 = tpu.matmul %4, %5, %cst {dimension_numbers = #tpu.dot_dimension_numbers<[1], [0], [0], [1], [0, 0, 1, 1], [], []>} : vector<128x384xbf16>, vector<384x128xbf16>, vector<128x128xf32> -> vector<128x128xf32>
    %7 = arith.addf %3, %6 : vector<128x128xf32>
    %c0_6 = arith.constant 0 : index
    %c0_7 = arith.constant 0 : index
    %8 = vector.load %arg7[%c0_6, %c0_7] : memref<128x128xf32, #tpu.memory_space<vmem>>, vector<128x128xf32>
    tpu.vector_store %arg7[%c0_6, %c0_7], %7 {strides = array<i32>} : memref<128x128xf32, #tpu.memory_space<vmem>>, vector<128x128xf32>,
    %c2_i32 = arith.constant 2 : i32
    %9 = arith.cmpi eq, %arg2, %c2_i32 : i32
    %10 = arith.extui %9 : i1 to i32
    %c0_i32_8 = arith.constant 0 : i32
    %11 = arith.cmpi ne, %10, %c0_i32_8 : i32
    scf.if %11 {
      %c0_9 = arith.constant 0 : index
      %c0_10 = arith.constant 0 : index
      %12 = vector.load %arg7[%c0_9, %c0_10] : memref<128x128xf32, #tpu.memory_space<vmem>>, vector<128x128xf32>
      %c0_11 = arith.constant 0 : index
      %c0_12 = arith.constant 0 : index
      %13 = vector.load %arg5[%c0_11, %c0_12] : memref<1x128xf32, #tpu.memory_space<vmem>>, vector<1x128xf32>
      %14 = vector.broadcast %13 : vector<1x128xf32> to vector<128x128xf32>
      %15 = arith.addf %12, %14 : vector<128x128xf32>
      %c0_13 = arith.constant 0 : index
      %c0_14 = arith.constant 0 : index
      %16 = vector.load %arg6[%c0_13, %c0_14] : memref<128x128xf32, #tpu.memory_space<vmem>>, vector<128x128xf32>
      tpu.vector_store %arg6[%c0_13, %c0_14], %15 {strides = array<i32>} : memref<128x128xf32, #tpu.memory_space<vmem>>, vector<128x128xf32>,
    } else {
    }
    return
  }
  func.func @transform_0(%arg0: i32, %arg1: i32, %arg2: i32) -> (i32, i32) {
    %c0_i32 = arith.constant 0 : i32
    return %arg0, %arg2 : i32, i32
  }
  func.func @transform_1(%arg0: i32, %arg1: i32, %arg2: i32) -> (i32, i32) {
    %c0_i32 = arith.constant 0 : i32
    return %arg2, %arg1 : i32, i32
  }
  func.func @transform_2(%arg0: i32, %arg1: i32, %arg2: i32) -> (i32, i32) {
    %c0_i32 = arith.constant 0 : i32
    %c0_i32_0 = arith.constant 0 : i32
    return %c0_i32, %arg1 : i32, i32
  }
  func.func @transform_3(%arg0: i32, %arg1: i32, %arg2: i32) -> (i32, i32) {
    %c0_i32 = arith.constant 0 : i32
    return %arg0, %arg1 : i32, i32
  }
}

module attributes {stable_mosaic.version = 11 : i64} {
  func.func @_matmul_bias_kernel(%arg0: i32, %arg1: i32, %arg2: i32, %arg3: memref<256x640xbf16, #tpu.memory_space<vmem>>, %arg4: memref<640x128xbf16, #tpu.memory_space<vmem>>, %arg5: memref<1x128xf32, #tpu.memory_space<vmem>>, %arg6: memref<256x128xf32, #tpu.memory_space<vmem>>, %arg7: memref<256x128xf32, #tpu.memory_space<vmem>>) attributes {dimension_semantics = [#tpu.dimension_semantics<parallel>, #tpu.dimension_semantics<parallel>, #tpu.dimension_semantics<arbitrary>], iteration_bounds = array<i64: 2, 1, 1>, scalar_prefetch = 0 : i64, scratch_operands = 1 : i64, tpu.core_type = #tpu.core_type<tc>, window_params = [{transform_indices = @transform_0, window_bounds = array<i64: 256, 640>}, {transform_indices = @transform_1, window_bounds = array<i64: 640, 128>}, {transform_indices = @transform_2, window_bounds = array<i64: 1, 128>}, {transform_indices = @transform_3, window_bounds = array<i64: 256, 128>}]} {
    %c0_i32 = arith.constant 0 : i32
    %0 = arith.cmpi eq, %arg2, %c0_i32 : i32
    %1 = arith.extui %0 : i1 to i32
    %c0_i32_0 = arith.constant 0 : i32
    %2 = arith.cmpi ne, %1, %c0_i32_0 : i32
    scf.if %2 {
      %cst_10 = arith.constant 0.000000e+00 : f32
      %12 = vector.broadcast %cst_10 : f32 to vector<256x128xf32>
      %c0_11 = arith.constant 0 : index
      %c0_12 = arith.constant 0 : index
      %13 = vector.load %arg7[%c0_11, %c0_12] : memref<256x128xf32, #tpu.memory_space<vmem>>, vector<256x128xf32>
      tpu.vector_store %arg7[%c0_11, %c0_12], %12 {strides = array<i32>} : memref<256x128xf32, #tpu.memory_space<vmem>>, vector<256x128xf32>,
    } else {
    }
    %c0 = arith.constant 0 : index
    %c0_1 = arith.constant 0 : index
    %3 = vector.load %arg7[%c0, %c0_1] : memref<256x128xf32, #tpu.memory_space<vmem>>, vector<256x128xf32>
    %c0_2 = arith.constant 0 : index
    %c0_3 = arith.constant 0 : index
    %4 = vector.load %arg3[%c0_2, %c0_3] : memref<256x640xbf16, #tpu.memory_space<vmem>>, vector<256x640xbf16>
    %c0_4 = arith.constant 0 : index
    %c0_5 = arith.constant 0 : index
    %5 = vector.load %arg4[%c0_4, %c0_5] : memref<640x128xbf16, #tpu.memory_space<vmem>>, vector<640x128xbf16>
    %cst = arith.constant dense<0.000000e+00> : vector<256x128xf32>
    %6 = tpu.matmul %4, %5, %cst {dimension_numbers = #tpu.dot_dimension_numbers<[1], [0], [0], [1], [0, 0, 1, 1], [], []>} : vector<256x640xbf16>, vector<640x128xbf16>, vector<256x128xf32> -> vector<256x128xf32>
    %7 = arith.addf %3, %6 : vector<256x128xf32>
    %c0_6 = arith.constant 0 : index
    %c0_7 = arith.constant 0 : index
    %8 = vector.load %arg7[%c0_6, %c0_7] : memref<256x128xf32, #tpu.memory_space<vmem>>, vector<256x128xf32>
    tpu.vector_store %arg7[%c0_6, %c0_7], %7 {strides = array<i32>} : memref<256x128xf32, #tpu.memory_space<vmem>>, vector<256x128xf32>,
    %c0_i32_8 = arith.constant 0 : i32
    %9 = arith.cmpi eq, %arg2, %c0_i32_8 : i32
    %10 = arith.extui %9 : i1 to i32
    %c0_i32_9 = arith.constant 0 : i32
    %11 = arith.cmpi ne, %10, %c0_i32_9 : i32
    scf.if %11 {
      %c0_10 = arith.constant 0 : index
      %c0_11 = arith.constant 0 : index
      %12 = vector.load %arg7[%c0_10, %c0_11] : memref<256x128xf32, #tpu.memory_space<vmem>>, vector<256x128xf32>
      %c0_12 = arith.constant 0 : index
      %c0_13 = arith.constant 0 : index
      %13 = vector.load %arg5[%c0_12, %c0_13] : memref<1x128xf32, #tpu.memory_space<vmem>>, vector<1x128xf32>
      %14 = vector.broadcast %13 : vector<1x128xf32> to vector<256x128xf32>
      %15 = arith.addf %12, %14 : vector<256x128xf32>
      %c0_14 = arith.constant 0 : index
      %c0_15 = arith.constant 0 : index
      %16 = vector.load %arg6[%c0_14, %c0_15] : memref<256x128xf32, #tpu.memory_space<vmem>>, vector<256x128xf32>
      tpu.vector_store %arg6[%c0_14, %c0_15], %15 {strides = array<i32>} : memref<256x128xf32, #tpu.memory_space<vmem>>, vector<256x128xf32>,
    } else {
    }
    return
  }
  func.func @transform_0(%arg0: i32, %arg1: i32, %arg2: i32) -> (i32, i32) {
    %c0_i32 = arith.constant 0 : i32
    return %arg0, %arg2 : i32, i32
  }
  func.func @transform_1(%arg0: i32, %arg1: i32, %arg2: i32) -> (i32, i32) {
    %c0_i32 = arith.constant 0 : i32
    return %arg2, %arg1 : i32, i32
  }
  func.func @transform_2(%arg0: i32, %arg1: i32, %arg2: i32) -> (i32, i32) {
    %c0_i32 = arith.constant 0 : i32
    %c0_i32_0 = arith.constant 0 : i32
    return %c0_i32, %arg1 : i32, i32
  }
  func.func @transform_3(%arg0: i32, %arg1: i32, %arg2: i32) -> (i32, i32) {
    %c0_i32 = arith.constant 0 : i32
    return %arg0, %arg1 : i32, i32
  }
}

module attributes {stable_mosaic.version = 11 : i64} {
  func.func @_matmul_bias_kernel(%arg0: i32, %arg1: i32, %arg2: i32, %arg3: memref<256x384xbf16, #tpu.memory_space<vmem>>, %arg4: memref<384x128xbf16, #tpu.memory_space<vmem>>, %arg5: memref<1x128xf32, #tpu.memory_space<vmem>>, %arg6: memref<256x128xf32, #tpu.memory_space<vmem>>, %arg7: memref<256x128xf32, #tpu.memory_space<vmem>>) attributes {dimension_semantics = [#tpu.dimension_semantics<parallel>, #tpu.dimension_semantics<parallel>, #tpu.dimension_semantics<arbitrary>], iteration_bounds = array<i64: 2, 1, 1>, scalar_prefetch = 0 : i64, scratch_operands = 1 : i64, tpu.core_type = #tpu.core_type<tc>, window_params = [{transform_indices = @transform_0, window_bounds = array<i64: 256, 384>}, {transform_indices = @transform_1, window_bounds = array<i64: 384, 128>}, {transform_indices = @transform_2, window_bounds = array<i64: 1, 128>}, {transform_indices = @transform_3, window_bounds = array<i64: 256, 128>}]} {
    %c0_i32 = arith.constant 0 : i32
    %0 = arith.cmpi eq, %arg2, %c0_i32 : i32
    %1 = arith.extui %0 : i1 to i32
    %c0_i32_0 = arith.constant 0 : i32
    %2 = arith.cmpi ne, %1, %c0_i32_0 : i32
    scf.if %2 {
      %cst_10 = arith.constant 0.000000e+00 : f32
      %12 = vector.broadcast %cst_10 : f32 to vector<256x128xf32>
      %c0_11 = arith.constant 0 : index
      %c0_12 = arith.constant 0 : index
      %13 = vector.load %arg7[%c0_11, %c0_12] : memref<256x128xf32, #tpu.memory_space<vmem>>, vector<256x128xf32>
      tpu.vector_store %arg7[%c0_11, %c0_12], %12 {strides = array<i32>} : memref<256x128xf32, #tpu.memory_space<vmem>>, vector<256x128xf32>,
    } else {
    }
    %c0 = arith.constant 0 : index
    %c0_1 = arith.constant 0 : index
    %3 = vector.load %arg7[%c0, %c0_1] : memref<256x128xf32, #tpu.memory_space<vmem>>, vector<256x128xf32>
    %c0_2 = arith.constant 0 : index
    %c0_3 = arith.constant 0 : index
    %4 = vector.load %arg3[%c0_2, %c0_3] : memref<256x384xbf16, #tpu.memory_space<vmem>>, vector<256x384xbf16>
    %c0_4 = arith.constant 0 : index
    %c0_5 = arith.constant 0 : index
    %5 = vector.load %arg4[%c0_4, %c0_5] : memref<384x128xbf16, #tpu.memory_space<vmem>>, vector<384x128xbf16>
    %cst = arith.constant dense<0.000000e+00> : vector<256x128xf32>
    %6 = tpu.matmul %4, %5, %cst {dimension_numbers = #tpu.dot_dimension_numbers<[1], [0], [0], [1], [0, 0, 1, 1], [], []>} : vector<256x384xbf16>, vector<384x128xbf16>, vector<256x128xf32> -> vector<256x128xf32>
    %7 = arith.addf %3, %6 : vector<256x128xf32>
    %c0_6 = arith.constant 0 : index
    %c0_7 = arith.constant 0 : index
    %8 = vector.load %arg7[%c0_6, %c0_7] : memref<256x128xf32, #tpu.memory_space<vmem>>, vector<256x128xf32>
    tpu.vector_store %arg7[%c0_6, %c0_7], %7 {strides = array<i32>} : memref<256x128xf32, #tpu.memory_space<vmem>>, vector<256x128xf32>,
    %c0_i32_8 = arith.constant 0 : i32
    %9 = arith.cmpi eq, %arg2, %c0_i32_8 : i32
    %10 = arith.extui %9 : i1 to i32
    %c0_i32_9 = arith.constant 0 : i32
    %11 = arith.cmpi ne, %10, %c0_i32_9 : i32
    scf.if %11 {
      %c0_10 = arith.constant 0 : index
      %c0_11 = arith.constant 0 : index
      %12 = vector.load %arg7[%c0_10, %c0_11] : memref<256x128xf32, #tpu.memory_space<vmem>>, vector<256x128xf32>
      %c0_12 = arith.constant 0 : index
      %c0_13 = arith.constant 0 : index
      %13 = vector.load %arg5[%c0_12, %c0_13] : memref<1x128xf32, #tpu.memory_space<vmem>>, vector<1x128xf32>
      %14 = vector.broadcast %13 : vector<1x128xf32> to vector<256x128xf32>
      %15 = arith.addf %12, %14 : vector<256x128xf32>
      %c0_14 = arith.constant 0 : index
      %c0_15 = arith.constant 0 : index
      %16 = vector.load %arg6[%c0_14, %c0_15] : memref<256x128xf32, #tpu.memory_space<vmem>>, vector<256x128xf32>
      tpu.vector_store %arg6[%c0_14, %c0_15], %15 {strides = array<i32>} : memref<256x128xf32, #tpu.memory_space<vmem>>, vector<256x128xf32>,
    } else {
    }
    return
  }
  func.func @transform_0(%arg0: i32, %arg1: i32, %arg2: i32) -> (i32, i32) {
    %c0_i32 = arith.constant 0 : i32
    return %arg0, %arg2 : i32, i32
  }
  func.func @transform_1(%arg0: i32, %arg1: i32, %arg2: i32) -> (i32, i32) {
    %c0_i32 = arith.constant 0 : i32
    return %arg2, %arg1 : i32, i32
  }
  func.func @transform_2(%arg0: i32, %arg1: i32, %arg2: i32) -> (i32, i32) {
    %c0_i32 = arith.constant 0 : i32
    %c0_i32_0 = arith.constant 0 : i32
    return %c0_i32, %arg1 : i32, i32
  }
  func.func @transform_3(%arg0: i32, %arg1: i32, %arg2: i32) -> (i32, i32) {
    %c0_i32 = arith.constant 0 : i32
    return %arg0, %arg1 : i32, i32
  }
}

module attributes {stable_mosaic.version = 11 : i64} {
  func.func @_matmul_bias_kernel(%arg0: i32, %arg1: i32, %arg2: i32, %arg3: memref<256x896xbf16, #tpu.memory_space<vmem>>, %arg4: memref<896x128xbf16, #tpu.memory_space<vmem>>, %arg5: memref<1x128xf32, #tpu.memory_space<vmem>>, %arg6: memref<256x128xf32, #tpu.memory_space<vmem>>, %arg7: memref<256x128xf32, #tpu.memory_space<vmem>>) attributes {dimension_semantics = [#tpu.dimension_semantics<parallel>, #tpu.dimension_semantics<parallel>, #tpu.dimension_semantics<arbitrary>], iteration_bounds = array<i64: 2, 1, 3>, scalar_prefetch = 0 : i64, scratch_operands = 1 : i64, tpu.core_type = #tpu.core_type<tc>, window_params = [{transform_indices = @transform_0, window_bounds = array<i64: 256, 896>}, {transform_indices = @transform_1, window_bounds = array<i64: 896, 128>}, {transform_indices = @transform_2, window_bounds = array<i64: 1, 128>}, {transform_indices = @transform_3, window_bounds = array<i64: 256, 128>}]} {
    %c0_i32 = arith.constant 0 : i32
    %0 = arith.cmpi eq, %arg2, %c0_i32 : i32
    %1 = arith.extui %0 : i1 to i32
    %c0_i32_0 = arith.constant 0 : i32
    %2 = arith.cmpi ne, %1, %c0_i32_0 : i32
    scf.if %2 {
      %cst_9 = arith.constant 0.000000e+00 : f32
      %12 = vector.broadcast %cst_9 : f32 to vector<256x128xf32>
      %c0_10 = arith.constant 0 : index
      %c0_11 = arith.constant 0 : index
      %13 = vector.load %arg7[%c0_10, %c0_11] : memref<256x128xf32, #tpu.memory_space<vmem>>, vector<256x128xf32>
      tpu.vector_store %arg7[%c0_10, %c0_11], %12 {strides = array<i32>} : memref<256x128xf32, #tpu.memory_space<vmem>>, vector<256x128xf32>,
    } else {
    }
    %c0 = arith.constant 0 : index
    %c0_1 = arith.constant 0 : index
    %3 = vector.load %arg7[%c0, %c0_1] : memref<256x128xf32, #tpu.memory_space<vmem>>, vector<256x128xf32>
    %c0_2 = arith.constant 0 : index
    %c0_3 = arith.constant 0 : index
    %4 = vector.load %arg3[%c0_2, %c0_3] : memref<256x896xbf16, #tpu.memory_space<vmem>>, vector<256x896xbf16>
    %c0_4 = arith.constant 0 : index
    %c0_5 = arith.constant 0 : index
    %5 = vector.load %arg4[%c0_4, %c0_5] : memref<896x128xbf16, #tpu.memory_space<vmem>>, vector<896x128xbf16>
    %cst = arith.constant dense<0.000000e+00> : vector<256x128xf32>
    %6 = tpu.matmul %4, %5, %cst {dimension_numbers = #tpu.dot_dimension_numbers<[1], [0], [0], [1], [0, 0, 1, 1], [], []>} : vector<256x896xbf16>, vector<896x128xbf16>, vector<256x128xf32> -> vector<256x128xf32>
    %7 = arith.addf %3, %6 : vector<256x128xf32>
    %c0_6 = arith.constant 0 : index
    %c0_7 = arith.constant 0 : index
    %8 = vector.load %arg7[%c0_6, %c0_7] : memref<256x128xf32, #tpu.memory_space<vmem>>, vector<256x128xf32>
    tpu.vector_store %arg7[%c0_6, %c0_7], %7 {strides = array<i32>} : memref<256x128xf32, #tpu.memory_space<vmem>>, vector<256x128xf32>,
    %c2_i32 = arith.constant 2 : i32
    %9 = arith.cmpi eq, %arg2, %c2_i32 : i32
    %10 = arith.extui %9 : i1 to i32
    %c0_i32_8 = arith.constant 0 : i32
    %11 = arith.cmpi ne, %10, %c0_i32_8 : i32
    scf.if %11 {
      %c0_9 = arith.constant 0 : index
      %c0_10 = arith.constant 0 : index
      %12 = vector.load %arg7[%c0_9, %c0_10] : memref<256x128xf32, #tpu.memory_space<vmem>>, vector<256x128xf32>
      %c0_11 = arith.constant 0 : index
      %c0_12 = arith.constant 0 : index
      %13 = vector.load %arg5[%c0_11, %c0_12] : memref<1x128xf32, #tpu.memory_space<vmem>>, vector<1x128xf32>
      %14 = vector.broadcast %13 : vector<1x128xf32> to vector<256x128xf32>
      %15 = arith.addf %12, %14 : vector<256x128xf32>
      %c0_13 = arith.constant 0 : index
      %c0_14 = arith.constant 0 : index
      %16 = vector.load %arg6[%c0_13, %c0_14] : memref<256x128xf32, #tpu.memory_space<vmem>>, vector<256x128xf32>
      tpu.vector_store %arg6[%c0_13, %c0_14], %15 {strides = array<i32>} : memref<256x128xf32, #tpu.memory_space<vmem>>, vector<256x128xf32>,
    } else {
    }
    return
  }
  func.func @transform_0(%arg0: i32, %arg1: i32, %arg2: i32) -> (i32, i32) {
    %c0_i32 = arith.constant 0 : i32
    return %arg0, %arg2 : i32, i32
  }
  func.func @transform_1(%arg0: i32, %arg1: i32, %arg2: i32) -> (i32, i32) {
    %c0_i32 = arith.constant 0 : i32
    return %arg2, %arg1 : i32, i32
  }
  func.func @transform_2(%arg0: i32, %arg1: i32, %arg2: i32) -> (i32, i32) {
    %c0_i32 = arith.constant 0 : i32
    %c0_i32_0 = arith.constant 0 : i32
    return %c0_i32, %arg1 : i32, i32
  }
  func.func @transform_3(%arg0: i32, %arg1: i32, %arg2: i32) -> (i32, i32) {
    %c0_i32 = arith.constant 0 : i32
    return %arg0, %arg1 : i32, i32
  }
}

</mosaic_0001>

<bundles_post_ra>
// kernel: _lambda_.59
= control target key start
LH: loop header
LB: loop body
LE: loop exit
PB: predicated region body
PF: predicated region fallthrough
CT: control target
= control target key end

     0   :  { %s571_s9 = smov 0   ;;  %s573_s10 = smov 0   ;;  %s716_s0 = inlined_call_operand.vmem [shape: f32[2,256,32], index: 0, kind: input, shape index: {}]   ;;  %s717_s1 = inlined_call_operand.vmem [shape: f32[2,1,32], index: 1, kind: output, shape index: {0}]   ;;  %s718_s2 = inlined_call_operand.vmem [shape: f32[2,1,32], index: 2, kind: output, shape index: {1}]  }
   0x1   :  { %s575_s11 = smov 0  }
   0x2 LB: > { %s25_s12 = sadd.s32 1, %s549_s10  ;;  %p498_p0 = scmp.ge.s32.totalorder %s553_s11, 1  ;;  %s553_s11 = sphi %s575_s11, %s13_s11   ;;  %s549_s10 = sphi %s573_s10, %s720_s10   ;;  %s545_s9 = sphi %s571_s9, %s719_s9  }
   0x3   : > { %p27_p1 = scmp.ge.s32.totalorder %s25_s12, 2  ;;  %p134_p2 = scmp.lt.s32.totalorder %s553_s11, 3 }
   0x5   : > { %s722_s12 = smov (%p27_p1, %s25_s12), 0  ;;  %p135_p3 = pnand %p498_p0, %p134_p2 }
   0x6   : > { %vm181_vm0 = vcmask (!%p135_p3), 253952   ;;  %p162_p4 = scmp.lt.s32.totalorder (!%p135_p3), %s545_s9, 1  ;;  %v555_v0 = vmov (!%p135_p3), 0.0   ;;  %vm217_vm1 = vcmask (!%p135_p3), 261120  }
   0x7   : > { %138 = sbr.rel (%p135_p3) target bundleno = 128 (0x80), region = 24  ;;  %182 = vst.msk [vmem:[#allocation2] sm:$0x1] (!%p135_p3), %vm181_vm0, %v555_v0  ;;  %183 = vst.msk [vmem:[#allocation3] sm:$0x1] (!%p135_p3), %vm181_vm0, %v555_v0 }
   0xe   : > { %s724_s9 = smov (!%p162_p4, %s545_s9), 1 }
   0xf   : > { %s503_s13 = sshll.u32 %s724_s9, 8  ;;  %s173_s19 = scalar_lea.vmem %s717_s1, %s724_s9 }
  0x10   : > { %s597_s16 = scalar_lea.vmem %s716_s0, %s503_s13  ;;  %s176_s22 = scalar_lea.vmem %s718_s2, %s724_s9 }
  0x11   : > { %v184_v1 = vld [vmem:[%s597_s16] sm:$0xff]  ;;  %v185_v2 = vld [vmem:[%s597_s16 + $0x8] sm:$0xff]  ;;  %v186_v3 = vld [vmem:[%s597_s16 + $0x10] sm:$0xff] }
  0x12   : > { %v187_v4 = vld [vmem:[%s597_s16 + $0x18] sm:$0xff]  ;;  %v218_v5 = vsel %vm217_vm1, %v184_v1, 0.0  ;;  %v219_v6 = vsel %vm217_vm1, %v185_v2, 0.0  ;;  %v221_v7 = vsel %vm217_vm1, %v186_v3, 0.0  ;;  %v188_v8 = vld [vmem:[%s597_s16 + $0x20] sm:$0xff]  ;;  %v189_v11 = vld [vmem:[%s597_s16 + $0x28] sm:$0xff]  ;;  %v291_v30 = vmul.f32 %v184_v1, %v184_v1 }
  0x13   : > { %v220_v9 = vadd.f32 %v219_v6, %v218_v5  ;;  %v223_v10 = vsel %vm217_vm1, %v187_v4, 0.0  ;;  %v225_v13 = vsel %vm217_vm1, %v188_v8, 0.0  ;;  %v190_v14 = vld [vmem:[%s597_s16 + $0x30] sm:$0xff]  ;;  %v227_v16 = vsel %vm217_vm1, %v189_v11, 0.0  ;;  %v191_v17 = vld [vmem:[%s597_s16 + $0x38] sm:$0xff]  ;;  %v192_v20 = vld [vmem:[%s597_s16 + $0x40] sm:$0xff] }
  0x14   : > { %v229_v19 = vsel %vm217_vm1, %v190_v14, 0.0  ;;  %v231_v22 = vsel %vm217_vm1, %v191_v17, 0.0  ;;  %v193_v23 = vld [vmem:[%s597_s16 + $0x48] sm:$0xff]  ;;  %v233_v25 = vsel %vm217_vm1, %v192_v20, 0.0  ;;  %v194_v26 = vld [vmem:[%s597_s16 + $0x50] sm:$0xff]  ;;  %v195_v28 = vld [vmem:[%s597_s16 + $0x58] sm:$0xff]  ;;  %v292_v31 = vmul.f32 %v185_v2, %v185_v2 }
  0x15   : > { %v222_v12 = vadd.f32 %v221_v7, %v220_v9  ;;  %v235_v29 = vsel %vm217_vm1, %v193_v23, 0.0  ;;  %v293_v32 = vmul.f32 %v186_v3, %v186_v3  ;;  %v237_v34 = vsel %vm217_vm1, %v194_v26, 0.0  ;;  %v196_v36 = vld [vmem:[%s597_s16 + $0x60] sm:$0xff]  ;;  %v197_v43 = vld [vmem:[%s597_s16 + $0x68] sm:$0xff]  ;;  %v198_v49 = vld [vmem:[%s597_s16 + $0x70] sm:$0xff] }
  0x16   : > { %v294_v35 = vmul.f32 %v187_v4, %v187_v4  ;;  %v239_v38 = vsel %vm217_vm1, %v195_v28, 0.0  ;;  %v295_v39 = vmul.f32 %v188_v8, %v188_v8  ;;  %v323_v40 = vsel %vm217_vm1, %v291_v30, 0.0  ;;  %v199_v55 = vld [vmem:[%s597_s16 + $0x78] sm:$0xff]  ;;  %v200_v61 = vld [vmem:[%s597_s16 + $0x80] sm:$0xff]  ;;  %v201_v3 = vld [vmem:[%s597_s16 + $0x88] sm:$0xff] }
  0x17   : > { %v224_v15 = vadd.f32 %v223_v10, %v222_v12  ;;  %v324_v41 = vsel %vm217_vm1, %v292_v31, 0.0  ;;  %v326_v42 = vsel %vm217_vm1, %v293_v32, 0.0  ;;  %v241_v46 = vsel %vm217_vm1, %v196_v36, 0.0  ;;  %v202_v9 = vld [vmem:[%s597_s16 + $0x90] sm:$0xff] }
  0x18   : > { %v325_v45 = vadd.f32 %v324_v41, %v323_v40  ;;  %v296_v47 = vmul.f32 %v189_v11, %v189_v11  ;;  %v328_v48 = vsel %vm217_vm1, %v294_v35, 0.0  ;;  %v243_v52 = vsel %vm217_vm1, %v197_v43, 0.0 }
  0x19   : > { %v226_v18 = vadd.f32 %v225_v13, %v224_v15  ;;  %v297_v53 = vmul.f32 %v190_v14, %v190_v14  ;;  %v330_v54 = vsel %vm217_vm1, %v295_v39, 0.0  ;;  %v245_v58 = vsel %vm217_vm1, %v198_v49, 0.0  ;;  %v203_v15 = vld [vmem:[%s597_s16 + $0x98] sm:$0xff] }
  0x1a   : > { %v327_v51 = vadd.f32 %v326_v42, %v325_v45  ;;  %v298_v59 = vmul.f32 %v191_v17, %v191_v17  ;;  %v332_v60 = vsel %vm217_vm1, %v296_v47, 0.0  ;;  %v247_v0 = vsel %vm217_vm1, %v199_v55, 0.0  ;;  %v207_v39 = vld [vmem:[%s597_s16 + $0xb8] sm:$0xff]  ;;  %v208_v45 = vld [vmem:[%s597_s16 + $0xc0] sm:$0xff] }
  0x1b   : > { %v228_v21 = vadd.f32 %v227_v16, %v226_v18  ;;  %v299_v1 = vmul.f32 %v192_v20, %v192_v20  ;;  %v334_v2 = vsel %vm217_vm1, %v297_v53, 0.0  ;;  %v249_v6 = vsel %vm217_vm1, %v200_v61, 0.0 }
  0x1c   : > { %v329_v57 = vadd.f32 %v328_v48, %v327_v51  ;;  %v300_v7 = vmul.f32 %v193_v23, %v193_v23  ;;  %v336_v8 = vsel %vm217_vm1, %v298_v59, 0.0  ;;  %v251_v12 = vsel %vm217_vm1, %v201_v3, 0.0  ;;  %v209_v51 = vld [vmem:[%s597_s16 + $0xc8] sm:$0xff] }
  0x1d   : > { %v230_v24 = vadd.f32 %v229_v19, %v228_v21  ;;  %v301_v13 = vmul.f32 %v194_v26, %v194_v26  ;;  %v338_v14 = vsel %vm217_vm1, %v299_v1, 0.0  ;;  %v253_v18 = vsel %vm217_vm1, %v202_v9, 0.0  ;;  %v204_v21 = vld [vmem:[%s597_s16 + $0xa0] sm:$0xff] }
  0x1e   : > { %v331_v63 = vadd.f32 %v330_v54, %v329_v57  ;;  %v302_v19 = vmul.f32 %v195_v28, %v195_v28  ;;  %v340_v20 = vsel %vm217_vm1, %v300_v7, 0.0  ;;  %v257_v31 = vsel %vm217_vm1, %v204_v21, 0.0  ;;  %v210_v57 = vld [vmem:[%s597_s16 + $0xd0] sm:$0xff] }
  0x1f   : > { %v232_v27 = vadd.f32 %v231_v22, %v230_v24  ;;  %v255_v24 = vsel %vm217_vm1, %v203_v15, 0.0  ;;  %v342_v26 = vsel %vm217_vm1, %v301_v13, 0.0  ;;  %v304_v32 = vmul.f32 %v197_v43, %v197_v43 }
  0x20   : > { %v333_v5 = vadd.f32 %v332_v60, %v331_v63  ;;  %v344_v28 = vsel %vm217_vm1, %v302_v19, 0.0  ;;  %v263_v48 = vsel %vm217_vm1, %v207_v39, 0.0  ;;  %v265_v54 = vsel %vm217_vm1, %v208_v45, 0.0  ;;  %v211_v63 = vld [vmem:[%s597_s16 + $0xd8] sm:$0xff] }
  0x21   : > { %v234_v33 = vadd.f32 %v233_v25, %v232_v27  ;;  %v303_v25 = vmul.f32 %v196_v36, %v196_v36  ;;  %v205_v27 = vld [vmem:[%s597_s16 + $0xa8] sm:$0xff]  ;;  %v348_v43 = vsel %vm217_vm1, %v304_v32, 0.0  ;;  %v267_v60 = vsel %vm217_vm1, %v209_v51, 0.0 }
  0x22   : > { %v335_v11 = vadd.f32 %v334_v2, %v333_v5  ;;  %v269_v2 = vsel %vm217_vm1, %v210_v57, 0.0  ;;  %v212_v5 = vld [vmem:[%s597_s16 + $0xe0] sm:$0xff] }
  0x23   : > { %v236_v37 = vadd.f32 %v235_v29, %v234_v33  ;;  %v206_v33 = vld [vmem:[%s597_s16 + $0xb0] sm:$0xff]  ;;  %v346_v36 = vsel %vm217_vm1, %v303_v25, 0.0 }
  0x24   : > { %v337_v17 = vadd.f32 %v336_v8, %v335_v11  ;;  %v261_v42 = vsel %vm217_vm1, %v206_v33, 0.0  ;;  %v271_v8 = vsel %vm217_vm1, %v211_v63, 0.0  ;;  %v213_v11 = vld [vmem:[%s597_s16 + $0xe8] sm:$0xff] }
  0x25   : > { %v238_v44 = vadd.f32 %v237_v34, %v236_v37  ;;  %v259_v37 = vsel %vm217_vm1, %v205_v27, 0.0 }
  0x26   : > { %v339_v23 = vadd.f32 %v338_v14, %v337_v17  ;;  %v273_v14 = vsel %vm217_vm1, %v212_v5, 0.0 }
  0x27   : > { %v240_v50 = vadd.f32 %v239_v38, %v238_v44  ;;  %v305_v38 = vmul.f32 %v198_v49, %v198_v49  ;;  %v306_v44 = vmul.f32 %v199_v55, %v199_v55 }
  0x28   : > { %v341_v30 = vadd.f32 %v340_v20, %v339_v23  ;;  %v275_v20 = vsel %vm217_vm1, %v213_v11, 0.0 }
  0x29   : > { %v242_v56 = vadd.f32 %v241_v46, %v240_v50  ;;  %v307_v50 = vmul.f32 %v200_v61, %v200_v61  ;;  %v350_v49 = vsel %vm217_vm1, %v305_v38, 0.0  ;;  %v352_v55 = vsel %vm217_vm1, %v306_v44, 0.0 }
  0x2a   : > { %v343_v35 = vadd.f32 %v342_v26, %v341_v30 }
  0x2b   : > { %v244_v62 = vadd.f32 %v243_v52, %v242_v56  ;;  %v308_v56 = vmul.f32 %v201_v3, %v201_v3  ;;  %v354_v61 = vsel %vm217_vm1, %v307_v50, 0.0 }
  0x2c   : > { %v345_v41 = vadd.f32 %v344_v28, %v343_v35  ;;  %v315_v28 = vmul.f32 %v208_v45, %v208_v45  ;;  %v319_v45 = vmul.f32 %v212_v5, %v212_v5 }
  0x2d   : > { %v246_v4 = vadd.f32 %v245_v58, %v244_v62  ;;  %v309_v62 = vmul.f32 %v202_v9, %v202_v9  ;;  %v356_v3 = vsel %vm217_vm1, %v308_v56, 0.0 }
  0x2e   : > { %v347_v47 = vadd.f32 %v346_v36, %v345_v41  ;;  %v317_v41 = vmul.f32 %v210_v57, %v210_v57  ;;  %v378_v57 = vsel %vm217_vm1, %v319_v45, 0.0 }
  0x2f   : > { %v248_v10 = vadd.f32 %v247_v0, %v246_v4  ;;  %v310_v4 = vmul.f32 %v203_v15, %v203_v15  ;;  %v358_v9 = vsel %vm217_vm1, %v309_v62, 0.0  ;;  %v214_v15 = vld [vmem:[%s597_s16 + $0xf0] sm:$0xff] }
  0x30   : > { %v349_v53 = vadd.f32 %v348_v43, %v347_v47  ;;  %v277_v26 = vsel %vm217_vm1, %v214_v15, 0.0  ;;  %v318_v43 = vmul.f32 %v211_v63, %v211_v63  ;;  %v374_v50 = vsel %vm217_vm1, %v317_v41, 0.0 }
  0x31   : > { %v250_v16 = vadd.f32 %v249_v6, %v248_v10  ;;  %v311_v10 = vmul.f32 %v204_v21, %v204_v21  ;;  %v360_v17 = vsel %vm217_vm1, %v310_v4, 0.0 }
  0x32   : > { %v351_v59 = vadd.f32 %v350_v49, %v349_v53  ;;  %v376_v53 = vsel %vm217_vm1, %v318_v43, 0.0 }
  0x33   : > { %v252_v22 = vadd.f32 %v251_v12, %v250_v16  ;;  %v312_v16 = vmul.f32 %v205_v27, %v205_v27  ;;  %v362_v23 = vsel %vm217_vm1, %v311_v10, 0.0 }
  0x34   : > { %v353_v1 = vadd.f32 %v352_v55, %v351_v59  ;;  %v321_v55 = vmul.f32 %v214_v15, %v214_v15 }
  0x35   : > { %v254_v29 = vadd.f32 %v253_v18, %v252_v22  ;;  %v313_v22 = vmul.f32 %v206_v33, %v206_v33  ;;  %v364_v30 = vsel %vm217_vm1, %v312_v16, 0.0  ;;  %v316_v33 = vmul.f32 %v209_v51, %v209_v51 }
  0x36   : > { %v355_v7 = vadd.f32 %v354_v61, %v353_v1  ;;  %v320_v51 = vmul.f32 %v213_v11, %v213_v11  ;;  %v382_v1 = vsel %vm217_vm1, %v321_v55, 0.0 }
  0x37   : > { %v256_v34 = vadd.f32 %v255_v24, %v254_v29  ;;  %v215_v24 = vld [vmem:[%s597_s16 + $0xf8] sm:$0xff]  ;;  %v314_v29 = vmul.f32 %v207_v39, %v207_v39 }
  0x38   : > { %v357_v13 = vadd.f32 %v356_v3, %v355_v7  ;;  %v279_v32 = vsel %vm217_vm1, %v215_v24, 0.0  ;;  %v322_v62 = vmul.f32 %v215_v24, %v215_v24  ;;  %v380_v61 = vsel %vm217_vm1, %v320_v51, 0.0 }
  0x39   : > { %v258_v40 = vadd.f32 %v257_v31, %v256_v34  ;;  %v366_v34 = vsel %vm217_vm1, %v313_v22, 0.0  ;;  %v368_v38 = vsel %vm217_vm1, %v314_v29, 0.0 }
  0x3a   : > { %v359_v19 = vadd.f32 %v358_v9, %v357_v13  ;;  %v384_v3 = vsel %vm217_vm1, %v322_v62, 0.0 }
  0x3b   : > { %v260_v46 = vadd.f32 %v259_v37, %v258_v40 }
  0x3c   : > { %v361_v25 = vadd.f32 %v360_v17, %v359_v19 }
  0x3d   : > { %v262_v52 = vadd.f32 %v261_v42, %v260_v46  ;;  %v370_v42 = vsel %vm217_vm1, %v315_v28, 0.0  ;;  %v372_v46 = vsel %vm217_vm1, %v316_v33, 0.0 }
  0x3e   : > { %v363_v27 = vadd.f32 %v362_v23, %v361_v25 }
  0x3f   : > { %v264_v58 = vadd.f32 %v263_v48, %v262_v52 }
  0x40   : > { %v365_v37 = vadd.f32 %v364_v30, %v363_v27 }
  0x41   : > { %v266_v0 = vadd.f32 %v265_v54, %v264_v58 }
  0x42   : > { %v367_v40 = vadd.f32 %v366_v34, %v365_v37 }
  0x43   : > { %v268_v6 = vadd.f32 %v267_v60, %v266_v0  ;;  %v216_v60 = vld [vmem:[#allocation2] sm:$0x1] }
  0x44   : > { %v369_v44 = vadd.f32 %v368_v38, %v367_v40 }
  0x45   : > { %v270_v12 = vadd.f32 %v269_v2, %v268_v6 }
  0x46   : > { %v371_v48 = vadd.f32 %v370_v42, %v369_v44 }
  0x47   : > { %v272_v18 = vadd.f32 %v271_v8, %v270_v12 }
  0x48   : > { %v373_v52 = vadd.f32 %v372_v46, %v371_v48 }
  0x49   : > { %v274_v21 = vadd.f32 %v273_v14, %v272_v18  ;;  %v290_v14 = vld [vmem:[#allocation3] sm:$0x1] }
  0x4a   : > { %v375_v56 = vadd.f32 %v374_v50, %v373_v52 }
  0x4b   : > { %v276_v31 = vadd.f32 %v275_v20, %v274_v21 }
  0x4c   : > { %v377_v59 = vadd.f32 %v376_v53, %v375_v56 }
  0x4d   : > { %v278_v35 = vadd.f32 %v277_v26, %v276_v31 }
  0x4e   : > { %v379_v0 = vadd.f32 %v378_v57, %v377_v59 }
  0x4f   : > { %v280_v36 = vadd.f32 %v279_v32, %v278_v35 }
  0x50   : > { %v381_v4 = vadd.f32 %v380_v61, %v379_v0 }
  0x51   : > { %v281_v39 = vrot.slane %v280_v36, 4 }
  0x52   : > { %v383_v5 = vadd.f32 %v382_v1, %v381_v4 }
  0x53   : > { %v282_v47 = vadd.f32 %v281_v39, %v280_v36 }
  0x54   : > { %v385_v6 = vadd.f32 %v384_v3, %v383_v5 }
  0x55   : > { %v283_v49 = vrot.slane %v282_v47, 2 }
  0x56   : > { %v386_v7 = vrot.slane %v385_v6, 4 }
  0x57   : > { %v284_v54 = vadd.f32 %v283_v49, %v282_v47 }
  0x58   : > { %v387_v8 = vadd.f32 %v386_v7, %v385_v6 }
  0x59   : > { %v285_v58 = vrot.slane %v284_v54, 1 }
  0x5a   : > { %v388_v9 = vrot.slane %v387_v8, 2 }
  0x5b   : > { %v286_v63 = vadd.f32 %v285_v58, %v284_v54 }
  0x5c   : > { %v389_v12 = vadd.f32 %v388_v9, %v387_v8 }
  0x5d   : > { %v287_v2 = vadd.f32 %v286_v63, %v216_v60 }
  0x5e   : > { %v390_v13 = vrot.slane %v389_v12, 1 }
  0x5f   : > { %289 = vst.msk [vmem:[#allocation2] sm:$0x1] %vm181_vm0, %v287_v2 }
  0x60   : > { %v391_v16 = vadd.f32 %v390_v13, %v389_v12 }
  0x62   : > { %v392_v17 = vadd.f32 %v391_v16, %v290_v14 }
  0x64   : > { %393 = vst.msk [vmem:[#allocation3] sm:$0x1] %vm181_vm0, %v392_v17 }
  0x66   : > { %v397_v10 = vld [vmem:[#allocation2] sm:$0x1] }
  0x67   : > { %v398_v11 = vmul.f32 0.00390625, %v397_v10 }
  0x69   : > { %404 = vst.msk [vmem:[%s173_s19] sm:$0x1] %vm181_vm0, %v398_v11  ;;  %v401_v15 = vmul.f32 %v398_v11, %v398_v11 }
  0x6b   : > { %v399_v18 = vld [vmem:[#allocation3] sm:$0x1] }
  0x6c   : > { %v400_v19 = vmul.f32 0.00390625, %v399_v18 }
  0x6e   : > { %v402_v20 = vsub.f32 %v400_v19, %v401_v15 }
  0x70   : > { %v403_v22 = vmax.f32 %v402_v20, 0.0 }
  0x72   : > { %v405_v23 = vadd.f32 1e-05, %v403_v22 }
  0x74   : > { %529 = vrsqrt.f32 %v405_v23 }
  0x7e   : > { %v530_v24 = vpop.eup %529 }
  0x7f   : > { %407 = vst.msk [vmem:[%s176_s22] sm:$0x1] %vm181_vm0, %v530_v24 }
  0x80 PF: > { %s13_s11 = sadd.s32 1, %s553_s11   ;;  %s719_s9 = smov %s549_s10 }
  0x81   : > { %p10_p5 = scmp.ge.s32.totalorder %s13_s11, 4   ;;  %s720_s10 = smov %s722_s12 }
  0x83   :  { %12 = sbr.rel (!%p10_p5) target bundleno = 2 (0x2), region = 74 }

// kernel: _lambda_.58
= control target key start
LH: loop header
LB: loop body
LE: loop exit
PB: predicated region body
PF: predicated region fallthrough
CT: control target
= control target key end

     0   :  { %s1425_s12 = smov 0   ;;  %s1427_s13 = smov 0   ;;  %s1618_s0 = inlined_call_operand.vmem [shape: bf16[512,256], index: 0, kind: input, shape index: {}]   ;;  %s1619_s1 = inlined_call_operand.vmem [shape: bf16[256,128], index: 1, kind: input, shape index: {}]   ;;  %s1620_s2 = inlined_call_operand.vmem [shape: f32[1,128], index: 2, kind: input, shape index: {}]   ;;  %s1621_s3 = inlined_call_operand.vmem [shape: f32[512,128], index: 3, kind: output, shape index: {}]  }
   0x1   :  { %s1429_s14 = smov 0  }
   0x2 LB: > { %s32_s15 = sadd.s32 1, %s1399_s13  ;;  %p1107_p0 = scmp.ge.s32.totalorder %s1403_s14, 1  ;;  %s1403_s14 = sphi %s1429_s14, %s13_s14   ;;  %s1399_s13 = sphi %s1427_s13, %s1623_s13   ;;  %s1395_s12 = sphi %s1425_s12, %s1622_s12  }
   0x3   : > { %p34_p1 = scmp.ge.s32.totalorder %s32_s15, 2  ;;  %p191_p2 = scmp.lt.s32.totalorder %s1403_s14, 3 }
   0x5   : > { %s1625_s15 = smov (%p34_p1, %s32_s15), 0  ;;  %p192_p3 = pnand %p1107_p0, %p191_p2 }
   0x6   : > { %v1317_v0 = vld [vmem:[%s1619_s1 + $0x40] sm:$0xff] (!%p192_p3)   ;;  %s1108_s18 = sshll.u32 (!%p192_p3), %s1395_s12, 5  ;;  %v1319_v2 = vld [vmem:[%s1619_s1 + $0x48] sm:$0xff] (!%p192_p3)   ;;  %v1321_v4 = vld [vmem:[%s1619_s1 + $0x50] sm:$0xff] (!%p192_p3)  }
   0x7   : > { %195 = sbr.rel (%p192_p3) target bundleno = 315 (0x13b), region = 32  ;;  %v1318_v1 = vld [vmem:[%s1619_s1] sm:$0xff] (!%p192_p3)   ;;  %1165 = vmatprep.subr.bf16.mxu0 (!%p192_p3), %v1317_v0  ;;  %1277 = vmatprep.subr.bf16.mxu1 (!%p192_p3), %v1317_v0  ;;  %v1320_v3 = vld [vmem:[%s1619_s1 + $0x8] sm:$0xff] (!%p192_p3)   ;;  %p236_p4 = scmp.lt.s32.totalorder (!%p192_p3), %s1108_s18, 63  ;;  %v1322_v5 = vld [vmem:[%s1619_s1 + $0x10] sm:$0xff] (!%p192_p3)  }
   0x8   : > { %1166 = vmatpush3.bf16.msra.mxu0 (!%p192_p3), %v1318_v1  ;;  %1285 = vmatpush3.bf16.msra.mxu1 (!%p192_p3), %v1318_v1  ;;  %v1323_v6 = vld [vmem:[%s1619_s1 + $0x58] sm:$0xff] (!%p192_p3)   ;;  %v1325_v8 = vld [vmem:[%s1619_s1 + $0x60] sm:$0xff] (!%p192_p3)   ;;  %v1327_v10 = vld [vmem:[%s1619_s1 + $0x68] sm:$0xff] (!%p192_p3)  }
   0x9   : > { %1167 = vmatprep.subr.bf16.mxu0 (!%p192_p3), %v1319_v2  ;;  %1278 = vmatprep.subr.bf16.mxu1 (!%p192_p3), %v1319_v2  ;;  %v1324_v7 = vld [vmem:[%s1619_s1 + $0x18] sm:$0xff] (!%p192_p3)   ;;  %v1326_v9 = vld [vmem:[%s1619_s1 + $0x20] sm:$0xff] (!%p192_p3)   ;;  %v1328_v13 = vld [vmem:[%s1619_s1 + $0x28] sm:$0xff] (!%p192_p3)  }
   0xa   : > { %v1329_v14 = vld [vmem:[%s1619_s1 + $0x70] sm:$0xff] (!%p192_p3)   ;;  %v1331_v16 = vld [vmem:[%s1619_s1 + $0x78] sm:$0xff] (!%p192_p3)   ;;  %v1536_v51 = vld [vmem:[%s1620_s2] ss:$0 sm:$0xff] (!%p192_p3) }
   0xb   : > { %v1330_v15 = vld [vmem:[%s1619_s1 + $0x30] sm:$0xff] (!%p192_p3)   ;;  %v1332_v17 = vld [vmem:[%s1619_s1 + $0x38] sm:$0xff] (!%p192_p3)  }
   0xc   : > { %1168 = vmatpush3.bf16.msra.mxu0 (!%p192_p3), %v1320_v3  ;;  %1286 = vmatpush3.bf16.msra.mxu1 (!%p192_p3), %v1320_v3 }
   0xd   : > { %1169 = vmatprep.subr.bf16.mxu0 (!%p192_p3), %v1321_v4  ;;  %1279 = vmatprep.subr.bf16.mxu1 (!%p192_p3), %v1321_v4 }
   0xe   : > { %s1627_s18 = smov (!%p236_p4, %s1108_s18), 63 }
   0xf   : > { %s1164_s6 = sshll.u32 %s1627_s18, 3 }
  0x10   : > { %1170 = vmatpush3.bf16.msra.mxu0 %v1322_v5  ;;  %1287 = vmatpush3.bf16.msra.mxu1 %v1322_v5  ;;  %s1478_s11 = scalar_lea.vmem %s1618_s0, %s1164_s6  ;;  %s1543_s8 = scalar_lea.vmem %s1621_s3, %s1164_s6 }
  0x11   : > { %1171 = vmatprep.subr.bf16.mxu0 %v1323_v6  ;;  %1280 = vmatprep.subr.bf16.mxu1 %v1323_v6  ;;  %v1335_v11 = vld [vmem:[%s1478_s11 + $0x4] ss:$8 sps:$4 sm:$0xff]   ;;  %v1333_v18 = vld [vmem:[%s1478_s11] ss:$8 sps:$4 sm:$0xff]   ;;  %v1339_v20 = vld [vmem:[%s1478_s11 + $0x14] ss:$8 sps:$4 sm:$0xff]  }
  0x12   : > { %v1338_v12 = vld [vmem:[%s1478_s11 + $0x84] ss:$8 sps:$4 sm:$0xff]   ;;  %688 = vmatprep.mubr.bf16.mxu0 %v1335_v11  ;;  %v1336_v19 = vld [vmem:[%s1478_s11 + $0x80] ss:$8 sps:$4 sm:$0xff]   ;;  %v1341_v21 = vld [vmem:[%s1478_s11 + $0x94] ss:$8 sps:$4 sm:$0xff]  }
  0x13   : > { %752 = vmatprep.mubr.bf16.mxu1 %v1338_v12  ;;  %v1343_v22 = vld [vmem:[%s1478_s11 + $0x10] ss:$8 sps:$4 sm:$0xff]   ;;  %v1345_v24 = vld [vmem:[%s1478_s11 + $0x24] ss:$8 sps:$4 sm:$0xff]   ;;  %v1349_v26 = vld [vmem:[%s1478_s11 + $0x20] ss:$8 sps:$4 sm:$0xff]  }
  0x14   : > { %1172 = vmatpush3.bf16.msra.mxu0 %v1324_v7  ;;  %1288 = vmatpush3.bf16.msra.mxu1 %v1324_v7  ;;  %v1344_v23 = vld [vmem:[%s1478_s11 + $0x90] ss:$8 sps:$4 sm:$0xff]   ;;  %v1347_v25 = vld [vmem:[%s1478_s11 + $0xa4] ss:$8 sps:$4 sm:$0xff]   ;;  %v1350_v27 = vld [vmem:[%s1478_s11 + $0xa0] ss:$8 sps:$4 sm:$0xff]  }
  0x15   : > { %1173 = vmatprep.subr.bf16.mxu0 %v1325_v8  ;;  %1281 = vmatprep.subr.bf16.mxu1 %v1325_v8  ;;  %v1351_v28 = vld [vmem:[%s1478_s11 + $0x34] ss:$8 sps:$4 sm:$0xff]   ;;  %v1355_v30 = vld [vmem:[%s1478_s11 + $0x30] ss:$8 sps:$4 sm:$0xff]   ;;  %v1357_v32 = vld [vmem:[%s1478_s11 + $0x44] ss:$8 sps:$4 sm:$0xff]  }
  0x16   : > { %v1353_v29 = vld [vmem:[%s1478_s11 + $0xb4] ss:$8 sps:$4 sm:$0xff]   ;;  %v1356_v31 = vld [vmem:[%s1478_s11 + $0xb0] ss:$8 sps:$4 sm:$0xff]   ;;  %v1359_v33 = vld [vmem:[%s1478_s11 + $0xc4] ss:$8 sps:$4 sm:$0xff]  }
  0x17   : > { %v1361_v34 = vld [vmem:[%s1478_s11 + $0x40] ss:$8 sps:$4 sm:$0xff]   ;;  %v1363_v36 = vld [vmem:[%s1478_s11 + $0x54] ss:$8 sps:$4 sm:$0xff]   ;;  %v1367_v38 = vld [vmem:[%s1478_s11 + $0x50] ss:$8 sps:$4 sm:$0xff]  }
  0x18   : > { %1174 = vmatpush3.bf16.msra.mxu0 %v1326_v9  ;;  %1289 = vmatpush3.bf16.msra.mxu1 %v1326_v9  ;;  %v1362_v35 = vld [vmem:[%s1478_s11 + $0xc0] ss:$8 sps:$4 sm:$0xff]   ;;  %v1365_v37 = vld [vmem:[%s1478_s11 + $0xd4] ss:$8 sps:$4 sm:$0xff]   ;;  %v1368_v39 = vld [vmem:[%s1478_s11 + $0xd0] ss:$8 sps:$4 sm:$0xff]  }
  0x19   : > { %1175 = vmatprep.subr.bf16.mxu0 %v1327_v10  ;;  %1282 = vmatprep.subr.bf16.mxu1 %v1327_v10  ;;  %v1369_v40 = vld [vmem:[%s1478_s11 + $0x64] ss:$8 sps:$4 sm:$0xff]   ;;  %v1373_v42 = vld [vmem:[%s1478_s11 + $0x60] ss:$8 sps:$4 sm:$0xff]   ;;  %v1375_v44 = vld [vmem:[%s1478_s11 + $0x74] ss:$8 sps:$4 sm:$0xff]  }
  0x1a   : > { %v1371_v41 = vld [vmem:[%s1478_s11 + $0xe4] ss:$8 sps:$4 sm:$0xff]   ;;  %v1374_v43 = vld [vmem:[%s1478_s11 + $0xe0] ss:$8 sps:$4 sm:$0xff]   ;;  %v1377_v45 = vld [vmem:[%s1478_s11 + $0xf4] ss:$8 sps:$4 sm:$0xff]  }
  0x1b   : > { %v1379_v46 = vld [vmem:[%s1478_s11 + $0x70] ss:$8 sps:$4 sm:$0xff]  }
  0x1c   : > { %1176 = vmatpush3.bf16.msra.mxu0 %v1328_v13  ;;  %1290 = vmatpush3.bf16.msra.mxu1 %v1328_v13  ;;  %v1380_v47 = vld [vmem:[%s1478_s11 + $0xf0] ss:$8 sps:$4 sm:$0xff]  }
  0x1d   : > { %1177 = vmatprep.subr.bf16.mxu0 %v1329_v14  ;;  %1283 = vmatprep.subr.bf16.mxu1 %v1329_v14 }
  0x20   : > { %1178 = vmatpush3.bf16.msra.mxu0 %v1330_v15  ;;  %1291 = vmatpush3.bf16.msra.mxu1 %v1330_v15 }
  0x21   : > { %1179 = vmatprep.subr.bf16.mxu0 %v1331_v16  ;;  %1284 = vmatprep.subr.bf16.mxu1 %v1331_v16 }
  0x24   : > { %1180 = vmatpush3.bf16.msra.mxu0 %v1332_v17  ;;  %1292 = vmatpush3.bf16.msra.mxu1 %v1332_v17 }
  0x27   : > { %689 = vmatmul.mubr.bf16.vlgmr.msra.gmra.mrb[0].mxu0 %v1333_v18  ;;  %753 = vmatmul.mubr.bf16.vlgmr.msra.gmra.mrb[0].mxu1 %v1336_v19 }
  0x28   : > { %696 = vmatprep.mubr.bf16.mxu0 %v1339_v20  ;;  %760 = vmatprep.mubr.bf16.mxu1 %v1341_v21 }
  0x2f   : > { %697 = vmatmul.mubr.bf16.gmra.mrb[4].mxu0 %v1343_v22  ;;  %761 = vmatmul.mubr.bf16.gmra.mrb[4].mxu1 %v1344_v23 }
  0x30   : > { %704 = vmatprep.mubr.bf16.mxu0 %v1345_v24  ;;  %768 = vmatprep.mubr.bf16.mxu1 %v1347_v25 }
  0x37   : > { %705 = vmatmul.mubr.bf16.gmra.mrb[8].mxu0 %v1349_v26  ;;  %769 = vmatmul.mubr.bf16.gmra.mrb[8].mxu1 %v1350_v27 }
  0x38   : > { %712 = vmatprep.mubr.bf16.mxu0 %v1351_v28  ;;  %776 = vmatprep.mubr.bf16.mxu1 %v1353_v29 }
  0x3f   : > { %713 = vmatmul.mubr.bf16.gmra.mrb[12].mxu0 %v1355_v30  ;;  %777 = vmatmul.mubr.bf16.gmra.mrb[12].mxu1 %v1356_v31 }
  0x40   : > { %720 = vmatprep.mubr.bf16.mxu0 %v1357_v32  ;;  %784 = vmatprep.mubr.bf16.mxu1 %v1359_v33 }
  0x47   : > { %721 = vmatmul.mubr.bf16.gmra.mrb[16].mxu0 %v1361_v34  ;;  %785 = vmatmul.mubr.bf16.gmra.mrb[16].mxu1 %v1362_v35 }
  0x48   : > { %728 = vmatprep.mubr.bf16.mxu0 %v1363_v36  ;;  %792 = vmatprep.mubr.bf16.mxu1 %v1365_v37 }
  0x4f   : > { %729 = vmatmul.mubr.bf16.gmra.mrb[20].mxu0 %v1367_v38  ;;  %793 = vmatmul.mubr.bf16.gmra.mrb[20].mxu1 %v1368_v39 }
  0x50   : > { %736 = vmatprep.mubr.bf16.mxu0 %v1369_v40  ;;  %800 = vmatprep.mubr.bf16.mxu1 %v1371_v41 }
  0x57   : > { %737 = vmatmul.mubr.bf16.gmra.mrb[24].mxu0 %v1373_v42  ;;  %801 = vmatmul.mubr.bf16.gmra.mrb[24].mxu1 %v1374_v43 }
  0x58   : > { %744 = vmatprep.mubr.bf16.mxu0 %v1375_v44  ;;  %808 = vmatprep.mubr.bf16.mxu1 %v1377_v45 }
  0x5f   : > { %745 = vmatmul.mubr.bf16.gmra.mrb[28].mxu0 %v1379_v46  ;;  %809 = vmatmul.mubr.bf16.gmra.mrb[28].mxu1 %v1380_v47 }
  0xfa   : > { %v1181_v48 = vpop.f32.mrb[0].mxu0  ;;  %v1229_v49 = vpop.f32.mrb[0].mxu1 }
  0xfb   : > { %v1182_v50 = vpop.f32.mrb[1].mxu0  ;;  %v1230_v52 = vpop.f32.mrb[1].mxu1 }
  0xfc   : > { %v1183_v53 = vadd.f32 %v1182_v50, %v1181_v48  ;;  %v1231_v54 = vadd.f32 %v1230_v52, %v1229_v49  ;;  %v1184_v55 = vpop.f32.mrb[2].mxu0  ;;  %v1232_v56 = vpop.f32.mrb[2].mxu1 }
  0xfd   : > { %v1185_v57 = vpop.f32.mrb[3].mxu0  ;;  %v1233_v58 = vpop.f32.mrb[3].mxu1 }
  0xfe   : > { %v923_v59 = vadd.f32 %v1183_v53, %v1536_v51  ;;  %v939_v60 = vadd.f32 %v1231_v54, %v1536_v51  ;;  %v1186_v61 = vadd.f32 %v1185_v57, %v1184_v55  ;;  %v1234_v62 = vadd.f32 %v1233_v58, %v1232_v56 }
 0x100   : > { %955 = vst [vmem:[%s1543_s8] sm:$0xff] %v923_v59  ;;  %971 = vst [vmem:[%s1543_s8 + $0x80] sm:$0xff] %v939_v60  ;;  %v924_v63 = vadd.f32 %v1186_v61, %v1536_v51  ;;  %v940_v0 = vadd.f32 %v1234_v62, %v1536_v51 }
 0x102   : > { %956 = vst [vmem:[%s1543_s8 + $0x8] sm:$0xff] %v924_v63  ;;  %972 = vst [vmem:[%s1543_s8 + $0x88] sm:$0xff] %v940_v0  ;;  %v1187_v1 = vpop.f32.mrb[4].mxu0  ;;  %v1235_v2 = vpop.f32.mrb[4].mxu1 }
 0x103   : > { %v1188_v3 = vpop.f32.mrb[5].mxu0  ;;  %v1236_v4 = vpop.f32.mrb[5].mxu1 }
 0x104   : > { %v1189_v5 = vadd.f32 %v1188_v3, %v1187_v1  ;;  %v1237_v6 = vadd.f32 %v1236_v4, %v1235_v2  ;;  %v1190_v7 = vpop.f32.mrb[6].mxu0  ;;  %v1238_v8 = vpop.f32.mrb[6].mxu1 }
 0x105   : > { %v1191_v9 = vpop.f32.mrb[7].mxu0  ;;  %v1239_v10 = vpop.f32.mrb[7].mxu1 }
 0x106   : > { %v925_v11 = vadd.f32 %v1189_v5, %v1536_v51  ;;  %v941_v12 = vadd.f32 %v1237_v6, %v1536_v51  ;;  %v1192_v13 = vadd.f32 %v1191_v9, %v1190_v7  ;;  %v1240_v14 = vadd.f32 %v1239_v10, %v1238_v8 }
 0x108   : > { %957 = vst [vmem:[%s1543_s8 + $0x10] sm:$0xff] %v925_v11  ;;  %973 = vst [vmem:[%s1543_s8 + $0x90] sm:$0xff] %v941_v12  ;;  %v926_v15 = vadd.f32 %v1192_v13, %v1536_v51  ;;  %v942_v16 = vadd.f32 %v1240_v14, %v1536_v51 }
 0x10a   : > { %958 = vst [vmem:[%s1543_s8 + $0x18] sm:$0xff] %v926_v15  ;;  %974 = vst [vmem:[%s1543_s8 + $0x98] sm:$0xff] %v942_v16  ;;  %v1193_v17 = vpop.f32.mrb[8].mxu0  ;;  %v1241_v18 = vpop.f32.mrb[8].mxu1 }
 0x10b   : > { %v1194_v19 = vpop.f32.mrb[9].mxu0  ;;  %v1242_v20 = vpop.f32.mrb[9].mxu1 }
 0x10c   : > { %v1195_v21 = vadd.f32 %v1194_v19, %v1193_v17  ;;  %v1243_v22 = vadd.f32 %v1242_v20, %v1241_v18  ;;  %v1196_v23 = vpop.f32.mrb[10].mxu0  ;;  %v1244_v24 = vpop.f32.mrb[10].mxu1 }
 0x10d   : > { %v1197_v25 = vpop.f32.mrb[11].mxu0  ;;  %v1245_v26 = vpop.f32.mrb[11].mxu1 }
 0x10e   : > { %v927_v27 = vadd.f32 %v1195_v21, %v1536_v51  ;;  %v943_v28 = vadd.f32 %v1243_v22, %v1536_v51  ;;  %v1198_v29 = vadd.f32 %v1197_v25, %v1196_v23  ;;  %v1246_v30 = vadd.f32 %v1245_v26, %v1244_v24 }
 0x110   : > { %959 = vst [vmem:[%s1543_s8 + $0x20] sm:$0xff] %v927_v27  ;;  %975 = vst [vmem:[%s1543_s8 + $0xa0] sm:$0xff] %v943_v28  ;;  %v928_v31 = vadd.f32 %v1198_v29, %v1536_v51  ;;  %v944_v32 = vadd.f32 %v1246_v30, %v1536_v51 }
 0x112   : > { %960 = vst [vmem:[%s1543_s8 + $0x28] sm:$0xff] %v928_v31  ;;  %976 = vst [vmem:[%s1543_s8 + $0xa8] sm:$0xff] %v944_v32  ;;  %v1199_v33 = vpop.f32.mrb[12].mxu0  ;;  %v1247_v34 = vpop.f32.mrb[12].mxu1 }
 0x113   : > { %v1200_v35 = vpop.f32.mrb[13].mxu0  ;;  %v1248_v36 = vpop.f32.mrb[13].mxu1 }
 0x114   : > { %v1201_v37 = vadd.f32 %v1200_v35, %v1199_v33  ;;  %v1249_v38 = vadd.f32 %v1248_v36, %v1247_v34  ;;  %v1202_v39 = vpop.f32.mrb[14].mxu0  ;;  %v1250_v40 = vpop.f32.mrb[14].mxu1 }
 0x115   : > { %v1203_v41 = vpop.f32.mrb[15].mxu0  ;;  %v1251_v42 = vpop.f32.mrb[15].mxu1 }
 0x116   : > { %v929_v43 = vadd.f32 %v1201_v37, %v1536_v51  ;;  %v945_v44 = vadd.f32 %v1249_v38, %v1536_v51  ;;  %v1204_v45 = vadd.f32 %v1203_v41, %v1202_v39  ;;  %v1252_v46 = vadd.f32 %v1251_v42, %v1250_v40 }
 0x118   : > { %961 = vst [vmem:[%s1543_s8 + $0x30] sm:$0xff] %v929_v43  ;;  %977 = vst [vmem:[%s1543_s8 + $0xb0] sm:$0xff] %v945_v44  ;;  %v930_v47 = vadd.f32 %v1204_v45, %v1536_v51  ;;  %v946_v48 = vadd.f32 %v1252_v46, %v1536_v51 }
 0x11a   : > { %962 = vst [vmem:[%s1543_s8 + $0x38] sm:$0xff] %v930_v47  ;;  %978 = vst [vmem:[%s1543_s8 + $0xb8] sm:$0xff] %v946_v48  ;;  %v1205_v49 = vpop.f32.mrb[16].mxu0  ;;  %v1253_v50 = vpop.f32.mrb[16].mxu1 }
 0x11b   : > { %v1206_v52 = vpop.f32.mrb[17].mxu0  ;;  %v1254_v53 = vpop.f32.mrb[17].mxu1 }
 0x11c   : > { %v1207_v54 = vadd.f32 %v1206_v52, %v1205_v49  ;;  %v1255_v55 = vadd.f32 %v1254_v53, %v1253_v50  ;;  %v1208_v56 = vpop.f32.mrb[18].mxu0  ;;  %v1256_v57 = vpop.f32.mrb[18].mxu1 }
 0x11d   : > { %v1209_v58 = vpop.f32.mrb[19].mxu0  ;;  %v1257_v59 = vpop.f32.mrb[19].mxu1 }
 0x11e   : > { %v931_v60 = vadd.f32 %v1207_v54, %v1536_v51  ;;  %v947_v61 = vadd.f32 %v1255_v55, %v1536_v51  ;;  %v1210_v62 = vadd.f32 %v1209_v58, %v1208_v56  ;;  %v1258_v63 = vadd.f32 %v1257_v59, %v1256_v57 }
 0x120   : > { %963 = vst [vmem:[%s1543_s8 + $0x40] sm:$0xff] %v931_v60  ;;  %979 = vst [vmem:[%s1543_s8 + $0xc0] sm:$0xff] %v947_v61  ;;  %v932_v0 = vadd.f32 %v1210_v62, %v1536_v51  ;;  %v948_v1 = vadd.f32 %v1258_v63, %v1536_v51 }
 0x122   : > { %964 = vst [vmem:[%s1543_s8 + $0x48] sm:$0xff] %v932_v0  ;;  %980 = vst [vmem:[%s1543_s8 + $0xc8] sm:$0xff] %v948_v1  ;;  %v1211_v2 = vpop.f32.mrb[20].mxu0  ;;  %v1259_v3 = vpop.f32.mrb[20].mxu1 }
 0x123   : > { %v1212_v4 = vpop.f32.mrb[21].mxu0  ;;  %v1260_v5 = vpop.f32.mrb[21].mxu1 }
 0x124   : > { %v1213_v6 = vadd.f32 %v1212_v4, %v1211_v2  ;;  %v1261_v7 = vadd.f32 %v1260_v5, %v1259_v3  ;;  %v1214_v8 = vpop.f32.mrb[22].mxu0  ;;  %v1262_v9 = vpop.f32.mrb[22].mxu1 }
 0x125   : > { %v1215_v10 = vpop.f32.mrb[23].mxu0  ;;  %v1263_v11 = vpop.f32.mrb[23].mxu1 }
 0x126   : > { %v933_v12 = vadd.f32 %v1213_v6, %v1536_v51  ;;  %v949_v13 = vadd.f32 %v1261_v7, %v1536_v51  ;;  %v1216_v14 = vadd.f32 %v1215_v10, %v1214_v8  ;;  %v1264_v15 = vadd.f32 %v1263_v11, %v1262_v9 }
 0x128   : > { %965 = vst [vmem:[%s1543_s8 + $0x50] sm:$0xff] %v933_v12  ;;  %981 = vst [vmem:[%s1543_s8 + $0xd0] sm:$0xff] %v949_v13  ;;  %v934_v16 = vadd.f32 %v1216_v14, %v1536_v51  ;;  %v950_v17 = vadd.f32 %v1264_v15, %v1536_v51 }
 0x12a   : > { %966 = vst [vmem:[%s1543_s8 + $0x58] sm:$0xff] %v934_v16  ;;  %982 = vst [vmem:[%s1543_s8 + $0xd8] sm:$0xff] %v950_v17  ;;  %v1217_v18 = vpop.f32.mrb[24].mxu0  ;;  %v1265_v19 = vpop.f32.mrb[24].mxu1 }
 0x12b   : > { %v1218_v20 = vpop.f32.mrb[25].mxu0  ;;  %v1266_v21 = vpop.f32.mrb[25].mxu1 }
 0x12c   : > { %v1219_v22 = vadd.f32 %v1218_v20, %v1217_v18  ;;  %v1267_v23 = vadd.f32 %v1266_v21, %v1265_v19  ;;  %v1220_v24 = vpop.f32.mrb[26].mxu0  ;;  %v1268_v25 = vpop.f32.mrb[26].mxu1 }
 0x12d   : > { %v1221_v26 = vpop.f32.mrb[27].mxu0  ;;  %v1269_v27 = vpop.f32.mrb[27].mxu1 }
 0x12e   : > { %v935_v28 = vadd.f32 %v1219_v22, %v1536_v51  ;;  %v951_v29 = vadd.f32 %v1267_v23, %v1536_v51  ;;  %v1222_v30 = vadd.f32 %v1221_v26, %v1220_v24  ;;  %v1270_v31 = vadd.f32 %v1269_v27, %v1268_v25 }
 0x130   : > { %967 = vst [vmem:[%s1543_s8 + $0x60] sm:$0xff] %v935_v28  ;;  %983 = vst [vmem:[%s1543_s8 + $0xe0] sm:$0xff] %v951_v29  ;;  %v936_v32 = vadd.f32 %v1222_v30, %v1536_v51  ;;  %v952_v33 = vadd.f32 %v1270_v31, %v1536_v51 }
 0x132   : > { %968 = vst [vmem:[%s1543_s8 + $0x68] sm:$0xff] %v936_v32  ;;  %984 = vst [vmem:[%s1543_s8 + $0xe8] sm:$0xff] %v952_v33  ;;  %v1223_v34 = vpop.f32.mrb[28].mxu0  ;;  %v1271_v35 = vpop.f32.mrb[28].mxu1 }
 0x133   : > { %v1224_v36 = vpop.f32.mrb[29].mxu0  ;;  %v1272_v37 = vpop.f32.mrb[29].mxu1 }
 0x134   : > { %v1225_v38 = vadd.f32 %v1224_v36, %v1223_v34  ;;  %v1273_v39 = vadd.f32 %v1272_v37, %v1271_v35  ;;  %v1226_v40 = vpop.f32.mrb[30].mxu0  ;;  %v1274_v41 = vpop.f32.mrb[30].mxu1 }
 0x135   : > { %v1227_v42 = vpop.f32.mrb[31].mxu0  ;;  %v1275_v43 = vpop.f32.mrb[31].mxu1 }
 0x136   : > { %v937_v44 = vadd.f32 %v1225_v38, %v1536_v51  ;;  %v953_v45 = vadd.f32 %v1273_v39, %v1536_v51  ;;  %v1228_v46 = vadd.f32 %v1227_v42, %v1226_v40  ;;  %v1276_v47 = vadd.f32 %v1275_v43, %v1274_v41 }
 0x138   : > { %969 = vst [vmem:[%s1543_s8 + $0x70] sm:$0xff] %v937_v44  ;;  %985 = vst [vmem:[%s1543_s8 + $0xf0] sm:$0xff] %v953_v45  ;;  %v938_v48 = vadd.f32 %v1228_v46, %v1536_v51  ;;  %v954_v49 = vadd.f32 %v1276_v47, %v1536_v51 }
 0x13a   : > { %970 = vst [vmem:[%s1543_s8 + $0x78] sm:$0xff] %v938_v48  ;;  %986 = vst [vmem:[%s1543_s8 + $0xf8] sm:$0xff] %v954_v49 }
 0x13b PF: > { %s13_s14 = sadd.s32 1, %s1403_s14   ;;  %s1622_s12 = smov %s1399_s13 }
 0x13c   : > { %p10_p5 = scmp.ge.s32.totalorder %s13_s14, 4   ;;  %s1623_s13 = smov %s1625_s15 }
 0x13e   :  { %12 = sbr.rel (!%p10_p5) target bundleno = 2 (0x2), region = 76 }

// kernel: _lambda_.60
= control target key start
LH: loop header
LB: loop body
LE: loop exit
PB: predicated region body
PF: predicated region fallthrough
CT: control target
= control target key end

     0   :  { %s706_s18 = smov 0   ;;  %s708_s19 = smov 0   ;;  %s962_s0 = inlined_call_operand.vmem [shape: f32[2,256,32], index: 0, kind: input, shape index: {}]   ;;  %s963_s1 = inlined_call_operand.vmem [shape: f32[2,1,32], index: 1, kind: input, shape index: {}]   ;;  %s964_s2 = inlined_call_operand.vmem [shape: f32[2,1,32], index: 2, kind: input, shape index: {}]   ;;  %s965_s3 = inlined_call_operand.vmem [shape: f32[1,1,32], index: 3, kind: input, shape index: {}]   ;;  %s966_s4 = inlined_call_operand.vmem [shape: f32[1,1,32], index: 4, kind: input, shape index: {}]   ;;  %s967_s5 = inlined_call_operand.vmem [shape: f32[2,256,32], index: 5, kind: output, shape index: {}]  }
   0x1   :  { %s710_s20 = smov 0  }
   0x2 LB: > { %s27_s21 = sadd.s32 1, %s670_s19  ;;  %p617_p0 = scmp.ge.s32.totalorder %s674_s20, 1  ;;  %s674_s20 = sphi %s710_s20, %s15_s20   ;;  %s670_s19 = sphi %s708_s19, %s969_s19   ;;  %s666_s18 = sphi %s706_s18, %s968_s18  }
   0x3   : > { %p29_p1 = scmp.ge.s32.totalorder %s27_s21, 2  ;;  %p224_p2 = scmp.lt.s32.totalorder %s674_s20, 3 }
   0x5   : > { %s971_s21 = smov (%p29_p1, %s27_s21), 0  ;;  %p225_p3 = pnand %p617_p0, %p224_p2 }
   0x6   : > { %p267_p4 = scmp.lt.s32.totalorder (!%p225_p3), %s666_s18, 1  ;;  %v367_v0 = vlaneseq (!%p225_p3)  ;;  %v364_v2 = vld [vmem:[%s965_s3] sm:$0x1] (!%p225_p3)  ;;  %vm475_vm0 = vcmask (!%p225_p3), 261120  }
   0x7   : > { %228 = sbr.rel (%p225_p3) target bundleno = 58 (0x3a), region = 40  ;;  %v771_v27 = vld [vmem:[%s966_s4] ss:$0 sm:$0xff] (!%p225_p3) }
   0x8   : > { %v368_v1 = vshrl.u32 (!%p225_p3), %v367_v0, 7 }
   0xa   : > { %v369_v4 = vsub.s32 (!%p225_p3), 0, %v368_v1 }
   0xe   : > { %s973_s18 = smov (!%p267_p4, %s666_s18), 1 }
   0xf   : > { %s626_s22 = sshll.u32 %s973_s18, 8  ;;  %s278_s25 = scalar_lea.vmem %s963_s1, %s973_s18 }
  0x10   : > { %s739_s30 = scalar_lea.vmem %s962_s0, %s626_s22  ;;  %s281_s8 = scalar_lea.vmem %s964_s2, %s973_s18  ;;  %v745_v3 = vld [vmem:[%s278_s25] ss:$0 sm:$0xff] }
  0x11   : > { %v292_v5 = vld [vmem:[%s739_s30] sm:$0xff]  ;;  %v293_v7 = vld [vmem:[%s739_s30 + $0x8] sm:$0xff]  ;;  %v294_v11 = vld [vmem:[%s739_s30 + $0x10] sm:$0xff]  ;;  %s793_s13 = scalar_lea.vmem %s967_s5, %s626_s22 }
  0x12   : > { %v363_v6 = vld [vmem:[%s281_s8] sm:$0x1]  ;;  %v331_v8 = vsub.f32 %v292_v5, %v745_v3  ;;  %v332_v10 = vsub.f32 %v293_v7, %v745_v3  ;;  %v295_v12 = vld [vmem:[%s739_s30 + $0x18] sm:$0xff]  ;;  %v333_v14 = vsub.f32 %v294_v11, %v745_v3  ;;  %v297_v17 = vld [vmem:[%s739_s30 + $0x28] sm:$0xff] }
  0x13   : > { %v365_v9 = vmul.f32 %v364_v2, %v363_v6  ;;  %v296_v13 = vld [vmem:[%s739_s30 + $0x20] sm:$0xff]  ;;  %v334_v15 = vsub.f32 %v295_v12, %v745_v3  ;;  %v298_v18 = vld [vmem:[%s739_s30 + $0x30] sm:$0xff]  ;;  %v299_v19 = vld [vmem:[%s739_s30 + $0x38] sm:$0xff]  ;;  %v336_v21 = vsub.f32 %v297_v17, %v745_v3 }
  0x14   : > { %v335_v16 = vsub.f32 %v296_v13, %v745_v3  ;;  %v337_v22 = vsub.f32 %v298_v18, %v745_v3  ;;  %v338_v23 = vsub.f32 %v299_v19, %v745_v3  ;;  %v300_v24 = vld [vmem:[%s739_s30 + $0x40] sm:$0xff]  ;;  %v301_v25 = vld [vmem:[%s739_s30 + $0x48] sm:$0xff]  ;;  %v302_v26 = vld [vmem:[%s739_s30 + $0x50] sm:$0xff] }
  0x15   : > { %v760_v20 = vrot.slane %v365_v9, %v369_v4  ;;  %v339_v28 = vsub.f32 %v300_v24, %v745_v3  ;;  %v340_v29 = vsub.f32 %v301_v25, %v745_v3  ;;  %v341_v30 = vsub.f32 %v302_v26, %v745_v3  ;;  %v303_v47 = vld [vmem:[%s739_s30 + $0x58] sm:$0xff]  ;;  %v304_v48 = vld [vmem:[%s739_s30 + $0x60] sm:$0xff]  ;;  %v305_v49 = vld [vmem:[%s739_s30 + $0x68] sm:$0xff] }
  0x16   : > { %v306_v54 = vld [vmem:[%s739_s30 + $0x70] sm:$0xff]  ;;  %v307_v55 = vld [vmem:[%s739_s30 + $0x78] sm:$0xff]  ;;  %v342_v63 = vsub.f32 %v303_v47, %v745_v3  ;;  %v343_v0 = vsub.f32 %v304_v48, %v745_v3  ;;  %v344_v1 = vsub.f32 %v305_v49, %v745_v3  ;;  %v308_v13 = vld [vmem:[%s739_s30 + $0x80] sm:$0xff] }
  0x17   : > { %v372_v31 = vmul.f32 %v760_v20, %v331_v8  ;;  %v373_v32 = vmul.f32 %v760_v20, %v332_v10  ;;  %v374_v33 = vmul.f32 %v760_v20, %v333_v14  ;;  %v375_v34 = vmul.f32 %v760_v20, %v334_v15  ;;  %v309_v14 = vld [vmem:[%s739_s30 + $0x88] sm:$0xff]  ;;  %v310_v15 = vld [vmem:[%s739_s30 + $0x90] sm:$0xff]  ;;  %v311_v25 = vld [vmem:[%s739_s30 + $0x98] sm:$0xff] }
  0x18   : > { %v376_v35 = vmul.f32 %v760_v20, %v335_v16  ;;  %v377_v36 = vmul.f32 %v760_v20, %v336_v21  ;;  %v378_v37 = vmul.f32 %v760_v20, %v337_v22  ;;  %v379_v38 = vmul.f32 %v760_v20, %v338_v23  ;;  %v312_v26 = vld [vmem:[%s739_s30 + $0xa0] sm:$0xff] }
  0x19   : > { %v411_v39 = vadd.f32 %v771_v27, %v372_v31  ;;  %v412_v40 = vadd.f32 %v771_v27, %v373_v32  ;;  %v413_v41 = vadd.f32 %v771_v27, %v374_v33  ;;  %v414_v42 = vadd.f32 %v771_v27, %v375_v34  ;;  %v313_v32 = vld [vmem:[%s739_s30 + $0xa8] sm:$0xff]  ;;  %v314_v33 = vld [vmem:[%s739_s30 + $0xb0] sm:$0xff]  ;;  %v315_v34 = vld [vmem:[%s739_s30 + $0xb8] sm:$0xff] }
  0x1a   : > { %v415_v43 = vadd.f32 %v771_v27, %v376_v35  ;;  %v416_v44 = vadd.f32 %v771_v27, %v377_v36  ;;  %v417_v45 = vadd.f32 %v771_v27, %v378_v37  ;;  %v418_v46 = vadd.f32 %v771_v27, %v379_v38 }
  0x1b   : > { %v443_v50 = vmax.f32 %v411_v39, 0.0  ;;  %v444_v51 = vmax.f32 %v412_v40, 0.0  ;;  %v445_v52 = vmax.f32 %v413_v41, 0.0  ;;  %v446_v53 = vmax.f32 %v414_v42, 0.0 }
  0x1c   : > { %v447_v56 = vmax.f32 %v415_v43, 0.0  ;;  %v448_v57 = vmax.f32 %v416_v44, 0.0  ;;  %v449_v58 = vmax.f32 %v417_v45, 0.0  ;;  %v450_v59 = vmax.f32 %v418_v46, 0.0 }
  0x1d   : > { %476 = vst.msk [vmem:[%s793_s13] sm:$0xff] %vm475_vm0, %v443_v50  ;;  %477 = vst.msk [vmem:[%s793_s13 + $0x8] sm:$0xff] %vm475_vm0, %v444_v51  ;;  %v380_v60 = vmul.f32 %v760_v20, %v339_v28  ;;  %v381_v61 = vmul.f32 %v760_v20, %v340_v29  ;;  %v382_v62 = vmul.f32 %v760_v20, %v341_v30 }
  0x1e   : > { %478 = vst.msk [vmem:[%s793_s13 + $0x10] sm:$0xff] %vm475_vm0, %v445_v52  ;;  %479 = vst.msk [vmem:[%s793_s13 + $0x18] sm:$0xff] %vm475_vm0, %v446_v53  ;;  %v345_v2 = vsub.f32 %v306_v54, %v745_v3  ;;  %v346_v4 = vsub.f32 %v307_v55, %v745_v3  ;;  %v383_v8 = vmul.f32 %v760_v20, %v342_v63  ;;  %v316_v55 = vld [vmem:[%s739_s30 + $0xc0] sm:$0xff] }
  0x1f   : > { %480 = vst.msk [vmem:[%s793_s13 + $0x20] sm:$0xff] %vm475_vm0, %v447_v56  ;;  %481 = vst.msk [vmem:[%s793_s13 + $0x28] sm:$0xff] %vm475_vm0, %v448_v57  ;;  %v419_v5 = vadd.f32 %v771_v27, %v380_v60  ;;  %v420_v6 = vadd.f32 %v771_v27, %v381_v61  ;;  %v421_v7 = vadd.f32 %v771_v27, %v382_v62  ;;  %v317_v56 = vld [vmem:[%s739_s30 + $0xc8] sm:$0xff]  ;;  %v318_v57 = vld [vmem:[%s739_s30 + $0xd0] sm:$0xff] }
  0x20   : > { %482 = vst.msk [vmem:[%s793_s13 + $0x30] sm:$0xff] %vm475_vm0, %v449_v58  ;;  %483 = vst.msk [vmem:[%s793_s13 + $0x38] sm:$0xff] %vm475_vm0, %v450_v59  ;;  %v384_v9 = vmul.f32 %v760_v20, %v343_v0  ;;  %v385_v10 = vmul.f32 %v760_v20, %v344_v1  ;;  %v386_v11 = vmul.f32 %v760_v20, %v345_v2  ;;  %v319_v2 = vld [vmem:[%s739_s30 + $0xd8] sm:$0xff] }
  0x21   : > { %v387_v12 = vmul.f32 %v760_v20, %v346_v4  ;;  %v451_v16 = vmax.f32 %v419_v5, 0.0  ;;  %v452_v17 = vmax.f32 %v420_v6, 0.0  ;;  %v453_v18 = vmax.f32 %v421_v7, 0.0  ;;  %v320_v4 = vld [vmem:[%s739_s30 + $0xe0] sm:$0xff] }
  0x22   : > { %v422_v19 = vadd.f32 %v771_v27, %v383_v8  ;;  %v423_v21 = vadd.f32 %v771_v27, %v384_v9  ;;  %v424_v22 = vadd.f32 %v771_v27, %v385_v10  ;;  %v425_v23 = vadd.f32 %v771_v27, %v386_v11  ;;  %v321_v9 = vld [vmem:[%s739_s30 + $0xe8] sm:$0xff]  ;;  %v322_v10 = vld [vmem:[%s739_s30 + $0xf0] sm:$0xff]  ;;  %v323_v11 = vld [vmem:[%s739_s30 + $0xf8] sm:$0xff] }
  0x23   : > { %v426_v24 = vadd.f32 %v771_v27, %v387_v12  ;;  %484 = vst.msk [vmem:[%s793_s13 + $0x40] sm:$0xff] %vm475_vm0, %v451_v16  ;;  %485 = vst.msk [vmem:[%s793_s13 + $0x48] sm:$0xff] %vm475_vm0, %v452_v17  ;;  %v347_v29 = vsub.f32 %v308_v13, %v745_v3  ;;  %v348_v30 = vsub.f32 %v309_v14, %v745_v3 }
  0x24   : > { %486 = vst.msk [vmem:[%s793_s13 + $0x50] sm:$0xff] %vm475_vm0, %v453_v18  ;;  %v454_v28 = vmax.f32 %v422_v19, 0.0  ;;  %v349_v31 = vsub.f32 %v310_v15, %v745_v3  ;;  %v455_v35 = vmax.f32 %v423_v21, 0.0  ;;  %v456_v36 = vmax.f32 %v424_v22, 0.0 }
  0x25   : > { %v457_v37 = vmax.f32 %v425_v23, 0.0  ;;  %v458_v38 = vmax.f32 %v426_v24, 0.0  ;;  %v388_v39 = vmul.f32 %v760_v20, %v347_v29  ;;  %v389_v40 = vmul.f32 %v760_v20, %v348_v30 }
  0x26   : > { %487 = vst.msk [vmem:[%s793_s13 + $0x58] sm:$0xff] %vm475_vm0, %v454_v28  ;;  %v390_v41 = vmul.f32 %v760_v20, %v349_v31  ;;  %v350_v42 = vsub.f32 %v311_v25, %v745_v3  ;;  %488 = vst.msk [vmem:[%s793_s13 + $0x60] sm:$0xff] %vm475_vm0, %v455_v35  ;;  %v351_v43 = vsub.f32 %v312_v26, %v745_v3 }
  0x27   : > { %489 = vst.msk [vmem:[%s793_s13 + $0x68] sm:$0xff] %vm475_vm0, %v456_v36  ;;  %490 = vst.msk [vmem:[%s793_s13 + $0x70] sm:$0xff] %vm475_vm0, %v457_v37  ;;  %v352_v44 = vsub.f32 %v313_v32, %v745_v3  ;;  %v353_v45 = vsub.f32 %v314_v33, %v745_v3  ;;  %v354_v46 = vsub.f32 %v315_v34, %v745_v3 }
  0x28   : > { %491 = vst.msk [vmem:[%s793_s13 + $0x78] sm:$0xff] %vm475_vm0, %v458_v38  ;;  %v427_v47 = vadd.f32 %v771_v27, %v388_v39  ;;  %v428_v48 = vadd.f32 %v771_v27, %v389_v40  ;;  %v429_v49 = vadd.f32 %v771_v27, %v390_v41  ;;  %v391_v50 = vmul.f32 %v760_v20, %v350_v42 }
  0x29   : > { %v392_v51 = vmul.f32 %v760_v20, %v351_v43  ;;  %v393_v52 = vmul.f32 %v760_v20, %v352_v44  ;;  %v394_v53 = vmul.f32 %v760_v20, %v353_v45  ;;  %v395_v54 = vmul.f32 %v760_v20, %v354_v46 }
  0x2a   : > { %v459_v58 = vmax.f32 %v427_v47, 0.0  ;;  %v460_v59 = vmax.f32 %v428_v48, 0.0  ;;  %v461_v60 = vmax.f32 %v429_v49, 0.0  ;;  %v430_v61 = vadd.f32 %v771_v27, %v391_v50 }
  0x2b   : > { %v431_v62 = vadd.f32 %v771_v27, %v392_v51  ;;  %v432_v63 = vadd.f32 %v771_v27, %v393_v52  ;;  %v433_v0 = vadd.f32 %v771_v27, %v394_v53  ;;  %v434_v1 = vadd.f32 %v771_v27, %v395_v54 }
  0x2c   : > { %492 = vst.msk [vmem:[%s793_s13 + $0x80] sm:$0xff] %vm475_vm0, %v459_v58  ;;  %493 = vst.msk [vmem:[%s793_s13 + $0x88] sm:$0xff] %vm475_vm0, %v460_v59  ;;  %v462_v5 = vmax.f32 %v430_v61, 0.0  ;;  %v355_v6 = vsub.f32 %v316_v55, %v745_v3  ;;  %v356_v7 = vsub.f32 %v317_v56, %v745_v3  ;;  %v357_v8 = vsub.f32 %v318_v57, %v745_v3 }
  0x2d   : > { %494 = vst.msk [vmem:[%s793_s13 + $0x90] sm:$0xff] %vm475_vm0, %v461_v60  ;;  %v463_v12 = vmax.f32 %v431_v62, 0.0  ;;  %v464_v13 = vmax.f32 %v432_v63, 0.0  ;;  %v465_v14 = vmax.f32 %v433_v0, 0.0  ;;  %v466_v15 = vmax.f32 %v434_v1, 0.0 }
  0x2e   : > { %495 = vst.msk [vmem:[%s793_s13 + $0x98] sm:$0xff] %vm475_vm0, %v462_v5  ;;  %v396_v16 = vmul.f32 %v760_v20, %v355_v6  ;;  %v397_v17 = vmul.f32 %v760_v20, %v356_v7  ;;  %v398_v18 = vmul.f32 %v760_v20, %v357_v8  ;;  %v358_v19 = vsub.f32 %v319_v2, %v745_v3 }
  0x2f   : > { %496 = vst.msk [vmem:[%s793_s13 + $0xa0] sm:$0xff] %vm475_vm0, %v463_v12  ;;  %497 = vst.msk [vmem:[%s793_s13 + $0xa8] sm:$0xff] %vm475_vm0, %v464_v13  ;;  %v359_v21 = vsub.f32 %v320_v4, %v745_v3  ;;  %v360_v22 = vsub.f32 %v321_v9, %v745_v3  ;;  %v361_v23 = vsub.f32 %v322_v10, %v745_v3 }
  0x30   : > { %498 = vst.msk [vmem:[%s793_s13 + $0xb0] sm:$0xff] %vm475_vm0, %v465_v14  ;;  %499 = vst.msk [vmem:[%s793_s13 + $0xb8] sm:$0xff] %vm475_vm0, %v466_v15  ;;  %v362_v24 = vsub.f32 %v323_v11, %v745_v3  ;;  %v435_v25 = vadd.f32 %v771_v27, %v396_v16  ;;  %v436_v26 = vadd.f32 %v771_v27, %v397_v17 }
  0x31   : > { %v437_v28 = vadd.f32 %v771_v27, %v398_v18  ;;  %v399_v29 = vmul.f32 %v760_v20, %v358_v19  ;;  %v400_v30 = vmul.f32 %v760_v20, %v359_v21  ;;  %v401_v31 = vmul.f32 %v760_v20, %v360_v22 }
  0x32   : > { %v402_v32 = vmul.f32 %v760_v20, %v361_v23  ;;  %v403_v33 = vmul.f32 %v760_v20, %v362_v24  ;;  %v467_v3 = vmax.f32 %v435_v25, 0.0  ;;  %v468_v34 = vmax.f32 %v436_v26, 0.0 }
  0x33   : > { %v469_v35 = vmax.f32 %v437_v28, 0.0  ;;  %v438_v36 = vadd.f32 %v771_v27, %v399_v29  ;;  %v439_v37 = vadd.f32 %v771_v27, %v400_v30  ;;  %v440_v38 = vadd.f32 %v771_v27, %v401_v31 }
  0x34   : > { %v441_v39 = vadd.f32 %v771_v27, %v402_v32  ;;  %v442_v40 = vadd.f32 %v771_v27, %v403_v33  ;;  %500 = vst.msk [vmem:[%s793_s13 + $0xc0] sm:$0xff] %vm475_vm0, %v467_v3  ;;  %501 = vst.msk [vmem:[%s793_s13 + $0xc8] sm:$0xff] %vm475_vm0, %v468_v34 }
  0x35   : > { %502 = vst.msk [vmem:[%s793_s13 + $0xd0] sm:$0xff] %vm475_vm0, %v469_v35  ;;  %v470_v20 = vmax.f32 %v438_v36, 0.0  ;;  %v471_v41 = vmax.f32 %v439_v37, 0.0  ;;  %v472_v42 = vmax.f32 %v440_v38, 0.0 }
  0x36   : > { %v473_v43 = vmax.f32 %v441_v39, 0.0  ;;  %v474_v44 = vmax.f32 %v442_v40, 0.0 }
  0x37   : > { %503 = vst.msk [vmem:[%s793_s13 + $0xd8] sm:$0xff] %vm475_vm0, %v470_v20  ;;  %504 = vst.msk [vmem:[%s793_s13 + $0xe0] sm:$0xff] %vm475_vm0, %v471_v41 }
  0x38   : > { %505 = vst.msk [vmem:[%s793_s13 + $0xe8] sm:$0xff] %vm475_vm0, %v472_v42  ;;  %506 = vst.msk [vmem:[%s793_s13 + $0xf0] sm:$0xff] %vm475_vm0, %v473_v43 }
  0x39   : > { %507 = vst.msk [vmem:[%s793_s13 + $0xf8] sm:$0xff] %vm475_vm0, %v474_v44 }
  0x3a PF: > { %s15_s20 = sadd.s32 1, %s674_s20   ;;  %s968_s18 = smov %s670_s19 }
  0x3b   : > { %p12_p5 = scmp.ge.s32.totalorder %s15_s20, 4   ;;  %s969_s19 = smov %s971_s21 }
  0x3d   :  { %14 = sbr.rel (!%p12_p5) target bundleno = 2 (0x2), region = 76 }

// kernel: _lambda_.61
= control target key start
LH: loop header
LB: loop body
LE: loop exit
PB: predicated region body
PF: predicated region fallthrough
CT: control target
= control target key end

     0   :  { %s1141_s1 = inlined_call_operand.vmem [shape: bf16[384,128], index: 1, kind: input, shape index: {}]   ;;  %s1142_s0 = inlined_call_operand.vmem [shape: bf16[128,384], index: 0, kind: input, shape index: {}]   ;;  %s1143_s2 = inlined_call_operand.vmem [shape: f32[1,128], index: 2, kind: input, shape index: {}]   ;;  %s1144_s3 = inlined_call_operand.vmem [shape: f32[128,128], index: 3, kind: output, shape index: {}]  }
   0x1   :  { %v852_v0 = vld [vmem:[%s1141_s1 + $0x40] sm:$0xff]   ;;  %v855_v3 = vld [vmem:[%s1141_s1 + $0x48] sm:$0xff]   ;;  %v858_v6 = vld [vmem:[%s1141_s1 + $0x50] sm:$0xff]  }
   0x2   :  { %v853_v1 = vld [vmem:[%s1141_s1] sm:$0xff]   ;;  %740 = vmatprep.subr.bf16.mxu0 %v852_v0  ;;  %v856_v4 = vld [vmem:[%s1141_s1 + $0x8] sm:$0xff]   ;;  %v859_v7 = vld [vmem:[%s1141_s1 + $0x10] sm:$0xff]  }
   0x3   :  { %v854_v2 = vld [vmem:[%s1141_s1 + $0x80] sm:$0xff]   ;;  %741 = vmatpush3.bf16.msra.mxu0 %v853_v1  ;;  %v857_v5 = vld [vmem:[%s1141_s1 + $0x88] sm:$0xff]   ;;  %v860_v8 = vld [vmem:[%s1141_s1 + $0x90] sm:$0xff]  }
   0x4   :  { %820 = vmatprep.subr.bf16.mxu1 %v854_v2  ;;  %742 = vmatprep.subr.bf16.mxu0 %v855_v3  ;;  %v861_v9 = vld [vmem:[%s1141_s1 + $0x58] sm:$0xff]   ;;  %v864_v12 = vld [vmem:[%s1141_s1 + $0x60] sm:$0xff]   ;;  %v867_v15 = vld [vmem:[%s1141_s1 + $0x68] sm:$0xff]  }
   0x5   :  { %821 = vmatpush3.bf16.msra.mxu1 %v854_v2  ;;  %v862_v10 = vld [vmem:[%s1141_s1 + $0x18] sm:$0xff]   ;;  %v866_v13 = vld [vmem:[%s1141_s1 + $0xa0] sm:$0xff]   ;;  %v869_v16 = vld [vmem:[%s1141_s1 + $0xa8] sm:$0xff]  }
   0x6   :  { %822 = vmatprep.subr.bf16.mxu1 %v857_v5  ;;  %v863_v11 = vld [vmem:[%s1141_s1 + $0x98] sm:$0xff]   ;;  %v865_v14 = vld [vmem:[%s1141_s1 + $0x20] sm:$0xff]   ;;  %v868_v17 = vld [vmem:[%s1141_s1 + $0x28] sm:$0xff]  }
   0x7   :  { %743 = vmatpush3.bf16.msra.mxu0 %v856_v4  ;;  %v870_v18 = vld [vmem:[%s1141_s1 + $0x70] sm:$0xff]   ;;  %v873_v21 = vld [vmem:[%s1141_s1 + $0x78] sm:$0xff]   ;;  %v876_v26 = vld [vmem:[%s1142_s0] ss:$12 sps:$4 sm:$0xff]  }
   0x8   :  { %744 = vmatprep.subr.bf16.mxu0 %v858_v6  ;;  %v871_v19 = vld [vmem:[%s1141_s1 + $0x30] sm:$0xff]   ;;  %v875_v22 = vld [vmem:[%s1141_s1 + $0xb8] sm:$0xff]   ;;  %v880_v28 = vld [vmem:[%s1142_s0 + $0x20] ss:$12 sps:$4 sm:$0xff]  }
   0x9   :  { %823 = vmatpush3.bf16.msra.mxu1 %v857_v5  ;;  %v872_v20 = vld [vmem:[%s1141_s1 + $0xb0] sm:$0xff]   ;;  %v874_v25 = vld [vmem:[%s1141_s1 + $0x38] sm:$0xff]   ;;  %v896_v36 = vld [vmem:[%s1142_s0 + $0x80] ss:$12 sps:$4 sm:$0xff]  }
   0xa   :  { %824 = vmatprep.subr.bf16.mxu1 %v860_v8  ;;  %v878_v23 = vld [vmem:[%s1142_s0 + $0x4] ss:$12 sps:$4 sm:$0xff]   ;;  %v879_v24 = vld [vmem:[%s1142_s0 + $0x8] ss:$12 sps:$4 sm:$0xff]   ;;  %v889_v35 = vld [vmem:[%s1142_s0 + $0x4c] ss:$12 sps:$4 sm:$0xff]  }
   0xb   :  { %745 = vmatpush3.bf16.msra.mxu0 %v859_v7  ;;  %435 = vmatprep.mubr.bf16.mxu0 %v878_v23  ;;  %v881_v27 = vld [vmem:[%s1142_s0 + $0x1c] ss:$12 sps:$4 sm:$0xff]   ;;  %v887_v29 = vld [vmem:[%s1142_s0 + $0x38] ss:$12 sps:$4 sm:$0xff]   ;;  %v884_v31 = vld [vmem:[%s1142_s0 + $0x34] ss:$12 sps:$4 sm:$0xff]  }
   0xc   :  { %746 = vmatprep.subr.bf16.mxu0 %v861_v9  ;;  %836 = vmatprep.mubr.bf16.mxu1 %v879_v24  ;;  %v883_v30 = vld [vmem:[%s1142_s0 + $0x18] ss:$12 sps:$4 sm:$0xff]   ;;  %v888_v32 = vld [vmem:[%s1142_s0 + $0x50] ss:$12 sps:$4 sm:$0xff]   ;;  %v895_v33 = vld [vmem:[%s1142_s0 + $0x68] ss:$12 sps:$4 sm:$0xff]  }
   0xd   :  { %825 = vmatpush3.bf16.msra.mxu1 %v860_v8  ;;  %v886_v34 = vld [vmem:[%s1142_s0 + $0x30] ss:$12 sps:$4 sm:$0xff]   ;;  %v903_v37 = vld [vmem:[%s1142_s0 + $0x98] ss:$12 sps:$4 sm:$0xff]   ;;  %v891_v38 = vld [vmem:[%s1142_s0 + $0x48] ss:$12 sps:$4 sm:$0xff]  }
   0xe   :  { %826 = vmatprep.subr.bf16.mxu1 %v863_v11  ;;  %v892_v39 = vld [vmem:[%s1142_s0 + $0x64] ss:$12 sps:$4 sm:$0xff]   ;;  %v894_v41 = vld [vmem:[%s1142_s0 + $0x60] ss:$12 sps:$4 sm:$0xff]   ;;  %v897_v42 = vld [vmem:[%s1142_s0 + $0x7c] ss:$12 sps:$4 sm:$0xff]  }
   0xf   :  { %747 = vmatpush3.bf16.msra.mxu0 %v862_v10  ;;  %v904_v40 = vld [vmem:[%s1142_s0 + $0xb0] ss:$12 sps:$4 sm:$0xff]   ;;  %v899_v43 = vld [vmem:[%s1142_s0 + $0x78] ss:$12 sps:$4 sm:$0xff]   ;;  %v900_v44 = vld [vmem:[%s1142_s0 + $0x94] ss:$12 sps:$4 sm:$0xff]  }
  0x10   :  { %748 = vmatprep.subr.bf16.mxu0 %v864_v12  ;;  %v902_v45 = vld [vmem:[%s1142_s0 + $0x90] ss:$12 sps:$4 sm:$0xff]   ;;  %v905_v46 = vld [vmem:[%s1142_s0 + $0xac] ss:$12 sps:$4 sm:$0xff]   ;;  %v907_v47 = vld [vmem:[%s1142_s0 + $0xa8] ss:$12 sps:$4 sm:$0xff]  }
  0x11   :  { %827 = vmatpush3.bf16.msra.mxu1 %v863_v11  ;;  %v1075_v55 = vld [vmem:[%s1143_s2] ss:$0 sm:$0xff] }
  0x12   :  { %828 = vmatprep.subr.bf16.mxu1 %v866_v13 }
  0x13   :  { %749 = vmatpush3.bf16.msra.mxu0 %v865_v14 }
  0x14   :  { %750 = vmatprep.subr.bf16.mxu0 %v867_v15 }
  0x15   :  { %829 = vmatpush3.bf16.msra.mxu1 %v866_v13 }
  0x16   :  { %830 = vmatprep.subr.bf16.mxu1 %v869_v16 }
  0x17   :  { %751 = vmatpush3.bf16.msra.mxu0 %v868_v17 }
  0x18   :  { %752 = vmatprep.subr.bf16.mxu0 %v870_v18 }
  0x19   :  { %831 = vmatpush3.bf16.msra.mxu1 %v869_v16 }
  0x1a   :  { %832 = vmatprep.subr.bf16.mxu1 %v872_v20 }
  0x1b   :  { %753 = vmatpush3.bf16.msra.mxu0 %v871_v19 }
  0x1c   :  { %754 = vmatprep.subr.bf16.mxu0 %v873_v21 }
  0x1d   :  { %833 = vmatpush3.bf16.msra.mxu1 %v872_v20 }
  0x1e   :  { %834 = vmatprep.subr.bf16.mxu1 %v875_v22 }
  0x1f   :  { %755 = vmatpush3.bf16.msra.mxu0 %v874_v25 }
  0x21   :  { %835 = vmatpush3.bf16.msra.mxu1 %v875_v22 }
  0x22   :  { %436 = vmatmul.mubr.bf16.vlgmr.msra.gmra.mrb[0].mxu0 %v876_v26 }
  0x23   :  { %443 = vmatprep.mubr.bf16.mxu0 %v881_v27 }
  0x24   :  { %837 = vmatmul.mubr.bf16.vlgmr.msra.gmra.mrb[0].mxu1 %v880_v28 }
  0x25   :  { %840 = vmatprep.mubr.bf16.mxu1 %v887_v29 }
  0x2a   :  { %444 = vmatmul.mubr.bf16.gmra.mrb[4].mxu0 %v883_v30 }
  0x2b   :  { %451 = vmatprep.mubr.bf16.mxu0 %v884_v31 }
  0x2c   :  { %841 = vmatmul.mubr.bf16.gmra.mrb[4].mxu1 %v888_v32 }
  0x2d   :  { %844 = vmatprep.mubr.bf16.mxu1 %v895_v33 }
  0x32   :  { %452 = vmatmul.mubr.bf16.gmra.mrb[8].mxu0 %v886_v34 }
  0x33   :  { %459 = vmatprep.mubr.bf16.mxu0 %v889_v35 }
  0x34   :  { %845 = vmatmul.mubr.bf16.gmra.mrb[8].mxu1 %v896_v36 }
  0x35   :  { %848 = vmatprep.mubr.bf16.mxu1 %v903_v37 }
  0x3a   :  { %460 = vmatmul.mubr.bf16.gmra.mrb[12].mxu0 %v891_v38 }
  0x3b   :  { %467 = vmatprep.mubr.bf16.mxu0 %v892_v39 }
  0x3c   :  { %849 = vmatmul.mubr.bf16.gmra.mrb[12].mxu1 %v904_v40 }
  0x42   :  { %468 = vmatmul.mubr.bf16.gmra.mrb[16].mxu0 %v894_v41 }
  0x43   :  { %475 = vmatprep.mubr.bf16.mxu0 %v897_v42 }
  0x4a   :  { %476 = vmatmul.mubr.bf16.gmra.mrb[20].mxu0 %v899_v43 }
  0x4b   :  { %483 = vmatprep.mubr.bf16.mxu0 %v900_v44 }
  0x52   :  { %484 = vmatmul.mubr.bf16.gmra.mrb[24].mxu0 %v902_v45 }
  0x53   :  { %491 = vmatprep.mubr.bf16.mxu0 %v905_v46 }
  0x5a   :  { %492 = vmatmul.mubr.bf16.gmra.mrb[28].mxu0 %v907_v47 }
  0xf5   :  { %v756_v48 = vpop.f32.mrb[0].mxu0 }
  0xf6   :  { %v757_v49 = vpop.f32.mrb[1].mxu0 }
  0xf7   :  { %v758_v50 = vadd.f32 %v757_v49, %v756_v48  ;;  %v759_v51 = vpop.f32.mrb[2].mxu0  ;;  %v838_v52 = vpop.f32.mrb[0].mxu1 }
  0xf8   :  { %v760_v53 = vpop.f32.mrb[3].mxu0  ;;  %v534_v54 = vpop.f32.mrb[1].mxu1 }
  0xf9   :  { %v761_v56 = vadd.f32 %v760_v53, %v759_v51  ;;  %v535_v57 = vadd.f32 %v758_v50, %v534_v54  ;;  %v839_v58 = vpop.f32.mrb[2].mxu1 }
  0xfa   :  { %v537_v59 = vpop.f32.mrb[3].mxu1 }
  0xfb   :  { %v655_v60 = vadd.f32 %v1075_v55, %v535_v57  ;;  %v538_v61 = vadd.f32 %v761_v56, %v537_v59 }
  0xfd   :  { %671 = vst [vmem:[%s1144_s3] sm:$0xff] %v655_v60  ;;  %v656_v62 = vadd.f32 %v1075_v55, %v538_v61  ;;  %v762_v63 = vpop.f32.mrb[4].mxu0 }
  0xfe   :  { %v763_v0 = vpop.f32.mrb[5].mxu0 }
  0xff   :  { %672 = vst [vmem:[%s1144_s3 + $0x8] sm:$0xff] %v656_v62  ;;  %v764_v1 = vadd.f32 %v763_v0, %v762_v63  ;;  %v765_v2 = vpop.f32.mrb[6].mxu0  ;;  %v842_v3 = vpop.f32.mrb[4].mxu1 }
 0x100   :  { %v766_v4 = vpop.f32.mrb[7].mxu0  ;;  %v550_v5 = vpop.f32.mrb[5].mxu1 }
 0x101   :  { %v543_v6 = vadd.f32 %v838_v52, %v764_v1  ;;  %v767_v7 = vadd.f32 %v766_v4, %v765_v2  ;;  %v843_v8 = vpop.f32.mrb[6].mxu1 }
 0x102   :  { %v553_v9 = vpop.f32.mrb[7].mxu1 }
 0x103   :  { %v657_v10 = vadd.f32 %v1075_v55, %v543_v6  ;;  %v546_v11 = vadd.f32 %v839_v58, %v767_v7 }
 0x105   :  { %673 = vst [vmem:[%s1144_s3 + $0x10] sm:$0xff] %v657_v10  ;;  %v658_v12 = vadd.f32 %v1075_v55, %v546_v11  ;;  %v768_v13 = vpop.f32.mrb[8].mxu0 }
 0x106   :  { %v769_v14 = vpop.f32.mrb[9].mxu0 }
 0x107   :  { %674 = vst [vmem:[%s1144_s3 + $0x18] sm:$0xff] %v658_v12  ;;  %v770_v15 = vadd.f32 %v769_v14, %v768_v13  ;;  %v771_v16 = vpop.f32.mrb[10].mxu0  ;;  %v846_v17 = vpop.f32.mrb[8].mxu1 }
 0x108   :  { %v772_v18 = vpop.f32.mrb[11].mxu0  ;;  %v566_v19 = vpop.f32.mrb[9].mxu1 }
 0x109   :  { %v773_v20 = vadd.f32 %v772_v18, %v771_v16  ;;  %v551_v21 = vadd.f32 %v770_v15, %v550_v5  ;;  %v847_v22 = vpop.f32.mrb[10].mxu1 }
 0x10a   :  { %v569_v23 = vpop.f32.mrb[11].mxu1 }
 0x10b   :  { %v659_v24 = vadd.f32 %v1075_v55, %v551_v21  ;;  %v554_v25 = vadd.f32 %v773_v20, %v553_v9 }
 0x10d   :  { %675 = vst [vmem:[%s1144_s3 + $0x20] sm:$0xff] %v659_v24  ;;  %v660_v26 = vadd.f32 %v1075_v55, %v554_v25  ;;  %v774_v27 = vpop.f32.mrb[12].mxu0 }
 0x10e   :  { %v775_v28 = vpop.f32.mrb[13].mxu0 }
 0x10f   :  { %676 = vst [vmem:[%s1144_s3 + $0x28] sm:$0xff] %v660_v26  ;;  %v776_v29 = vadd.f32 %v775_v28, %v774_v27  ;;  %v777_v30 = vpop.f32.mrb[14].mxu0  ;;  %v850_v31 = vpop.f32.mrb[12].mxu1 }
 0x110   :  { %v778_v32 = vpop.f32.mrb[15].mxu0  ;;  %v582_v33 = vpop.f32.mrb[13].mxu1 }
 0x111   :  { %v559_v34 = vadd.f32 %v842_v3, %v776_v29  ;;  %v779_v35 = vadd.f32 %v778_v32, %v777_v30  ;;  %v851_v36 = vpop.f32.mrb[14].mxu1 }
 0x112   :  { %v585_v37 = vpop.f32.mrb[15].mxu1 }
 0x113   :  { %v661_v38 = vadd.f32 %v1075_v55, %v559_v34  ;;  %v562_v39 = vadd.f32 %v843_v8, %v779_v35 }
 0x115   :  { %677 = vst [vmem:[%s1144_s3 + $0x30] sm:$0xff] %v661_v38  ;;  %v662_v40 = vadd.f32 %v1075_v55, %v562_v39  ;;  %v780_v41 = vpop.f32.mrb[16].mxu0 }
 0x116   :  { %v781_v42 = vpop.f32.mrb[17].mxu0 }
 0x117   :  { %678 = vst [vmem:[%s1144_s3 + $0x38] sm:$0xff] %v662_v40  ;;  %v782_v43 = vadd.f32 %v781_v42, %v780_v41  ;;  %v783_v44 = vpop.f32.mrb[18].mxu0 }
 0x118   :  { %v784_v45 = vpop.f32.mrb[19].mxu0 }
 0x119   :  { %v785_v46 = vadd.f32 %v784_v45, %v783_v44  ;;  %v567_v47 = vadd.f32 %v782_v43, %v566_v19 }
 0x11b   :  { %v663_v48 = vadd.f32 %v1075_v55, %v567_v47  ;;  %v570_v49 = vadd.f32 %v785_v46, %v569_v23 }
 0x11d   :  { %679 = vst [vmem:[%s1144_s3 + $0x40] sm:$0xff] %v663_v48  ;;  %v664_v50 = vadd.f32 %v1075_v55, %v570_v49  ;;  %v786_v51 = vpop.f32.mrb[20].mxu0 }
 0x11e   :  { %v787_v52 = vpop.f32.mrb[21].mxu0 }
 0x11f   :  { %680 = vst [vmem:[%s1144_s3 + $0x48] sm:$0xff] %v664_v50  ;;  %v788_v53 = vadd.f32 %v787_v52, %v786_v51  ;;  %v789_v54 = vpop.f32.mrb[22].mxu0 }
 0x120   :  { %v790_v56 = vpop.f32.mrb[23].mxu0 }
 0x121   :  { %v575_v57 = vadd.f32 %v846_v17, %v788_v53  ;;  %v791_v58 = vadd.f32 %v790_v56, %v789_v54 }
 0x123   :  { %v665_v59 = vadd.f32 %v1075_v55, %v575_v57  ;;  %v578_v60 = vadd.f32 %v847_v22, %v791_v58 }
 0x125   :  { %681 = vst [vmem:[%s1144_s3 + $0x50] sm:$0xff] %v665_v59  ;;  %v666_v61 = vadd.f32 %v1075_v55, %v578_v60  ;;  %v792_v62 = vpop.f32.mrb[24].mxu0 }
 0x126   :  { %v793_v63 = vpop.f32.mrb[25].mxu0 }
 0x127   :  { %682 = vst [vmem:[%s1144_s3 + $0x58] sm:$0xff] %v666_v61  ;;  %v794_v0 = vadd.f32 %v793_v63, %v792_v62  ;;  %v795_v1 = vpop.f32.mrb[26].mxu0 }
 0x128   :  { %v796_v2 = vpop.f32.mrb[27].mxu0 }
 0x129   :  { %v797_v3 = vadd.f32 %v796_v2, %v795_v1  ;;  %v583_v4 = vadd.f32 %v794_v0, %v582_v33 }
 0x12b   :  { %v667_v5 = vadd.f32 %v1075_v55, %v583_v4  ;;  %v586_v6 = vadd.f32 %v797_v3, %v585_v37 }
 0x12d   :  { %683 = vst [vmem:[%s1144_s3 + $0x60] sm:$0xff] %v667_v5  ;;  %v668_v7 = vadd.f32 %v1075_v55, %v586_v6  ;;  %v798_v8 = vpop.f32.mrb[28].mxu0 }
 0x12e   :  { %v799_v9 = vpop.f32.mrb[29].mxu0 }
 0x12f   :  { %684 = vst [vmem:[%s1144_s3 + $0x68] sm:$0xff] %v668_v7  ;;  %v800_v10 = vadd.f32 %v799_v9, %v798_v8  ;;  %v801_v11 = vpop.f32.mrb[30].mxu0 }
 0x130   :  { %v802_v12 = vpop.f32.mrb[31].mxu0 }
 0x131   :  { %v591_v13 = vadd.f32 %v850_v31, %v800_v10  ;;  %v803_v14 = vadd.f32 %v802_v12, %v801_v11 }
 0x133   :  { %v669_v15 = vadd.f32 %v1075_v55, %v591_v13  ;;  %v594_v16 = vadd.f32 %v851_v36, %v803_v14 }
 0x135   :  { %685 = vst [vmem:[%s1144_s3 + $0x70] sm:$0xff] %v669_v15  ;;  %v670_v17 = vadd.f32 %v1075_v55, %v594_v16 }
 0x137   :  { %686 = vst [vmem:[%s1144_s3 + $0x78] sm:$0xff] %v670_v17 }

// kernel: _lambda_.62
= control target key start
LH: loop header
LB: loop body
LE: loop exit
PB: predicated region body
PF: predicated region fallthrough
CT: control target
= control target key end

     0   :  { %s427_s9 = smov 0   ;;  %s429_s10 = smov 0   ;;  %s490_s0 = inlined_call_operand.vmem [shape: f32[2,64,64], index: 0, kind: input, shape index: {}]   ;;  %s491_s1 = inlined_call_operand.vmem [shape: f32[2,1,64], index: 1, kind: output, shape index: {0}]   ;;  %s492_s2 = inlined_call_operand.vmem [shape: f32[2,1,64], index: 2, kind: output, shape index: {1}]  }
   0x1   :  { %s431_s11 = smov 0  }
   0x2 LB: > { %s25_s12 = sadd.s32 1, %s405_s10  ;;  %p354_p0 = scmp.ge.s32.totalorder %s409_s11, 1  ;;  %s409_s11 = sphi %s431_s11, %s13_s11   ;;  %s405_s10 = sphi %s429_s10, %s494_s10   ;;  %s401_s9 = sphi %s427_s9, %s493_s9  }
   0x3   : > { %p27_p1 = scmp.ge.s32.totalorder %s25_s12, 2  ;;  %p134_p2 = scmp.lt.s32.totalorder %s409_s11, 3 }
   0x5   : > { %s496_s12 = smov (%p27_p1, %s25_s12), 0  ;;  %p135_p3 = pnand %p354_p0, %p134_p2 }
   0x6   : > { %vm181_vm0 = vcmask (!%p135_p3), 516096   ;;  %p162_p4 = scmp.lt.s32.totalorder (!%p135_p3), %s401_s9, 1  ;;  %v411_v0 = vmov (!%p135_p3), 0.0   ;;  %vm193_vm1 = vcmask (!%p135_p3), 523264  }
   0x7   : > { %138 = sbr.rel (%p135_p3) target bundleno = 78 (0x4e), region = 24  ;;  %182 = vst.msk [vmem:[#allocation2] sm:$0x1] (!%p135_p3), %vm181_vm0, %v411_v0  ;;  %183 = vst.msk [vmem:[#allocation3] sm:$0x1] (!%p135_p3), %vm181_vm0, %v411_v0 }
   0xe   : > { %s498_s9 = smov (!%p162_p4, %s401_s9), 1  ;;  %v192_v55 = vld [vmem:[#allocation2] sm:$0x1]  ;;  %v218_v60 = vld [vmem:[#allocation3] sm:$0x1] }
   0xf   : > { %s359_s13 = sshll.u32 %s498_s9, 6  ;;  %s173_s19 = scalar_lea.vmem %s491_s1, %s498_s9 }
  0x10   : > { %s169_s16 = scalar_lea.vmem %s490_s0, %s359_s13  ;;  %s176_s22 = scalar_lea.vmem %s492_s2, %s498_s9 }
  0x11   : > { %v184_v1 = vld [vmem:[%s169_s16] sm:$0xff]  ;;  %v185_v2 = vld [vmem:[%s169_s16 + $0x8] sm:$0xff]  ;;  %v186_v3 = vld [vmem:[%s169_s16 + $0x10] sm:$0xff] }
  0x12   : > { %v187_v4 = vld [vmem:[%s169_s16 + $0x18] sm:$0xff]  ;;  %v194_v5 = vsel %vm193_vm1, %v184_v1, 0.0  ;;  %v195_v6 = vsel %vm193_vm1, %v185_v2, 0.0  ;;  %v197_v7 = vsel %vm193_vm1, %v186_v3, 0.0  ;;  %v219_v8 = vmul.f32 %v184_v1, %v184_v1  ;;  %v188_v9 = vld [vmem:[%s169_s16 + $0x20] sm:$0xff]  ;;  %v189_v14 = vld [vmem:[%s169_s16 + $0x28] sm:$0xff] }
  0x13   : > { %v196_v10 = vadd.f32 %v195_v6, %v194_v5  ;;  %v220_v11 = vmul.f32 %v185_v2, %v185_v2  ;;  %v199_v12 = vsel %vm193_vm1, %v187_v4, 0.0  ;;  %v221_v13 = vmul.f32 %v186_v3, %v186_v3  ;;  %v190_v21 = vld [vmem:[%s169_s16 + $0x30] sm:$0xff]  ;;  %v191_v28 = vld [vmem:[%s169_s16 + $0x38] sm:$0xff] }
  0x14   : > { %v222_v16 = vmul.f32 %v187_v4, %v187_v4  ;;  %v201_v17 = vsel %vm193_vm1, %v188_v9, 0.0  ;;  %v223_v18 = vmul.f32 %v188_v9, %v188_v9  ;;  %v227_v19 = vsel %vm193_vm1, %v219_v8, 0.0 }
  0x15   : > { %v198_v15 = vadd.f32 %v197_v7, %v196_v10  ;;  %v228_v20 = vsel %vm193_vm1, %v220_v11, 0.0  ;;  %v230_v24 = vsel %vm193_vm1, %v221_v13, 0.0  ;;  %v203_v25 = vsel %vm193_vm1, %v189_v14, 0.0 }
  0x16   : > { %v229_v23 = vadd.f32 %v228_v20, %v227_v19  ;;  %v224_v26 = vmul.f32 %v189_v14, %v189_v14  ;;  %v232_v27 = vsel %vm193_vm1, %v222_v16, 0.0  ;;  %v205_v31 = vsel %vm193_vm1, %v190_v21, 0.0 }
  0x17   : > { %v200_v22 = vadd.f32 %v199_v12, %v198_v15  ;;  %v225_v32 = vmul.f32 %v190_v21, %v190_v21  ;;  %v234_v33 = vsel %vm193_vm1, %v223_v18, 0.0  ;;  %v207_v36 = vsel %vm193_vm1, %v191_v28, 0.0 }
  0x18   : > { %v231_v30 = vadd.f32 %v230_v24, %v229_v23  ;;  %v226_v37 = vmul.f32 %v191_v28, %v191_v28  ;;  %v236_v38 = vsel %vm193_vm1, %v224_v26, 0.0 }
  0x19   : > { %v202_v29 = vadd.f32 %v201_v17, %v200_v22  ;;  %v238_v41 = vsel %vm193_vm1, %v225_v32, 0.0 }
  0x1a   : > { %v233_v35 = vadd.f32 %v232_v27, %v231_v30  ;;  %v240_v44 = vsel %vm193_vm1, %v226_v37, 0.0 }
  0x1b   : > { %v204_v34 = vadd.f32 %v203_v25, %v202_v29 }
  0x1c   : > { %v235_v40 = vadd.f32 %v234_v33, %v233_v35 }
  0x1d   : > { %v206_v39 = vadd.f32 %v205_v31, %v204_v34 }
  0x1e   : > { %v237_v43 = vadd.f32 %v236_v38, %v235_v40 }
  0x1f   : > { %v208_v42 = vadd.f32 %v207_v36, %v206_v39 }
  0x20   : > { %v239_v46 = vadd.f32 %v238_v41, %v237_v43 }
  0x21   : > { %v209_v45 = vrot.slane %v208_v42, 4 }
  0x22   : > { %v241_v48 = vadd.f32 %v240_v44, %v239_v46 }
  0x23   : > { %v210_v47 = vadd.f32 %v209_v45, %v208_v42 }
  0x24   : > { %v242_v50 = vrot.slane %v241_v48, 4 }
  0x25   : > { %v211_v49 = vrot.slane %v210_v47, 2 }
  0x26   : > { %v243_v52 = vadd.f32 %v242_v50, %v241_v48 }
  0x27   : > { %v212_v51 = vadd.f32 %v211_v49, %v210_v47 }
  0x28   : > { %v244_v54 = vrot.slane %v243_v52, 2 }
  0x29   : > { %v213_v53 = vrot.slane %v212_v51, 1 }
  0x2a   : > { %v245_v57 = vadd.f32 %v244_v54, %v243_v52 }
  0x2b   : > { %v214_v56 = vadd.f32 %v213_v53, %v212_v51 }
  0x2c   : > { %v246_v59 = vrot.slane %v245_v57, 1 }
  0x2d   : > { %v215_v58 = vadd.f32 %v214_v56, %v192_v55 }
  0x2e   : > { %v247_v61 = vadd.f32 %v246_v59, %v245_v57 }
  0x2f   : > { %217 = vst.msk [vmem:[#allocation2] sm:$0x1] %vm181_vm0, %v215_v58 }
  0x30   : > { %v248_v62 = vadd.f32 %v247_v61, %v218_v60 }
  0x32   : > { %249 = vst.msk [vmem:[#allocation3] sm:$0x1] %vm181_vm0, %v248_v62 }
  0x36   : > { %v253_v63 = vld [vmem:[#allocation2] sm:$0x1] }
  0x37   : > { %v254_v0 = vmul.f32 0.015625, %v253_v63 }
  0x39   : > { %v257_v1 = vmul.f32 %v254_v0, %v254_v0  ;;  %260 = vst.msk [vmem:[%s173_s19] sm:$0x1] %vm181_vm0, %v254_v0  ;;  %v255_v2 = vld [vmem:[#allocation3] sm:$0x1] }
  0x3a   : > { %v256_v3 = vmul.f32 0.015625, %v255_v2 }
  0x3c   : > { %v258_v4 = vsub.f32 %v256_v3, %v257_v1 }
  0x3e   : > { %v259_v5 = vmax.f32 %v258_v4, 0.0 }
  0x40   : > { %v261_v6 = vadd.f32 1e-05, %v259_v5 }
  0x42   : > { %385 = vrsqrt.f32 %v261_v6 }
  0x4c   : > { %v386_v7 = vpop.eup %385 }
  0x4d   : > { %263 = vst.msk [vmem:[%s176_s22] sm:$0x1] %vm181_vm0, %v386_v7 }
  0x4e PF: > { %s13_s11 = sadd.s32 1, %s409_s11   ;;  %s493_s9 = smov %s405_s10 }
  0x4f   : > { %p10_p5 = scmp.ge.s32.totalorder %s13_s11, 4   ;;  %s494_s10 = smov %s496_s12 }
  0x51   :  { %12 = sbr.rel (!%p10_p5) target bundleno = 2 (0x2), region = 74 }

// kernel: _lambda_.63
= control target key start
LH: loop header
LB: loop body
LE: loop exit
PB: predicated region body
PF: predicated region fallthrough
CT: control target
= control target key end

     0   :  { %s562_s18 = smov 0   ;;  %s564_s19 = smov 0   ;;  %s624_s0 = inlined_call_operand.vmem [shape: f32[2,64,64], index: 0, kind: input, shape index: {}]   ;;  %s625_s1 = inlined_call_operand.vmem [shape: f32[2,1,64], index: 1, kind: input, shape index: {}]   ;;  %s626_s2 = inlined_call_operand.vmem [shape: f32[2,1,64], index: 2, kind: input, shape index: {}]   ;;  %s627_s3 = inlined_call_operand.vmem [shape: f32[1,1,64], index: 3, kind: input, shape index: {}]   ;;  %s628_s4 = inlined_call_operand.vmem [shape: f32[1,1,64], index: 4, kind: input, shape index: {}]   ;;  %s629_s5 = inlined_call_operand.vmem [shape: f32[2,64,64], index: 5, kind: output, shape index: {}]  }
   0x1   :  { %s566_s20 = smov 0  }
   0x2 LB: > { %s27_s21 = sadd.s32 1, %s526_s19  ;;  %p473_p0 = scmp.ge.s32.totalorder %s530_s20, 1  ;;  %s530_s20 = sphi %s566_s20, %s15_s20   ;;  %s526_s19 = sphi %s564_s19, %s631_s19   ;;  %s522_s18 = sphi %s562_s18, %s630_s18  }
   0x3   : > { %p29_p1 = scmp.ge.s32.totalorder %s27_s21, 2  ;;  %p224_p2 = scmp.lt.s32.totalorder %s530_s20, 3 }
   0x5   : > { %s633_s21 = smov (%p29_p1, %s27_s21), 0  ;;  %p225_p3 = pnand %p473_p0, %p224_p2 }
   0x6   : > { %p267_p4 = scmp.lt.s32.totalorder (!%p225_p3), %s522_s18, 1  ;;  %v319_v0 = vlaneseq (!%p225_p3)  ;;  %v316_v2 = vld [vmem:[%s627_s3] sm:$0x1] (!%p225_p3)  ;;  %vm355_vm0 = vcmask (!%p225_p3), 523264  }
   0x7   : > { %228 = sbr.rel (%p225_p3) target bundleno = 33 (0x21), region = 40  ;;  %v479_v24 = vld [vmem:[%s628_s4] ss:$0 sm:$0xff] (!%p225_p3) }
   0x8   : > { %v320_v1 = vshrl.u32 (!%p225_p3), %v319_v0, 7 }
   0xa   : > { %v321_v4 = vsub.s32 (!%p225_p3), 0, %v320_v1 }
   0xe   : > { %s635_s18 = smov (!%p267_p4, %s522_s18), 1 }
   0xf   : > { %s482_s22 = sshll.u32 %s635_s18, 6  ;;  %s278_s25 = scalar_lea.vmem %s625_s1, %s635_s18 }
  0x10   : > { %s274_s30 = scalar_lea.vmem %s624_s0, %s482_s22  ;;  %s281_s8 = scalar_lea.vmem %s626_s2, %s635_s18  ;;  %v478_v3 = vld [vmem:[%s278_s25] ss:$0 sm:$0xff] }
  0x11   : > { %v292_v5 = vld [vmem:[%s274_s30] sm:$0xff]  ;;  %v293_v7 = vld [vmem:[%s274_s30 + $0x8] sm:$0xff]  ;;  %v294_v11 = vld [vmem:[%s274_s30 + $0x10] sm:$0xff]  ;;  %s290_s13 = scalar_lea.vmem %s629_s5, %s482_s22 }
  0x12   : > { %v315_v6 = vld [vmem:[%s281_s8] sm:$0x1]  ;;  %v307_v8 = vsub.f32 %v292_v5, %v478_v3  ;;  %v308_v10 = vsub.f32 %v293_v7, %v478_v3  ;;  %v295_v12 = vld [vmem:[%s274_s30 + $0x18] sm:$0xff]  ;;  %v309_v14 = vsub.f32 %v294_v11, %v478_v3  ;;  %v297_v17 = vld [vmem:[%s274_s30 + $0x28] sm:$0xff] }
  0x13   : > { %v317_v9 = vmul.f32 %v316_v2, %v315_v6  ;;  %v296_v13 = vld [vmem:[%s274_s30 + $0x20] sm:$0xff]  ;;  %v310_v15 = vsub.f32 %v295_v12, %v478_v3  ;;  %v298_v18 = vld [vmem:[%s274_s30 + $0x30] sm:$0xff]  ;;  %v299_v19 = vld [vmem:[%s274_s30 + $0x38] sm:$0xff]  ;;  %v312_v21 = vsub.f32 %v297_v17, %v478_v3 }
  0x14   : > { %v311_v16 = vsub.f32 %v296_v13, %v478_v3  ;;  %v313_v22 = vsub.f32 %v298_v18, %v478_v3  ;;  %v314_v23 = vsub.f32 %v299_v19, %v478_v3 }
  0x15   : > { %v322_v20 = vrot.slane %v317_v9, %v321_v4 }
  0x17   : > { %v324_v25 = vmul.f32 %v322_v20, %v307_v8  ;;  %v325_v26 = vmul.f32 %v322_v20, %v308_v10  ;;  %v326_v27 = vmul.f32 %v322_v20, %v309_v14  ;;  %v327_v28 = vmul.f32 %v322_v20, %v310_v15 }
  0x18   : > { %v328_v29 = vmul.f32 %v322_v20, %v311_v16  ;;  %v329_v30 = vmul.f32 %v322_v20, %v312_v21  ;;  %v330_v31 = vmul.f32 %v322_v20, %v313_v22  ;;  %v331_v32 = vmul.f32 %v322_v20, %v314_v23 }
  0x19   : > { %v339_v33 = vadd.f32 %v479_v24, %v324_v25  ;;  %v340_v34 = vadd.f32 %v479_v24, %v325_v26  ;;  %v341_v35 = vadd.f32 %v479_v24, %v326_v27  ;;  %v342_v36 = vadd.f32 %v479_v24, %v327_v28 }
  0x1a   : > { %v343_v37 = vadd.f32 %v479_v24, %v328_v29  ;;  %v344_v38 = vadd.f32 %v479_v24, %v329_v30  ;;  %v345_v39 = vadd.f32 %v479_v24, %v330_v31  ;;  %v346_v40 = vadd.f32 %v479_v24, %v331_v32 }
  0x1b   : > { %v347_v41 = vmax.f32 %v339_v33, 0.0  ;;  %v348_v42 = vmax.f32 %v340_v34, 0.0  ;;  %v349_v43 = vmax.f32 %v341_v35, 0.0  ;;  %v350_v44 = vmax.f32 %v342_v36, 0.0 }
  0x1c   : > { %v351_v45 = vmax.f32 %v343_v37, 0.0  ;;  %v352_v46 = vmax.f32 %v344_v38, 0.0  ;;  %v353_v47 = vmax.f32 %v345_v39, 0.0  ;;  %v354_v48 = vmax.f32 %v346_v40, 0.0 }
  0x1d   : > { %356 = vst.msk [vmem:[%s290_s13] sm:$0xff] %vm355_vm0, %v347_v41  ;;  %357 = vst.msk [vmem:[%s290_s13 + $0x8] sm:$0xff] %vm355_vm0, %v348_v42 }
  0x1e   : > { %358 = vst.msk [vmem:[%s290_s13 + $0x10] sm:$0xff] %vm355_vm0, %v349_v43  ;;  %359 = vst.msk [vmem:[%s290_s13 + $0x18] sm:$0xff] %vm355_vm0, %v350_v44 }
  0x1f   : > { %360 = vst.msk [vmem:[%s290_s13 + $0x20] sm:$0xff] %vm355_vm0, %v351_v45  ;;  %361 = vst.msk [vmem:[%s290_s13 + $0x28] sm:$0xff] %vm355_vm0, %v352_v46 }
  0x20   : > { %362 = vst.msk [vmem:[%s290_s13 + $0x30] sm:$0xff] %vm355_vm0, %v353_v47  ;;  %363 = vst.msk [vmem:[%s290_s13 + $0x38] sm:$0xff] %vm355_vm0, %v354_v48 }
  0x21 PF: > { %s15_s20 = sadd.s32 1, %s530_s20   ;;  %s630_s18 = smov %s526_s19 }
  0x22   : > { %p12_p5 = scmp.ge.s32.totalorder %s15_s20, 4   ;;  %s631_s19 = smov %s633_s21 }
  0x24   :  { %14 = sbr.rel (!%p12_p5) target bundleno = 2 (0x2), region = 76 }

// kernel: _lambda_.64
= control target key start
LH: loop header
LB: loop body
LE: loop exit
PB: predicated region body
PF: predicated region fallthrough
CT: control target
= control target key end

     0   :  { %s968_s1 = inlined_call_operand.vmem [shape: bf16[640,128], index: 1, kind: input, shape index: {}]   ;;  %s969_s0 = inlined_call_operand.vmem [shape: bf16[32,640], index: 0, kind: input, shape index: {}]   ;;  %s970_s2 = inlined_call_operand.vmem [shape: f32[1,128], index: 2, kind: input, shape index: {}]   ;;  %s971_s3 = inlined_call_operand.vmem [shape: f32[32,128], index: 3, kind: output, shape index: {}]  }
   0x1   :  { %v729_v0 = vld [vmem:[%s968_s1 + $0x40] sm:$0xff]   ;;  %v733_v4 = vld [vmem:[%s968_s1 + $0x48] sm:$0xff]   ;;  %v737_v8 = vld [vmem:[%s968_s1 + $0x50] sm:$0xff]  }
   0x2   :  { %v730_v1 = vld [vmem:[%s968_s1 + $0xc0] sm:$0xff]   ;;  %643 = vmatprep.subr.bf16.mxu0 %v729_v0  ;;  %v734_v5 = vld [vmem:[%s968_s1 + $0xc8] sm:$0xff]   ;;  %v738_v9 = vld [vmem:[%s968_s1 + $0xd0] sm:$0xff]  }
   0x3   :  { %v731_v2 = vld [vmem:[%s968_s1] sm:$0xff]   ;;  %671 = vmatprep.subr.bf16.mxu1 %v730_v1  ;;  %v735_v6 = vld [vmem:[%s968_s1 + $0x8] sm:$0xff]   ;;  %v739_v10 = vld [vmem:[%s968_s1 + $0x10] sm:$0xff]  }
   0x4   :  { %v732_v3 = vld [vmem:[%s968_s1 + $0x80] sm:$0xff]   ;;  %644 = vmatpush3.bf16.msra.mxu0 %v731_v2  ;;  %v736_v7 = vld [vmem:[%s968_s1 + $0x88] sm:$0xff]   ;;  %v740_v11 = vld [vmem:[%s968_s1 + $0x90] sm:$0xff]  }
   0x5   :  { %672 = vmatpush3.bf16.msra.mxu1 %v732_v3  ;;  %645 = vmatprep.subr.bf16.mxu0 %v733_v4  ;;  %v741_v12 = vld [vmem:[%s968_s1 + $0x58] sm:$0xff]   ;;  %v745_v16 = vld [vmem:[%s968_s1 + $0x60] sm:$0xff]   ;;  %v749_v20 = vld [vmem:[%s968_s1 + $0x68] sm:$0xff]  }
   0x6   :  { %673 = vmatprep.subr.bf16.mxu1 %v734_v5  ;;  %v742_v13 = vld [vmem:[%s968_s1 + $0xd8] sm:$0xff]   ;;  %v746_v17 = vld [vmem:[%s968_s1 + $0xe0] sm:$0xff]   ;;  %v750_v21 = vld [vmem:[%s968_s1 + $0xe8] sm:$0xff]  }
   0x7   :  { %v743_v14 = vld [vmem:[%s968_s1 + $0x18] sm:$0xff]   ;;  %v747_v18 = vld [vmem:[%s968_s1 + $0x20] sm:$0xff]   ;;  %v751_v22 = vld [vmem:[%s968_s1 + $0x28] sm:$0xff]  }
   0x8   :  { %646 = vmatpush3.bf16.msra.mxu0 %v735_v6  ;;  %v744_v15 = vld [vmem:[%s968_s1 + $0x98] sm:$0xff]   ;;  %v748_v19 = vld [vmem:[%s968_s1 + $0xa0] sm:$0xff]   ;;  %v752_v23 = vld [vmem:[%s968_s1 + $0xa8] sm:$0xff]  }
   0x9   :  { %674 = vmatpush3.bf16.msra.mxu1 %v736_v7  ;;  %647 = vmatprep.subr.bf16.mxu0 %v737_v8  ;;  %v753_v24 = vld [vmem:[%s968_s1 + $0x70] sm:$0xff]   ;;  %v757_v28 = vld [vmem:[%s968_s1 + $0x78] sm:$0xff]   ;;  %v766_v35 = vld [vmem:[%s969_s0 + $0xc] ss:$20 sps:$4 sm:$0xff]  }
   0xa   :  { %675 = vmatprep.subr.bf16.mxu1 %v738_v9  ;;  %v754_v25 = vld [vmem:[%s968_s1 + $0xf0] sm:$0xff]   ;;  %v758_v29 = vld [vmem:[%s968_s1 + $0xf8] sm:$0xff]   ;;  %v767_v36 = vld [vmem:[%s968_s1 + $0x100] sm:$0xff]   ;;  %492 = vmatprep.mubr.bf16.mxu1 %v766_v35 }
   0xb   :  { %v755_v26 = vld [vmem:[%s968_s1 + $0x30] sm:$0xff]   ;;  %v759_v30 = vld [vmem:[%s968_s1 + $0x38] sm:$0xff]   ;;  %v768_v37 = vld [vmem:[%s968_s1 + $0x108] sm:$0xff]  }
   0xc   :  { %648 = vmatpush3.bf16.msra.mxu0 %v739_v10  ;;  %v756_v27 = vld [vmem:[%s968_s1 + $0xb0] sm:$0xff]   ;;  %v760_v31 = vld [vmem:[%s968_s1 + $0xb8] sm:$0xff]   ;;  %v772_v39 = vld [vmem:[%s969_s0 + $0x2c] ss:$20 sps:$4 sm:$0xff]  }
   0xd   :  { %676 = vmatpush3.bf16.msra.mxu1 %v740_v11  ;;  %649 = vmatprep.subr.bf16.mxu0 %v741_v12  ;;  %v761_v32 = vld [vmem:[%s969_s0] ss:$20 sps:$4 sm:$0xff]   ;;  %v763_v33 = vld [vmem:[%s969_s0 + $0x4] ss:$20 sps:$4 sm:$0xff]   ;;  %v764_v34 = vld [vmem:[%s969_s0 + $0x8] ss:$20 sps:$4 sm:$0xff]  }
   0xe   :  { %677 = vmatprep.subr.bf16.mxu1 %v742_v13  ;;  %443 = vmatprep.mubr.bf16.mxu0 %v763_v33  ;;  %v769_v38 = vld [vmem:[%s968_s1 + $0x110] sm:$0xff]   ;;  %v770_v41 = vld [vmem:[%s968_s1 + $0x118] sm:$0xff]   ;;  %v771_v45 = vld [vmem:[%s968_s1 + $0x120] sm:$0xff]  }
   0xf   :  { %v774_v40 = vld [vmem:[%s969_s0 + $0x34] ss:$20 sps:$4 sm:$0xff]   ;;  %v778_v43 = vld [vmem:[%s969_s0 + $0x30] ss:$20 sps:$4 sm:$0xff]   ;;  %v780_v48 = vld [vmem:[%s968_s1 + $0x138] sm:$0xff]  }
  0x10   :  { %650 = vmatpush3.bf16.msra.mxu0 %v743_v14  ;;  %v777_v42 = vld [vmem:[%s969_s0 + $0x28] ss:$20 sps:$4 sm:$0xff]   ;;  %v781_v44 = vld [vmem:[%s969_s0 + $0x10] ss:$20 sps:$4 sm:$0xff]   ;;  %v782_v49 = vld [vmem:[%s969_s0 + $0x38] ss:$20 sps:$4 sm:$0xff]  }
  0x11   :  { %678 = vmatpush3.bf16.msra.mxu1 %v744_v15  ;;  %651 = vmatprep.subr.bf16.mxu0 %v745_v16  ;;  %v776_v46 = vld [vmem:[%s968_s1 + $0x128] sm:$0xff]   ;;  %v779_v47 = vld [vmem:[%s968_s1 + $0x130] sm:$0xff]   ;;  %v642_v15 = vld [vmem:[%s970_s2] ss:$0 sm:$0xff] }
  0x12   :  { %679 = vmatprep.subr.bf16.mxu1 %v746_v17 }
  0x14   :  { %652 = vmatpush3.bf16.msra.mxu0 %v747_v18 }
  0x15   :  { %680 = vmatpush3.bf16.msra.mxu1 %v748_v19  ;;  %653 = vmatprep.subr.bf16.mxu0 %v749_v20 }
  0x16   :  { %681 = vmatprep.subr.bf16.mxu1 %v750_v21 }
  0x18   :  { %654 = vmatpush3.bf16.msra.mxu0 %v751_v22 }
  0x19   :  { %682 = vmatpush3.bf16.msra.mxu1 %v752_v23  ;;  %655 = vmatprep.subr.bf16.mxu0 %v753_v24 }
  0x1a   :  { %683 = vmatprep.subr.bf16.mxu1 %v754_v25 }
  0x1c   :  { %656 = vmatpush3.bf16.msra.mxu0 %v755_v26 }
  0x1d   :  { %684 = vmatpush3.bf16.msra.mxu1 %v756_v27  ;;  %657 = vmatprep.subr.bf16.mxu0 %v757_v28 }
  0x1e   :  { %685 = vmatprep.subr.bf16.mxu1 %v758_v29 }
  0x20   :  { %658 = vmatpush3.bf16.msra.mxu0 %v759_v30 }
  0x21   :  { %686 = vmatpush3.bf16.msra.mxu1 %v760_v31  ;;  %709 = vmatprep.subr.bf16.mxu0 %v767_v36 }
  0x23   :  { %444 = vmatmul.mubr.bf16.vlgmr.msra.gmra.mrb[0].mxu0 %v761_v32 }
  0x24   :  { %493 = vmatmul.mubr.bf16.vlgmr.msra.gmra.mrb[0].mxu1 %v764_v34  ;;  %710 = vmatpush3.bf16.msra.mxu0 %v767_v36 }
  0x25   :  { %711 = vmatprep.subr.bf16.mxu0 %v768_v37  ;;  %451 = vmatprep.mubr.bf16.mxu0 %v772_v39 }
  0x26   :  { %500 = vmatprep.mubr.bf16.mxu1 %v774_v40 }
  0x28   :  { %712 = vmatpush3.bf16.msra.mxu0 %v768_v37 }
  0x29   :  { %713 = vmatprep.subr.bf16.mxu0 %v769_v38 }
  0x2b   :  { %452 = vmatmul.mubr.bf16.gmra.mrb[4].mxu0 %v777_v42 }
  0x2c   :  { %501 = vmatmul.mubr.bf16.gmra.mrb[4].mxu1 %v778_v43  ;;  %714 = vmatpush3.bf16.msra.mxu0 %v769_v38 }
  0x2d   :  { %715 = vmatprep.subr.bf16.mxu0 %v770_v41  ;;  %725 = vmatprep.mubr.bf16.mxu0 %v781_v44 }
  0x30   :  { %716 = vmatpush3.bf16.msra.mxu0 %v770_v41 }
  0x31   :  { %717 = vmatprep.subr.bf16.mxu0 %v771_v45 }
  0x34   :  { %718 = vmatpush3.bf16.msra.mxu0 %v771_v45 }
  0x35   :  { %719 = vmatprep.subr.bf16.mxu0 %v776_v46 }
  0x38   :  { %720 = vmatpush3.bf16.msra.mxu0 %v776_v46 }
  0x39   :  { %721 = vmatprep.subr.bf16.mxu0 %v779_v47 }
  0x3c   :  { %722 = vmatpush3.bf16.msra.mxu0 %v779_v47 }
  0x3d   :  { %723 = vmatprep.subr.bf16.mxu0 %v780_v48 }
  0x40   :  { %724 = vmatpush3.bf16.msra.mxu0 %v780_v48 }
  0x43   :  { %726 = vmatmul.mubr.bf16.vlgmr.msra.gmra.mrb[8].mxu0 %v782_v49 }
  0xf6   :  { %v659_v50 = vpop.f32.mrb[0].mxu0 }
  0xf7   :  { %v687_v51 = vpop.f32.mrb[0].mxu1  ;;  %v660_v52 = vpop.f32.mrb[1].mxu0 }
  0xf8   :  { %v661_v53 = vadd.f32 %v660_v52, %v659_v50  ;;  %v688_v54 = vpop.f32.mrb[1].mxu1  ;;  %v662_v55 = vpop.f32.mrb[2].mxu0 }
  0xf9   :  { %v689_v56 = vadd.f32 %v688_v54, %v687_v51  ;;  %v690_v57 = vpop.f32.mrb[2].mxu1  ;;  %v663_v58 = vpop.f32.mrb[3].mxu0 }
  0xfa   :  { %v664_v59 = vadd.f32 %v663_v58, %v662_v55  ;;  %v691_v60 = vpop.f32.mrb[3].mxu1 }
  0xfb   :  { %v692_v61 = vadd.f32 %v691_v60, %v690_v57  ;;  %v495_v62 = vadd.f32 %v689_v56, %v661_v53 }
  0xfd   :  { %v498_v63 = vadd.f32 %v692_v61, %v664_v59 }
  0xfe   :  { %v665_v0 = vpop.f32.mrb[4].mxu0 }
  0xff   :  { %v693_v1 = vpop.f32.mrb[4].mxu1  ;;  %v666_v2 = vpop.f32.mrb[5].mxu0 }
 0x100   :  { %v667_v3 = vadd.f32 %v666_v2, %v665_v0  ;;  %v694_v4 = vpop.f32.mrb[5].mxu1  ;;  %v668_v5 = vpop.f32.mrb[6].mxu0 }
 0x101   :  { %v695_v6 = vadd.f32 %v694_v4, %v693_v1  ;;  %v696_v7 = vpop.f32.mrb[6].mxu1  ;;  %v669_v8 = vpop.f32.mrb[7].mxu0 }
 0x102   :  { %v670_v9 = vadd.f32 %v669_v8, %v668_v5  ;;  %v697_v10 = vpop.f32.mrb[7].mxu1 }
 0x103   :  { %v698_v11 = vadd.f32 %v697_v10, %v696_v7  ;;  %v503_v12 = vadd.f32 %v695_v6, %v667_v3 }
 0x105   :  { %v506_v13 = vadd.f32 %v698_v11, %v670_v9 }
 0x116   :  { %v727_v14 = vpop.f32.mrb[8].mxu0 }
 0x117   :  { %v552_v16 = vadd.f32 %v727_v14, %v503_v12  ;;  %v543_v17 = vpop.f32.mrb[9].mxu0 }
 0x118   :  { %v544_v18 = vadd.f32 %v543_v17, %v495_v62  ;;  %v728_v19 = vpop.f32.mrb[10].mxu0 }
 0x119   :  { %v582_v20 = vadd.f32 %v642_v15, %v552_v16  ;;  %v555_v21 = vadd.f32 %v728_v19, %v506_v13  ;;  %v546_v22 = vpop.f32.mrb[11].mxu0 }
 0x11a   :  { %v580_v23 = vadd.f32 %v642_v15, %v544_v18  ;;  %v547_v24 = vadd.f32 %v546_v22, %v498_v63 }
 0x11b   :  { %586 = vst [vmem:[%s971_s3 + $0x10] sm:$0xff] %v582_v20  ;;  %v583_v25 = vadd.f32 %v642_v15, %v555_v21 }
 0x11c   :  { %584 = vst [vmem:[%s971_s3] sm:$0xff] %v580_v23  ;;  %v581_v26 = vadd.f32 %v642_v15, %v547_v24 }
 0x11d   :  { %587 = vst [vmem:[%s971_s3 + $0x18] sm:$0xff] %v583_v25 }
 0x11e   :  { %585 = vst [vmem:[%s971_s3 + $0x8] sm:$0xff] %v581_v26 }

// kernel: _lambda_.65
= control target key start
LH: loop header
LB: loop body
LE: loop exit
PB: predicated region body
PF: predicated region fallthrough
CT: control target
= control target key end

     0   :  { %s384_s9 = smov 0   ;;  %s386_s10 = smov 0   ;;  %s425_s0 = inlined_call_operand.vmem [shape: f32[2,16,128], index: 0, kind: input, shape index: {}]   ;;  %s426_s1 = inlined_call_operand.vmem [shape: f32[2,1,128], index: 1, kind: output, shape index: {0}]   ;;  %s427_s2 = inlined_call_operand.vmem [shape: f32[2,1,128], index: 2, kind: output, shape index: {1}]  }
   0x1   :  { %s388_s11 = smov 0  }
   0x2 LB: > { %s25_s12 = sadd.s32 1, %s362_s10  ;;  %p311_p0 = scmp.ge.s32.totalorder %s366_s11, 1  ;;  %s366_s11 = sphi %s388_s11, %s13_s11   ;;  %s362_s10 = sphi %s386_s10, %s429_s10   ;;  %s358_s9 = sphi %s384_s9, %s428_s9  }
   0x3   : > { %p27_p1 = scmp.ge.s32.totalorder %s25_s12, 2  ;;  %p134_p2 = scmp.lt.s32.totalorder %s366_s11, 3 }
   0x5   : > { %s431_s12 = smov (%p27_p1, %s25_s12), 0  ;;  %p135_p3 = pnand %p311_p0, %p134_p2 }
   0x6   : > { %p162_p4 = scmp.lt.s32.totalorder (!%p135_p3), %s358_s9, 1  ;;  %v368_v0 = vmov (!%p135_p3), 0.0  }
   0x7   : > { %138 = sbr.rel (%p135_p3) target bundleno = 64 (0x40), region = 24  ;;  %181 = vst [vmem:[#allocation2] sm:$0x1] (!%p135_p3), %v368_v0  ;;  %182 = vst [vmem:[#allocation3] sm:$0x1] (!%p135_p3), %v368_v0 }
   0xe   : > { %s433_s9 = smov (!%p162_p4, %s358_s9), 1  ;;  %v185_v16 = vld [vmem:[#allocation2] sm:$0x1]  ;;  %v195_v19 = vld [vmem:[#allocation3] sm:$0x1] }
   0xf   : > { %s316_s13 = sshll.u32 %s433_s9, 4  ;;  %s173_s19 = scalar_lea.vmem %s426_s1, %s433_s9 }
  0x10   : > { %s169_s16 = scalar_lea.vmem %s425_s0, %s316_s13  ;;  %s176_s22 = scalar_lea.vmem %s427_s2, %s433_s9 }
  0x11   : > { %v183_v1 = vld [vmem:[%s169_s16] sm:$0xff]  ;;  %v184_v2 = vld [vmem:[%s169_s16 + $0x8] sm:$0xff] }
  0x12   : > { %v186_v3 = vadd.f32 %v184_v2, %v183_v1  ;;  %v196_v4 = vmul.f32 %v183_v1, %v183_v1  ;;  %v197_v5 = vmul.f32 %v184_v2, %v184_v2 }
  0x14   : > { %v187_v6 = vrot.slane %v186_v3, 4  ;;  %v198_v7 = vadd.f32 %v197_v5, %v196_v4 }
  0x16   : > { %v188_v8 = vadd.f32 %v187_v6, %v186_v3  ;;  %v199_v9 = vrot.slane %v198_v7, 4 }
  0x18   : > { %v189_v10 = vrot.slane %v188_v8, 2  ;;  %v200_v11 = vadd.f32 %v199_v9, %v198_v7 }
  0x1a   : > { %v190_v12 = vadd.f32 %v189_v10, %v188_v8  ;;  %v201_v13 = vrot.slane %v200_v11, 2 }
  0x1c   : > { %v191_v14 = vrot.slane %v190_v12, 1  ;;  %v202_v15 = vadd.f32 %v201_v13, %v200_v11 }
  0x1e   : > { %v192_v17 = vadd.f32 %v191_v14, %v190_v12  ;;  %v203_v18 = vrot.slane %v202_v15, 1 }
  0x20   : > { %v193_v20 = vadd.f32 %v192_v17, %v185_v16  ;;  %v204_v21 = vadd.f32 %v203_v18, %v202_v15 }
  0x22   : > { %194 = vst [vmem:[#allocation2] sm:$0x1] %v193_v20  ;;  %v205_v22 = vadd.f32 %v204_v21, %v195_v19 }
  0x24   : > { %206 = vst [vmem:[#allocation3] sm:$0x1] %v205_v22 }
  0x29   : > { %v210_v23 = vld [vmem:[#allocation2] sm:$0x1] }
  0x2a   : > { %v211_v24 = vmul.f32 0.0625, %v210_v23 }
  0x2b   : > { %v212_v25 = vld [vmem:[#allocation3] sm:$0x1] }
  0x2c   : > { %v213_v26 = vmul.f32 0.0625, %v212_v25  ;;  %v214_v27 = vmul.f32 %v211_v24, %v211_v24  ;;  %217 = vst [vmem:[%s173_s19] sm:$0x1] %v211_v24 }
  0x2e   : > { %v215_v28 = vsub.f32 %v213_v26, %v214_v27 }
  0x30   : > { %v216_v29 = vmax.f32 %v215_v28, 0.0 }
  0x32   : > { %v218_v30 = vadd.f32 1e-05, %v216_v29 }
  0x34   : > { %342 = vrsqrt.f32 %v218_v30 }
  0x3e   : > { %v343_v31 = vpop.eup %342 }
  0x3f   : > { %220 = vst [vmem:[%s176_s22] sm:$0x1] %v343_v31 }
  0x40 PF: > { %s13_s11 = sadd.s32 1, %s366_s11   ;;  %s428_s9 = smov %s362_s10 }
  0x41   : > { %p10_p5 = scmp.ge.s32.totalorder %s13_s11, 4   ;;  %s429_s10 = smov %s431_s12 }
  0x43   :  { %12 = sbr.rel (!%p10_p5) target bundleno = 2 (0x2), region = 74 }

// kernel: _lambda_.66
= control target key start
LH: loop header
LB: loop body
LE: loop exit
PB: predicated region body
PF: predicated region fallthrough
CT: control target
= control target key end

     0   :  { %s525_s18 = smov 0   ;;  %s527_s19 = smov 0   ;;  %s570_s0 = inlined_call_operand.vmem [shape: f32[2,16,128], index: 0, kind: input, shape index: {}]   ;;  %s571_s1 = inlined_call_operand.vmem [shape: f32[2,1,128], index: 1, kind: input, shape index: {}]   ;;  %s572_s2 = inlined_call_operand.vmem [shape: f32[2,1,128], index: 2, kind: input, shape index: {}]   ;;  %s573_s3 = inlined_call_operand.vmem [shape: f32[1,1,128], index: 3, kind: input, shape index: {}]   ;;  %s574_s4 = inlined_call_operand.vmem [shape: f32[1,1,128], index: 4, kind: input, shape index: {}]   ;;  %s575_s5 = inlined_call_operand.vmem [shape: f32[2,16,128], index: 5, kind: output, shape index: {}]  }
   0x1   :  { %s529_s20 = smov 0  }
   0x2 LB: > { %s27_s21 = sadd.s32 1, %s489_s19  ;;  %p436_p0 = scmp.ge.s32.totalorder %s493_s20, 1  ;;  %s493_s20 = sphi %s529_s20, %s15_s20   ;;  %s489_s19 = sphi %s527_s19, %s577_s19   ;;  %s485_s18 = sphi %s525_s18, %s576_s18  }
   0x3   : > { %p29_p1 = scmp.ge.s32.totalorder %s27_s21, 2  ;;  %p224_p2 = scmp.lt.s32.totalorder %s493_s20, 3 }
   0x5   : > { %s579_s21 = smov (%p29_p1, %s27_s21), 0  ;;  %p225_p3 = pnand %p436_p0, %p224_p2 }
   0x6   : > { %p267_p4 = scmp.lt.s32.totalorder (!%p225_p3), %s485_s18, 1  ;;  %v307_v0 = vlaneseq (!%p225_p3)  ;;  %v304_v2 = vld [vmem:[%s573_s3] sm:$0x1] (!%p225_p3) }
   0x7   : > { %228 = sbr.rel (%p225_p3) target bundleno = 30 (0x1e), region = 40  ;;  %v442_v12 = vld [vmem:[%s574_s4] ss:$0 sm:$0xff] (!%p225_p3) }
   0x8   : > { %v308_v1 = vshrl.u32 (!%p225_p3), %v307_v0, 7 }
   0xa   : > { %v309_v4 = vsub.s32 (!%p225_p3), 0, %v308_v1 }
   0xe   : > { %s581_s18 = smov (!%p267_p4, %s485_s18), 1 }
   0xf   : > { %s445_s22 = sshll.u32 %s581_s18, 4  ;;  %s278_s25 = scalar_lea.vmem %s571_s1, %s581_s18 }
  0x10   : > { %s274_s30 = scalar_lea.vmem %s570_s0, %s445_s22  ;;  %s281_s8 = scalar_lea.vmem %s572_s2, %s581_s18  ;;  %v441_v3 = vld [vmem:[%s278_s25] ss:$0 sm:$0xff] }
  0x11   : > { %v292_v5 = vld [vmem:[%s274_s30] sm:$0xff]  ;;  %v293_v6 = vld [vmem:[%s274_s30 + $0x8] sm:$0xff]  ;;  %s290_s13 = scalar_lea.vmem %s575_s5, %s445_s22 }
  0x12   : > { %v303_v7 = vld [vmem:[%s281_s8] sm:$0x1]  ;;  %v301_v8 = vsub.f32 %v292_v5, %v441_v3  ;;  %v302_v9 = vsub.f32 %v293_v6, %v441_v3 }
  0x13   : > { %v305_v10 = vmul.f32 %v304_v2, %v303_v7 }
  0x15   : > { %v310_v11 = vrot.slane %v305_v10, %v309_v4 }
  0x17   : > { %v312_v13 = vmul.f32 %v310_v11, %v301_v8  ;;  %v313_v14 = vmul.f32 %v310_v11, %v302_v9 }
  0x19   : > { %v321_v15 = vadd.f32 %v442_v12, %v312_v13  ;;  %v322_v16 = vadd.f32 %v442_v12, %v313_v14 }
  0x1b   : > { %v323_v17 = vmax.f32 %v321_v15, 0.0  ;;  %v324_v18 = vmax.f32 %v322_v16, 0.0 }
  0x1d   : > { %325 = vst [vmem:[%s290_s13] sm:$0xff] %v323_v17  ;;  %326 = vst [vmem:[%s290_s13 + $0x8] sm:$0xff] %v324_v18 }
  0x1e PF: > { %s15_s20 = sadd.s32 1, %s493_s20   ;;  %s576_s18 = smov %s489_s19 }
  0x1f   : > { %p12_p5 = scmp.ge.s32.totalorder %s15_s20, 4   ;;  %s577_s19 = smov %s579_s21 }
  0x21   :  { %14 = sbr.rel (!%p12_p5) target bundleno = 2 (0x2), region = 76 }

// kernel: _lambda_.72
= control target key start
LH: loop header
LB: loop body
LE: loop exit
PB: predicated region body
PF: predicated region fallthrough
CT: control target
= control target key end

     0   :  { %s616_s21 = smov 0   ;;  %s618_s22 = smov 0   ;;  %s664_s0 = inlined_call_operand.vmem [shape: f32[2,16,128], index: 0, kind: input, shape index: {}]   ;;  %s665_s1 = inlined_call_operand.vmem [shape: f32[2,1,128], index: 1, kind: input, shape index: {}]   ;;  %s666_s2 = inlined_call_operand.vmem [shape: f32[2,1,128], index: 2, kind: input, shape index: {}]   ;;  %s667_s3 = inlined_call_operand.vmem [shape: f32[1,1,128], index: 3, kind: input, shape index: {}]   ;;  %s668_s4 = inlined_call_operand.vmem [shape: f32[1,1,128], index: 4, kind: input, shape index: {}]   ;;  %s669_s5 = inlined_call_operand.vmem [shape: f32[2,16,128], index: 5, kind: input, shape index: {}]   ;;  %s670_s6 = inlined_call_operand.vmem [shape: f32[2,16,128], index: 6, kind: output, shape index: {}]  }
   0x1   :  { %s620_s23 = smov 0  }
   0x2 LB: > { %s28_s24 = sadd.s32 1, %s575_s22  ;;  %p519_p0 = scmp.ge.s32.totalorder %s579_s23, 1  ;;  %s579_s23 = sphi %s620_s23, %s16_s23   ;;  %s575_s22 = sphi %s618_s22, %s672_s22   ;;  %s571_s21 = sphi %s616_s21, %s671_s21  }
   0x3   : > { %p30_p1 = scmp.ge.s32.totalorder %s28_s24, 2  ;;  %p266_p2 = scmp.lt.s32.totalorder %s579_s23, 3 }
   0x5   : > { %s674_s24 = smov (%p30_p1, %s28_s24), 0  ;;  %p267_p3 = pnand %p519_p0, %p266_p2 }
   0x6   : > { %p320_p4 = scmp.lt.s32.totalorder (!%p267_p3), %s571_s21, 1  ;;  %v370_v0 = vlaneseq (!%p267_p3)  ;;  %v367_v2 = vld [vmem:[%s667_s3] sm:$0x1] (!%p267_p3) }
   0x7   : > { %270 = sbr.rel (%p267_p3) target bundleno = 30 (0x1e), region = 44  ;;  %v527_v12 = vld [vmem:[%s668_s4] ss:$0 sm:$0xff] (!%p267_p3) }
   0x8   : > { %v371_v1 = vshrl.u32 (!%p267_p3), %v370_v0, 7 }
   0xa   : > { %v372_v4 = vsub.s32 (!%p267_p3), 0, %v371_v1 }
   0xe   : > { %s676_s21 = smov (!%p320_p4, %s571_s21), 1 }
   0xf   : > { %s530_s25 = sshll.u32 %s676_s21, 4  ;;  %s331_s28 = scalar_lea.vmem %s665_s1, %s676_s21 }
  0x10   : > { %s327_s9 = scalar_lea.vmem %s664_s0, %s530_s25  ;;  %s334_s12 = scalar_lea.vmem %s666_s2, %s676_s21  ;;  %v526_v3 = vld [vmem:[%s331_s28] ss:$0 sm:$0xff] }
  0x11   : > { %v355_v5 = vld [vmem:[%s327_s9] sm:$0xff]  ;;  %v356_v6 = vld [vmem:[%s327_s9 + $0x8] sm:$0xff]  ;;  %s343_s15 = scalar_lea.vmem %s669_s5, %s530_s25  ;;  %s353_s20 = scalar_lea.vmem %s670_s6, %s530_s25 }
  0x12   : > { %v366_v7 = vld [vmem:[%s334_s12] sm:$0x1]  ;;  %v364_v8 = vsub.f32 %v355_v5, %v526_v3  ;;  %v365_v9 = vsub.f32 %v356_v6, %v526_v3  ;;  %v387_v16 = vld [vmem:[%s343_s15 + $0x8] sm:$0xff] }
  0x13   : > { %v368_v10 = vmul.f32 %v367_v2, %v366_v7  ;;  %v386_v15 = vld [vmem:[%s343_s15] sm:$0xff] }
  0x15   : > { %v373_v11 = vrot.slane %v368_v10, %v372_v4 }
  0x17   : > { %v375_v13 = vmul.f32 %v373_v11, %v364_v8  ;;  %v376_v14 = vmul.f32 %v373_v11, %v365_v9 }
  0x19   : > { %v384_v17 = vadd.f32 %v527_v12, %v375_v13  ;;  %v385_v18 = vadd.f32 %v527_v12, %v376_v14 }
  0x1b   : > { %v388_v19 = vadd.f32 %v386_v15, %v384_v17  ;;  %v389_v20 = vadd.f32 %v387_v16, %v385_v18 }
  0x1d   : > { %390 = vst [vmem:[%s353_s20] sm:$0xff] %v388_v19  ;;  %391 = vst [vmem:[%s353_s20 + $0x8] sm:$0xff] %v389_v20 }
  0x1e PF: > { %s16_s23 = sadd.s32 1, %s579_s23   ;;  %s671_s21 = smov %s575_s22 }
  0x1f   : > { %p13_p5 = scmp.ge.s32.totalorder %s16_s23, 4   ;;  %s672_s22 = smov %s674_s24 }
  0x21   :  { %15 = sbr.rel (!%p13_p5) target bundleno = 2 (0x2), region = 83 }

// kernel: _lambda_.67
= control target key start
LH: loop header
LB: loop body
LE: loop exit
PB: predicated region body
PF: predicated region fallthrough
CT: control target
= control target key end

     0   :  { %s1032_s12 = smov 0   ;;  %s1034_s13 = smov 0   ;;  %s1148_s0 = inlined_call_operand.vmem [shape: bf16[32,1152], index: 0, kind: input, shape index: {}]   ;;  %s1149_s1 = inlined_call_operand.vmem [shape: bf16[1152,128], index: 1, kind: input, shape index: {}]   ;;  %s1150_s2 = inlined_call_operand.vmem [shape: f32[1,128], index: 2, kind: input, shape index: {}]   ;;  %s1151_s3 = inlined_call_operand.vmem [shape: f32[32,128], index: 3, kind: output, shape index: {}]  }
   0x1   :  { %s1036_s14 = smov 0   ;;  %s1038_s15 = smov 0  }
   0x2   :  { %s1040_s16 = smov 0  }
   0x3 LB: > { %s25_s17 = sadd.s32 1, %s1005_s15  ;;  %p48_p1 = scmp.ne.s32.totalorder %s997_s13, %s993_s12  ;;  %s1009_s16 = sphi %s1040_s16, %s13_s16   ;;  %s1005_s15 = sphi %s1038_s15, %s1155_s15   ;;  %s1001_s14 = sphi %s1036_s14, %s1154_s14   ;;  %s997_s13 = sphi %s1034_s13, %s1153_s13   ;;  %s993_s12 = sphi %s1032_s12, %s1152_s12  }
   0x4   : > { %p26_p0 = scmp.ge.s32.totalorder %s25_s17, 3  ;;  %p49_p2 = scmp.eq.s32.totalorder %s1009_s16, 0 }
   0x5   : > { %s41_s19 = sadd.s32 1, %s997_s13  ;;  %p788_p5 = scmp.ge.s32.totalorder %s1009_s16, 3 }
   0x6   : > { %s1157_s17 = smov (%p26_p0, %s25_s17), 0  ;;  %p50_p3 = por %p49_p2, %p48_p1 }
   0x7   : > { %s37_s18 = ssub.s32 %s1005_s15, %s1157_s17  ;;  %162 = sbr.rel (%p788_p5) target bundleno = 23 (0x17), region = 20 }
   0x8   : > { %p39_p4 = scmp.eq.s32.totalorder %s37_s18, 0 }
   0xa   : > { %s1067_s20 = scalar_select %p39_p4, %s997_s13, %s41_s19  }
   0xe   : > { %165 = sbr.rel (!%p50_p3) target bundleno = 23 (0x17), region = 24  ;;  %s167_s21 = sand.u32 (%p50_p3), 1, %s997_s13  }
   0xf   : > { %s837_s22 = smul.u32 (%p50_p3), 12, %s1005_s15 }
  0x10   : > { %s896_s23 = smul.u32 (%p50_p3), 48, %s167_s21 }
  0x11   : > { %s175_s26 = scalar_lea.vmem (%p50_p3), %s1148_s0, %s837_s22 }
  0x12   : > { %v190_v0 = vld [vmem:[%s175_s26] sm:$0xff] (%p50_p3)  ;;  %v194_v2 = vld [vmem:[%s175_s26 + $0x48] sm:$0xff] (%p50_p3)  ;;  %s169_s27 = scalar_lea.vmem (%p50_p3), [#allocation3], %s896_s23  ;;  %v794_v6 = vld [vmem:[%s175_s26 + $0x50] sm:$0xf] (%p50_p3) }
  0x13   : > { %v192_v1 = vld [vmem:[%s175_s26 + $0x24] sm:$0xff] (%p50_p3)  ;;  %191 = vst [vmem:[%s169_s27] sm:$0xff] (%p50_p3), %v190_v0  ;;  %195 = vst [vmem:[%s169_s27 + $0x18] sm:$0xff] (%p50_p3), %v194_v2  ;;  %v196_v3 = vld [vmem:[%s175_s26 + $0x6c] sm:$0xff] (%p50_p3) }
  0x14   : > { %193 = vst [vmem:[%s169_s27 + $0xc] sm:$0xff] (%p50_p3), %v192_v1  ;;  %v790_v4 = vld [vmem:[%s175_s26 + $0x8] sm:$0xf] (%p50_p3)  ;;  %v792_v5 = vld [vmem:[%s175_s26 + $0x2c] sm:$0xf] (%p50_p3)  ;;  %197 = vst [vmem:[%s169_s27 + $0x24] sm:$0xff] (%p50_p3), %v196_v3 }
  0x15   : > { %791 = vst [vmem:[%s169_s27 + $0x8] sm:$0xf] %v790_v4  ;;  %793 = vst [vmem:[%s169_s27 + $0x14] sm:$0xf] %v792_v5  ;;  %v796_v7 = vld [vmem:[%s175_s26 + $0x74] sm:$0xf] }
  0x16   : > { %795 = vst [vmem:[%s169_s27 + $0x20] sm:$0xf] %v794_v6  ;;  %797 = vst [vmem:[%s169_s27 + $0x2c] sm:$0xf] %v796_v7 }
  0x17 PF: > { %p798_p6 = scmp.ge.s32.totalorder %s1009_s16, 1  ;;  %p229_p7 = scmp.lt.s32.totalorder %s1009_s16, 4 }
  0x19   : > { %p230_p8 = pnand %p798_p6, %p229_p7 }
  0x1a   : > { %s236_s28 = sand.u32 (!%p230_p8), 1, %s993_s12   ;;  %s275_s29 = smul.u32 (!%p230_p8), 48, %s1001_s14 }
  0x1b   : > { %233 = sbr.rel (%p230_p8) target bundleno = 314 (0x13a), region = 54  ;;  %p800_p10 = scmp.ne.s32.totalorder (!%p230_p8), %s1001_s14, 0 }
  0x1c   : > { %s897_s30 = smul.u32 (!%p230_p8), 48, %s236_s28  ;;  %p276_p9 = scmp.lt.s32.totalorder (!%p230_p8), %s275_s29, 143 }
  0x1e   : > { %s1084_s8 = scalar_lea.vmem (!%p230_p8), [#allocation3], %s897_s30 }
  0x22   : > { %s1159_s29 = smov (!%p276_p9, %s275_s29), 143  ;;  %300 = sbr.rel (%p800_p10) target bundleno = 41 (0x29), region = 62 }
  0x23   : > { %s799_s4 = sshll.u32 %s1159_s29, 2  ;;  %v1011_v8 = vmov (!%p800_p10), 0.0  }
  0x24   : > { %s1082_s7 = scalar_lea.vmem %s1149_s1, %s799_s4  ;;  %301 = vst [vmem:[#allocation2] sm:$0xff] (!%p800_p10), %v1011_v8  ;;  %302 = vst [vmem:[#allocation2 + $0x8] sm:$0xff] (!%p800_p10), %v1011_v8 }
  0x25   : > { %303 = vst [vmem:[#allocation2 + $0x10] sm:$0xff] (!%p800_p10), %v1011_v8  ;;  %304 = vst [vmem:[#allocation2 + $0x18] sm:$0xff] (!%p800_p10), %v1011_v8 }
  0x29 PF: > { %v939_v9 = vld [vmem:[%s1082_s7 + $0x40] sm:$0xff]   ;;  %v942_v12 = vld [vmem:[%s1082_s7 + $0x48] sm:$0xff]   ;;  %v945_v15 = vld [vmem:[%s1082_s7 + $0x50] sm:$0xff]   ;;  %p831_p11 = scmp.ne.s32.totalorder %s1001_s14, 2 }
  0x2a   : > { %v940_v10 = vld [vmem:[%s1082_s7] sm:$0xff]   ;;  %838 = vmatprep.subr.bf16.mxu0 %v939_v9  ;;  %v943_v13 = vld [vmem:[%s1082_s7 + $0x8] sm:$0xff]   ;;  %v946_v16 = vld [vmem:[%s1082_s7 + $0x10] sm:$0xff]  }
  0x2b   : > { %v941_v11 = vld [vmem:[%s1082_s7 + $0x80] sm:$0xff]   ;;  %839 = vmatpush3.bf16.msra.mxu0 %v940_v10  ;;  %v944_v14 = vld [vmem:[%s1082_s7 + $0x88] sm:$0xff]   ;;  %v947_v17 = vld [vmem:[%s1082_s7 + $0x90] sm:$0xff]  }
  0x2c   : > { %876 = vmatprep.subr.bf16.mxu1 %v941_v11  ;;  %840 = vmatprep.subr.bf16.mxu0 %v942_v12  ;;  %v948_v18 = vld [vmem:[%s1082_s7 + $0x58] sm:$0xff]   ;;  %v951_v21 = vld [vmem:[%s1082_s7 + $0x60] sm:$0xff]   ;;  %v954_v24 = vld [vmem:[%s1082_s7 + $0x68] sm:$0xff]  }
  0x2d   : > { %877 = vmatpush3.bf16.msra.mxu1 %v941_v11  ;;  %v949_v19 = vld [vmem:[%s1082_s7 + $0x18] sm:$0xff]   ;;  %v953_v22 = vld [vmem:[%s1082_s7 + $0xa0] sm:$0xff]   ;;  %v956_v25 = vld [vmem:[%s1082_s7 + $0xa8] sm:$0xff]  }
  0x2e   : > { %878 = vmatprep.subr.bf16.mxu1 %v944_v14  ;;  %v950_v20 = vld [vmem:[%s1082_s7 + $0x98] sm:$0xff]   ;;  %v952_v23 = vld [vmem:[%s1082_s7 + $0x20] sm:$0xff]   ;;  %v955_v26 = vld [vmem:[%s1082_s7 + $0x28] sm:$0xff]  }
  0x2f   : > { %841 = vmatpush3.bf16.msra.mxu0 %v943_v13  ;;  %v957_v27 = vld [vmem:[%s1082_s7 + $0x70] sm:$0xff]   ;;  %v960_v30 = vld [vmem:[%s1082_s7 + $0x78] sm:$0xff]   ;;  %v305_v45 = vld [vmem:[#allocation2] sm:$0xff] }
  0x30   : > { %842 = vmatprep.subr.bf16.mxu0 %v945_v15  ;;  %v958_v28 = vld [vmem:[%s1082_s7 + $0x30] sm:$0xff]   ;;  %v962_v31 = vld [vmem:[%s1082_s7 + $0xb8] sm:$0xff]   ;;  %v306_v50 = vld [vmem:[#allocation2 + $0x8] sm:$0xff] }
  0x31   : > { %879 = vmatpush3.bf16.msra.mxu1 %v944_v14  ;;  %v959_v29 = vld [vmem:[%s1082_s7 + $0xb0] sm:$0xff]   ;;  %v961_v34 = vld [vmem:[%s1082_s7 + $0x38] sm:$0xff]   ;;  %v832_v4 = vld [vmem:[%s1150_s2] ss:$0 sm:$0xff] (!%p831_p11) }
  0x32   : > { %880 = vmatprep.subr.bf16.mxu1 %v947_v17  ;;  %v965_v32 = vld [vmem:[%s1084_s8 + $0x4] ss:$12 sps:$4 sm:$0xff]   ;;  %v966_v33 = vld [vmem:[%s1084_s8 + $0x8] ss:$12 sps:$4 sm:$0xff]   ;;  %v963_v35 = vld [vmem:[%s1084_s8] ss:$12 sps:$4 sm:$0xff]  }
  0x33   : > { %843 = vmatpush3.bf16.msra.mxu0 %v946_v16  ;;  %573 = vmatprep.mubr.bf16.mxu0 %v965_v32  ;;  %v968_v36 = vld [vmem:[%s1084_s8 + $0x1c] ss:$12 sps:$4 sm:$0xff]   ;;  %v967_v37 = vld [vmem:[%s1084_s8 + $0x20] ss:$12 sps:$4 sm:$0xff]   ;;  %v970_v38 = vld [vmem:[%s1084_s8 + $0x18] ss:$12 sps:$4 sm:$0xff]  }
  0x34   : > { %844 = vmatprep.subr.bf16.mxu0 %v948_v18  ;;  %892 = vmatprep.mubr.bf16.mxu1 %v966_v33  ;;  %v307_v59 = vld [vmem:[#allocation2 + $0x10] sm:$0xff]  ;;  %v308_v63 = vld [vmem:[#allocation2 + $0x18] sm:$0xff] }
  0x35   : > { %881 = vmatpush3.bf16.msra.mxu1 %v947_v17 }
  0x36   : > { %882 = vmatprep.subr.bf16.mxu1 %v950_v20 }
  0x37   : > { %845 = vmatpush3.bf16.msra.mxu0 %v949_v19 }
  0x38   : > { %846 = vmatprep.subr.bf16.mxu0 %v951_v21 }
  0x39   : > { %883 = vmatpush3.bf16.msra.mxu1 %v950_v20 }
  0x3a   : > { %884 = vmatprep.subr.bf16.mxu1 %v953_v22 }
  0x3b   : > { %847 = vmatpush3.bf16.msra.mxu0 %v952_v23 }
  0x3c   : > { %848 = vmatprep.subr.bf16.mxu0 %v954_v24 }
  0x3d   : > { %885 = vmatpush3.bf16.msra.mxu1 %v953_v22 }
  0x3e   : > { %886 = vmatprep.subr.bf16.mxu1 %v956_v25 }
  0x3f   : > { %849 = vmatpush3.bf16.msra.mxu0 %v955_v26 }
  0x40   : > { %850 = vmatprep.subr.bf16.mxu0 %v957_v27 }
  0x41   : > { %887 = vmatpush3.bf16.msra.mxu1 %v956_v25 }
  0x42   : > { %888 = vmatprep.subr.bf16.mxu1 %v959_v29 }
  0x43   : > { %851 = vmatpush3.bf16.msra.mxu0 %v958_v28 }
  0x44   : > { %852 = vmatprep.subr.bf16.mxu0 %v960_v30 }
  0x45   : > { %889 = vmatpush3.bf16.msra.mxu1 %v959_v29 }
  0x46   : > { %890 = vmatprep.subr.bf16.mxu1 %v962_v31 }
  0x47   : > { %853 = vmatpush3.bf16.msra.mxu0 %v961_v34 }
  0x49   : > { %891 = vmatpush3.bf16.msra.mxu1 %v962_v31 }
  0x4a   : > { %574 = vmatmul.mubr.bf16.vlgmr.msra.gmra.mrb[0].mxu0 %v963_v35 }
  0x4b   : > { %581 = vmatprep.mubr.bf16.mxu0 %v968_v36 }
  0x4c   : > { %893 = vmatmul.mubr.bf16.vlgmr.msra.gmra.mrb[0].mxu1 %v967_v37 }
  0x52   : > { %582 = vmatmul.mubr.bf16.gmra.mrb[4].mxu0 %v970_v38 }
 0x11d   : > { %v854_v39 = vpop.f32.mrb[0].mxu0 }
 0x11e   : > { %v855_v40 = vpop.f32.mrb[1].mxu0 }
 0x11f   : > { %v856_v41 = vadd.f32 %v855_v40, %v854_v39  ;;  %v857_v42 = vpop.f32.mrb[2].mxu0  ;;  %v894_v43 = vpop.f32.mrb[0].mxu1 }
 0x120   : > { %v858_v44 = vpop.f32.mrb[3].mxu0  ;;  %v624_v46 = vpop.f32.mrb[1].mxu1 }
 0x121   : > { %v859_v47 = vadd.f32 %v858_v44, %v857_v42  ;;  %v625_v48 = vadd.f32 %v856_v41, %v624_v46  ;;  %v895_v49 = vpop.f32.mrb[2].mxu1 }
 0x122   : > { %v627_v51 = vpop.f32.mrb[3].mxu1 }
 0x123   : > { %v639_v52 = vadd.f32 %v625_v48, %v305_v45  ;;  %v628_v53 = vadd.f32 %v859_v47, %v627_v51 }
 0x125   : > { %643 = vst [vmem:[#allocation2] sm:$0xff] %v639_v52  ;;  %v640_v54 = vadd.f32 %v628_v53, %v306_v50  ;;  %v860_v55 = vpop.f32.mrb[4].mxu0 }
 0x126   : > { %v861_v56 = vpop.f32.mrb[5].mxu0 }
 0x127   : > { %644 = vst [vmem:[#allocation2 + $0x8] sm:$0xff] %v640_v54  ;;  %v862_v57 = vadd.f32 %v861_v56, %v860_v55  ;;  %v863_v58 = vpop.f32.mrb[6].mxu0 }
 0x128   : > { %v864_v60 = vpop.f32.mrb[7].mxu0 }
 0x129   : > { %v633_v61 = vadd.f32 %v894_v43, %v862_v57  ;;  %v865_v62 = vadd.f32 %v864_v60, %v863_v58  ;;  %650 = sbr.rel (%p831_p11) target bundleno = 314 (0x13a), region = 66 }
 0x12b   : > { %v641_v0 = vadd.f32 %v633_v61, %v307_v59  ;;  %v636_v1 = vadd.f32 %v895_v49, %v865_v62 }
 0x12c   : > { %v651_v3 = vld [vmem:[#allocation2] sm:$0xff] (!%p831_p11) }
 0x12d   : > { %645 = vst [vmem:[#allocation2 + $0x10] sm:$0xff] %v641_v0  ;;  %v642_v2 = vadd.f32 %v636_v1, %v308_v63  ;;  %v662_v6 = vadd.f32 (!%p831_p11), %v832_v4, %v651_v3 }
 0x12e   : > { %v652_v5 = vld [vmem:[#allocation2 + $0x8] sm:$0xff] (!%p831_p11) }
 0x12f   : > { %646 = vst [vmem:[#allocation2 + $0x18] sm:$0xff] %v642_v2  ;;  %v663_v7 = vadd.f32 (!%p831_p11), %v832_v4, %v652_v5  ;;  %666 = vst [vmem:[%s1151_s3] sm:$0xff] (!%p831_p11), %v662_v6 }
 0x131   : > { %667 = vst [vmem:[%s1151_s3 + $0x8] sm:$0xff] %v663_v7 }
 0x134   : > { %v653_v8 = vld [vmem:[#allocation2 + $0x10] sm:$0xff] }
 0x135   : > { %v664_v10 = vadd.f32 %v832_v4, %v653_v8 }
 0x136   : > { %v654_v9 = vld [vmem:[#allocation2 + $0x18] sm:$0xff] }
 0x137   : > { %v665_v11 = vadd.f32 %v832_v4, %v654_v9  ;;  %668 = vst [vmem:[%s1151_s3 + $0x10] sm:$0xff] %v664_v10 }
 0x139   : > { %669 = vst [vmem:[%s1151_s3 + $0x18] sm:$0xff] %v665_v11 }
 0x13a PF: > { %s13_s16 = sadd.s32 1, %s1009_s16   ;;  %s1152_s12 = smov %s997_s13 }
 0x13b   : > { %p10_p12 = scmp.ge.s32.totalorder %s13_s16, 5   ;;  %s1153_s13 = smov %s1067_s20 }
 0x13c   : > { %s1154_s14 = smov %s1005_s15  ;;  %s1155_s15 = smov %s1157_s17 }
 0x13d   :  { %12 = sbr.rel (!%p10_p12) target bundleno = 3 (0x3), region = 113 }

// kernel: _lambda_.105
= control target key start
LH: loop header
LB: loop body
LE: loop exit
PB: predicated region body
PF: predicated region fallthrough
CT: control target
= control target key end

     0   :  { %s1500_s12 = smov 0   ;;  %s1502_s13 = smov 0   ;;  %s1738_s0 = inlined_call_operand.vmem [shape: bf16[128,1152], index: 0, kind: input, shape index: {}]   ;;  %s1739_s1 = inlined_call_operand.vmem [shape: bf16[1152,128], index: 1, kind: input, shape index: {}]   ;;  %s1740_s2 = inlined_call_operand.vmem [shape: f32[1,128], index: 2, kind: input, shape index: {}]   ;;  %s1741_s3 = inlined_call_operand.vmem [shape: f32[128,128], index: 3, kind: output, shape index: {}]  }
   0x1   :  { %s1504_s14 = smov 0   ;;  %s1506_s15 = smov 0  }
   0x2   :  { %s1508_s16 = smov 0  }
   0x3 LB: > { %s25_s17 = sadd.s32 1, %s1473_s15  ;;  %p48_p1 = scmp.ne.s32.totalorder %s1465_s13, %s1461_s12  ;;  %s1477_s16 = sphi %s1508_s16, %s13_s16   ;;  %s1473_s15 = sphi %s1506_s15, %s1745_s15   ;;  %s1469_s14 = sphi %s1504_s14, %s1744_s14   ;;  %s1465_s13 = sphi %s1502_s13, %s1743_s13   ;;  %s1461_s12 = sphi %s1500_s12, %s1742_s12  }
   0x4   : > { %p26_p0 = scmp.ge.s32.totalorder %s25_s17, 3  ;;  %p49_p2 = scmp.eq.s32.totalorder %s1477_s16, 0 }
   0x5   : > { %s41_s19 = sadd.s32 1, %s1465_s13  ;;  %p1136_p5 = scmp.ge.s32.totalorder %s1477_s16, 3 }
   0x6   : > { %s1747_s17 = smov (%p26_p0, %s25_s17), 0  ;;  %p50_p3 = por %p49_p2, %p48_p1 }
   0x7   : > { %s37_s18 = ssub.s32 %s1473_s15, %s1747_s17  ;;  %162 = sbr.rel (%p1136_p5) target bundleno = 37 (0x25), region = 20 }
   0x8   : > { %p39_p4 = scmp.eq.s32.totalorder %s37_s18, 0 }
   0xa   : > { %s1535_s20 = scalar_select %p39_p4, %s1465_s13, %s41_s19  }
   0xe   : > { %165 = sbr.rel (!%p50_p3) target bundleno = 37 (0x25), region = 24  ;;  %s167_s21 = sand.u32 (%p50_p3), 1, %s1465_s13  }
   0xf   : > { %s1227_s22 = smul.u32 (%p50_p3), 12, %s1473_s15 }
  0x10   : > { %s1340_s23 = smul.u32 (%p50_p3), 192, %s167_s21 }
  0x11   : > { %s1543_s26 = scalar_lea.vmem (%p50_p3), %s1738_s0, %s1227_s22 }
  0x12   : > { %v190_v0 = vld [vmem:[%s1543_s26] sm:$0xff] (%p50_p3)  ;;  %v194_v2 = vld [vmem:[%s1543_s26 + $0x48] sm:$0xff] (%p50_p3)  ;;  %s1548_s27 = scalar_lea.vmem (%p50_p3), [#allocation3], %s1340_s23  ;;  %v198_v4 = vld [vmem:[%s1543_s26 + $0x90] sm:$0xff] (%p50_p3) }
  0x13   : > { %v192_v1 = vld [vmem:[%s1543_s26 + $0x24] sm:$0xff] (%p50_p3)  ;;  %191 = vst [vmem:[%s1548_s27] sm:$0xff] (%p50_p3), %v190_v0  ;;  %195 = vst [vmem:[%s1548_s27 + $0x18] sm:$0xff] (%p50_p3), %v194_v2  ;;  %v196_v3 = vld [vmem:[%s1543_s26 + $0x6c] sm:$0xff] (%p50_p3) }
  0x14   : > { %193 = vst [vmem:[%s1548_s27 + $0xc] sm:$0xff] (%p50_p3), %v192_v1  ;;  %v200_v5 = vld [vmem:[%s1543_s26 + $0xb4] sm:$0xff] (%p50_p3)  ;;  %197 = vst [vmem:[%s1548_s27 + $0x24] sm:$0xff] (%p50_p3), %v196_v3  ;;  %v204_v7 = vld [vmem:[%s1543_s26 + $0xfc] sm:$0xff] (%p50_p3) }
  0x15   : > { %199 = vst [vmem:[%s1548_s27 + $0x30] sm:$0xff] %v198_v4  ;;  %201 = vst [vmem:[%s1548_s27 + $0x3c] sm:$0xff] %v200_v5  ;;  %v202_v6 = vld [vmem:[%s1543_s26 + $0xd8] sm:$0xff]  ;;  %v206_v8 = vld [vmem:[%s1543_s26 + $0x120] sm:$0xff] }
  0x16   : > { %203 = vst [vmem:[%s1548_s27 + $0x48] sm:$0xff] %v202_v6  ;;  %205 = vst [vmem:[%s1548_s27 + $0x54] sm:$0xff] %v204_v7  ;;  %v208_v9 = vld [vmem:[%s1543_s26 + $0x144] sm:$0xff]  ;;  %v212_v11 = vld [vmem:[%s1543_s26 + $0x18c] sm:$0xff] }
  0x17   : > { %207 = vst [vmem:[%s1548_s27 + $0x60] sm:$0xff] %v206_v8  ;;  %v210_v10 = vld [vmem:[%s1543_s26 + $0x168] sm:$0xff]  ;;  %209 = vst [vmem:[%s1548_s27 + $0x6c] sm:$0xff] %v208_v9  ;;  %v214_v12 = vld [vmem:[%s1543_s26 + $0x1b0] sm:$0xff] }
  0x18   : > { %211 = vst [vmem:[%s1548_s27 + $0x78] sm:$0xff] %v210_v10  ;;  %213 = vst [vmem:[%s1548_s27 + $0x84] sm:$0xff] %v212_v11  ;;  %v216_v13 = vld [vmem:[%s1543_s26 + $0x1d4] sm:$0xff]  ;;  %v220_v15 = vld [vmem:[%s1543_s26 + $0x21c] sm:$0xff] }
  0x19   : > { %v218_v14 = vld [vmem:[%s1543_s26 + $0x1f8] sm:$0xff]  ;;  %215 = vst [vmem:[%s1548_s27 + $0x90] sm:$0xff] %v214_v12  ;;  %217 = vst [vmem:[%s1548_s27 + $0x9c] sm:$0xff] %v216_v13  ;;  %v1138_v16 = vld [vmem:[%s1543_s26 + $0x8] sm:$0xf] }
  0x1a   : > { %219 = vst [vmem:[%s1548_s27 + $0xa8] sm:$0xff] %v218_v14  ;;  %v1140_v17 = vld [vmem:[%s1543_s26 + $0x2c] sm:$0xf]  ;;  %221 = vst [vmem:[%s1548_s27 + $0xb4] sm:$0xff] %v220_v15  ;;  %v1142_v18 = vld [vmem:[%s1543_s26 + $0x50] sm:$0xf] }
  0x1b   : > { %1139 = vst [vmem:[%s1548_s27 + $0x8] sm:$0xf] %v1138_v16  ;;  %1141 = vst [vmem:[%s1548_s27 + $0x14] sm:$0xf] %v1140_v17  ;;  %v1144_v19 = vld [vmem:[%s1543_s26 + $0x74] sm:$0xf] }
  0x1c   : > { %v1146_v20 = vld [vmem:[%s1543_s26 + $0x98] sm:$0xf]  ;;  %1143 = vst [vmem:[%s1548_s27 + $0x20] sm:$0xf] %v1142_v18  ;;  %1145 = vst [vmem:[%s1548_s27 + $0x2c] sm:$0xf] %v1144_v19 }
  0x1d   : > { %1147 = vst [vmem:[%s1548_s27 + $0x38] sm:$0xf] %v1146_v20  ;;  %v1148_v21 = vld [vmem:[%s1543_s26 + $0xbc] sm:$0xf]  ;;  %v1150_v22 = vld [vmem:[%s1543_s26 + $0xe0] sm:$0xf] }
  0x1e   : > { %v1152_v23 = vld [vmem:[%s1543_s26 + $0x104] sm:$0xf]  ;;  %1149 = vst [vmem:[%s1548_s27 + $0x44] sm:$0xf] %v1148_v21  ;;  %1151 = vst [vmem:[%s1548_s27 + $0x50] sm:$0xf] %v1150_v22 }
  0x1f   : > { %1153 = vst [vmem:[%s1548_s27 + $0x5c] sm:$0xf] %v1152_v23  ;;  %v1154_v24 = vld [vmem:[%s1543_s26 + $0x128] sm:$0xf]  ;;  %v1156_v25 = vld [vmem:[%s1543_s26 + $0x14c] sm:$0xf] }
  0x20   : > { %v1158_v26 = vld [vmem:[%s1543_s26 + $0x170] sm:$0xf]  ;;  %1155 = vst [vmem:[%s1548_s27 + $0x68] sm:$0xf] %v1154_v24  ;;  %1157 = vst [vmem:[%s1548_s27 + $0x74] sm:$0xf] %v1156_v25 }
  0x21   : > { %1159 = vst [vmem:[%s1548_s27 + $0x80] sm:$0xf] %v1158_v26  ;;  %v1160_v27 = vld [vmem:[%s1543_s26 + $0x194] sm:$0xf]  ;;  %v1162_v28 = vld [vmem:[%s1543_s26 + $0x1b8] sm:$0xf] }
  0x22   : > { %v1164_v29 = vld [vmem:[%s1543_s26 + $0x1dc] sm:$0xf]  ;;  %1161 = vst [vmem:[%s1548_s27 + $0x8c] sm:$0xf] %v1160_v27  ;;  %1163 = vst [vmem:[%s1548_s27 + $0x98] sm:$0xf] %v1162_v28 }
  0x23   : > { %1165 = vst [vmem:[%s1548_s27 + $0xa4] sm:$0xf] %v1164_v29  ;;  %v1166_v30 = vld [vmem:[%s1543_s26 + $0x200] sm:$0xf]  ;;  %v1168_v31 = vld [vmem:[%s1543_s26 + $0x224] sm:$0xf] }
  0x24   : > { %1167 = vst [vmem:[%s1548_s27 + $0xb0] sm:$0xf] %v1166_v30  ;;  %1169 = vst [vmem:[%s1548_s27 + $0xbc] sm:$0xf] %v1168_v31 }
  0x25 PF: > { %p1170_p6 = scmp.ge.s32.totalorder %s1477_s16, 1  ;;  %p277_p7 = scmp.lt.s32.totalorder %s1477_s16, 4 }
  0x27   : > { %p278_p8 = pnand %p1170_p6, %p277_p7 }
  0x28   : > { %s284_s28 = sand.u32 (!%p278_p8), 1, %s1461_s12   ;;  %s323_s29 = smul.u32 (!%p278_p8), 48, %s1469_s14 }
  0x29   : > { %281 = sbr.rel (%p278_p8) target bundleno = 379 (0x17b), region = 54  ;;  %p1172_p10 = scmp.ne.s32.totalorder (!%p278_p8), %s1469_s14, 0 }
  0x2a   : > { %s1341_s30 = smul.u32 (!%p278_p8), 192, %s284_s28  ;;  %p324_p9 = scmp.lt.s32.totalorder (!%p278_p8), %s323_s29, 143 }
  0x2c   : > { %s1620_s8 = scalar_lea.vmem (!%p278_p8), [#allocation3], %s1341_s30 }
  0x30   : > { %s1749_s29 = smov (!%p324_p9, %s323_s29), 143  ;;  %348 = sbr.rel (%p1172_p10) target bundleno = 58 (0x3a), region = 62 }
  0x31   : > { %s1171_s4 = sshll.u32 %s1749_s29, 2  ;;  %v1479_v32 = vmov (!%p1172_p10), 0.0  }
  0x32   : > { %s1618_s7 = scalar_lea.vmem %s1739_s1, %s1171_s4  ;;  %349 = vst [vmem:[#allocation2] sm:$0xff] (!%p1172_p10), %v1479_v32  ;;  %350 = vst [vmem:[#allocation2 + $0x8] sm:$0xff] (!%p1172_p10), %v1479_v32 }
  0x33   : > { %351 = vst [vmem:[#allocation2 + $0x10] sm:$0xff] (!%p1172_p10), %v1479_v32  ;;  %352 = vst [vmem:[#allocation2 + $0x18] sm:$0xff] (!%p1172_p10), %v1479_v32 }
  0x34   : > { %353 = vst [vmem:[#allocation2 + $0x20] sm:$0xff] (!%p1172_p10), %v1479_v32  ;;  %354 = vst [vmem:[#allocation2 + $0x28] sm:$0xff] (!%p1172_p10), %v1479_v32 }
  0x35   : > { %355 = vst [vmem:[#allocation2 + $0x30] sm:$0xff] (!%p1172_p10), %v1479_v32  ;;  %356 = vst [vmem:[#allocation2 + $0x38] sm:$0xff] (!%p1172_p10), %v1479_v32 }
  0x36   : > { %357 = vst [vmem:[#allocation2 + $0x40] sm:$0xff] (!%p1172_p10), %v1479_v32  ;;  %358 = vst [vmem:[#allocation2 + $0x48] sm:$0xff] (!%p1172_p10), %v1479_v32 }
  0x37   : > { %359 = vst [vmem:[#allocation2 + $0x50] sm:$0xff] %v1479_v32  ;;  %360 = vst [vmem:[#allocation2 + $0x58] sm:$0xff] %v1479_v32 }
  0x38   : > { %361 = vst [vmem:[#allocation2 + $0x60] sm:$0xff] %v1479_v32  ;;  %362 = vst [vmem:[#allocation2 + $0x68] sm:$0xff] %v1479_v32 }
  0x39   : > { %363 = vst [vmem:[#allocation2 + $0x70] sm:$0xff] %v1479_v32  ;;  %364 = vst [vmem:[#allocation2 + $0x78] sm:$0xff] %v1479_v32 }
  0x3a PF: > { %v1383_v33 = vld [vmem:[%s1618_s7 + $0x40] sm:$0xff]   ;;  %v1386_v36 = vld [vmem:[%s1618_s7 + $0x48] sm:$0xff]   ;;  %v1389_v39 = vld [vmem:[%s1618_s7 + $0x50] sm:$0xff]   ;;  %p1221_p11 = scmp.ne.s32.totalorder %s1469_s14, 2 }
  0x3b   : > { %v1384_v34 = vld [vmem:[%s1618_s7] sm:$0xff]   ;;  %1228 = vmatprep.subr.bf16.mxu0 %v1383_v33  ;;  %v1387_v37 = vld [vmem:[%s1618_s7 + $0x8] sm:$0xff]   ;;  %v1390_v40 = vld [vmem:[%s1618_s7 + $0x10] sm:$0xff]  }
  0x3c   : > { %v1385_v35 = vld [vmem:[%s1618_s7 + $0x80] sm:$0xff]   ;;  %1229 = vmatpush3.bf16.msra.mxu0 %v1384_v34  ;;  %v1388_v38 = vld [vmem:[%s1618_s7 + $0x88] sm:$0xff]   ;;  %v1391_v41 = vld [vmem:[%s1618_s7 + $0x90] sm:$0xff]  }
  0x3d   : > { %1308 = vmatprep.subr.bf16.mxu1 %v1385_v35  ;;  %1230 = vmatprep.subr.bf16.mxu0 %v1386_v36  ;;  %v1392_v42 = vld [vmem:[%s1618_s7 + $0x58] sm:$0xff]   ;;  %v1395_v45 = vld [vmem:[%s1618_s7 + $0x60] sm:$0xff]   ;;  %v1398_v48 = vld [vmem:[%s1618_s7 + $0x68] sm:$0xff]  }
  0x3e   : > { %1309 = vmatpush3.bf16.msra.mxu1 %v1385_v35  ;;  %v1393_v43 = vld [vmem:[%s1618_s7 + $0x18] sm:$0xff]   ;;  %v1397_v46 = vld [vmem:[%s1618_s7 + $0xa0] sm:$0xff]   ;;  %v1400_v49 = vld [vmem:[%s1618_s7 + $0xa8] sm:$0xff]  }
  0x3f   : > { %1310 = vmatprep.subr.bf16.mxu1 %v1388_v38  ;;  %v1394_v44 = vld [vmem:[%s1618_s7 + $0x98] sm:$0xff]   ;;  %v1396_v47 = vld [vmem:[%s1618_s7 + $0x20] sm:$0xff]   ;;  %v1399_v50 = vld [vmem:[%s1618_s7 + $0x28] sm:$0xff]  }
  0x40   : > { %1231 = vmatpush3.bf16.msra.mxu0 %v1387_v37  ;;  %v1401_v51 = vld [vmem:[%s1618_s7 + $0x70] sm:$0xff]   ;;  %v1404_v54 = vld [vmem:[%s1618_s7 + $0x78] sm:$0xff]   ;;  %v1407_v59 = vld [vmem:[%s1620_s8] ss:$12 sps:$4 sm:$0xff]  }
  0x41   : > { %1232 = vmatprep.subr.bf16.mxu0 %v1389_v39  ;;  %v1402_v52 = vld [vmem:[%s1618_s7 + $0x30] sm:$0xff]   ;;  %v1406_v55 = vld [vmem:[%s1618_s7 + $0xb8] sm:$0xff]   ;;  %v1411_v61 = vld [vmem:[%s1620_s8 + $0x20] ss:$12 sps:$4 sm:$0xff]  }
  0x42   : > { %1311 = vmatpush3.bf16.msra.mxu1 %v1388_v38  ;;  %v1403_v53 = vld [vmem:[%s1618_s7 + $0xb0] sm:$0xff]   ;;  %v1405_v58 = vld [vmem:[%s1618_s7 + $0x38] sm:$0xff]   ;;  %v1427_v5 = vld [vmem:[%s1620_s8 + $0x80] ss:$12 sps:$4 sm:$0xff]  }
  0x43   : > { %1312 = vmatprep.subr.bf16.mxu1 %v1391_v41  ;;  %v1409_v56 = vld [vmem:[%s1620_s8 + $0x4] ss:$12 sps:$4 sm:$0xff]   ;;  %v1410_v57 = vld [vmem:[%s1620_s8 + $0x8] ss:$12 sps:$4 sm:$0xff]   ;;  %v1420_v4 = vld [vmem:[%s1620_s8 + $0x4c] ss:$12 sps:$4 sm:$0xff]  }
  0x44   : > { %1233 = vmatpush3.bf16.msra.mxu0 %v1390_v40  ;;  %765 = vmatprep.mubr.bf16.mxu0 %v1409_v56  ;;  %v1412_v60 = vld [vmem:[%s1620_s8 + $0x1c] ss:$12 sps:$4 sm:$0xff]   ;;  %v1418_v62 = vld [vmem:[%s1620_s8 + $0x38] ss:$12 sps:$4 sm:$0xff]   ;;  %v1415_v0 = vld [vmem:[%s1620_s8 + $0x34] ss:$12 sps:$4 sm:$0xff]  }
  0x45   : > { %1234 = vmatprep.subr.bf16.mxu0 %v1392_v42  ;;  %1324 = vmatprep.mubr.bf16.mxu1 %v1410_v57  ;;  %v1414_v63 = vld [vmem:[%s1620_s8 + $0x18] ss:$12 sps:$4 sm:$0xff]   ;;  %v1419_v1 = vld [vmem:[%s1620_s8 + $0x50] ss:$12 sps:$4 sm:$0xff]   ;;  %v1426_v2 = vld [vmem:[%s1620_s8 + $0x68] ss:$12 sps:$4 sm:$0xff]  }
  0x46   : > { %1313 = vmatpush3.bf16.msra.mxu1 %v1391_v41  ;;  %v1417_v3 = vld [vmem:[%s1620_s8 + $0x30] ss:$12 sps:$4 sm:$0xff]   ;;  %v1434_v6 = vld [vmem:[%s1620_s8 + $0x98] ss:$12 sps:$4 sm:$0xff]   ;;  %v1422_v7 = vld [vmem:[%s1620_s8 + $0x48] ss:$12 sps:$4 sm:$0xff]  }
  0x47   : > { %1314 = vmatprep.subr.bf16.mxu1 %v1394_v44  ;;  %v1423_v8 = vld [vmem:[%s1620_s8 + $0x64] ss:$12 sps:$4 sm:$0xff]   ;;  %v1425_v10 = vld [vmem:[%s1620_s8 + $0x60] ss:$12 sps:$4 sm:$0xff]   ;;  %v1428_v11 = vld [vmem:[%s1620_s8 + $0x7c] ss:$12 sps:$4 sm:$0xff]  }
  0x48   : > { %1235 = vmatpush3.bf16.msra.mxu0 %v1393_v43  ;;  %v1435_v9 = vld [vmem:[%s1620_s8 + $0xb0] ss:$12 sps:$4 sm:$0xff]   ;;  %v1430_v12 = vld [vmem:[%s1620_s8 + $0x78] ss:$12 sps:$4 sm:$0xff]   ;;  %v1431_v13 = vld [vmem:[%s1620_s8 + $0x94] ss:$12 sps:$4 sm:$0xff]  }
  0x49   : > { %1236 = vmatprep.subr.bf16.mxu0 %v1395_v45  ;;  %v1433_v14 = vld [vmem:[%s1620_s8 + $0x90] ss:$12 sps:$4 sm:$0xff]   ;;  %v1436_v15 = vld [vmem:[%s1620_s8 + $0xac] ss:$12 sps:$4 sm:$0xff]   ;;  %v1438_v16 = vld [vmem:[%s1620_s8 + $0xa8] ss:$12 sps:$4 sm:$0xff]  }
  0x4a   : > { %1315 = vmatpush3.bf16.msra.mxu1 %v1394_v44  ;;  %v365_v23 = vld [vmem:[#allocation2] sm:$0xff]  ;;  %v366_v28 = vld [vmem:[#allocation2 + $0x8] sm:$0xff]  ;;  %v367_v38 = vld [vmem:[#allocation2 + $0x10] sm:$0xff] }
  0x4b   : > { %1316 = vmatprep.subr.bf16.mxu1 %v1397_v46  ;;  %v368_v44 = vld [vmem:[#allocation2 + $0x18] sm:$0xff] }
  0x4c   : > { %1237 = vmatpush3.bf16.msra.mxu0 %v1396_v47 }
  0x4d   : > { %1238 = vmatprep.subr.bf16.mxu0 %v1398_v48 }
  0x4e   : > { %1317 = vmatpush3.bf16.msra.mxu1 %v1397_v46 }
  0x4f   : > { %1318 = vmatprep.subr.bf16.mxu1 %v1400_v49 }
  0x50   : > { %1239 = vmatpush3.bf16.msra.mxu0 %v1399_v50 }
  0x51   : > { %1240 = vmatprep.subr.bf16.mxu0 %v1401_v51 }
  0x52   : > { %1319 = vmatpush3.bf16.msra.mxu1 %v1400_v49 }
  0x53   : > { %1320 = vmatprep.subr.bf16.mxu1 %v1403_v53 }
  0x54   : > { %1241 = vmatpush3.bf16.msra.mxu0 %v1402_v52 }
  0x55   : > { %1242 = vmatprep.subr.bf16.mxu0 %v1404_v54 }
  0x56   : > { %1321 = vmatpush3.bf16.msra.mxu1 %v1403_v53 }
  0x57   : > { %1322 = vmatprep.subr.bf16.mxu1 %v1406_v55 }
  0x58   : > { %1243 = vmatpush3.bf16.msra.mxu0 %v1405_v58 }
  0x5a   : > { %1323 = vmatpush3.bf16.msra.mxu1 %v1406_v55  ;;  %v369_v55 = vld [vmem:[#allocation2 + $0x20] sm:$0xff] }
  0x5b   : > { %766 = vmatmul.mubr.bf16.vlgmr.msra.gmra.mrb[0].mxu0 %v1407_v59 }
  0x5c   : > { %773 = vmatprep.mubr.bf16.mxu0 %v1412_v60  ;;  %v370_v60 = vld [vmem:[#allocation2 + $0x28] sm:$0xff] }
  0x5d   : > { %1325 = vmatmul.mubr.bf16.vlgmr.msra.gmra.mrb[0].mxu1 %v1411_v61 }
  0x5e   : > { %1328 = vmatprep.mubr.bf16.mxu1 %v1418_v62 }
  0x63   : > { %774 = vmatmul.mubr.bf16.gmra.mrb[4].mxu0 %v1414_v63 }
  0x64   : > { %781 = vmatprep.mubr.bf16.mxu0 %v1415_v0 }
  0x65   : > { %1329 = vmatmul.mubr.bf16.gmra.mrb[4].mxu1 %v1419_v1 }
  0x66   : > { %1332 = vmatprep.mubr.bf16.mxu1 %v1426_v2 }
  0x6b   : > { %782 = vmatmul.mubr.bf16.gmra.mrb[8].mxu0 %v1417_v3 }
  0x6c   : > { %789 = vmatprep.mubr.bf16.mxu0 %v1420_v4 }
  0x6d   : > { %1333 = vmatmul.mubr.bf16.gmra.mrb[8].mxu1 %v1427_v5 }
  0x6e   : > { %1336 = vmatprep.mubr.bf16.mxu1 %v1434_v6  ;;  %v371_v6 = vld [vmem:[#allocation2 + $0x30] sm:$0xff] }
  0x73   : > { %790 = vmatmul.mubr.bf16.gmra.mrb[12].mxu0 %v1422_v7 }
  0x74   : > { %797 = vmatprep.mubr.bf16.mxu0 %v1423_v8 }
  0x75   : > { %1337 = vmatmul.mubr.bf16.gmra.mrb[12].mxu1 %v1435_v9 }
  0x7b   : > { %798 = vmatmul.mubr.bf16.gmra.mrb[16].mxu0 %v1425_v10 }
  0x7c   : > { %805 = vmatprep.mubr.bf16.mxu0 %v1428_v11 }
  0x83   : > { %806 = vmatmul.mubr.bf16.gmra.mrb[20].mxu0 %v1430_v12  ;;  %v372_v12 = vld [vmem:[#allocation2 + $0x38] sm:$0xff] }
  0x84   : > { %813 = vmatprep.mubr.bf16.mxu0 %v1431_v13 }
  0x8b   : > { %814 = vmatmul.mubr.bf16.gmra.mrb[24].mxu0 %v1433_v14 }
  0x8c   : > { %821 = vmatprep.mubr.bf16.mxu0 %v1436_v15 }
  0x93   : > { %822 = vmatmul.mubr.bf16.gmra.mrb[28].mxu0 %v1438_v16 }
 0x12e   : > { %v1244_v17 = vpop.f32.mrb[0].mxu0 }
 0x12f   : > { %v1245_v18 = vpop.f32.mrb[1].mxu0 }
 0x130   : > { %v1246_v19 = vadd.f32 %v1245_v18, %v1244_v17  ;;  %v1247_v20 = vpop.f32.mrb[2].mxu0  ;;  %v1326_v21 = vpop.f32.mrb[0].mxu1 }
 0x131   : > { %v1248_v22 = vpop.f32.mrb[3].mxu0  ;;  %v864_v24 = vpop.f32.mrb[1].mxu1 }
 0x132   : > { %v1249_v25 = vadd.f32 %v1248_v22, %v1247_v20  ;;  %v865_v26 = vadd.f32 %v1246_v19, %v864_v24  ;;  %v1327_v27 = vpop.f32.mrb[2].mxu1  ;;  %v373_v22 = vld [vmem:[#allocation2 + $0x40] sm:$0xff] }
 0x133   : > { %v867_v29 = vpop.f32.mrb[3].mxu1 }
 0x134   : > { %v927_v30 = vadd.f32 %v865_v26, %v365_v23  ;;  %v868_v31 = vadd.f32 %v1249_v25, %v867_v29  ;;  %v374_v25 = vld [vmem:[#allocation2 + $0x48] sm:$0xff] }
 0x136   : > { %943 = vst [vmem:[#allocation2] sm:$0xff] %v927_v30  ;;  %v928_v32 = vadd.f32 %v868_v31, %v366_v28  ;;  %v1250_v33 = vpop.f32.mrb[4].mxu0 }
 0x137   : > { %v1251_v34 = vpop.f32.mrb[5].mxu0 }
 0x138   : > { %944 = vst [vmem:[#allocation2 + $0x8] sm:$0xff] %v928_v32  ;;  %v1252_v35 = vadd.f32 %v1251_v34, %v1250_v33  ;;  %v1253_v36 = vpop.f32.mrb[6].mxu0  ;;  %v1330_v37 = vpop.f32.mrb[4].mxu1  ;;  %v375_v33 = vld [vmem:[#allocation2 + $0x50] sm:$0xff] }
 0x139   : > { %v1254_v39 = vpop.f32.mrb[7].mxu0  ;;  %v880_v40 = vpop.f32.mrb[5].mxu1 }
 0x13a   : > { %v873_v41 = vadd.f32 %v1326_v21, %v1252_v35  ;;  %v1255_v42 = vadd.f32 %v1254_v39, %v1253_v36  ;;  %v1331_v43 = vpop.f32.mrb[6].mxu1 }
 0x13b   : > { %v883_v45 = vpop.f32.mrb[7].mxu1 }
 0x13c   : > { %v929_v46 = vadd.f32 %v873_v41, %v367_v38  ;;  %v876_v47 = vadd.f32 %v1327_v27, %v1255_v42 }
 0x13e   : > { %945 = vst [vmem:[#allocation2 + $0x10] sm:$0xff] %v929_v46  ;;  %v930_v48 = vadd.f32 %v876_v47, %v368_v44  ;;  %v1256_v49 = vpop.f32.mrb[8].mxu0  ;;  %v377_v46 = vld [vmem:[#allocation2 + $0x60] sm:$0xff] }
 0x13f   : > { %v1257_v50 = vpop.f32.mrb[9].mxu0 }
 0x140   : > { %946 = vst [vmem:[#allocation2 + $0x18] sm:$0xff] %v930_v48  ;;  %v1258_v51 = vadd.f32 %v1257_v50, %v1256_v49  ;;  %v1259_v52 = vpop.f32.mrb[10].mxu0  ;;  %v1334_v53 = vpop.f32.mrb[8].mxu1  ;;  %v378_v49 = vld [vmem:[#allocation2 + $0x68] sm:$0xff] }
 0x141   : > { %v1260_v54 = vpop.f32.mrb[11].mxu0  ;;  %v896_v56 = vpop.f32.mrb[9].mxu1 }
 0x142   : > { %v1261_v57 = vadd.f32 %v1260_v54, %v1259_v52  ;;  %v881_v58 = vadd.f32 %v1258_v51, %v880_v40  ;;  %v1335_v59 = vpop.f32.mrb[10].mxu1 }
 0x143   : > { %v899_v61 = vpop.f32.mrb[11].mxu1 }
 0x144   : > { %v931_v62 = vadd.f32 %v881_v58, %v369_v55  ;;  %v884_v63 = vadd.f32 %v1261_v57, %v883_v45  ;;  %v379_v57 = vld [vmem:[#allocation2 + $0x70] sm:$0xff] }
 0x146   : > { %947 = vst [vmem:[#allocation2 + $0x20] sm:$0xff] %v931_v62  ;;  %v932_v0 = vadd.f32 %v884_v63, %v370_v60  ;;  %v1262_v1 = vpop.f32.mrb[12].mxu0 }
 0x147   : > { %v1263_v2 = vpop.f32.mrb[13].mxu0 }
 0x148   : > { %948 = vst [vmem:[#allocation2 + $0x28] sm:$0xff] %v932_v0  ;;  %v1264_v3 = vadd.f32 %v1263_v2, %v1262_v1  ;;  %v1265_v4 = vpop.f32.mrb[14].mxu0  ;;  %v1338_v5 = vpop.f32.mrb[12].mxu1  ;;  %v963_v1 = vld [vmem:[#allocation2] sm:$0xff] (!%p1221_p11) }
 0x149   : > { %v1266_v7 = vpop.f32.mrb[15].mxu0  ;;  %v912_v8 = vpop.f32.mrb[13].mxu1  ;;  %v1222_v2 = vld [vmem:[%s1740_s2] ss:$0 sm:$0xff] (!%p1221_p11) }
 0x14a   : > { %v889_v9 = vadd.f32 %v1330_v37, %v1264_v3  ;;  %v1267_v10 = vadd.f32 %v1266_v7, %v1265_v4  ;;  %v1339_v11 = vpop.f32.mrb[14].mxu1  ;;  %v376_v37 = vld [vmem:[#allocation2 + $0x58] sm:$0xff]  ;;  %v964_v3 = vld [vmem:[#allocation2 + $0x8] sm:$0xff] (!%p1221_p11)  ;;  %v986_v4 = vadd.f32 (!%p1221_p11), %v1222_v2, %v963_v1  ;;  %v965_v7 = vld [vmem:[#allocation2 + $0x10] sm:$0xff] (!%p1221_p11) }
 0x14b   : > { %v915_v13 = vpop.f32.mrb[15].mxu1 }
 0x14c   : > { %v933_v14 = vadd.f32 %v889_v9, %v371_v6  ;;  %v892_v15 = vadd.f32 %v1331_v43, %v1267_v10  ;;  %v987_v6 = vadd.f32 (!%p1221_p11), %v1222_v2, %v964_v3  ;;  %v988_v9 = vadd.f32 (!%p1221_p11), %v1222_v2, %v965_v7  ;;  %1002 = vst [vmem:[%s1741_s3] sm:$0xff] (!%p1221_p11), %v986_v4 }
 0x14e   : > { %949 = vst [vmem:[#allocation2 + $0x30] sm:$0xff] %v933_v14  ;;  %v934_v16 = vadd.f32 %v892_v15, %v372_v12  ;;  %v1268_v17 = vpop.f32.mrb[16].mxu0  ;;  %1003 = vst [vmem:[%s1741_s3 + $0x8] sm:$0xff] (!%p1221_p11), %v987_v6 }
 0x14f   : > { %v1269_v18 = vpop.f32.mrb[17].mxu0  ;;  %v968_v12 = vld [vmem:[#allocation2 + $0x28] sm:$0xff] (!%p1221_p11)  ;;  %1004 = vst [vmem:[%s1741_s3 + $0x10] sm:$0xff] (!%p1221_p11), %v988_v9 }
 0x150   : > { %950 = vst [vmem:[#allocation2 + $0x38] sm:$0xff] %v934_v16  ;;  %v1270_v19 = vadd.f32 %v1269_v18, %v1268_v17  ;;  %v1271_v20 = vpop.f32.mrb[18].mxu0  ;;  %v991_v15 = vadd.f32 (!%p1221_p11), %v1222_v2, %v968_v12 }
 0x151   : > { %v1272_v21 = vpop.f32.mrb[19].mxu0 }
 0x152   : > { %v1273_v23 = vadd.f32 %v1272_v21, %v1271_v20  ;;  %v897_v24 = vadd.f32 %v1270_v19, %v896_v56  ;;  %1007 = vst [vmem:[%s1741_s3 + $0x28] sm:$0xff] (!%p1221_p11), %v991_v15 }
 0x154   : > { %v935_v26 = vadd.f32 %v897_v24, %v373_v22  ;;  %v900_v27 = vadd.f32 %v1273_v23, %v899_v61  ;;  %v380_v61 = vld [vmem:[#allocation2 + $0x78] sm:$0xff] }
 0x156   : > { %951 = vst [vmem:[#allocation2 + $0x40] sm:$0xff] %v935_v26  ;;  %v936_v28 = vadd.f32 %v900_v27, %v374_v25  ;;  %v1274_v29 = vpop.f32.mrb[20].mxu0 }
 0x157   : > { %v1275_v30 = vpop.f32.mrb[21].mxu0  ;;  %v970_v14 = vld [vmem:[#allocation2 + $0x38] sm:$0xff] (!%p1221_p11) }
 0x158   : > { %952 = vst [vmem:[#allocation2 + $0x48] sm:$0xff] %v936_v28  ;;  %v1276_v31 = vadd.f32 %v1275_v30, %v1274_v29  ;;  %v1277_v32 = vpop.f32.mrb[22].mxu0  ;;  %v993_v17 = vadd.f32 (!%p1221_p11), %v1222_v2, %v970_v14 }
 0x159   : > { %v1278_v34 = vpop.f32.mrb[23].mxu0 }
 0x15a   : > { %v905_v35 = vadd.f32 %v1334_v53, %v1276_v31  ;;  %v1279_v36 = vadd.f32 %v1278_v34, %v1277_v32  ;;  %1009 = vst [vmem:[%s1741_s3 + $0x38] sm:$0xff] (!%p1221_p11), %v993_v17 }
 0x15c   : > { %v937_v38 = vadd.f32 %v905_v35, %v375_v33  ;;  %v908_v39 = vadd.f32 %v1335_v59, %v1279_v36 }
 0x15d   : > { %v971_v18 = vld [vmem:[#allocation2 + $0x40] sm:$0xff] (!%p1221_p11) }
 0x15e   : > { %953 = vst [vmem:[#allocation2 + $0x50] sm:$0xff] %v937_v38  ;;  %v938_v40 = vadd.f32 %v908_v39, %v376_v37  ;;  %v1280_v41 = vpop.f32.mrb[24].mxu0  ;;  %v994_v21 = vadd.f32 (!%p1221_p11), %v1222_v2, %v971_v18 }
 0x15f   : > { %v1281_v42 = vpop.f32.mrb[25].mxu0  ;;  %v972_v19 = vld [vmem:[#allocation2 + $0x48] sm:$0xff] (!%p1221_p11) }
 0x160   : > { %954 = vst [vmem:[#allocation2 + $0x58] sm:$0xff] %v938_v40  ;;  %v1282_v43 = vadd.f32 %v1281_v42, %v1280_v41  ;;  %v1283_v44 = vpop.f32.mrb[26].mxu0  ;;  %v995_v22 = vadd.f32 (!%p1221_p11), %v1222_v2, %v972_v19  ;;  %1010 = vst [vmem:[%s1741_s3 + $0x40] sm:$0xff] (!%p1221_p11), %v994_v21 }
 0x161   : > { %v1284_v45 = vpop.f32.mrb[27].mxu0 }
 0x162   : > { %v1285_v47 = vadd.f32 %v1284_v45, %v1283_v44  ;;  %v913_v48 = vadd.f32 %v1282_v43, %v912_v8  ;;  %v967_v8 = vld [vmem:[#allocation2 + $0x20] sm:$0xff] (!%p1221_p11)  ;;  %1011 = vst [vmem:[%s1741_s3 + $0x48] sm:$0xff] (!%p1221_p11), %v995_v22 }
 0x164   : > { %v939_v50 = vadd.f32 %v913_v48, %v377_v46  ;;  %v916_v51 = vadd.f32 %v1285_v47, %v915_v13  ;;  %v969_v13 = vld [vmem:[#allocation2 + $0x30] sm:$0xff] (!%p1221_p11) }
 0x165   : > { %v992_v16 = vadd.f32 (!%p1221_p11), %v1222_v2, %v969_v13  ;;  %v973_v20 = vld [vmem:[#allocation2 + $0x50] sm:$0xff] (!%p1221_p11) }
 0x166   : > { %955 = vst [vmem:[#allocation2 + $0x60] sm:$0xff] %v939_v50  ;;  %v940_v52 = vadd.f32 %v916_v51, %v378_v49  ;;  %v1286_v53 = vpop.f32.mrb[28].mxu0  ;;  %v996_v23 = vadd.f32 (!%p1221_p11), %v1222_v2, %v973_v20 }
 0x167   : > { %v1287_v54 = vpop.f32.mrb[29].mxu0  ;;  %v974_v24 = vld [vmem:[#allocation2 + $0x58] sm:$0xff] (!%p1221_p11)  ;;  %1008 = vst [vmem:[%s1741_s3 + $0x30] sm:$0xff] (!%p1221_p11), %v992_v16 }
 0x168   : > { %956 = vst [vmem:[#allocation2 + $0x68] sm:$0xff] %v940_v52  ;;  %v1288_v55 = vadd.f32 %v1287_v54, %v1286_v53  ;;  %v1289_v56 = vpop.f32.mrb[30].mxu0  ;;  %v997_v27 = vadd.f32 (!%p1221_p11), %v1222_v2, %v974_v24  ;;  %1012 = vst [vmem:[%s1741_s3 + $0x50] sm:$0xff] (!%p1221_p11), %v996_v23 }
 0x169   : > { %v1290_v58 = vpop.f32.mrb[31].mxu0 }
 0x16a   : > { %v921_v59 = vadd.f32 %v1338_v5, %v1288_v55  ;;  %v1291_v60 = vadd.f32 %v1290_v58, %v1289_v56  ;;  %962 = sbr.rel (%p1221_p11) target bundleno = 379 (0x17b), region = 66  ;;  %v966_v5 = vld [vmem:[#allocation2 + $0x18] sm:$0xff] (!%p1221_p11)  ;;  %1013 = vst [vmem:[%s1741_s3 + $0x58] sm:$0xff] (!%p1221_p11), %v997_v27 }
 0x16b   : > { %v989_v10 = vadd.f32 (!%p1221_p11), %v1222_v2, %v966_v5 }
 0x16c   : > { %v941_v62 = vadd.f32 %v921_v59, %v379_v57  ;;  %v924_v63 = vadd.f32 %v1339_v11, %v1291_v60  ;;  %v990_v11 = vadd.f32 (!%p1221_p11), %v1222_v2, %v967_v8 }
 0x16d   : > { %1005 = vst [vmem:[%s1741_s3 + $0x18] sm:$0xff] (!%p1221_p11), %v989_v10  ;;  %v975_v25 = vld [vmem:[#allocation2 + $0x60] sm:$0xff] (!%p1221_p11) }
 0x16e   : > { %957 = vst [vmem:[#allocation2 + $0x70] sm:$0xff] %v941_v62  ;;  %v942_v0 = vadd.f32 %v924_v63, %v380_v61  ;;  %1006 = vst [vmem:[%s1741_s3 + $0x20] sm:$0xff] (!%p1221_p11), %v990_v11  ;;  %v998_v28 = vadd.f32 (!%p1221_p11), %v1222_v2, %v975_v25 }
 0x16f   : > { %v976_v26 = vld [vmem:[#allocation2 + $0x68] sm:$0xff] (!%p1221_p11) }
 0x170   : > { %958 = vst [vmem:[#allocation2 + $0x78] sm:$0xff] %v942_v0  ;;  %v999_v29 = vadd.f32 (!%p1221_p11), %v1222_v2, %v976_v26  ;;  %1014 = vst [vmem:[%s1741_s3 + $0x60] sm:$0xff] (!%p1221_p11), %v998_v28 }
 0x172   : > { %1015 = vst [vmem:[%s1741_s3 + $0x68] sm:$0xff] %v999_v29 }
 0x175   : > { %v977_v30 = vld [vmem:[#allocation2 + $0x70] sm:$0xff] }
 0x176   : > { %v1000_v32 = vadd.f32 %v1222_v2, %v977_v30 }
 0x177   : > { %v978_v31 = vld [vmem:[#allocation2 + $0x78] sm:$0xff] }
 0x178   : > { %v1001_v33 = vadd.f32 %v1222_v2, %v978_v31  ;;  %1016 = vst [vmem:[%s1741_s3 + $0x70] sm:$0xff] %v1000_v32 }
 0x17a   : > { %1017 = vst [vmem:[%s1741_s3 + $0x78] sm:$0xff] %v1001_v33 }
 0x17b PF: > { %s13_s16 = sadd.s32 1, %s1477_s16   ;;  %s1742_s12 = smov %s1465_s13 }
 0x17c   : > { %p10_p12 = scmp.ge.s32.totalorder %s13_s16, 5   ;;  %s1743_s13 = smov %s1535_s20 }
 0x17d   : > { %s1744_s14 = smov %s1473_s15  ;;  %s1745_s15 = smov %s1747_s17 }
 0x17e   :  { %12 = sbr.rel (!%p10_p12) target bundleno = 3 (0x3), region = 113 }

// kernel: _lambda_.108
= control target key start
LH: loop header
LB: loop body
LE: loop exit
PB: predicated region body
PF: predicated region fallthrough
CT: control target
= control target key end

     0   :  { %s2602_s12 = smov 0   ;;  %s2604_s13 = smov 0   ;;  %s3017_s0 = inlined_call_operand.vmem [shape: bf16[512,640], index: 0, kind: input, shape index: {}]   ;;  %s3018_s1 = inlined_call_operand.vmem [shape: bf16[640,128], index: 1, kind: input, shape index: {}]   ;;  %s3019_s2 = inlined_call_operand.vmem [shape: f32[1,128], index: 2, kind: input, shape index: {}]   ;;  %s3020_s3 = inlined_call_operand.vmem [shape: f32[512,128], index: 3, kind: output, shape index: {}]  }
   0x1   :  { %s2606_s14 = smov 0  }
   0x2 LB: > { %s32_s15 = sadd.s32 1, %s2576_s13  ;;  %p1941_p0 = scmp.ge.s32.totalorder %s2580_s14, 1  ;;  %s2580_s14 = sphi %s2606_s14, %s13_s14   ;;  %s2576_s13 = sphi %s2604_s13, %s3022_s13   ;;  %s2572_s12 = sphi %s2602_s12, %s3021_s12  }
   0x3   : > { %p34_p1 = scmp.ge.s32.totalorder %s32_s15, 2  ;;  %p191_p2 = scmp.lt.s32.totalorder %s2580_s14, 3 }
   0x5   : > { %s3024_s15 = smov (%p34_p1, %s32_s15), 0  ;;  %p192_p3 = pnand %p1941_p0, %p191_p2 }
   0x6   : > { %v2406_v0 = vld [vmem:[%s3018_s1 + $0x40] sm:$0xff] (!%p192_p3)   ;;  %s1942_s18 = sshll.u32 (!%p192_p3), %s2572_s12, 5  ;;  %v2408_v2 = vld [vmem:[%s3018_s1 + $0x48] sm:$0xff] (!%p192_p3)   ;;  %v2410_v4 = vld [vmem:[%s3018_s1 + $0x50] sm:$0xff] (!%p192_p3)  }
   0x7   : > { %195 = sbr.rel (%p192_p3) target bundleno = 415 (0x19f), region = 32  ;;  %v2407_v1 = vld [vmem:[%s3018_s1] sm:$0xff] (!%p192_p3)   ;;  %2069 = vmatprep.subr.bf16.mxu0 (!%p192_p3), %v2406_v0  ;;  %2365 = vmatprep.subr.bf16.mxu1 (!%p192_p3), %v2406_v0  ;;  %p236_p4 = scmp.lt.s32.totalorder (!%p192_p3), %s1942_s18, 63  ;;  %v2409_v3 = vld [vmem:[%s3018_s1 + $0x8] sm:$0xff] (!%p192_p3)   ;;  %v2411_v5 = vld [vmem:[%s3018_s1 + $0x10] sm:$0xff] (!%p192_p3)  }
   0x8   : > { %2070 = vmatpush3.bf16.msra.mxu0 (!%p192_p3), %v2407_v1  ;;  %2373 = vmatpush3.bf16.msra.mxu1 (!%p192_p3), %v2407_v1  ;;  %v2412_v6 = vld [vmem:[%s3018_s1 + $0x58] sm:$0xff] (!%p192_p3)   ;;  %v2414_v8 = vld [vmem:[%s3018_s1 + $0x60] sm:$0xff] (!%p192_p3)   ;;  %v2416_v10 = vld [vmem:[%s3018_s1 + $0x68] sm:$0xff] (!%p192_p3)  }
   0x9   : > { %2071 = vmatprep.subr.bf16.mxu0 (!%p192_p3), %v2408_v2  ;;  %2366 = vmatprep.subr.bf16.mxu1 (!%p192_p3), %v2408_v2  ;;  %v2413_v7 = vld [vmem:[%s3018_s1 + $0x18] sm:$0xff] (!%p192_p3)   ;;  %v2415_v9 = vld [vmem:[%s3018_s1 + $0x20] sm:$0xff] (!%p192_p3)   ;;  %v2417_v13 = vld [vmem:[%s3018_s1 + $0x28] sm:$0xff] (!%p192_p3)  }
   0xa   : > { %v2418_v14 = vld [vmem:[%s3018_s1 + $0x70] sm:$0xff] (!%p192_p3)   ;;  %v2420_v16 = vld [vmem:[%s3018_s1 + $0x78] sm:$0xff] (!%p192_p3)   ;;  %v2428_v18 = vld [vmem:[%s3018_s1 + $0xc0] sm:$0xff] (!%p192_p3)  }
   0xb   : > { %v2419_v15 = vld [vmem:[%s3018_s1 + $0x30] sm:$0xff] (!%p192_p3)   ;;  %v2421_v17 = vld [vmem:[%s3018_s1 + $0x38] sm:$0xff] (!%p192_p3)   ;;  %v2431_v19 = vld [vmem:[%s3018_s1 + $0x100] sm:$0xff] (!%p192_p3)  }
   0xc   : > { %2072 = vmatpush3.bf16.msra.mxu0 (!%p192_p3), %v2409_v3  ;;  %2374 = vmatpush3.bf16.msra.mxu1 (!%p192_p3), %v2409_v3  ;;  %v2429_v22 = vld [vmem:[%s3018_s1 + $0x80] sm:$0xff] (!%p192_p3)   ;;  %v2430_v23 = vld [vmem:[%s3018_s1 + $0xc8] sm:$0xff] (!%p192_p3)   ;;  %v2439_v29 = vld [vmem:[%s3018_s1 + $0xd0] sm:$0xff] (!%p192_p3)  }
   0xd   : > { %2073 = vmatprep.subr.bf16.mxu0 (!%p192_p3), %v2410_v4  ;;  %2367 = vmatprep.subr.bf16.mxu1 (!%p192_p3), %v2410_v4  ;;  %v2450_v26 = vld [vmem:[%s3018_s1 + $0x108] sm:$0xff] (!%p192_p3)   ;;  %v2440_v31 = vld [vmem:[%s3018_s1 + $0x90] sm:$0xff] (!%p192_p3)   ;;  %v2441_v33 = vld [vmem:[%s3018_s1 + $0xd8] sm:$0xff] (!%p192_p3)  }
   0xe   : > { %s3026_s18 = smov (!%p236_p4, %s1942_s18), 63  ;;  %v2432_v27 = vld [vmem:[%s3018_s1 + $0x88] sm:$0xff]   ;;  %v2442_v35 = vld [vmem:[%s3018_s1 + $0x98] sm:$0xff]   ;;  %v2449_v36 = vld [vmem:[%s3018_s1 + $0xe0] sm:$0xff]  }
   0xf   : > { %s2381_s4 = smul.u32 20, %s3026_s18  ;;  %v2463_v38 = vld [vmem:[%s3018_s1 + $0x110] sm:$0xff]   ;;  %v2451_v40 = vld [vmem:[%s3018_s1 + $0xa0] sm:$0xff]   ;;  %v2452_v41 = vld [vmem:[%s3018_s1 + $0xe8] sm:$0xff]  }
  0x10   : > { %2074 = vmatpush3.bf16.msra.mxu0 %v2411_v5  ;;  %2375 = vmatpush3.bf16.msra.mxu1 %v2411_v5  ;;  %v2453_v44 = vld [vmem:[%s3018_s1 + $0xa8] sm:$0xff]   ;;  %v2477_v45 = vld [vmem:[%s3018_s1 + $0x118] sm:$0xff]   ;;  %v2460_v48 = vld [vmem:[%s3018_s1 + $0xf0] sm:$0xff]  }
  0x11   : > { %2075 = vmatprep.subr.bf16.mxu0 %v2412_v6  ;;  %2368 = vmatprep.subr.bf16.mxu1 %v2412_v6  ;;  %s2653_s11 = scalar_lea.vmem %s3017_s0, %s2381_s4  ;;  %v2461_v49 = vld [vmem:[%s3018_s1 + $0xb0] sm:$0xff]   ;;  %v2462_v50 = vld [vmem:[%s3018_s1 + $0xf8] sm:$0xff]   ;;  %v2484_v52 = vld [vmem:[%s3018_s1 + $0x120] sm:$0xff]  }
  0x12   : > { %v2424_v11 = vld [vmem:[%s2653_s11 + $0x4] ss:$20 sps:$4 sm:$0xff]   ;;  %v2422_v20 = vld [vmem:[%s2653_s11] ss:$20 sps:$4 sm:$0xff]   ;;  %v2437_v28 = vld [vmem:[%s2653_s11 + $0x28] ss:$20 sps:$4 sm:$0xff]  }
  0x13   : > { %v2427_v12 = vld [vmem:[%s2653_s11 + $0x1e4] ss:$20 sps:$4 sm:$0xff]   ;;  %1200 = vmatprep.mubr.bf16.mxu0 %v2424_v11  ;;  %v2425_v21 = vld [vmem:[%s2653_s11 + $0x1e0] ss:$20 sps:$4 sm:$0xff]   ;;  %v2438_v30 = vld [vmem:[%s2653_s11 + $0x208] ss:$20 sps:$4 sm:$0xff]  }
  0x14   : > { %2076 = vmatpush3.bf16.msra.mxu0 %v2413_v7  ;;  %2376 = vmatpush3.bf16.msra.mxu1 %v2413_v7  ;;  %v2433_v24 = vld [vmem:[%s2653_s11 + $0x2c] ss:$20 sps:$4 sm:$0xff]   ;;  %v2443_v32 = vld [vmem:[%s2653_s11 + $0x54] ss:$20 sps:$4 sm:$0xff]   ;;  %v2447_v37 = vld [vmem:[%s2653_s11 + $0x50] ss:$20 sps:$4 sm:$0xff]  }
  0x15   : > { %2077 = vmatprep.subr.bf16.mxu0 %v2414_v8  ;;  %2369 = vmatprep.subr.bf16.mxu1 %v2414_v8  ;;  %v2435_v25 = vld [vmem:[%s2653_s11 + $0x20c] ss:$20 sps:$4 sm:$0xff]   ;;  %v2445_v34 = vld [vmem:[%s2653_s11 + $0x234] ss:$20 sps:$4 sm:$0xff]   ;;  %v2448_v39 = vld [vmem:[%s2653_s11 + $0x230] ss:$20 sps:$4 sm:$0xff]  }
  0x16   : > { %1296 = vmatprep.mubr.bf16.mxu1 %v2427_v12  ;;  %v2454_v42 = vld [vmem:[%s2653_s11 + $0x7c] ss:$20 sps:$4 sm:$0xff]   ;;  %v2458_v46 = vld [vmem:[%s2653_s11 + $0x78] ss:$20 sps:$4 sm:$0xff]   ;;  %v2470_v56 = vld [vmem:[%s2653_s11 + $0xa0] ss:$20 sps:$4 sm:$0xff]  }
  0x17   : > { %v2456_v43 = vld [vmem:[%s2653_s11 + $0x25c] ss:$20 sps:$4 sm:$0xff]   ;;  %v2459_v47 = vld [vmem:[%s2653_s11 + $0x258] ss:$20 sps:$4 sm:$0xff]   ;;  %v2473_v59 = vld [vmem:[%s2653_s11 + $0x34] ss:$20 sps:$4 sm:$0xff]  }
  0x18   : > { %2078 = vmatpush3.bf16.msra.mxu0 %v2415_v9  ;;  %2377 = vmatpush3.bf16.msra.mxu1 %v2415_v9  ;;  %v2465_v51 = vld [vmem:[%s2653_s11 + $0xa4] ss:$20 sps:$4 sm:$0xff]   ;;  %v2469_v53 = vld [vmem:[%s2653_s11 + $0xc] ss:$20 sps:$4 sm:$0xff]   ;;  %v2467_v55 = vld [vmem:[%s2653_s11 + $0x8] ss:$20 sps:$4 sm:$0xff]  }
  0x19   : > { %2079 = vmatprep.subr.bf16.mxu0 %v2416_v10  ;;  %2370 = vmatprep.subr.bf16.mxu1 %v2416_v10  ;;  %v2464_v54 = vld [vmem:[%s3018_s1 + $0xb8] sm:$0xff]   ;;  %v2497_v57 = vld [vmem:[%s3018_s1 + $0x128] sm:$0xff]   ;;  %v2504_v60 = vld [vmem:[%s3018_s1 + $0x130] sm:$0xff]  }
  0x1a   : > { %v2471_v58 = vld [vmem:[%s2653_s11 + $0xcc] ss:$20 sps:$4 sm:$0xff]   ;;  %v2475_v61 = vld [vmem:[%s2653_s11 + $0xc8] ss:$20 sps:$4 sm:$0xff]   ;;  %v2476_v62 = vld [vmem:[%s2653_s11 + $0x30] ss:$20 sps:$4 sm:$0xff]  }
  0x1b   : > { %v2478_v63 = vld [vmem:[%s2653_s11 + $0xf4] ss:$20 sps:$4 sm:$0xff]   ;;  %v2480_v0 = vld [vmem:[%s2653_s11 + $0x5c] ss:$20 sps:$4 sm:$0xff]   ;;  %v2483_v3 = vld [vmem:[%s2653_s11 + $0x58] ss:$20 sps:$4 sm:$0xff]  }
  0x1c   : > { %2080 = vmatpush3.bf16.msra.mxu0 %v2417_v13  ;;  %2378 = vmatpush3.bf16.msra.mxu1 %v2417_v13  ;;  %v2517_v1 = vld [vmem:[%s3018_s1 + $0x138] sm:$0xff]   ;;  %v2482_v2 = vld [vmem:[%s2653_s11 + $0xf0] ss:$20 sps:$4 sm:$0xff]   ;;  %v2490_v7 = vld [vmem:[%s2653_s11 + $0x80] ss:$20 sps:$4 sm:$0xff]  }
  0x1d   : > { %2081 = vmatprep.subr.bf16.mxu0 %v2418_v14  ;;  %2371 = vmatprep.subr.bf16.mxu1 %v2418_v14  ;;  %v2485_v4 = vld [vmem:[%s2653_s11 + $0x11c] ss:$20 sps:$4 sm:$0xff]   ;;  %v2487_v5 = vld [vmem:[%s2653_s11 + $0x84] ss:$20 sps:$4 sm:$0xff]   ;;  %v2493_v9 = vld [vmem:[%s2653_s11 + $0xac] ss:$20 sps:$4 sm:$0xff]  }
  0x1e   : > { %v2489_v6 = vld [vmem:[%s2653_s11 + $0x118] ss:$20 sps:$4 sm:$0xff]   ;;  %v2495_v10 = vld [vmem:[%s2653_s11 + $0x140] ss:$20 sps:$4 sm:$0xff]   ;;  %v2496_v11 = vld [vmem:[%s2653_s11 + $0xa8] ss:$20 sps:$4 sm:$0xff]  }
  0x1f   : > { %v2491_v8 = vld [vmem:[%s2653_s11 + $0x144] ss:$20 sps:$4 sm:$0xff]   ;;  %v2498_v12 = vld [vmem:[%s2653_s11 + $0x16c] ss:$20 sps:$4 sm:$0xff]   ;;  %v2500_v13 = vld [vmem:[%s2653_s11 + $0xd4] ss:$20 sps:$4 sm:$0xff]  }
  0x20   : > { %2082 = vmatpush3.bf16.msra.mxu0 %v2419_v15  ;;  %2379 = vmatpush3.bf16.msra.mxu1 %v2419_v15  ;;  %v2502_v14 = vld [vmem:[%s2653_s11 + $0x168] ss:$20 sps:$4 sm:$0xff]   ;;  %v2503_v15 = vld [vmem:[%s2653_s11 + $0xd0] ss:$20 sps:$4 sm:$0xff]  }
  0x21   : > { %2083 = vmatprep.subr.bf16.mxu0 %v2420_v16  ;;  %2372 = vmatprep.subr.bf16.mxu1 %v2420_v16  ;;  %v2505_v16 = vld [vmem:[%s2653_s11 + $0x194] ss:$20 sps:$4 sm:$0xff]  }
  0x24   : > { %2084 = vmatpush3.bf16.msra.mxu0 %v2421_v17  ;;  %2380 = vmatpush3.bf16.msra.mxu1 %v2421_v17  ;;  %v2507_v17 = vld [vmem:[%s2653_s11 + $0xfc] ss:$20 sps:$4 sm:$0xff]  }
  0x25   : > { %2181 = vmatprep.subr.bf16.mxu1 %v2428_v18  ;;  %2317 = vmatprep.subr.bf16.mxu0 %v2431_v19  ;;  %v2509_v18 = vld [vmem:[%s2653_s11 + $0x190] ss:$20 sps:$4 sm:$0xff]  }
  0x27   : > { %1201 = vmatmul.mubr.bf16.vlgmr.msra.gmra.mrb[0].mxu0 %v2422_v20  ;;  %1297 = vmatmul.mubr.bf16.vlgmr.msra.gmra.mrb[0].mxu1 %v2425_v21  ;;  %v2511_v20 = vld [vmem:[%s2653_s11 + $0x1bc] ss:$20 sps:$4 sm:$0xff]   ;;  %v2513_v21 = vld [vmem:[%s2653_s11 + $0x124] ss:$20 sps:$4 sm:$0xff]  }
  0x28   : > { %2182 = vmatpush3.bf16.msra.mxu1 %v2429_v22  ;;  %2318 = vmatpush3.bf16.msra.mxu0 %v2431_v19  ;;  %v2510_v19 = vld [vmem:[%s2653_s11 + $0xf8] ss:$20 sps:$4 sm:$0xff]  }
  0x29   : > { %2183 = vmatprep.subr.bf16.mxu1 %v2430_v23  ;;  %1208 = vmatprep.mubr.bf16.mxu0 %v2433_v24  ;;  %v2515_v22 = vld [vmem:[%s2653_s11 + $0x1b8] ss:$20 sps:$4 sm:$0xff]   ;;  %v2516_v23 = vld [vmem:[%s2653_s11 + $0x120] ss:$20 sps:$4 sm:$0xff]  }
  0x2a   : > { %1304 = vmatprep.mubr.bf16.mxu1 %v2435_v25  ;;  %2319 = vmatprep.subr.bf16.mxu0 %v2450_v26  ;;  %v2518_v24 = vld [vmem:[%s2653_s11 + $0x14c] ss:$20 sps:$4 sm:$0xff]   ;;  %v2520_v25 = vld [vmem:[%s2653_s11 + $0x10] ss:$20 sps:$4 sm:$0xff]  }
  0x2c   : > { %2184 = vmatpush3.bf16.msra.mxu1 %v2432_v27  ;;  %2320 = vmatpush3.bf16.msra.mxu0 %v2450_v26  ;;  %v2521_v26 = vld [vmem:[%s2653_s11 + $0x148] ss:$20 sps:$4 sm:$0xff]   ;;  %v2522_v27 = vld [vmem:[%s2653_s11 + $0x38] ss:$20 sps:$4 sm:$0xff]  }
  0x2d   : > { %2185 = vmatprep.subr.bf16.mxu1 %v2439_v29  ;;  %2321 = vmatprep.subr.bf16.mxu0 %v2463_v38  ;;  %v2525_v29 = vld [vmem:[%s2653_s11 + $0x60] ss:$20 sps:$4 sm:$0xff]  }
  0x2f   : > { %1209 = vmatmul.mubr.bf16.gmra.mrb[4].mxu0 %v2437_v28  ;;  %1305 = vmatmul.mubr.bf16.gmra.mrb[4].mxu1 %v2438_v30  ;;  %v2523_v28 = vld [vmem:[%s2653_s11 + $0x174] ss:$20 sps:$4 sm:$0xff]   ;;  %v2526_v30 = vld [vmem:[%s2653_s11 + $0x170] ss:$20 sps:$4 sm:$0xff]  }
  0x30   : > { %2186 = vmatpush3.bf16.msra.mxu1 %v2440_v31  ;;  %1216 = vmatprep.mubr.bf16.mxu0 %v2443_v32  ;;  %v2527_v31 = vld [vmem:[%s2653_s11 + $0x88] ss:$20 sps:$4 sm:$0xff]  }
  0x31   : > { %2187 = vmatprep.subr.bf16.mxu1 %v2441_v33  ;;  %1312 = vmatprep.mubr.bf16.mxu1 %v2445_v34  ;;  %v2528_v32 = vld [vmem:[%s2653_s11 + $0x19c] ss:$20 sps:$4 sm:$0xff]   ;;  %v2531_v34 = vld [vmem:[%s2653_s11 + $0x198] ss:$20 sps:$4 sm:$0xff]  }
  0x32   : > { %2322 = vmatpush3.bf16.msra.mxu0 %v2463_v38  ;;  %v2530_v33 = vld [vmem:[%s2653_s11 + $0xb0] ss:$20 sps:$4 sm:$0xff]   ;;  %v2536_v38 = vld [vmem:[%s2653_s11 + $0x1c0] ss:$20 sps:$4 sm:$0xff]  }
  0x33   : > { %2323 = vmatprep.subr.bf16.mxu0 %v2477_v45 }
  0x34   : > { %2188 = vmatpush3.bf16.msra.mxu1 %v2442_v35  ;;  %v2532_v35 = vld [vmem:[%s2653_s11 + $0xd8] ss:$20 sps:$4 sm:$0xff]  }
  0x35   : > { %2189 = vmatprep.subr.bf16.mxu1 %v2449_v36  ;;  %v2533_v36 = vld [vmem:[%s2653_s11 + $0x1c4] ss:$20 sps:$4 sm:$0xff]  }
  0x36   : > { %2324 = vmatpush3.bf16.msra.mxu0 %v2477_v45  ;;  %v2545_v45 = vld [vmem:[%s2653_s11 + $0x1a0] ss:$20 sps:$4 sm:$0xff]  }
  0x37   : > { %1217 = vmatmul.mubr.bf16.gmra.mrb[8].mxu0 %v2447_v37  ;;  %1313 = vmatmul.mubr.bf16.gmra.mrb[8].mxu1 %v2448_v39  ;;  %v2535_v37 = vld [vmem:[%s2653_s11 + $0x100] ss:$20 sps:$4 sm:$0xff]   ;;  %v2537_v39 = vld [vmem:[%s2653_s11 + $0x128] ss:$20 sps:$4 sm:$0xff]  }
  0x38   : > { %2190 = vmatpush3.bf16.msra.mxu1 %v2451_v40  ;;  %1224 = vmatprep.mubr.bf16.mxu0 %v2454_v42  ;;  %v2538_v40 = vld [vmem:[%s2653_s11 + $0x1ec] ss:$20 sps:$4 sm:$0xff]   ;;  %v2541_v42 = vld [vmem:[%s2653_s11 + $0x1e8] ss:$20 sps:$4 sm:$0xff]  }
  0x39   : > { %2191 = vmatprep.subr.bf16.mxu1 %v2452_v41  ;;  %1320 = vmatprep.mubr.bf16.mxu1 %v2456_v43  ;;  %v2540_v41 = vld [vmem:[%s2653_s11 + $0x150] ss:$20 sps:$4 sm:$0xff]   ;;  %v2542_v43 = vld [vmem:[%s2653_s11 + $0x178] ss:$20 sps:$4 sm:$0xff]  }
  0x3a   : > { %2325 = vmatprep.subr.bf16.mxu0 %v2484_v52 }
  0x3b   : > { %2326 = vmatpush3.bf16.msra.mxu0 %v2484_v52  ;;  %v2553_v52 = vld [vmem:[%s2653_s11 + $0x264] ss:$20 sps:$4 sm:$0xff]  }
  0x3c   : > { %2192 = vmatpush3.bf16.msra.mxu1 %v2453_v44  ;;  %2327 = vmatprep.subr.bf16.mxu0 %v2497_v57  ;;  %v2543_v44 = vld [vmem:[%s2653_s11 + $0x214] ss:$20 sps:$4 sm:$0xff]  }
  0x3d   : > { %2193 = vmatprep.subr.bf16.mxu1 %v2460_v48  ;;  %v2548_v48 = vld [vmem:[%s2653_s11 + $0x23c] ss:$20 sps:$4 sm:$0xff]  }
  0x3f   : > { %1225 = vmatmul.mubr.bf16.gmra.mrb[12].mxu0 %v2458_v46  ;;  %1321 = vmatmul.mubr.bf16.gmra.mrb[12].mxu1 %v2459_v47  ;;  %v2546_v46 = vld [vmem:[%s2653_s11 + $0x210] ss:$20 sps:$4 sm:$0xff]   ;;  %v2547_v47 = vld [vmem:[%s2653_s11 + $0x1c8] ss:$20 sps:$4 sm:$0xff]  }
  0x40   : > { %2194 = vmatpush3.bf16.msra.mxu1 %v2461_v49  ;;  %1232 = vmatprep.mubr.bf16.mxu0 %v2465_v51  ;;  %v2550_v49 = vld [vmem:[%s2653_s11 + $0x1f0] ss:$20 sps:$4 sm:$0xff]   ;;  %v2552_v51 = vld [vmem:[%s2653_s11 + $0x218] ss:$20 sps:$4 sm:$0xff]  }
  0x41   : > { %2195 = vmatprep.subr.bf16.mxu1 %v2462_v50  ;;  %1361 = vmatprep.mubr.bf16.mxu1 %v2469_v53  ;;  %v2551_v50 = vld [vmem:[%s2653_s11 + $0x238] ss:$20 sps:$4 sm:$0xff]   ;;  %v2555_v53 = vld [vmem:[%s2653_s11 + $0x240] ss:$20 sps:$4 sm:$0xff]  }
  0x42   : > { %2328 = vmatpush3.bf16.msra.mxu0 %v2497_v57 }
  0x43   : > { %2329 = vmatprep.subr.bf16.mxu0 %v2504_v60 }
  0x44   : > { %2196 = vmatpush3.bf16.msra.mxu1 %v2464_v54  ;;  %v2556_v54 = vld [vmem:[%s2653_s11 + $0x260] ss:$20 sps:$4 sm:$0xff]  }
  0x46   : > { %2330 = vmatpush3.bf16.msra.mxu0 %v2504_v60 }
  0x47   : > { %1233 = vmatmul.mubr.bf16.gmra.mrb[16].mxu0 %v2470_v56  ;;  %1362 = vmatmul.mubr.bf16.vlgmr.msra.gmra.mrb[16].mxu1 %v2467_v55  ;;  %v2557_v55 = vld [vmem:[%s2653_s11 + $0x268] ss:$20 sps:$4 sm:$0xff]   ;;  %s1945_s11 = sshll.u32 %s3026_s18, 3 }
  0x48   : > { %1240 = vmatprep.mubr.bf16.mxu0 %v2471_v58  ;;  %1369 = vmatprep.mubr.bf16.mxu1 %v2473_v59  ;;  %s2902_s12 = scalar_lea.vmem %s3020_s3, %s1945_s11 }
  0x49   : > { %2331 = vmatprep.subr.bf16.mxu0 %v2517_v1 }
  0x4a   : > { %2332 = vmatpush3.bf16.msra.mxu0 %v2517_v1 }
  0x4f   : > { %1241 = vmatmul.mubr.bf16.gmra.mrb[20].mxu0 %v2475_v61  ;;  %1370 = vmatmul.mubr.bf16.gmra.mrb[20].mxu1 %v2476_v62 }
  0x50   : > { %1248 = vmatprep.mubr.bf16.mxu0 %v2478_v63  ;;  %1377 = vmatprep.mubr.bf16.mxu1 %v2480_v0 }
  0x57   : > { %1249 = vmatmul.mubr.bf16.gmra.mrb[24].mxu0 %v2482_v2  ;;  %1378 = vmatmul.mubr.bf16.gmra.mrb[24].mxu1 %v2483_v3 }
  0x58   : > { %1256 = vmatprep.mubr.bf16.mxu0 %v2485_v4  ;;  %1385 = vmatprep.mubr.bf16.mxu1 %v2487_v5 }
  0x5f   : > { %1257 = vmatmul.mubr.bf16.gmra.mrb[28].mxu0 %v2489_v6  ;;  %1386 = vmatmul.mubr.bf16.gmra.mrb[28].mxu1 %v2490_v7 }
  0x60   : > { %1264 = vmatprep.mubr.bf16.mxu0 %v2491_v8  ;;  %1393 = vmatprep.mubr.bf16.mxu1 %v2493_v9 }
  0x67   : > { %1265 = vmatmul.mubr.bf16.gmra.mrb[32].mxu0 %v2495_v10  ;;  %1394 = vmatmul.mubr.bf16.gmra.mrb[32].mxu1 %v2496_v11 }
  0x68   : > { %1272 = vmatprep.mubr.bf16.mxu0 %v2498_v12  ;;  %1401 = vmatprep.mubr.bf16.mxu1 %v2500_v13 }
  0x6f   : > { %1273 = vmatmul.mubr.bf16.gmra.mrb[36].mxu0 %v2502_v14  ;;  %1402 = vmatmul.mubr.bf16.gmra.mrb[36].mxu1 %v2503_v15 }
  0x70   : > { %1280 = vmatprep.mubr.bf16.mxu0 %v2505_v16  ;;  %1409 = vmatprep.mubr.bf16.mxu1 %v2507_v17 }
  0x77   : > { %1281 = vmatmul.mubr.bf16.gmra.mrb[40].mxu0 %v2509_v18  ;;  %1410 = vmatmul.mubr.bf16.gmra.mrb[40].mxu1 %v2510_v19 }
  0x78   : > { %1288 = vmatprep.mubr.bf16.mxu0 %v2511_v20  ;;  %1417 = vmatprep.mubr.bf16.mxu1 %v2513_v21 }
  0x7f   : > { %1289 = vmatmul.mubr.bf16.gmra.mrb[44].mxu0 %v2515_v22  ;;  %1418 = vmatmul.mubr.bf16.gmra.mrb[44].mxu1 %v2516_v23 }
  0x80   : > { %1425 = vmatprep.mubr.bf16.mxu1 %v2518_v24  ;;  %2333 = vmatprep.mubr.bf16.mxu0 %v2520_v25 }
  0x87   : > { %1426 = vmatmul.mubr.bf16.gmra.mrb[48].mxu1 %v2521_v26  ;;  %2334 = vmatmul.mubr.bf16.vlgmr.msra.gmra.mrb[48].mxu0 %v2522_v27 }
  0x88   : > { %1433 = vmatprep.mubr.bf16.mxu1 %v2523_v28  ;;  %2337 = vmatprep.mubr.bf16.mxu0 %v2525_v29 }
  0x8f   : > { %1434 = vmatmul.mubr.bf16.gmra.mrb[52].mxu1 %v2526_v30  ;;  %2338 = vmatmul.mubr.bf16.gmra.mrb[52].mxu0 %v2527_v31 }
  0x90   : > { %1441 = vmatprep.mubr.bf16.mxu1 %v2528_v32  ;;  %2341 = vmatprep.mubr.bf16.mxu0 %v2530_v33 }
  0x97   : > { %1442 = vmatmul.mubr.bf16.gmra.mrb[56].mxu1 %v2531_v34  ;;  %2342 = vmatmul.mubr.bf16.gmra.mrb[56].mxu0 %v2532_v35 }
  0x98   : > { %1449 = vmatprep.mubr.bf16.mxu1 %v2533_v36  ;;  %2345 = vmatprep.mubr.bf16.mxu0 %v2535_v37 }
  0x9f   : > { %1450 = vmatmul.mubr.bf16.gmra.mrb[60].mxu1 %v2536_v38  ;;  %2346 = vmatmul.mubr.bf16.gmra.mrb[60].mxu0 %v2537_v39 }
  0xa0   : > { %1457 = vmatprep.mubr.bf16.mxu1 %v2538_v40  ;;  %2349 = vmatprep.mubr.bf16.mxu0 %v2540_v41 }
  0xa7   : > { %1458 = vmatmul.mubr.bf16.gmra.mrb[64].mxu1 %v2541_v42  ;;  %2350 = vmatmul.mubr.bf16.gmra.mrb[64].mxu0 %v2542_v43 }
  0xa8   : > { %1465 = vmatprep.mubr.bf16.mxu1 %v2543_v44  ;;  %2353 = vmatprep.mubr.bf16.mxu0 %v2545_v45 }
  0xaf   : > { %1466 = vmatmul.mubr.bf16.gmra.mrb[68].mxu1 %v2546_v46  ;;  %2354 = vmatmul.mubr.bf16.gmra.mrb[68].mxu0 %v2547_v47 }
  0xb0   : > { %1473 = vmatprep.mubr.bf16.mxu1 %v2548_v48  ;;  %2357 = vmatprep.mubr.bf16.mxu0 %v2550_v49 }
  0xb7   : > { %1474 = vmatmul.mubr.bf16.gmra.mrb[72].mxu1 %v2551_v50  ;;  %2358 = vmatmul.mubr.bf16.gmra.mrb[72].mxu0 %v2552_v51 }
  0xb8   : > { %1481 = vmatprep.mubr.bf16.mxu1 %v2553_v52  ;;  %2361 = vmatprep.mubr.bf16.mxu0 %v2555_v53 }
  0xbf   : > { %1482 = vmatmul.mubr.bf16.gmra.mrb[76].mxu1 %v2556_v54  ;;  %2362 = vmatmul.mubr.bf16.gmra.mrb[76].mxu0 %v2557_v55 }
  0xfa   : > { %v2157_v56 = vpop.f32.mrb[0].mxu1  ;;  %v2085_v57 = vpop.f32.mrb[0].mxu0 }
  0xfb   : > { %v2158_v58 = vpop.f32.mrb[1].mxu1  ;;  %v2086_v59 = vpop.f32.mrb[1].mxu0 }
  0xfc   : > { %v2828_v60 = vadd.f32 %v2158_v58, %v2157_v56  ;;  %v2160_v61 = vpop.f32.mrb[2].mxu1  ;;  %v2087_v62 = vadd.f32 %v2086_v59, %v2085_v57  ;;  %v2088_v63 = vpop.f32.mrb[2].mxu0 }
  0xfd   : > { %v2161_v0 = vpop.f32.mrb[3].mxu1  ;;  %v2089_v1 = vpop.f32.mrb[3].mxu0 }
  0xfe   : > { %v2830_v2 = vadd.f32 %v2161_v0, %v2160_v61  ;;  %v2090_v3 = vadd.f32 %v2089_v1, %v2088_v63 }
 0x102   : > { %v2163_v4 = vpop.f32.mrb[4].mxu1  ;;  %v2091_v5 = vpop.f32.mrb[4].mxu0 }
 0x103   : > { %v2164_v6 = vpop.f32.mrb[5].mxu1  ;;  %v2092_v7 = vpop.f32.mrb[5].mxu0 }
 0x104   : > { %v2832_v8 = vadd.f32 %v2164_v6, %v2163_v4  ;;  %v2166_v9 = vpop.f32.mrb[6].mxu1  ;;  %v2093_v10 = vadd.f32 %v2092_v7, %v2091_v5  ;;  %v2094_v11 = vpop.f32.mrb[6].mxu0 }
 0x105   : > { %v2167_v12 = vpop.f32.mrb[7].mxu1  ;;  %v2095_v13 = vpop.f32.mrb[7].mxu0 }
 0x106   : > { %v2834_v14 = vadd.f32 %v2167_v12, %v2166_v9  ;;  %v2096_v15 = vadd.f32 %v2095_v13, %v2094_v11 }
 0x10a   : > { %v2169_v16 = vpop.f32.mrb[8].mxu1  ;;  %v2097_v17 = vpop.f32.mrb[8].mxu0 }
 0x10b   : > { %v2170_v18 = vpop.f32.mrb[9].mxu1  ;;  %v2098_v19 = vpop.f32.mrb[9].mxu0 }
 0x10c   : > { %v2836_v20 = vadd.f32 %v2170_v18, %v2169_v16  ;;  %v2172_v21 = vpop.f32.mrb[10].mxu1  ;;  %v2099_v22 = vadd.f32 %v2098_v19, %v2097_v17  ;;  %v2100_v23 = vpop.f32.mrb[10].mxu0 }
 0x10d   : > { %v2173_v24 = vpop.f32.mrb[11].mxu1  ;;  %v2101_v25 = vpop.f32.mrb[11].mxu0 }
 0x10e   : > { %v2838_v26 = vadd.f32 %v2173_v24, %v2172_v21  ;;  %v2102_v27 = vadd.f32 %v2101_v25, %v2100_v23 }
 0x112   : > { %v2175_v28 = vpop.f32.mrb[12].mxu1  ;;  %v2103_v29 = vpop.f32.mrb[12].mxu0 }
 0x113   : > { %v2176_v30 = vpop.f32.mrb[13].mxu1  ;;  %v2104_v31 = vpop.f32.mrb[13].mxu0 }
 0x114   : > { %v2840_v32 = vadd.f32 %v2176_v30, %v2175_v28  ;;  %v2178_v33 = vpop.f32.mrb[14].mxu1  ;;  %v2105_v34 = vadd.f32 %v2104_v31, %v2103_v29  ;;  %v2106_v35 = vpop.f32.mrb[14].mxu0 }
 0x115   : > { %v2179_v36 = vpop.f32.mrb[15].mxu1  ;;  %v2107_v37 = vpop.f32.mrb[15].mxu0 }
 0x116   : > { %v2842_v38 = vadd.f32 %v2179_v36, %v2178_v33  ;;  %v2108_v39 = vadd.f32 %v2107_v37, %v2106_v35 }
 0x11a   : > { %v2197_v40 = vpop.f32.mrb[16].mxu1  ;;  %v2109_v41 = vpop.f32.mrb[16].mxu0 }
 0x11b   : > { %v2198_v42 = vpop.f32.mrb[17].mxu1  ;;  %v2110_v43 = vpop.f32.mrb[17].mxu0 }
 0x11c   : > { %v2199_v44 = vadd.f32 %v2198_v42, %v2197_v40  ;;  %v2200_v45 = vpop.f32.mrb[18].mxu1  ;;  %v2111_v46 = vadd.f32 %v2110_v43, %v2109_v41  ;;  %v2112_v47 = vpop.f32.mrb[18].mxu0 }
 0x11d   : > { %v2201_v48 = vpop.f32.mrb[19].mxu1  ;;  %v2113_v49 = vpop.f32.mrb[19].mxu0 }
 0x11e   : > { %v2202_v50 = vadd.f32 %v2201_v48, %v2200_v45  ;;  %v2114_v51 = vadd.f32 %v2113_v49, %v2112_v47  ;;  %v2844_v52 = vadd.f32 %v2199_v44, %v2087_v62 }
 0x120   : > { %v2846_v53 = vadd.f32 %v2202_v50, %v2090_v3 }
 0x122   : > { %v2203_v54 = vpop.f32.mrb[20].mxu1  ;;  %v2115_v55 = vpop.f32.mrb[20].mxu0 }
 0x123   : > { %v2204_v56 = vpop.f32.mrb[21].mxu1  ;;  %v2116_v57 = vpop.f32.mrb[21].mxu0 }
 0x124   : > { %v2205_v58 = vadd.f32 %v2204_v56, %v2203_v54  ;;  %v2206_v59 = vpop.f32.mrb[22].mxu1  ;;  %v2117_v61 = vadd.f32 %v2116_v57, %v2115_v55  ;;  %v2118_v63 = vpop.f32.mrb[22].mxu0 }
 0x125   : > { %v2207_v0 = vpop.f32.mrb[23].mxu1  ;;  %v2119_v1 = vpop.f32.mrb[23].mxu0 }
 0x126   : > { %v2208_v4 = vadd.f32 %v2207_v0, %v2206_v59  ;;  %v2120_v5 = vadd.f32 %v2119_v1, %v2118_v63  ;;  %v2848_v6 = vadd.f32 %v2205_v58, %v2093_v10 }
 0x128   : > { %v2850_v7 = vadd.f32 %v2208_v4, %v2096_v15 }
 0x12a   : > { %v2209_v62 = vpop.f32.mrb[24].mxu1  ;;  %v2121_v9 = vpop.f32.mrb[24].mxu0 }
 0x12b   : > { %v2210_v3 = vpop.f32.mrb[25].mxu1  ;;  %v2122_v11 = vpop.f32.mrb[25].mxu0 }
 0x12c   : > { %v2211_v12 = vadd.f32 %v2210_v3, %v2209_v62  ;;  %v2212_v13 = vpop.f32.mrb[26].mxu1  ;;  %v2123_v16 = vadd.f32 %v2122_v11, %v2121_v9  ;;  %v2124_v17 = vpop.f32.mrb[26].mxu0 }
 0x12d   : > { %v2213_v18 = vpop.f32.mrb[27].mxu1  ;;  %v2125_v19 = vpop.f32.mrb[27].mxu0 }
 0x12e   : > { %v2214_v21 = vadd.f32 %v2213_v18, %v2212_v13  ;;  %v2126_v23 = vadd.f32 %v2125_v19, %v2124_v17  ;;  %v2852_v24 = vadd.f32 %v2211_v12, %v2099_v22 }
 0x130   : > { %v2854_v25 = vadd.f32 %v2214_v21, %v2102_v27 }
 0x132   : > { %v2215_v10 = vpop.f32.mrb[28].mxu1  ;;  %v2127_v28 = vpop.f32.mrb[28].mxu0 }
 0x133   : > { %v2216_v15 = vpop.f32.mrb[29].mxu1  ;;  %v2128_v29 = vpop.f32.mrb[29].mxu0 }
 0x134   : > { %v2217_v30 = vadd.f32 %v2216_v15, %v2215_v10  ;;  %v2218_v31 = vpop.f32.mrb[30].mxu1  ;;  %v2129_v33 = vadd.f32 %v2128_v29, %v2127_v28  ;;  %v2130_v35 = vpop.f32.mrb[30].mxu0 }
 0x135   : > { %v2219_v36 = vpop.f32.mrb[31].mxu1  ;;  %v2131_v37 = vpop.f32.mrb[31].mxu0 }
 0x136   : > { %v2220_v40 = vadd.f32 %v2219_v36, %v2218_v31  ;;  %v2132_v41 = vadd.f32 %v2131_v37, %v2130_v35  ;;  %v2856_v42 = vadd.f32 %v2217_v30, %v2105_v34 }
 0x138   : > { %v2858_v43 = vadd.f32 %v2220_v40, %v2108_v39 }
 0x13a   : > { %v2221_v22 = vpop.f32.mrb[32].mxu1  ;;  %v2133_v44 = vpop.f32.mrb[32].mxu0 }
 0x13b   : > { %v2222_v27 = vpop.f32.mrb[33].mxu1  ;;  %v2134_v45 = vpop.f32.mrb[33].mxu0 }
 0x13c   : > { %v2223_v47 = vadd.f32 %v2222_v27, %v2221_v22  ;;  %v2224_v48 = vpop.f32.mrb[34].mxu1  ;;  %v2860_v49 = vadd.f32 %v2134_v45, %v2133_v44  ;;  %v2136_v50 = vpop.f32.mrb[34].mxu0 }
 0x13d   : > { %v2225_v54 = vpop.f32.mrb[35].mxu1  ;;  %v2137_v55 = vpop.f32.mrb[35].mxu0 }
 0x13e   : > { %v2226_v56 = vadd.f32 %v2225_v54, %v2224_v48  ;;  %v2862_v57 = vadd.f32 %v2137_v55, %v2136_v50  ;;  %v2864_v58 = vadd.f32 %v2223_v47, %v2111_v46 }
 0x140   : > { %v2866_v34 = vadd.f32 %v2226_v56, %v2114_v51 }
 0x142   : > { %v2227_v39 = vpop.f32.mrb[36].mxu1  ;;  %v2139_v59 = vpop.f32.mrb[36].mxu0 }
 0x143   : > { %v2228_v63 = vpop.f32.mrb[37].mxu1  ;;  %v2140_v0 = vpop.f32.mrb[37].mxu0 }
 0x144   : > { %v2229_v1 = vadd.f32 %v2228_v63, %v2227_v39  ;;  %v2230_v4 = vpop.f32.mrb[38].mxu1  ;;  %v2868_v62 = vadd.f32 %v2140_v0, %v2139_v59  ;;  %v2142_v9 = vpop.f32.mrb[38].mxu0  ;;  %v2896_v63 = vld [vmem:[%s3019_s2] ss:$0 sm:$0xff] }
 0x145   : > { %v2231_v3 = vpop.f32.mrb[39].mxu1  ;;  %v2143_v11 = vpop.f32.mrb[39].mxu0 }
 0x146   : > { %v2232_v12 = vadd.f32 %v2231_v3, %v2230_v4  ;;  %v2870_v13 = vadd.f32 %v2143_v11, %v2142_v9  ;;  %v2872_v17 = vadd.f32 %v2229_v1, %v2117_v61 }
 0x148   : > { %v2874_v46 = vadd.f32 %v2232_v12, %v2120_v5 }
 0x14a   : > { %v2233_v51 = vpop.f32.mrb[40].mxu1  ;;  %v2145_v18 = vpop.f32.mrb[40].mxu0 }
 0x14b   : > { %v2234_v19 = vpop.f32.mrb[41].mxu1  ;;  %v2146_v21 = vpop.f32.mrb[41].mxu0 }
 0x14c   : > { %v2235_v10 = vadd.f32 %v2234_v19, %v2233_v51  ;;  %v2236_v28 = vpop.f32.mrb[42].mxu1  ;;  %v2876_v15 = vadd.f32 %v2146_v21, %v2145_v18  ;;  %v2148_v29 = vpop.f32.mrb[42].mxu0 }
 0x14d   : > { %v2237_v30 = vpop.f32.mrb[43].mxu1  ;;  %v2149_v31 = vpop.f32.mrb[43].mxu0 }
 0x14e   : > { %v2238_v35 = vadd.f32 %v2237_v30, %v2236_v28  ;;  %v2878_v36 = vadd.f32 %v2149_v31, %v2148_v29  ;;  %v2880_v37 = vadd.f32 %v2235_v10, %v2123_v16 }
 0x150   : > { %v2882_v61 = vadd.f32 %v2238_v35, %v2126_v23 }
 0x152   : > { %v2239_v5 = vpop.f32.mrb[44].mxu1  ;;  %v2151_v40 = vpop.f32.mrb[44].mxu0 }
 0x153   : > { %v2240_v22 = vpop.f32.mrb[45].mxu1  ;;  %v2152_v44 = vpop.f32.mrb[45].mxu0 }
 0x154   : > { %v2241_v27 = vadd.f32 %v2240_v22, %v2239_v5  ;;  %v2242_v45 = vpop.f32.mrb[46].mxu1  ;;  %v2884_v47 = vadd.f32 %v2152_v44, %v2151_v40  ;;  %v2154_v48 = vpop.f32.mrb[46].mxu0 }
 0x155   : > { %v2243_v50 = vpop.f32.mrb[47].mxu1  ;;  %v2155_v54 = vpop.f32.mrb[47].mxu0 }
 0x156   : > { %v2244_v55 = vadd.f32 %v2243_v50, %v2242_v45  ;;  %v2886_v56 = vadd.f32 %v2155_v54, %v2154_v48  ;;  %v2888_v39 = vadd.f32 %v2241_v27, %v2129_v33 }
 0x158   : > { %v2890_v16 = vadd.f32 %v2244_v55, %v2132_v41 }
 0x15a   : > { %v2245_v23 = vpop.f32.mrb[48].mxu1  ;;  %v2335_v59 = vpop.f32.mrb[48].mxu0 }
 0x15b   : > { %v1533_v0 = vadd.f32 %v2335_v59, %v2848_v6  ;;  %v2246_v1 = vpop.f32.mrb[49].mxu1  ;;  %v1524_v4 = vpop.f32.mrb[49].mxu0 }
 0x15c   : > { %v2247_v33 = vadd.f32 %v2246_v1, %v2245_v23  ;;  %v1525_v41 = vadd.f32 %v1524_v4, %v2844_v52  ;;  %v2248_v9 = vpop.f32.mrb[50].mxu1  ;;  %v2336_v3 = vpop.f32.mrb[50].mxu0 }
 0x15d   : > { %v1759_v11 = vadd.f32 %v2896_v63, %v1533_v0  ;;  %v1536_v6 = vadd.f32 %v2336_v3, %v2850_v7  ;;  %v2249_v12 = vpop.f32.mrb[51].mxu1  ;;  %v1527_v51 = vpop.f32.mrb[51].mxu0 }
 0x15e   : > { %v1757_v18 = vadd.f32 %v2896_v63, %v1525_v41  ;;  %v2250_v19 = vadd.f32 %v2249_v12, %v2248_v9  ;;  %v1528_v21 = vadd.f32 %v1527_v51, %v2846_v53  ;;  %v2910_v10 = vadd.f32 %v2247_v33, %v2860_v49 }
 0x15f   : > { %1791 = vst [vmem:[%s2902_s12 + $0x10] sm:$0xff] %v1759_v11  ;;  %v1760_v52 = vadd.f32 %v2896_v63, %v1536_v6 }
 0x160   : > { %1789 = vst [vmem:[%s2902_s12] sm:$0xff] %v1757_v18  ;;  %v1758_v28 = vadd.f32 %v2896_v63, %v1528_v21  ;;  %v2917_v29 = vadd.f32 %v2250_v19, %v2862_v57 }
 0x161   : > { %1792 = vst [vmem:[%s2902_s12 + $0x18] sm:$0xff] %v1760_v52 }
 0x162   : > { %1790 = vst [vmem:[%s2902_s12 + $0x8] sm:$0xff] %v1758_v28  ;;  %v2251_v7 = vpop.f32.mrb[52].mxu1  ;;  %v2339_v30 = vpop.f32.mrb[52].mxu0 }
 0x163   : > { %v1549_v31 = vadd.f32 %v2339_v30, %v2856_v42  ;;  %v2252_v53 = vpop.f32.mrb[53].mxu1  ;;  %v1540_v49 = vpop.f32.mrb[53].mxu0 }
 0x164   : > { %v2253_v35 = vadd.f32 %v2252_v53, %v2251_v7  ;;  %v1541_v5 = vadd.f32 %v1540_v49, %v2852_v24  ;;  %v2254_v40 = vpop.f32.mrb[54].mxu1  ;;  %v2340_v22 = vpop.f32.mrb[54].mxu0 }
 0x165   : > { %v1763_v57 = vadd.f32 %v2896_v63, %v1549_v31  ;;  %v1552_v44 = vadd.f32 %v2340_v22, %v2858_v43  ;;  %v2255_v27 = vpop.f32.mrb[55].mxu1  ;;  %v1543_v45 = vpop.f32.mrb[55].mxu0 }
 0x166   : > { %v1761_v48 = vadd.f32 %v2896_v63, %v1541_v5  ;;  %v2256_v50 = vadd.f32 %v2255_v27, %v2254_v40  ;;  %v1544_v42 = vadd.f32 %v1543_v45, %v2854_v25  ;;  %v1436_v54 = vadd.f32 %v2253_v35, %v2868_v62 }
 0x167   : > { %1795 = vst [vmem:[%s2902_s12 + $0x30] sm:$0xff] %v1763_v57  ;;  %v1764_v24 = vadd.f32 %v2896_v63, %v1552_v44 }
 0x168   : > { %1793 = vst [vmem:[%s2902_s12 + $0x20] sm:$0xff] %v1761_v48  ;;  %v1762_v55 = vadd.f32 %v2896_v63, %v1544_v42  ;;  %v1439_v23 = vadd.f32 %v2256_v50, %v2870_v13 }
 0x169   : > { %1796 = vst [vmem:[%s2902_s12 + $0x38] sm:$0xff] %v1764_v24 }
 0x16a   : > { %1794 = vst [vmem:[%s2902_s12 + $0x28] sm:$0xff] %v1762_v55  ;;  %v2257_v43 = vpop.f32.mrb[56].mxu1  ;;  %v2343_v59 = vpop.f32.mrb[56].mxu0 }
 0x16b   : > { %v1565_v0 = vadd.f32 %v2343_v59, %v2872_v17  ;;  %v2258_v1 = vpop.f32.mrb[57].mxu1  ;;  %v1556_v25 = vpop.f32.mrb[57].mxu0 }
 0x16c   : > { %v2259_v4 = vadd.f32 %v2258_v1, %v2257_v43  ;;  %v1557_v62 = vadd.f32 %v1556_v25, %v2864_v58  ;;  %v2260_v33 = vpop.f32.mrb[58].mxu1  ;;  %v2344_v41 = vpop.f32.mrb[58].mxu0 }
 0x16d   : > { %v1767_v9 = vadd.f32 %v2896_v63, %v1565_v0  ;;  %v1568_v13 = vadd.f32 %v2344_v41, %v2874_v46  ;;  %v2261_v3 = vpop.f32.mrb[59].mxu1  ;;  %v1559_v11 = vpop.f32.mrb[59].mxu0 }
 0x16e   : > { %v1765_v6 = vadd.f32 %v2896_v63, %v1557_v62  ;;  %v2262_v12 = vadd.f32 %v2261_v3, %v2260_v33  ;;  %v1560_v17 = vadd.f32 %v1559_v11, %v2866_v34  ;;  %v1444_v51 = vadd.f32 %v2259_v4, %v2876_v15 }
 0x16f   : > { %1799 = vst [vmem:[%s2902_s12 + $0x50] sm:$0xff] %v1767_v9  ;;  %v1768_v58 = vadd.f32 %v2896_v63, %v1568_v13 }
 0x170   : > { %1797 = vst [vmem:[%s2902_s12 + $0x40] sm:$0xff] %v1765_v6  ;;  %v1766_v18 = vadd.f32 %v2896_v63, %v1560_v17  ;;  %v2947_v19 = vadd.f32 %v2262_v12, %v2878_v36 }
 0x171   : > { %1800 = vst [vmem:[%s2902_s12 + $0x58] sm:$0xff] %v1768_v58 }
 0x172   : > { %1798 = vst [vmem:[%s2902_s12 + $0x48] sm:$0xff] %v1766_v18  ;;  %v2263_v46 = vpop.f32.mrb[60].mxu1  ;;  %v2347_v21 = vpop.f32.mrb[60].mxu0 }
 0x173   : > { %v1581_v52 = vadd.f32 %v2347_v21, %v2888_v39  ;;  %v2264_v28 = vpop.f32.mrb[61].mxu1  ;;  %v1572_v34 = vpop.f32.mrb[61].mxu0 }
 0x174   : > { %v2265_v15 = vadd.f32 %v2264_v28, %v2263_v46  ;;  %v1573_v7 = vadd.f32 %v1572_v34, %v2880_v37  ;;  %v2266_v30 = vpop.f32.mrb[62].mxu1  ;;  %v2348_v31 = vpop.f32.mrb[62].mxu0 }
 0x175   : > { %v1771_v36 = vadd.f32 %v2896_v63, %v1581_v52  ;;  %v1584_v53 = vadd.f32 %v2348_v31, %v2890_v16  ;;  %v2267_v49 = vpop.f32.mrb[63].mxu1  ;;  %v1575_v35 = vpop.f32.mrb[63].mxu0 }
 0x176   : > { %v1769_v5 = vadd.f32 %v2896_v63, %v1573_v7  ;;  %v2268_v40 = vadd.f32 %v2267_v49, %v2266_v30  ;;  %v1576_v39 = vadd.f32 %v1575_v35, %v2882_v61  ;;  %v1452_v22 = vadd.f32 %v2265_v15, %v2884_v47 }
 0x177   : > { %1803 = vst [vmem:[%s2902_s12 + $0x70] sm:$0xff] %v1771_v36  ;;  %v1772_v37 = vadd.f32 %v2896_v63, %v1584_v53 }
 0x178   : > { %1801 = vst [vmem:[%s2902_s12 + $0x60] sm:$0xff] %v1769_v5  ;;  %v1770_v57 = vadd.f32 %v2896_v63, %v1576_v39  ;;  %v1455_v44 = vadd.f32 %v2268_v40, %v2886_v56 }
 0x179   : > { %1804 = vst [vmem:[%s2902_s12 + $0x78] sm:$0xff] %v1772_v37 }
 0x17a   : > { %1802 = vst [vmem:[%s2902_s12 + $0x68] sm:$0xff] %v1770_v57  ;;  %v2269_v16 = vpop.f32.mrb[64].mxu1  ;;  %v2351_v27 = vpop.f32.mrb[64].mxu0 }
 0x17b   : > { %v1597_v45 = vadd.f32 %v2351_v27, %v1436_v54  ;;  %v2270_v48 = vpop.f32.mrb[65].mxu1  ;;  %v1588_v50 = vpop.f32.mrb[65].mxu0 }
 0x17c   : > { %v2271_v61 = vadd.f32 %v2270_v48, %v2269_v16  ;;  %v1589_v47 = vadd.f32 %v1588_v50, %v2910_v10  ;;  %v2272_v42 = vpop.f32.mrb[66].mxu1  ;;  %v2352_v24 = vpop.f32.mrb[66].mxu0 }
 0x17d   : > { %v1775_v55 = vadd.f32 %v2896_v63, %v1597_v45  ;;  %v1600_v43 = vadd.f32 %v2352_v24, %v1439_v23  ;;  %v2273_v56 = vpop.f32.mrb[67].mxu1  ;;  %v1591_v59 = vpop.f32.mrb[67].mxu0 }
 0x17e   : > { %v1773_v0 = vadd.f32 %v2896_v63, %v1589_v47  ;;  %v2274_v1 = vadd.f32 %v2273_v56, %v2272_v42  ;;  %v1592_v54 = vadd.f32 %v1591_v59, %v2917_v29  ;;  %v1460_v25 = vadd.f32 %v2271_v61, %v2828_v60 }
 0x17f   : > { %1807 = vst [vmem:[%s2902_s12 + $0x90] sm:$0xff] %v1775_v55  ;;  %v1776_v4 = vadd.f32 %v2896_v63, %v1600_v43 }
 0x180   : > { %1805 = vst [vmem:[%s2902_s12 + $0x80] sm:$0xff] %v1773_v0  ;;  %v1774_v10 = vadd.f32 %v2896_v63, %v1592_v54  ;;  %v1463_v62 = vadd.f32 %v2274_v1, %v2830_v2 }
 0x181   : > { %1808 = vst [vmem:[%s2902_s12 + $0x98] sm:$0xff] %v1776_v4 }
 0x182   : > { %1806 = vst [vmem:[%s2902_s12 + $0x88] sm:$0xff] %v1774_v10  ;;  %v2275_v23 = vpop.f32.mrb[68].mxu1  ;;  %v2355_v33 = vpop.f32.mrb[68].mxu0 }
 0x183   : > { %v1613_v41 = vadd.f32 %v2355_v33, %v1452_v22  ;;  %v2276_v9 = vpop.f32.mrb[69].mxu1  ;;  %v1604_v13 = vpop.f32.mrb[69].mxu0 }
 0x184   : > { %v2277_v29 = vadd.f32 %v2276_v9, %v2275_v23  ;;  %v1605_v3 = vadd.f32 %v1604_v13, %v1444_v51  ;;  %v2278_v60 = vpop.f32.mrb[70].mxu1  ;;  %v2356_v11 = vpop.f32.mrb[70].mxu0 }
 0x185   : > { %v1779_v6 = vadd.f32 %v2896_v63, %v1613_v41  ;;  %v1616_v12 = vadd.f32 %v2356_v11, %v1455_v44  ;;  %v2279_v17 = vpop.f32.mrb[71].mxu1  ;;  %v1607_v2 = vpop.f32.mrb[71].mxu0 }
 0x186   : > { %v1777_v58 = vadd.f32 %v2896_v63, %v1605_v3  ;;  %v2280_v18 = vadd.f32 %v2279_v17, %v2278_v60  ;;  %v1608_v46 = vadd.f32 %v1607_v2, %v2947_v19  ;;  %v1468_v21 = vadd.f32 %v2277_v29, %v2832_v8 }
 0x187   : > { %1811 = vst [vmem:[%s2902_s12 + $0xb0] sm:$0xff] %v1779_v6  ;;  %v1780_v52 = vadd.f32 %v2896_v63, %v1616_v12 }
 0x188   : > { %1809 = vst [vmem:[%s2902_s12 + $0xa0] sm:$0xff] %v1777_v58  ;;  %v1778_v51 = vadd.f32 %v2896_v63, %v1608_v46  ;;  %v1471_v28 = vadd.f32 %v2280_v18, %v2834_v14 }
 0x189   : > { %1812 = vst [vmem:[%s2902_s12 + $0xb8] sm:$0xff] %v1780_v52 }
 0x18a   : > { %1810 = vst [vmem:[%s2902_s12 + $0xa8] sm:$0xff] %v1778_v51  ;;  %v2281_v34 = vpop.f32.mrb[72].mxu1  ;;  %v2359_v15 = vpop.f32.mrb[72].mxu0 }
 0x18b   : > { %v1629_v7 = vadd.f32 %v2359_v15, %v1468_v21  ;;  %v2282_v30 = vpop.f32.mrb[73].mxu1  ;;  %v1620_v31 = vpop.f32.mrb[73].mxu0 }
 0x18c   : > { %v2283_v19 = vadd.f32 %v2282_v30, %v2281_v34  ;;  %v1621_v36 = vadd.f32 %v1620_v31, %v1460_v25  ;;  %v2284_v8 = vpop.f32.mrb[74].mxu1  ;;  %v2360_v53 = vpop.f32.mrb[74].mxu0 }
 0x18d   : > { %v1783_v49 = vadd.f32 %v2896_v63, %v1629_v7  ;;  %v1632_v35 = vadd.f32 %v2360_v53, %v1471_v28  ;;  %v2285_v5 = vpop.f32.mrb[75].mxu1  ;;  %v1623_v14 = vpop.f32.mrb[75].mxu0 }
 0x18e   : > { %v1781_v40 = vadd.f32 %v2896_v63, %v1621_v36  ;;  %v2286_v39 = vadd.f32 %v2285_v5, %v2284_v8  ;;  %v1624_v22 = vadd.f32 %v1623_v14, %v1463_v62  ;;  %v1476_v37 = vadd.f32 %v2283_v19, %v2836_v20 }
 0x18f   : > { %1815 = vst [vmem:[%s2902_s12 + $0xd0] sm:$0xff] %v1783_v49  ;;  %v1784_v57 = vadd.f32 %v2896_v63, %v1632_v35 }
 0x190   : > { %1813 = vst [vmem:[%s2902_s12 + $0xc0] sm:$0xff] %v1781_v40  ;;  %v1782_v44 = vadd.f32 %v2896_v63, %v1624_v22  ;;  %v1479_v16 = vadd.f32 %v2286_v39, %v2838_v26 }
 0x191   : > { %1816 = vst [vmem:[%s2902_s12 + $0xd8] sm:$0xff] %v1784_v57 }
 0x192   : > { %1814 = vst [vmem:[%s2902_s12 + $0xc8] sm:$0xff] %v1782_v44  ;;  %v2287_v27 = vpop.f32.mrb[76].mxu1  ;;  %v2363_v45 = vpop.f32.mrb[76].mxu0 }
 0x193   : > { %v2288_v48 = vpop.f32.mrb[77].mxu1  ;;  %v1636_v50 = vpop.f32.mrb[77].mxu0 }
 0x194   : > { %v2289_v61 = vadd.f32 %v2288_v48, %v2287_v27  ;;  %v1637_v47 = vadd.f32 %v1636_v50, %v1476_v37  ;;  %v2290_v20 = vpop.f32.mrb[78].mxu1  ;;  %v2364_v42 = vpop.f32.mrb[78].mxu0 }
 0x195   : > { %v2291_v24 = vpop.f32.mrb[79].mxu1  ;;  %v1639_v55 = vpop.f32.mrb[79].mxu0 }
 0x196   : > { %v1484_v43 = vadd.f32 %v2289_v61, %v2840_v32  ;;  %v1785_v26 = vadd.f32 %v2896_v63, %v1637_v47  ;;  %v2292_v56 = vadd.f32 %v2291_v24, %v2290_v20  ;;  %v1640_v59 = vadd.f32 %v1639_v55, %v1479_v16 }
 0x198   : > { %v1645_v0 = vadd.f32 %v2363_v45, %v1484_v43  ;;  %1817 = vst [vmem:[%s2902_s12 + $0xe0] sm:$0xff] %v1785_v26  ;;  %v1487_v1 = vadd.f32 %v2292_v56, %v2842_v38  ;;  %v1786_v54 = vadd.f32 %v2896_v63, %v1640_v59 }
 0x19a   : > { %v1787_v25 = vadd.f32 %v2896_v63, %v1645_v0  ;;  %v1648_v4 = vadd.f32 %v2364_v42, %v1487_v1  ;;  %1818 = vst [vmem:[%s2902_s12 + $0xe8] sm:$0xff] %v1786_v54 }
 0x19c   : > { %1819 = vst [vmem:[%s2902_s12 + $0xf0] sm:$0xff] %v1787_v25  ;;  %v1788_v10 = vadd.f32 %v2896_v63, %v1648_v4 }
 0x19e   : > { %1820 = vst [vmem:[%s2902_s12 + $0xf8] sm:$0xff] %v1788_v10 }
 0x19f PF: > { %s13_s14 = sadd.s32 1, %s2580_s14   ;;  %s3021_s12 = smov %s2576_s13 }
 0x1a0   : > { %p10_p5 = scmp.ge.s32.totalorder %s13_s14, 4   ;;  %s3022_s13 = smov %s3024_s15 }
 0x1a2   :  { %12 = sbr.rel (!%p10_p5) target bundleno = 2 (0x2), region = 76 }

// kernel: _lambda_.111
= control target key start
LH: loop header
LB: loop body
LE: loop exit
PB: predicated region body
PF: predicated region fallthrough
CT: control target
= control target key end

     0   :  { %s1897_s12 = smov 0   ;;  %s1899_s13 = smov 0   ;;  %s2151_s0 = inlined_call_operand.vmem [shape: bf16[512,384], index: 0, kind: input, shape index: {}]   ;;  %s2152_s1 = inlined_call_operand.vmem [shape: bf16[384,128], index: 1, kind: input, shape index: {}]   ;;  %s2153_s2 = inlined_call_operand.vmem [shape: f32[1,128], index: 2, kind: input, shape index: {}]   ;;  %s2154_s3 = inlined_call_operand.vmem [shape: f32[512,128], index: 3, kind: output, shape index: {}]  }
   0x1   :  { %s1901_s14 = smov 0  }
   0x2 LB: > { %s32_s15 = sadd.s32 1, %s1871_s13  ;;  %p1460_p0 = scmp.ge.s32.totalorder %s1875_s14, 1  ;;  %s1875_s14 = sphi %s1901_s14, %s13_s14   ;;  %s1871_s13 = sphi %s1899_s13, %s2156_s13   ;;  %s1867_s12 = sphi %s1897_s12, %s2155_s12  }
   0x3   : > { %p34_p1 = scmp.ge.s32.totalorder %s32_s15, 2  ;;  %p191_p2 = scmp.lt.s32.totalorder %s1875_s14, 3 }
   0x5   : > { %s2158_s15 = smov (%p34_p1, %s32_s15), 0  ;;  %p192_p3 = pnand %p1460_p0, %p191_p2 }
   0x6   : > { %v1765_v0 = vld [vmem:[%s2152_s1 + $0x40] sm:$0xff] (!%p192_p3)   ;;  %s1461_s18 = sshll.u32 (!%p192_p3), %s1867_s12, 5  ;;  %v1767_v2 = vld [vmem:[%s2152_s1 + $0x48] sm:$0xff] (!%p192_p3)   ;;  %v1769_v4 = vld [vmem:[%s2152_s1 + $0x50] sm:$0xff] (!%p192_p3)  }
   0x7   : > { %195 = sbr.rel (%p192_p3) target bundleno = 349 (0x15d), region = 32  ;;  %v1766_v1 = vld [vmem:[%s2152_s1] sm:$0xff] (!%p192_p3)   ;;  %1540 = vmatprep.subr.bf16.mxu0 (!%p192_p3), %v1765_v0  ;;  %1724 = vmatprep.subr.bf16.mxu1 (!%p192_p3), %v1765_v0  ;;  %p236_p4 = scmp.lt.s32.totalorder (!%p192_p3), %s1461_s18, 63  ;;  %v1768_v3 = vld [vmem:[%s2152_s1 + $0x8] sm:$0xff] (!%p192_p3)   ;;  %v1770_v5 = vld [vmem:[%s2152_s1 + $0x10] sm:$0xff] (!%p192_p3)  }
   0x8   : > { %1541 = vmatpush3.bf16.msra.mxu0 (!%p192_p3), %v1766_v1  ;;  %1732 = vmatpush3.bf16.msra.mxu1 (!%p192_p3), %v1766_v1  ;;  %v1771_v6 = vld [vmem:[%s2152_s1 + $0x58] sm:$0xff] (!%p192_p3)   ;;  %v1773_v8 = vld [vmem:[%s2152_s1 + $0x60] sm:$0xff] (!%p192_p3)   ;;  %v1775_v10 = vld [vmem:[%s2152_s1 + $0x68] sm:$0xff] (!%p192_p3)  }
   0x9   : > { %1542 = vmatprep.subr.bf16.mxu0 (!%p192_p3), %v1767_v2  ;;  %1725 = vmatprep.subr.bf16.mxu1 (!%p192_p3), %v1767_v2  ;;  %v1772_v7 = vld [vmem:[%s2152_s1 + $0x18] sm:$0xff] (!%p192_p3)   ;;  %v1774_v9 = vld [vmem:[%s2152_s1 + $0x20] sm:$0xff] (!%p192_p3)   ;;  %v1776_v13 = vld [vmem:[%s2152_s1 + $0x28] sm:$0xff] (!%p192_p3)  }
   0xa   : > { %v1777_v14 = vld [vmem:[%s2152_s1 + $0x70] sm:$0xff] (!%p192_p3)   ;;  %v1779_v16 = vld [vmem:[%s2152_s1 + $0x78] sm:$0xff] (!%p192_p3)   ;;  %v1787_v18 = vld [vmem:[%s2152_s1 + $0x80] sm:$0xff] (!%p192_p3)  }
   0xb   : > { %v1778_v15 = vld [vmem:[%s2152_s1 + $0x30] sm:$0xff] (!%p192_p3)   ;;  %v1780_v17 = vld [vmem:[%s2152_s1 + $0x38] sm:$0xff] (!%p192_p3)   ;;  %v1788_v22 = vld [vmem:[%s2152_s1 + $0x88] sm:$0xff] (!%p192_p3)  }
   0xc   : > { %1543 = vmatpush3.bf16.msra.mxu0 (!%p192_p3), %v1768_v3  ;;  %1733 = vmatpush3.bf16.msra.mxu1 (!%p192_p3), %v1768_v3  ;;  %v1795_v25 = vld [vmem:[%s2152_s1 + $0x90] sm:$0xff] (!%p192_p3)   ;;  %v1796_v27 = vld [vmem:[%s2152_s1 + $0x98] sm:$0xff] (!%p192_p3)   ;;  %v1803_v30 = vld [vmem:[%s2152_s1 + $0xa0] sm:$0xff] (!%p192_p3)  }
   0xd   : > { %1544 = vmatprep.subr.bf16.mxu0 (!%p192_p3), %v1769_v4  ;;  %1726 = vmatprep.subr.bf16.mxu1 (!%p192_p3), %v1769_v4  ;;  %v1804_v33 = vld [vmem:[%s2152_s1 + $0xa8] sm:$0xff] (!%p192_p3)   ;;  %v1811_v36 = vld [vmem:[%s2152_s1 + $0xb0] sm:$0xff] (!%p192_p3)   ;;  %v1812_v40 = vld [vmem:[%s2152_s1 + $0xb8] sm:$0xff] (!%p192_p3)  }
   0xe   : > { %s2160_s18 = smov (!%p236_p4, %s1461_s18), 63 }
   0xf   : > { %s1740_s4 = smul.u32 12, %s2160_s18 }
  0x10   : > { %1545 = vmatpush3.bf16.msra.mxu0 %v1770_v5  ;;  %1734 = vmatpush3.bf16.msra.mxu1 %v1770_v5 }
  0x11   : > { %1546 = vmatprep.subr.bf16.mxu0 %v1771_v6  ;;  %1727 = vmatprep.subr.bf16.mxu1 %v1771_v6  ;;  %s1948_s11 = scalar_lea.vmem %s2151_s0, %s1740_s4 }
  0x12   : > { %v1783_v11 = vld [vmem:[%s1948_s11 + $0x4] ss:$12 sps:$4 sm:$0xff]   ;;  %v1781_v19 = vld [vmem:[%s1948_s11] ss:$12 sps:$4 sm:$0xff]   ;;  %v1789_v21 = vld [vmem:[%s1948_s11 + $0x1c] ss:$12 sps:$4 sm:$0xff]  }
  0x13   : > { %v1786_v12 = vld [vmem:[%s1948_s11 + $0x124] ss:$12 sps:$4 sm:$0xff]   ;;  %880 = vmatprep.mubr.bf16.mxu0 %v1783_v11  ;;  %v1784_v20 = vld [vmem:[%s1948_s11 + $0x120] ss:$12 sps:$4 sm:$0xff]   ;;  %v1791_v23 = vld [vmem:[%s1948_s11 + $0x13c] ss:$12 sps:$4 sm:$0xff]  }
  0x14   : > { %1547 = vmatpush3.bf16.msra.mxu0 %v1772_v7  ;;  %1735 = vmatpush3.bf16.msra.mxu1 %v1772_v7  ;;  %v1793_v24 = vld [vmem:[%s1948_s11 + $0x18] ss:$12 sps:$4 sm:$0xff]   ;;  %v1797_v28 = vld [vmem:[%s1948_s11 + $0x34] ss:$12 sps:$4 sm:$0xff]   ;;  %v1801_v31 = vld [vmem:[%s1948_s11 + $0x30] ss:$12 sps:$4 sm:$0xff]  }
  0x15   : > { %1548 = vmatprep.subr.bf16.mxu0 %v1773_v8  ;;  %1728 = vmatprep.subr.bf16.mxu1 %v1773_v8  ;;  %v1794_v26 = vld [vmem:[%s1948_s11 + $0x138] ss:$12 sps:$4 sm:$0xff]   ;;  %v1799_v29 = vld [vmem:[%s1948_s11 + $0x154] ss:$12 sps:$4 sm:$0xff]   ;;  %v1802_v32 = vld [vmem:[%s1948_s11 + $0x150] ss:$12 sps:$4 sm:$0xff]  }
  0x16   : > { %976 = vmatprep.mubr.bf16.mxu1 %v1786_v12  ;;  %v1805_v34 = vld [vmem:[%s1948_s11 + $0x4c] ss:$12 sps:$4 sm:$0xff]   ;;  %v1809_v37 = vld [vmem:[%s1948_s11 + $0x48] ss:$12 sps:$4 sm:$0xff]   ;;  %v1813_v39 = vld [vmem:[%s1948_s11 + $0x64] ss:$12 sps:$4 sm:$0xff]  }
  0x17   : > { %v1807_v35 = vld [vmem:[%s1948_s11 + $0x16c] ss:$12 sps:$4 sm:$0xff]   ;;  %v1810_v38 = vld [vmem:[%s1948_s11 + $0x168] ss:$12 sps:$4 sm:$0xff]   ;;  %v1822_v47 = vld [vmem:[%s1948_s11 + $0x50] ss:$12 sps:$4 sm:$0xff]  }
  0x18   : > { %1549 = vmatpush3.bf16.msra.mxu0 %v1774_v9  ;;  %1736 = vmatpush3.bf16.msra.mxu1 %v1774_v9  ;;  %v1815_v41 = vld [vmem:[%s1948_s11 + $0x8] ss:$12 sps:$4 sm:$0xff]   ;;  %v1816_v42 = vld [vmem:[%s1948_s11 + $0x60] ss:$12 sps:$4 sm:$0xff]   ;;  %v1820_v45 = vld [vmem:[%s1948_s11 + $0x38] ss:$12 sps:$4 sm:$0xff]  }
  0x19   : > { %1550 = vmatprep.subr.bf16.mxu0 %v1775_v10  ;;  %1729 = vmatprep.subr.bf16.mxu1 %v1775_v10  ;;  %v1817_v43 = vld [vmem:[%s1948_s11 + $0x20] ss:$12 sps:$4 sm:$0xff]   ;;  %v1818_v44 = vld [vmem:[%s1948_s11 + $0x7c] ss:$12 sps:$4 sm:$0xff]   ;;  %v1821_v46 = vld [vmem:[%s1948_s11 + $0x78] ss:$12 sps:$4 sm:$0xff]  }
  0x1a   : > { %v1823_v48 = vld [vmem:[%s1948_s11 + $0x94] ss:$12 sps:$4 sm:$0xff]   ;;  %v1826_v50 = vld [vmem:[%s1948_s11 + $0x90] ss:$12 sps:$4 sm:$0xff]   ;;  %v1828_v52 = vld [vmem:[%s1948_s11 + $0xac] ss:$12 sps:$4 sm:$0xff]  }
  0x1b   : > { %v1825_v49 = vld [vmem:[%s1948_s11 + $0x68] ss:$12 sps:$4 sm:$0xff]   ;;  %v1827_v51 = vld [vmem:[%s1948_s11 + $0x80] ss:$12 sps:$4 sm:$0xff]   ;;  %v1830_v53 = vld [vmem:[%s1948_s11 + $0x98] ss:$12 sps:$4 sm:$0xff]  }
  0x1c   : > { %1551 = vmatpush3.bf16.msra.mxu0 %v1776_v13  ;;  %1737 = vmatpush3.bf16.msra.mxu1 %v1776_v13  ;;  %v1831_v54 = vld [vmem:[%s1948_s11 + $0xa8] ss:$12 sps:$4 sm:$0xff]   ;;  %v1832_v55 = vld [vmem:[%s1948_s11 + $0xb0] ss:$12 sps:$4 sm:$0xff]   ;;  %v1836_v58 = vld [vmem:[%s1948_s11 + $0xc0] ss:$12 sps:$4 sm:$0xff]  }
  0x1d   : > { %1552 = vmatprep.subr.bf16.mxu0 %v1777_v14  ;;  %1730 = vmatprep.subr.bf16.mxu1 %v1777_v14  ;;  %v1833_v56 = vld [vmem:[%s1948_s11 + $0xc4] ss:$12 sps:$4 sm:$0xff]   ;;  %v1835_v57 = vld [vmem:[%s1948_s11 + $0xc8] ss:$12 sps:$4 sm:$0xff]   ;;  %v1837_v59 = vld [vmem:[%s1948_s11 + $0xe0] ss:$12 sps:$4 sm:$0xff]  }
  0x1e   : > { %v1838_v60 = vld [vmem:[%s1948_s11 + $0xdc] ss:$12 sps:$4 sm:$0xff]   ;;  %v1840_v61 = vld [vmem:[%s1948_s11 + $0xf8] ss:$12 sps:$4 sm:$0xff]   ;;  %v1843_v0 = vld [vmem:[%s1948_s11 + $0xf4] ss:$12 sps:$4 sm:$0xff]  }
  0x1f   : > { %v1841_v62 = vld [vmem:[%s1948_s11 + $0xd8] ss:$12 sps:$4 sm:$0xff]   ;;  %v1842_v63 = vld [vmem:[%s1948_s11 + $0x110] ss:$12 sps:$4 sm:$0xff]   ;;  %v1845_v1 = vld [vmem:[%s1948_s11 + $0x128] ss:$12 sps:$4 sm:$0xff]  }
  0x20   : > { %1553 = vmatpush3.bf16.msra.mxu0 %v1778_v15  ;;  %1738 = vmatpush3.bf16.msra.mxu1 %v1778_v15  ;;  %v1846_v2 = vld [vmem:[%s1948_s11 + $0xf0] ss:$12 sps:$4 sm:$0xff]   ;;  %v1847_v3 = vld [vmem:[%s1948_s11 + $0x140] ss:$12 sps:$4 sm:$0xff]   ;;  %v1850_v5 = vld [vmem:[%s1948_s11 + $0x158] ss:$12 sps:$4 sm:$0xff]  }
  0x21   : > { %1554 = vmatprep.subr.bf16.mxu0 %v1779_v16  ;;  %1731 = vmatprep.subr.bf16.mxu1 %v1779_v16  ;;  %v1848_v4 = vld [vmem:[%s1948_s11 + $0x10c] ss:$12 sps:$4 sm:$0xff]   ;;  %v1851_v6 = vld [vmem:[%s1948_s11 + $0x108] ss:$12 sps:$4 sm:$0xff]   ;;  %v1852_v7 = vld [vmem:[%s1948_s11 + $0x170] ss:$12 sps:$4 sm:$0xff]  }
  0x22   : > { %s1464_s11 = sshll.u32 %s2160_s18, 3 }
  0x23   : > { %s2068_s28 = scalar_lea.vmem %s2154_s3, %s1464_s11 }
  0x24   : > { %1555 = vmatpush3.bf16.msra.mxu0 %v1780_v17  ;;  %1739 = vmatpush3.bf16.msra.mxu1 %v1780_v17 }
  0x25   : > { %1676 = vmatprep.subr.bf16.mxu1 %v1787_v18 }
  0x27   : > { %881 = vmatmul.mubr.bf16.vlgmr.msra.gmra.mrb[0].mxu0 %v1781_v19  ;;  %977 = vmatmul.mubr.bf16.vlgmr.msra.gmra.mrb[0].mxu1 %v1784_v20 }
  0x28   : > { %1677 = vmatpush3.bf16.msra.mxu1 %v1787_v18  ;;  %888 = vmatprep.mubr.bf16.mxu0 %v1789_v21 }
  0x29   : > { %1678 = vmatprep.subr.bf16.mxu1 %v1788_v22  ;;  %984 = vmatprep.mubr.bf16.mxu1 %v1791_v23 }
  0x2c   : > { %1679 = vmatpush3.bf16.msra.mxu1 %v1788_v22 }
  0x2d   : > { %1680 = vmatprep.subr.bf16.mxu1 %v1795_v25 }
  0x2f   : > { %889 = vmatmul.mubr.bf16.gmra.mrb[4].mxu0 %v1793_v24  ;;  %985 = vmatmul.mubr.bf16.gmra.mrb[4].mxu1 %v1794_v26 }
  0x30   : > { %1681 = vmatpush3.bf16.msra.mxu1 %v1795_v25  ;;  %896 = vmatprep.mubr.bf16.mxu0 %v1797_v28 }
  0x31   : > { %1682 = vmatprep.subr.bf16.mxu1 %v1796_v27  ;;  %992 = vmatprep.mubr.bf16.mxu1 %v1799_v29 }
  0x34   : > { %1683 = vmatpush3.bf16.msra.mxu1 %v1796_v27 }
  0x35   : > { %1684 = vmatprep.subr.bf16.mxu1 %v1803_v30 }
  0x37   : > { %897 = vmatmul.mubr.bf16.gmra.mrb[8].mxu0 %v1801_v31  ;;  %993 = vmatmul.mubr.bf16.gmra.mrb[8].mxu1 %v1802_v32 }
  0x38   : > { %1685 = vmatpush3.bf16.msra.mxu1 %v1803_v30  ;;  %904 = vmatprep.mubr.bf16.mxu0 %v1805_v34 }
  0x39   : > { %1686 = vmatprep.subr.bf16.mxu1 %v1804_v33  ;;  %1000 = vmatprep.mubr.bf16.mxu1 %v1807_v35 }
  0x3c   : > { %1687 = vmatpush3.bf16.msra.mxu1 %v1804_v33 }
  0x3d   : > { %1688 = vmatprep.subr.bf16.mxu1 %v1811_v36 }
  0x3f   : > { %905 = vmatmul.mubr.bf16.gmra.mrb[12].mxu0 %v1809_v37  ;;  %1001 = vmatmul.mubr.bf16.gmra.mrb[12].mxu1 %v1810_v38 }
  0x40   : > { %1689 = vmatpush3.bf16.msra.mxu1 %v1811_v36  ;;  %912 = vmatprep.mubr.bf16.mxu0 %v1813_v39 }
  0x41   : > { %1690 = vmatprep.subr.bf16.mxu1 %v1812_v40  ;;  %1692 = vmatprep.mubr.bf16.mxu1 %v1815_v41 }
  0x44   : > { %1691 = vmatpush3.bf16.msra.mxu1 %v1812_v40 }
  0x47   : > { %913 = vmatmul.mubr.bf16.gmra.mrb[16].mxu0 %v1816_v42  ;;  %1693 = vmatmul.mubr.bf16.vlgmr.msra.gmra.mrb[16].mxu1 %v1817_v43 }
  0x48   : > { %920 = vmatprep.mubr.bf16.mxu0 %v1818_v44  ;;  %1696 = vmatprep.mubr.bf16.mxu1 %v1820_v45 }
  0x4f   : > { %921 = vmatmul.mubr.bf16.gmra.mrb[20].mxu0 %v1821_v46  ;;  %1697 = vmatmul.mubr.bf16.gmra.mrb[20].mxu1 %v1822_v47 }
  0x50   : > { %928 = vmatprep.mubr.bf16.mxu0 %v1823_v48  ;;  %1700 = vmatprep.mubr.bf16.mxu1 %v1825_v49 }
  0x57   : > { %929 = vmatmul.mubr.bf16.gmra.mrb[24].mxu0 %v1826_v50  ;;  %1701 = vmatmul.mubr.bf16.gmra.mrb[24].mxu1 %v1827_v51 }
  0x58   : > { %936 = vmatprep.mubr.bf16.mxu0 %v1828_v52  ;;  %1704 = vmatprep.mubr.bf16.mxu1 %v1830_v53 }
  0x5f   : > { %937 = vmatmul.mubr.bf16.gmra.mrb[28].mxu0 %v1831_v54  ;;  %1705 = vmatmul.mubr.bf16.gmra.mrb[28].mxu1 %v1832_v55 }
  0x60   : > { %944 = vmatprep.mubr.bf16.mxu0 %v1833_v56  ;;  %1708 = vmatprep.mubr.bf16.mxu1 %v1835_v57 }
  0x67   : > { %945 = vmatmul.mubr.bf16.gmra.mrb[32].mxu0 %v1836_v58  ;;  %1709 = vmatmul.mubr.bf16.gmra.mrb[32].mxu1 %v1837_v59  ;;  %v2063_v58 = vld [vmem:[%s2153_s2] ss:$0 sm:$0xff] }
  0x68   : > { %952 = vmatprep.mubr.bf16.mxu0 %v1838_v60  ;;  %1712 = vmatprep.mubr.bf16.mxu1 %v1840_v61 }
  0x6f   : > { %953 = vmatmul.mubr.bf16.gmra.mrb[36].mxu0 %v1841_v62  ;;  %1713 = vmatmul.mubr.bf16.gmra.mrb[36].mxu1 %v1842_v63 }
  0x70   : > { %960 = vmatprep.mubr.bf16.mxu0 %v1843_v0  ;;  %1716 = vmatprep.mubr.bf16.mxu1 %v1845_v1 }
  0x77   : > { %961 = vmatmul.mubr.bf16.gmra.mrb[40].mxu0 %v1846_v2  ;;  %1717 = vmatmul.mubr.bf16.gmra.mrb[40].mxu1 %v1847_v3 }
  0x78   : > { %968 = vmatprep.mubr.bf16.mxu0 %v1848_v4  ;;  %1720 = vmatprep.mubr.bf16.mxu1 %v1850_v5 }
  0x7f   : > { %969 = vmatmul.mubr.bf16.gmra.mrb[44].mxu0 %v1851_v6  ;;  %1721 = vmatmul.mubr.bf16.gmra.mrb[44].mxu1 %v1852_v7 }
  0xfa   : > { %v1556_v8 = vpop.f32.mrb[0].mxu0  ;;  %v1628_v9 = vpop.f32.mrb[0].mxu1 }
  0xfb   : > { %v1557_v10 = vpop.f32.mrb[1].mxu0  ;;  %v1629_v11 = vpop.f32.mrb[1].mxu1 }
  0xfc   : > { %v1558_v12 = vadd.f32 %v1557_v10, %v1556_v8  ;;  %v2043_v13 = vadd.f32 %v1629_v11, %v1628_v9  ;;  %v1559_v14 = vpop.f32.mrb[2].mxu0  ;;  %v1631_v15 = vpop.f32.mrb[2].mxu1 }
  0xfd   : > { %v1560_v16 = vpop.f32.mrb[3].mxu0  ;;  %v1632_v17 = vpop.f32.mrb[3].mxu1 }
  0xfe   : > { %v1561_v18 = vadd.f32 %v1560_v16, %v1559_v14  ;;  %v2045_v19 = vadd.f32 %v1632_v17, %v1631_v15 }
 0x102   : > { %v1562_v20 = vpop.f32.mrb[4].mxu0  ;;  %v1634_v21 = vpop.f32.mrb[4].mxu1 }
 0x103   : > { %v1563_v22 = vpop.f32.mrb[5].mxu0  ;;  %v1635_v23 = vpop.f32.mrb[5].mxu1 }
 0x104   : > { %v1564_v24 = vadd.f32 %v1563_v22, %v1562_v20  ;;  %v2047_v25 = vadd.f32 %v1635_v23, %v1634_v21  ;;  %v1565_v26 = vpop.f32.mrb[6].mxu0  ;;  %v1637_v27 = vpop.f32.mrb[6].mxu1 }
 0x105   : > { %v1566_v28 = vpop.f32.mrb[7].mxu0  ;;  %v1638_v29 = vpop.f32.mrb[7].mxu1 }
 0x106   : > { %v1567_v30 = vadd.f32 %v1566_v28, %v1565_v26  ;;  %v2049_v31 = vadd.f32 %v1638_v29, %v1637_v27 }
 0x10a   : > { %v1568_v32 = vpop.f32.mrb[8].mxu0  ;;  %v1640_v33 = vpop.f32.mrb[8].mxu1 }
 0x10b   : > { %v1569_v34 = vpop.f32.mrb[9].mxu0  ;;  %v1641_v35 = vpop.f32.mrb[9].mxu1 }
 0x10c   : > { %v1570_v36 = vadd.f32 %v1569_v34, %v1568_v32  ;;  %v2051_v37 = vadd.f32 %v1641_v35, %v1640_v33  ;;  %v1571_v38 = vpop.f32.mrb[10].mxu0  ;;  %v1643_v39 = vpop.f32.mrb[10].mxu1 }
 0x10d   : > { %v1572_v40 = vpop.f32.mrb[11].mxu0  ;;  %v1644_v41 = vpop.f32.mrb[11].mxu1 }
 0x10e   : > { %v1573_v42 = vadd.f32 %v1572_v40, %v1571_v38  ;;  %v2053_v43 = vadd.f32 %v1644_v41, %v1643_v39 }
 0x112   : > { %v1574_v44 = vpop.f32.mrb[12].mxu0  ;;  %v1646_v45 = vpop.f32.mrb[12].mxu1 }
 0x113   : > { %v1575_v46 = vpop.f32.mrb[13].mxu0  ;;  %v1647_v47 = vpop.f32.mrb[13].mxu1 }
 0x114   : > { %v1576_v48 = vadd.f32 %v1575_v46, %v1574_v44  ;;  %v2055_v49 = vadd.f32 %v1647_v47, %v1646_v45  ;;  %v1577_v50 = vpop.f32.mrb[14].mxu0  ;;  %v1649_v51 = vpop.f32.mrb[14].mxu1 }
 0x115   : > { %v1578_v52 = vpop.f32.mrb[15].mxu0  ;;  %v1650_v53 = vpop.f32.mrb[15].mxu1 }
 0x116   : > { %v1579_v54 = vadd.f32 %v1578_v52, %v1577_v50  ;;  %v2057_v55 = vadd.f32 %v1650_v53, %v1649_v51 }
 0x11a   : > { %v1580_v56 = vpop.f32.mrb[16].mxu0  ;;  %v1694_v57 = vpop.f32.mrb[16].mxu1 }
 0x11b   : > { %v1052_v59 = vadd.f32 %v1694_v57, %v1564_v24  ;;  %v1581_v60 = vpop.f32.mrb[17].mxu0  ;;  %v1043_v61 = vpop.f32.mrb[17].mxu1 }
 0x11c   : > { %v1582_v62 = vadd.f32 %v1581_v60, %v1580_v56  ;;  %v1044_v63 = vadd.f32 %v1558_v12, %v1043_v61  ;;  %v1583_v0 = vpop.f32.mrb[18].mxu0  ;;  %v1695_v1 = vpop.f32.mrb[18].mxu1 }
 0x11d   : > { %v1278_v2 = vadd.f32 %v2063_v58, %v1052_v59  ;;  %v1055_v3 = vadd.f32 %v1695_v1, %v1567_v30  ;;  %v1584_v4 = vpop.f32.mrb[19].mxu0  ;;  %v1046_v5 = vpop.f32.mrb[19].mxu1 }
 0x11e   : > { %v1276_v6 = vadd.f32 %v2063_v58, %v1044_v63  ;;  %v1585_v7 = vadd.f32 %v1584_v4, %v1583_v0  ;;  %v1047_v8 = vadd.f32 %v1561_v18, %v1046_v5 }
 0x11f   : > { %1310 = vst [vmem:[%s2068_s28 + $0x10] sm:$0xff] %v1278_v2  ;;  %v1279_v9 = vadd.f32 %v2063_v58, %v1055_v3 }
 0x120   : > { %1308 = vst [vmem:[%s2068_s28] sm:$0xff] %v1276_v6  ;;  %v1277_v10 = vadd.f32 %v2063_v58, %v1047_v8 }
 0x121   : > { %1311 = vst [vmem:[%s2068_s28 + $0x18] sm:$0xff] %v1279_v9 }
 0x122   : > { %1309 = vst [vmem:[%s2068_s28 + $0x8] sm:$0xff] %v1277_v10  ;;  %v1586_v11 = vpop.f32.mrb[20].mxu0  ;;  %v1698_v12 = vpop.f32.mrb[20].mxu1 }
 0x123   : > { %v1068_v14 = vadd.f32 %v1698_v12, %v1576_v48  ;;  %v1587_v15 = vpop.f32.mrb[21].mxu0  ;;  %v1059_v16 = vpop.f32.mrb[21].mxu1 }
 0x124   : > { %v1588_v17 = vadd.f32 %v1587_v15, %v1586_v11  ;;  %v1060_v20 = vadd.f32 %v1570_v36, %v1059_v16  ;;  %v1589_v18 = vpop.f32.mrb[22].mxu0  ;;  %v1699_v21 = vpop.f32.mrb[22].mxu1 }
 0x125   : > { %v1282_v22 = vadd.f32 %v2063_v58, %v1068_v14  ;;  %v1071_v23 = vadd.f32 %v1699_v21, %v1579_v54  ;;  %v1590_v24 = vpop.f32.mrb[23].mxu0  ;;  %v1062_v26 = vpop.f32.mrb[23].mxu1 }
 0x126   : > { %v1280_v27 = vadd.f32 %v2063_v58, %v1060_v20  ;;  %v1591_v28 = vadd.f32 %v1590_v24, %v1589_v18  ;;  %v1063_v29 = vadd.f32 %v1573_v42, %v1062_v26 }
 0x127   : > { %1314 = vst [vmem:[%s2068_s28 + $0x30] sm:$0xff] %v1282_v22  ;;  %v1283_v30 = vadd.f32 %v2063_v58, %v1071_v23 }
 0x128   : > { %1312 = vst [vmem:[%s2068_s28 + $0x20] sm:$0xff] %v1280_v27  ;;  %v1281_v32 = vadd.f32 %v2063_v58, %v1063_v29 }
 0x129   : > { %1315 = vst [vmem:[%s2068_s28 + $0x38] sm:$0xff] %v1283_v30 }
 0x12a   : > { %1313 = vst [vmem:[%s2068_s28 + $0x28] sm:$0xff] %v1281_v32  ;;  %v1592_v33 = vpop.f32.mrb[24].mxu0  ;;  %v1702_v34 = vpop.f32.mrb[24].mxu1 }
 0x12b   : > { %v1084_v35 = vadd.f32 %v1702_v34, %v1588_v17  ;;  %v1593_v36 = vpop.f32.mrb[25].mxu0  ;;  %v1075_v38 = vpop.f32.mrb[25].mxu1 }
 0x12c   : > { %v1594_v39 = vadd.f32 %v1593_v36, %v1592_v33  ;;  %v1076_v40 = vadd.f32 %v1582_v62, %v1075_v38  ;;  %v1595_v41 = vpop.f32.mrb[26].mxu0  ;;  %v1703_v42 = vpop.f32.mrb[26].mxu1 }
 0x12d   : > { %v1286_v44 = vadd.f32 %v2063_v58, %v1084_v35  ;;  %v1087_v45 = vadd.f32 %v1703_v42, %v1591_v28  ;;  %v1596_v46 = vpop.f32.mrb[27].mxu0  ;;  %v1078_v47 = vpop.f32.mrb[27].mxu1 }
 0x12e   : > { %v1284_v48 = vadd.f32 %v2063_v58, %v1076_v40  ;;  %v1597_v50 = vadd.f32 %v1596_v46, %v1595_v41  ;;  %v1079_v51 = vadd.f32 %v1585_v7, %v1078_v47 }
 0x12f   : > { %1318 = vst [vmem:[%s2068_s28 + $0x50] sm:$0xff] %v1286_v44  ;;  %v1287_v52 = vadd.f32 %v2063_v58, %v1087_v45 }
 0x130   : > { %1316 = vst [vmem:[%s2068_s28 + $0x40] sm:$0xff] %v1284_v48  ;;  %v1285_v53 = vadd.f32 %v2063_v58, %v1079_v51 }
 0x131   : > { %1319 = vst [vmem:[%s2068_s28 + $0x58] sm:$0xff] %v1287_v52 }
 0x132   : > { %1317 = vst [vmem:[%s2068_s28 + $0x48] sm:$0xff] %v1285_v53  ;;  %v1598_v54 = vpop.f32.mrb[28].mxu0  ;;  %v1706_v56 = vpop.f32.mrb[28].mxu1 }
 0x133   : > { %v1599_v57 = vpop.f32.mrb[29].mxu0  ;;  %v1091_v59 = vpop.f32.mrb[29].mxu1 }
 0x134   : > { %v1600_v60 = vadd.f32 %v1599_v57, %v1598_v54  ;;  %v1092_v61 = vadd.f32 %v1594_v39, %v1091_v59  ;;  %v1601_v62 = vpop.f32.mrb[30].mxu0  ;;  %v1707_v63 = vpop.f32.mrb[30].mxu1 }
 0x135   : > { %v1602_v0 = vpop.f32.mrb[31].mxu0  ;;  %v1094_v1 = vpop.f32.mrb[31].mxu1 }
 0x136   : > { %v1100_v2 = vadd.f32 %v1706_v56, %v1600_v60  ;;  %v1288_v3 = vadd.f32 %v2063_v58, %v1092_v61  ;;  %v1603_v4 = vadd.f32 %v1602_v0, %v1601_v62  ;;  %v1095_v5 = vadd.f32 %v1597_v50, %v1094_v1 }
 0x138   : > { %v1290_v6 = vadd.f32 %v2063_v58, %v1100_v2  ;;  %1320 = vst [vmem:[%s2068_s28 + $0x60] sm:$0xff] %v1288_v3  ;;  %v1103_v7 = vadd.f32 %v1707_v63, %v1603_v4  ;;  %v1289_v8 = vadd.f32 %v2063_v58, %v1095_v5 }
 0x13a   : > { %1322 = vst [vmem:[%s2068_s28 + $0x70] sm:$0xff] %v1290_v6  ;;  %v1291_v9 = vadd.f32 %v2063_v58, %v1103_v7  ;;  %1321 = vst [vmem:[%s2068_s28 + $0x68] sm:$0xff] %v1289_v8  ;;  %v1604_v10 = vpop.f32.mrb[32].mxu0  ;;  %v1710_v11 = vpop.f32.mrb[32].mxu1 }
 0x13b   : > { %v1605_v12 = vpop.f32.mrb[33].mxu0  ;;  %v1107_v14 = vpop.f32.mrb[33].mxu1 }
 0x13c   : > { %1323 = vst [vmem:[%s2068_s28 + $0x78] sm:$0xff] %v1291_v9  ;;  %v1606_v15 = vadd.f32 %v1605_v12, %v1604_v10  ;;  %v1607_v16 = vpop.f32.mrb[34].mxu0  ;;  %v1711_v17 = vpop.f32.mrb[34].mxu1 }
 0x13d   : > { %v1608_v20 = vpop.f32.mrb[35].mxu0  ;;  %v1110_v18 = vpop.f32.mrb[35].mxu1 }
 0x13e   : > { %v1108_v21 = vadd.f32 %v1606_v15, %v1107_v14  ;;  %v1609_v22 = vadd.f32 %v1608_v20, %v1607_v16 }
 0x140   : > { %v1292_v23 = vadd.f32 %v2063_v58, %v1108_v21  ;;  %v1111_v24 = vadd.f32 %v1609_v22, %v1110_v18 }
 0x142   : > { %1324 = vst [vmem:[%s2068_s28 + $0x80] sm:$0xff] %v1292_v23  ;;  %v1293_v26 = vadd.f32 %v2063_v58, %v1111_v24  ;;  %v1610_v27 = vpop.f32.mrb[36].mxu0  ;;  %v1714_v28 = vpop.f32.mrb[36].mxu1 }
 0x143   : > { %v1611_v29 = vpop.f32.mrb[37].mxu0  ;;  %v1123_v30 = vpop.f32.mrb[37].mxu1 }
 0x144   : > { %1325 = vst [vmem:[%s2068_s28 + $0x88] sm:$0xff] %v1293_v26  ;;  %v1612_v32 = vadd.f32 %v1611_v29, %v1610_v27  ;;  %v1613_v33 = vpop.f32.mrb[38].mxu0  ;;  %v1715_v34 = vpop.f32.mrb[38].mxu1 }
 0x145   : > { %v1614_v35 = vpop.f32.mrb[39].mxu0  ;;  %v1126_v36 = vpop.f32.mrb[39].mxu1 }
 0x146   : > { %v1116_v38 = vadd.f32 %v1710_v11, %v1612_v32  ;;  %v1615_v39 = vadd.f32 %v1614_v35, %v1613_v33 }
 0x148   : > { %v1294_v40 = vadd.f32 %v2063_v58, %v1116_v38  ;;  %v1119_v41 = vadd.f32 %v1711_v17, %v1615_v39 }
 0x14a   : > { %1326 = vst [vmem:[%s2068_s28 + $0x90] sm:$0xff] %v1294_v40  ;;  %v1295_v42 = vadd.f32 %v2063_v58, %v1119_v41  ;;  %v1616_v44 = vpop.f32.mrb[40].mxu0  ;;  %v1718_v45 = vpop.f32.mrb[40].mxu1 }
 0x14b   : > { %v1148_v46 = vadd.f32 %v1718_v45, %v2047_v25  ;;  %v1617_v47 = vpop.f32.mrb[41].mxu0  ;;  %v1139_v48 = vpop.f32.mrb[41].mxu1 }
 0x14c   : > { %1327 = vst [vmem:[%s2068_s28 + $0x98] sm:$0xff] %v1295_v42  ;;  %v1618_v50 = vadd.f32 %v1617_v47, %v1616_v44  ;;  %v1140_v51 = vadd.f32 %v2043_v13, %v1139_v48  ;;  %v1619_v52 = vpop.f32.mrb[42].mxu0  ;;  %v1719_v53 = vpop.f32.mrb[42].mxu1 }
 0x14d   : > { %v1302_v54 = vadd.f32 %v2063_v58, %v1148_v46  ;;  %v1151_v56 = vadd.f32 %v1719_v53, %v2049_v31  ;;  %v1620_v57 = vpop.f32.mrb[43].mxu0  ;;  %v1142_v59 = vpop.f32.mrb[43].mxu1 }
 0x14e   : > { %v1124_v25 = vadd.f32 %v1618_v50, %v1123_v30  ;;  %v1300_v60 = vadd.f32 %v2063_v58, %v1140_v51  ;;  %v1621_v61 = vadd.f32 %v1620_v57, %v1619_v52  ;;  %v1143_v62 = vadd.f32 %v2045_v19, %v1142_v59 }
 0x14f   : > { %1334 = vst [vmem:[%s2068_s28 + $0xd0] sm:$0xff] %v1302_v54  ;;  %v1303_v13 = vadd.f32 %v2063_v58, %v1151_v56 }
 0x150   : > { %v1296_v63 = vadd.f32 %v2063_v58, %v1124_v25  ;;  %1332 = vst [vmem:[%s2068_s28 + $0xc0] sm:$0xff] %v1300_v60  ;;  %v1127_v0 = vadd.f32 %v1621_v61, %v1126_v36  ;;  %v1301_v1 = vadd.f32 %v2063_v58, %v1143_v62 }
 0x151   : > { %1335 = vst [vmem:[%s2068_s28 + $0xd8] sm:$0xff] %v1303_v13 }
 0x152   : > { %1328 = vst [vmem:[%s2068_s28 + $0xa0] sm:$0xff] %v1296_v63  ;;  %v1297_v31 = vadd.f32 %v2063_v58, %v1127_v0  ;;  %1333 = vst [vmem:[%s2068_s28 + $0xc8] sm:$0xff] %v1301_v1  ;;  %v1622_v2 = vpop.f32.mrb[44].mxu0  ;;  %v1722_v3 = vpop.f32.mrb[44].mxu1 }
 0x153   : > { %v1164_v4 = vadd.f32 %v1722_v3, %v2055_v49  ;;  %v1623_v19 = vpop.f32.mrb[45].mxu0  ;;  %v1155_v5 = vpop.f32.mrb[45].mxu1 }
 0x154   : > { %1329 = vst [vmem:[%s2068_s28 + $0xa8] sm:$0xff] %v1297_v31  ;;  %v1624_v6 = vadd.f32 %v1623_v19, %v1622_v2  ;;  %v1156_v7 = vadd.f32 %v2051_v37, %v1155_v5  ;;  %v1625_v8 = vpop.f32.mrb[46].mxu0  ;;  %v1723_v9 = vpop.f32.mrb[46].mxu1 }
 0x155   : > { %v1306_v10 = vadd.f32 %v2063_v58, %v1164_v4  ;;  %v1167_v11 = vadd.f32 %v1723_v9, %v2057_v55  ;;  %v1626_v12 = vpop.f32.mrb[47].mxu0  ;;  %v1158_v49 = vpop.f32.mrb[47].mxu1 }
 0x156   : > { %v1132_v14 = vadd.f32 %v1714_v28, %v1624_v6  ;;  %v1304_v15 = vadd.f32 %v2063_v58, %v1156_v7  ;;  %v1627_v16 = vadd.f32 %v1626_v12, %v1625_v8  ;;  %v1159_v17 = vadd.f32 %v2053_v43, %v1158_v49 }
 0x157   : > { %1338 = vst [vmem:[%s2068_s28 + $0xf0] sm:$0xff] %v1306_v10  ;;  %v1307_v37 = vadd.f32 %v2063_v58, %v1167_v11 }
 0x158   : > { %v1298_v20 = vadd.f32 %v2063_v58, %v1132_v14  ;;  %1336 = vst [vmem:[%s2068_s28 + $0xe0] sm:$0xff] %v1304_v15  ;;  %v1135_v18 = vadd.f32 %v1715_v34, %v1627_v16  ;;  %v1305_v21 = vadd.f32 %v2063_v58, %v1159_v17 }
 0x159   : > { %1339 = vst [vmem:[%s2068_s28 + $0xf8] sm:$0xff] %v1307_v37 }
 0x15a   : > { %1330 = vst [vmem:[%s2068_s28 + $0xb0] sm:$0xff] %v1298_v20  ;;  %v1299_v55 = vadd.f32 %v2063_v58, %v1135_v18  ;;  %1337 = vst [vmem:[%s2068_s28 + $0xe8] sm:$0xff] %v1305_v21 }
 0x15c   : > { %1331 = vst [vmem:[%s2068_s28 + $0xb8] sm:$0xff] %v1299_v55 }
 0x15d PF: > { %s13_s14 = sadd.s32 1, %s1875_s14   ;;  %s2155_s12 = smov %s1871_s13 }
 0x15e   : > { %p10_p5 = scmp.ge.s32.totalorder %s13_s14, 4   ;;  %s2156_s13 = smov %s2158_s15 }
 0x160   :  { %12 = sbr.rel (!%p10_p5) target bundleno = 2 (0x2), region = 76 }

// kernel: _lambda_.115
= control target key start
LH: loop header
LB: loop body
LE: loop exit
PB: predicated region body
PF: predicated region fallthrough
CT: control target
= control target key end

     0   :  { %s3719_s12 = smov 0   ;;  %s3721_s13 = smov 0   ;;  %s4517_s0 = inlined_call_operand.vmem [shape: bf16[512,2688], index: 0, kind: input, shape index: {}]   ;;  %s4518_s1 = inlined_call_operand.vmem [shape: bf16[2688,128], index: 1, kind: input, shape index: {}]   ;;  %s4519_s2 = inlined_call_operand.vmem [shape: f32[1,128], index: 2, kind: input, shape index: {}]   ;;  %s4520_s3 = inlined_call_operand.vmem [shape: f32[512,128], index: 3, kind: output, shape index: {}]  }
   0x1   :  { %s3723_s14 = smov 0   ;;  %s3725_s15 = smov 0  }
   0x2   :  { %s3727_s16 = smov 0   ;;  %s3729_s17 = smov 0  }
   0x3   :  { %s3731_s18 = smov 0  }
   0x4 LB: > { %s25_s19 = sadd.s32 1, %s3688_s16  ;;  %s32_s20 = sadd.s32 1, %s3692_s17  ;;  %s3696_s18 = sphi %s3731_s18, %s13_s18   ;;  %s3692_s17 = sphi %s3729_s17, %s4526_s17   ;;  %s3688_s16 = sphi %s3727_s16, %s4525_s16   ;;  %s3684_s15 = sphi %s3725_s15, %s4524_s15   ;;  %s3680_s14 = sphi %s3723_s14, %s4523_s14   ;;  %s3676_s13 = sphi %s3721_s13, %s4522_s13   ;;  %s3672_s12 = sphi %s3719_s12, %s4521_s12  }
   0x5   : > { %p26_p0 = scmp.ge.s32.totalorder %s25_s19, 3  ;;  %p48_p1 = scmp.ne.s32.totalorder %s3676_s13, %s3672_s12 }
   0x6   : > { %p49_p2 = scmp.eq.s32.totalorder %s3696_s18, 0  ;;  %s41_s24 = sadd.s32 1, %s3676_s13 }
   0x7   : > { %s4528_s19 = smov (%p26_p0, %s25_s19), 0  ;;  %s4530_s20 = smov (!%p26_p0, %s32_s20), %s3692_s17 }
   0x8   : > { %p50_p3 = por %p49_p2, %p48_p1  ;;  %p34_p4 = scmp.ge.s32.totalorder %s4530_s20, 2 }
   0x9   : > { %s37_s21 = ssub.s32 %s3688_s16, %s4528_s19  ;;  %p2697_p6 = scmp.ge.s32.totalorder %s3696_s18, 6 }
   0xa   : > { %s4532_s20 = smov (%p34_p4, %s4530_s20), 0 }
   0xb   : > { %s36_s22 = ssub.s32 %s3692_s17, %s4532_s20  ;;  %162 = sbr.rel (%p2697_p6) target bundleno = 96 (0x60), region = 20 }
   0xc   : > { %s38_s23 = sor.u32 %s37_s21, %s36_s22 }
   0xd   : > { %p39_p5 = scmp.eq.s32.totalorder %s38_s23, 0 }
   0xf   : > { %s3770_s25 = scalar_select %p39_p5, %s3676_s13, %s41_s24  }
  0x12   : > { %165 = sbr.rel (!%p50_p3) target bundleno = 96 (0x60), region = 24  ;;  %s167_s26 = sand.u32 (%p50_p3), 1, %s3676_s13  }
  0x13   : > { %s171_s27 = smul.u32 (%p50_p3), 7, %s3688_s16 }
  0x14   : > { %s3366_s28 = smul.u32 (%p50_p3), 896, %s167_s26 }
  0x15   : > { %s3367_s29 = smul.u32 (%p50_p3), 672, %s3692_s17 }
  0x16   : > { %s3784_s8 = scalar_lea.vmem (%p50_p3), [#allocation3], %s3366_s28 }
  0x17   : > { %s173_s30 = sadd.s32 (%p50_p3), %s3367_s29, %s171_s27 }
  0x18   : > { %s2700_s4 = sshll.u32 (%p50_p3), %s173_s30, 2 }
  0x19   : > { %s3779_s7 = scalar_lea.vmem %s4517_s0, %s2700_s4 }
  0x1a   : > { %v190_v0 = vld [vmem:[%s3779_s7] sm:$0xff]  ;;  %v192_v1 = vld [vmem:[%s3779_s7 + $0x8] sm:$0xff]  ;;  %v194_v2 = vld [vmem:[%s3779_s7 + $0x10] sm:$0xff] }
  0x1b   : > { %191 = vst [vmem:[%s3784_s8] sm:$0xff] %v190_v0  ;;  %193 = vst [vmem:[%s3784_s8 + $0x8] sm:$0xff] %v192_v1  ;;  %v196_v3 = vld [vmem:[%s3779_s7 + $0x54] sm:$0xff]  ;;  %v198_v4 = vld [vmem:[%s3779_s7 + $0x5c] sm:$0xff] }
  0x1c   : > { %195 = vst [vmem:[%s3784_s8 + $0x10] sm:$0xff] %v194_v2  ;;  %v200_v5 = vld [vmem:[%s3779_s7 + $0x64] sm:$0xff]  ;;  %197 = vst [vmem:[%s3784_s8 + $0x1c] sm:$0xff] %v196_v3  ;;  %v204_v7 = vld [vmem:[%s3779_s7 + $0xb0] sm:$0xff] }
  0x1d   : > { %199 = vst [vmem:[%s3784_s8 + $0x24] sm:$0xff] %v198_v4  ;;  %201 = vst [vmem:[%s3784_s8 + $0x2c] sm:$0xff] %v200_v5  ;;  %v202_v6 = vld [vmem:[%s3779_s7 + $0xa8] sm:$0xff]  ;;  %v206_v8 = vld [vmem:[%s3779_s7 + $0xb8] sm:$0xff] }
  0x1e   : > { %203 = vst [vmem:[%s3784_s8 + $0x38] sm:$0xff] %v202_v6  ;;  %205 = vst [vmem:[%s3784_s8 + $0x40] sm:$0xff] %v204_v7  ;;  %v208_v9 = vld [vmem:[%s3779_s7 + $0xfc] sm:$0xff]  ;;  %v210_v10 = vld [vmem:[%s3779_s7 + $0x104] sm:$0xff] }
  0x1f   : > { %207 = vst [vmem:[%s3784_s8 + $0x48] sm:$0xff] %v206_v8  ;;  %v212_v11 = vld [vmem:[%s3779_s7 + $0x10c] sm:$0xff]  ;;  %209 = vst [vmem:[%s3784_s8 + $0x54] sm:$0xff] %v208_v9  ;;  %v216_v13 = vld [vmem:[%s3779_s7 + $0x158] sm:$0xff] }
  0x20   : > { %211 = vst [vmem:[%s3784_s8 + $0x5c] sm:$0xff] %v210_v10  ;;  %213 = vst [vmem:[%s3784_s8 + $0x64] sm:$0xff] %v212_v11  ;;  %v214_v12 = vld [vmem:[%s3779_s7 + $0x150] sm:$0xff]  ;;  %v218_v14 = vld [vmem:[%s3779_s7 + $0x160] sm:$0xff] }
  0x21   : > { %215 = vst [vmem:[%s3784_s8 + $0x70] sm:$0xff] %v214_v12  ;;  %217 = vst [vmem:[%s3784_s8 + $0x78] sm:$0xff] %v216_v13  ;;  %v220_v15 = vld [vmem:[%s3779_s7 + $0x1a4] sm:$0xff]  ;;  %v222_v16 = vld [vmem:[%s3779_s7 + $0x1ac] sm:$0xff] }
  0x22   : > { %219 = vst [vmem:[%s3784_s8 + $0x80] sm:$0xff] %v218_v14  ;;  %v224_v17 = vld [vmem:[%s3779_s7 + $0x1b4] sm:$0xff]  ;;  %221 = vst [vmem:[%s3784_s8 + $0x8c] sm:$0xff] %v220_v15  ;;  %v228_v19 = vld [vmem:[%s3779_s7 + $0x200] sm:$0xff] }
  0x23   : > { %223 = vst [vmem:[%s3784_s8 + $0x94] sm:$0xff] %v222_v16  ;;  %225 = vst [vmem:[%s3784_s8 + $0x9c] sm:$0xff] %v224_v17  ;;  %v226_v18 = vld [vmem:[%s3779_s7 + $0x1f8] sm:$0xff]  ;;  %v230_v20 = vld [vmem:[%s3779_s7 + $0x208] sm:$0xff] }
  0x24   : > { %227 = vst [vmem:[%s3784_s8 + $0xa8] sm:$0xff] %v226_v18  ;;  %229 = vst [vmem:[%s3784_s8 + $0xb0] sm:$0xff] %v228_v19  ;;  %v232_v21 = vld [vmem:[%s3779_s7 + $0x24c] sm:$0xff]  ;;  %v234_v22 = vld [vmem:[%s3779_s7 + $0x254] sm:$0xff] }
  0x25   : > { %231 = vst [vmem:[%s3784_s8 + $0xb8] sm:$0xff] %v230_v20  ;;  %v236_v23 = vld [vmem:[%s3779_s7 + $0x25c] sm:$0xff]  ;;  %233 = vst [vmem:[%s3784_s8 + $0xc4] sm:$0xff] %v232_v21  ;;  %v240_v25 = vld [vmem:[%s3779_s7 + $0x2a8] sm:$0xff] }
  0x26   : > { %235 = vst [vmem:[%s3784_s8 + $0xcc] sm:$0xff] %v234_v22  ;;  %237 = vst [vmem:[%s3784_s8 + $0xd4] sm:$0xff] %v236_v23  ;;  %v238_v24 = vld [vmem:[%s3779_s7 + $0x2a0] sm:$0xff]  ;;  %v242_v26 = vld [vmem:[%s3779_s7 + $0x2b0] sm:$0xff] }
  0x27   : > { %239 = vst [vmem:[%s3784_s8 + $0xe0] sm:$0xff] %v238_v24  ;;  %241 = vst [vmem:[%s3784_s8 + $0xe8] sm:$0xff] %v240_v25  ;;  %v244_v27 = vld [vmem:[%s3779_s7 + $0x2f4] sm:$0xff]  ;;  %v246_v28 = vld [vmem:[%s3779_s7 + $0x2fc] sm:$0xff] }
  0x28   : > { %243 = vst [vmem:[%s3784_s8 + $0xf0] sm:$0xff] %v242_v26  ;;  %v248_v29 = vld [vmem:[%s3779_s7 + $0x304] sm:$0xff]  ;;  %245 = vst [vmem:[%s3784_s8 + $0xfc] sm:$0xff] %v244_v27  ;;  %v252_v31 = vld [vmem:[%s3779_s7 + $0x350] sm:$0xff] }
  0x29   : > { %247 = vst [vmem:[%s3784_s8 + $0x104] sm:$0xff] %v246_v28  ;;  %249 = vst [vmem:[%s3784_s8 + $0x10c] sm:$0xff] %v248_v29  ;;  %v250_v30 = vld [vmem:[%s3779_s7 + $0x348] sm:$0xff]  ;;  %v254_v32 = vld [vmem:[%s3779_s7 + $0x358] sm:$0xff] }
  0x2a   : > { %251 = vst [vmem:[%s3784_s8 + $0x118] sm:$0xff] %v250_v30  ;;  %253 = vst [vmem:[%s3784_s8 + $0x120] sm:$0xff] %v252_v31  ;;  %v256_v33 = vld [vmem:[%s3779_s7 + $0x39c] sm:$0xff]  ;;  %v258_v34 = vld [vmem:[%s3779_s7 + $0x3a4] sm:$0xff] }
  0x2b   : > { %255 = vst [vmem:[%s3784_s8 + $0x128] sm:$0xff] %v254_v32  ;;  %v260_v35 = vld [vmem:[%s3779_s7 + $0x3ac] sm:$0xff]  ;;  %257 = vst [vmem:[%s3784_s8 + $0x134] sm:$0xff] %v256_v33  ;;  %v264_v37 = vld [vmem:[%s3779_s7 + $0x3f8] sm:$0xff] }
  0x2c   : > { %259 = vst [vmem:[%s3784_s8 + $0x13c] sm:$0xff] %v258_v34  ;;  %261 = vst [vmem:[%s3784_s8 + $0x144] sm:$0xff] %v260_v35  ;;  %v262_v36 = vld [vmem:[%s3779_s7 + $0x3f0] sm:$0xff]  ;;  %v266_v38 = vld [vmem:[%s3779_s7 + $0x400] sm:$0xff] }
  0x2d   : > { %263 = vst [vmem:[%s3784_s8 + $0x150] sm:$0xff] %v262_v36  ;;  %265 = vst [vmem:[%s3784_s8 + $0x158] sm:$0xff] %v264_v37  ;;  %v268_v39 = vld [vmem:[%s3779_s7 + $0x444] sm:$0xff]  ;;  %v270_v40 = vld [vmem:[%s3779_s7 + $0x44c] sm:$0xff] }
  0x2e   : > { %267 = vst [vmem:[%s3784_s8 + $0x160] sm:$0xff] %v266_v38  ;;  %v272_v41 = vld [vmem:[%s3779_s7 + $0x454] sm:$0xff]  ;;  %269 = vst [vmem:[%s3784_s8 + $0x16c] sm:$0xff] %v268_v39  ;;  %v276_v43 = vld [vmem:[%s3779_s7 + $0x4a0] sm:$0xff] }
  0x2f   : > { %271 = vst [vmem:[%s3784_s8 + $0x174] sm:$0xff] %v270_v40  ;;  %273 = vst [vmem:[%s3784_s8 + $0x17c] sm:$0xff] %v272_v41  ;;  %v274_v42 = vld [vmem:[%s3779_s7 + $0x498] sm:$0xff]  ;;  %v278_v44 = vld [vmem:[%s3779_s7 + $0x4a8] sm:$0xff] }
  0x30   : > { %275 = vst [vmem:[%s3784_s8 + $0x188] sm:$0xff] %v274_v42  ;;  %277 = vst [vmem:[%s3784_s8 + $0x190] sm:$0xff] %v276_v43  ;;  %v280_v45 = vld [vmem:[%s3779_s7 + $0x4ec] sm:$0xff]  ;;  %v282_v46 = vld [vmem:[%s3779_s7 + $0x4f4] sm:$0xff] }
  0x31   : > { %279 = vst [vmem:[%s3784_s8 + $0x198] sm:$0xff] %v278_v44  ;;  %v284_v47 = vld [vmem:[%s3779_s7 + $0x4fc] sm:$0xff]  ;;  %281 = vst [vmem:[%s3784_s8 + $0x1a4] sm:$0xff] %v280_v45  ;;  %v288_v49 = vld [vmem:[%s3779_s7 + $0x548] sm:$0xff] }
  0x32   : > { %283 = vst [vmem:[%s3784_s8 + $0x1ac] sm:$0xff] %v282_v46  ;;  %285 = vst [vmem:[%s3784_s8 + $0x1b4] sm:$0xff] %v284_v47  ;;  %v286_v48 = vld [vmem:[%s3779_s7 + $0x540] sm:$0xff]  ;;  %v290_v50 = vld [vmem:[%s3779_s7 + $0x550] sm:$0xff] }
  0x33   : > { %287 = vst [vmem:[%s3784_s8 + $0x1c0] sm:$0xff] %v286_v48  ;;  %289 = vst [vmem:[%s3784_s8 + $0x1c8] sm:$0xff] %v288_v49  ;;  %v292_v51 = vld [vmem:[%s3779_s7 + $0x594] sm:$0xff]  ;;  %v294_v52 = vld [vmem:[%s3779_s7 + $0x59c] sm:$0xff] }
  0x34   : > { %291 = vst [vmem:[%s3784_s8 + $0x1d0] sm:$0xff] %v290_v50  ;;  %v296_v53 = vld [vmem:[%s3779_s7 + $0x5a4] sm:$0xff]  ;;  %293 = vst [vmem:[%s3784_s8 + $0x1dc] sm:$0xff] %v292_v51  ;;  %v300_v55 = vld [vmem:[%s3779_s7 + $0x5f0] sm:$0xff] }
  0x35   : > { %295 = vst [vmem:[%s3784_s8 + $0x1e4] sm:$0xff] %v294_v52  ;;  %297 = vst [vmem:[%s3784_s8 + $0x1ec] sm:$0xff] %v296_v53  ;;  %v298_v54 = vld [vmem:[%s3779_s7 + $0x5e8] sm:$0xff]  ;;  %v302_v56 = vld [vmem:[%s3779_s7 + $0x5f8] sm:$0xff] }
  0x36   : > { %299 = vst [vmem:[%s3784_s8 + $0x1f8] sm:$0xff] %v298_v54  ;;  %301 = vst [vmem:[%s3784_s8 + $0x200] sm:$0xff] %v300_v55  ;;  %v304_v57 = vld [vmem:[%s3779_s7 + $0x63c] sm:$0xff]  ;;  %v306_v58 = vld [vmem:[%s3779_s7 + $0x644] sm:$0xff] }
  0x37   : > { %303 = vst [vmem:[%s3784_s8 + $0x208] sm:$0xff] %v302_v56  ;;  %v308_v59 = vld [vmem:[%s3779_s7 + $0x64c] sm:$0xff]  ;;  %305 = vst [vmem:[%s3784_s8 + $0x214] sm:$0xff] %v304_v57  ;;  %v312_v61 = vld [vmem:[%s3779_s7 + $0x698] sm:$0xff] }
  0x38   : > { %307 = vst [vmem:[%s3784_s8 + $0x21c] sm:$0xff] %v306_v58  ;;  %309 = vst [vmem:[%s3784_s8 + $0x224] sm:$0xff] %v308_v59  ;;  %v310_v60 = vld [vmem:[%s3779_s7 + $0x690] sm:$0xff]  ;;  %v314_v62 = vld [vmem:[%s3779_s7 + $0x6a0] sm:$0xff] }
  0x39   : > { %311 = vst [vmem:[%s3784_s8 + $0x230] sm:$0xff] %v310_v60  ;;  %313 = vst [vmem:[%s3784_s8 + $0x238] sm:$0xff] %v312_v61  ;;  %v316_v63 = vld [vmem:[%s3779_s7 + $0x6e4] sm:$0xff]  ;;  %v318_v0 = vld [vmem:[%s3779_s7 + $0x6ec] sm:$0xff] }
  0x3a   : > { %315 = vst [vmem:[%s3784_s8 + $0x240] sm:$0xff] %v314_v62  ;;  %v320_v1 = vld [vmem:[%s3779_s7 + $0x6f4] sm:$0xff]  ;;  %317 = vst [vmem:[%s3784_s8 + $0x24c] sm:$0xff] %v316_v63  ;;  %v324_v3 = vld [vmem:[%s3779_s7 + $0x740] sm:$0xff] }
  0x3b   : > { %319 = vst [vmem:[%s3784_s8 + $0x254] sm:$0xff] %v318_v0  ;;  %321 = vst [vmem:[%s3784_s8 + $0x25c] sm:$0xff] %v320_v1  ;;  %v322_v2 = vld [vmem:[%s3779_s7 + $0x738] sm:$0xff]  ;;  %v326_v4 = vld [vmem:[%s3779_s7 + $0x748] sm:$0xff] }
  0x3c   : > { %323 = vst [vmem:[%s3784_s8 + $0x268] sm:$0xff] %v322_v2  ;;  %325 = vst [vmem:[%s3784_s8 + $0x270] sm:$0xff] %v324_v3  ;;  %v328_v5 = vld [vmem:[%s3779_s7 + $0x78c] sm:$0xff]  ;;  %v330_v6 = vld [vmem:[%s3779_s7 + $0x794] sm:$0xff] }
  0x3d   : > { %327 = vst [vmem:[%s3784_s8 + $0x278] sm:$0xff] %v326_v4  ;;  %v332_v7 = vld [vmem:[%s3779_s7 + $0x79c] sm:$0xff]  ;;  %329 = vst [vmem:[%s3784_s8 + $0x284] sm:$0xff] %v328_v5  ;;  %v336_v9 = vld [vmem:[%s3779_s7 + $0x7e8] sm:$0xff] }
  0x3e   : > { %331 = vst [vmem:[%s3784_s8 + $0x28c] sm:$0xff] %v330_v6  ;;  %333 = vst [vmem:[%s3784_s8 + $0x294] sm:$0xff] %v332_v7  ;;  %v334_v8 = vld [vmem:[%s3779_s7 + $0x7e0] sm:$0xff]  ;;  %v338_v10 = vld [vmem:[%s3779_s7 + $0x7f0] sm:$0xff] }
  0x3f   : > { %335 = vst [vmem:[%s3784_s8 + $0x2a0] sm:$0xff] %v334_v8  ;;  %337 = vst [vmem:[%s3784_s8 + $0x2a8] sm:$0xff] %v336_v9  ;;  %v340_v11 = vld [vmem:[%s3779_s7 + $0x834] sm:$0xff]  ;;  %v342_v12 = vld [vmem:[%s3779_s7 + $0x83c] sm:$0xff] }
  0x40   : > { %339 = vst [vmem:[%s3784_s8 + $0x2b0] sm:$0xff] %v338_v10  ;;  %v344_v13 = vld [vmem:[%s3779_s7 + $0x844] sm:$0xff]  ;;  %341 = vst [vmem:[%s3784_s8 + $0x2bc] sm:$0xff] %v340_v11  ;;  %v348_v15 = vld [vmem:[%s3779_s7 + $0x890] sm:$0xff] }
  0x41   : > { %343 = vst [vmem:[%s3784_s8 + $0x2c4] sm:$0xff] %v342_v12  ;;  %345 = vst [vmem:[%s3784_s8 + $0x2cc] sm:$0xff] %v344_v13  ;;  %v346_v14 = vld [vmem:[%s3779_s7 + $0x888] sm:$0xff]  ;;  %v350_v16 = vld [vmem:[%s3779_s7 + $0x898] sm:$0xff] }
  0x42   : > { %347 = vst [vmem:[%s3784_s8 + $0x2d8] sm:$0xff] %v346_v14  ;;  %349 = vst [vmem:[%s3784_s8 + $0x2e0] sm:$0xff] %v348_v15  ;;  %v352_v17 = vld [vmem:[%s3779_s7 + $0x8dc] sm:$0xff]  ;;  %v354_v18 = vld [vmem:[%s3779_s7 + $0x8e4] sm:$0xff] }
  0x43   : > { %351 = vst [vmem:[%s3784_s8 + $0x2e8] sm:$0xff] %v350_v16  ;;  %v356_v19 = vld [vmem:[%s3779_s7 + $0x8ec] sm:$0xff]  ;;  %353 = vst [vmem:[%s3784_s8 + $0x2f4] sm:$0xff] %v352_v17  ;;  %v360_v21 = vld [vmem:[%s3779_s7 + $0x938] sm:$0xff] }
  0x44   : > { %355 = vst [vmem:[%s3784_s8 + $0x2fc] sm:$0xff] %v354_v18  ;;  %357 = vst [vmem:[%s3784_s8 + $0x304] sm:$0xff] %v356_v19  ;;  %v358_v20 = vld [vmem:[%s3779_s7 + $0x930] sm:$0xff]  ;;  %v362_v22 = vld [vmem:[%s3779_s7 + $0x940] sm:$0xff] }
  0x45   : > { %359 = vst [vmem:[%s3784_s8 + $0x310] sm:$0xff] %v358_v20  ;;  %361 = vst [vmem:[%s3784_s8 + $0x318] sm:$0xff] %v360_v21  ;;  %v364_v23 = vld [vmem:[%s3779_s7 + $0x984] sm:$0xff]  ;;  %v366_v24 = vld [vmem:[%s3779_s7 + $0x98c] sm:$0xff] }
  0x46   : > { %363 = vst [vmem:[%s3784_s8 + $0x320] sm:$0xff] %v362_v22  ;;  %v368_v25 = vld [vmem:[%s3779_s7 + $0x994] sm:$0xff]  ;;  %365 = vst [vmem:[%s3784_s8 + $0x32c] sm:$0xff] %v364_v23  ;;  %v372_v27 = vld [vmem:[%s3779_s7 + $0x9e0] sm:$0xff] }
  0x47   : > { %367 = vst [vmem:[%s3784_s8 + $0x334] sm:$0xff] %v366_v24  ;;  %369 = vst [vmem:[%s3784_s8 + $0x33c] sm:$0xff] %v368_v25  ;;  %v370_v26 = vld [vmem:[%s3779_s7 + $0x9d8] sm:$0xff]  ;;  %v374_v28 = vld [vmem:[%s3779_s7 + $0x9e8] sm:$0xff] }
  0x48   : > { %371 = vst [vmem:[%s3784_s8 + $0x348] sm:$0xff] %v370_v26  ;;  %373 = vst [vmem:[%s3784_s8 + $0x350] sm:$0xff] %v372_v27  ;;  %v376_v29 = vld [vmem:[%s3779_s7 + $0xa2c] sm:$0xff]  ;;  %v378_v30 = vld [vmem:[%s3779_s7 + $0xa34] sm:$0xff] }
  0x49   : > { %375 = vst [vmem:[%s3784_s8 + $0x358] sm:$0xff] %v374_v28  ;;  %v380_v31 = vld [vmem:[%s3779_s7 + $0xa3c] sm:$0xff]  ;;  %377 = vst [vmem:[%s3784_s8 + $0x364] sm:$0xff] %v376_v29  ;;  %v2701_v32 = vld [vmem:[%s3779_s7 + $0x18] sm:$0xf] }
  0x4a   : > { %379 = vst [vmem:[%s3784_s8 + $0x36c] sm:$0xff] %v378_v30  ;;  %381 = vst [vmem:[%s3784_s8 + $0x374] sm:$0xff] %v380_v31  ;;  %v2703_v33 = vld [vmem:[%s3779_s7 + $0x6c] sm:$0xf]  ;;  %v2705_v34 = vld [vmem:[%s3779_s7 + $0xc0] sm:$0xf] }
  0x4b   : > { %2702 = vst [vmem:[%s3784_s8 + $0x18] sm:$0xf] %v2701_v32  ;;  %2704 = vst [vmem:[%s3784_s8 + $0x34] sm:$0xf] %v2703_v33  ;;  %v2707_v35 = vld [vmem:[%s3779_s7 + $0x114] sm:$0xf] }
  0x4c   : > { %2706 = vst [vmem:[%s3784_s8 + $0x50] sm:$0xf] %v2705_v34  ;;  %v2709_v36 = vld [vmem:[%s3779_s7 + $0x168] sm:$0xf]  ;;  %v2711_v37 = vld [vmem:[%s3779_s7 + $0x1bc] sm:$0xf] }
  0x4d   : > { %2708 = vst [vmem:[%s3784_s8 + $0x6c] sm:$0xf] %v2707_v35  ;;  %2710 = vst [vmem:[%s3784_s8 + $0x88] sm:$0xf] %v2709_v36  ;;  %v2713_v38 = vld [vmem:[%s3779_s7 + $0x210] sm:$0xf] }
  0x4e   : > { %2712 = vst [vmem:[%s3784_s8 + $0xa4] sm:$0xf] %v2711_v37  ;;  %v2715_v39 = vld [vmem:[%s3779_s7 + $0x264] sm:$0xf]  ;;  %v2717_v40 = vld [vmem:[%s3779_s7 + $0x2b8] sm:$0xf] }
  0x4f   : > { %2714 = vst [vmem:[%s3784_s8 + $0xc0] sm:$0xf] %v2713_v38  ;;  %2716 = vst [vmem:[%s3784_s8 + $0xdc] sm:$0xf] %v2715_v39  ;;  %v2719_v41 = vld [vmem:[%s3779_s7 + $0x30c] sm:$0xf] }
  0x50   : > { %2718 = vst [vmem:[%s3784_s8 + $0xf8] sm:$0xf] %v2717_v40  ;;  %v2721_v42 = vld [vmem:[%s3779_s7 + $0x360] sm:$0xf]  ;;  %v2723_v43 = vld [vmem:[%s3779_s7 + $0x3b4] sm:$0xf] }
  0x51   : > { %2720 = vst [vmem:[%s3784_s8 + $0x114] sm:$0xf] %v2719_v41  ;;  %2722 = vst [vmem:[%s3784_s8 + $0x130] sm:$0xf] %v2721_v42  ;;  %v2725_v44 = vld [vmem:[%s3779_s7 + $0x408] sm:$0xf] }
  0x52   : > { %2724 = vst [vmem:[%s3784_s8 + $0x14c] sm:$0xf] %v2723_v43  ;;  %v2727_v45 = vld [vmem:[%s3779_s7 + $0x45c] sm:$0xf]  ;;  %v2729_v46 = vld [vmem:[%s3779_s7 + $0x4b0] sm:$0xf] }
  0x53   : > { %2726 = vst [vmem:[%s3784_s8 + $0x168] sm:$0xf] %v2725_v44  ;;  %2728 = vst [vmem:[%s3784_s8 + $0x184] sm:$0xf] %v2727_v45  ;;  %v2731_v47 = vld [vmem:[%s3779_s7 + $0x504] sm:$0xf] }
  0x54   : > { %2730 = vst [vmem:[%s3784_s8 + $0x1a0] sm:$0xf] %v2729_v46  ;;  %v2733_v48 = vld [vmem:[%s3779_s7 + $0x558] sm:$0xf]  ;;  %v2735_v49 = vld [vmem:[%s3779_s7 + $0x5ac] sm:$0xf] }
  0x55   : > { %2732 = vst [vmem:[%s3784_s8 + $0x1bc] sm:$0xf] %v2731_v47  ;;  %2734 = vst [vmem:[%s3784_s8 + $0x1d8] sm:$0xf] %v2733_v48  ;;  %v2737_v50 = vld [vmem:[%s3779_s7 + $0x600] sm:$0xf] }
  0x56   : > { %2736 = vst [vmem:[%s3784_s8 + $0x1f4] sm:$0xf] %v2735_v49  ;;  %v2739_v51 = vld [vmem:[%s3779_s7 + $0x654] sm:$0xf]  ;;  %v2741_v52 = vld [vmem:[%s3779_s7 + $0x6a8] sm:$0xf] }
  0x57   : > { %2738 = vst [vmem:[%s3784_s8 + $0x210] sm:$0xf] %v2737_v50  ;;  %2740 = vst [vmem:[%s3784_s8 + $0x22c] sm:$0xf] %v2739_v51  ;;  %v2743_v53 = vld [vmem:[%s3779_s7 + $0x6fc] sm:$0xf] }
  0x58   : > { %2742 = vst [vmem:[%s3784_s8 + $0x248] sm:$0xf] %v2741_v52  ;;  %v2745_v54 = vld [vmem:[%s3779_s7 + $0x750] sm:$0xf]  ;;  %v2747_v55 = vld [vmem:[%s3779_s7 + $0x7a4] sm:$0xf] }
  0x59   : > { %2744 = vst [vmem:[%s3784_s8 + $0x264] sm:$0xf] %v2743_v53  ;;  %2746 = vst [vmem:[%s3784_s8 + $0x280] sm:$0xf] %v2745_v54  ;;  %v2749_v56 = vld [vmem:[%s3779_s7 + $0x7f8] sm:$0xf] }
  0x5a   : > { %2748 = vst [vmem:[%s3784_s8 + $0x29c] sm:$0xf] %v2747_v55  ;;  %v2751_v57 = vld [vmem:[%s3779_s7 + $0x84c] sm:$0xf]  ;;  %v2753_v58 = vld [vmem:[%s3779_s7 + $0x8a0] sm:$0xf] }
  0x5b   : > { %2750 = vst [vmem:[%s3784_s8 + $0x2b8] sm:$0xf] %v2749_v56  ;;  %2752 = vst [vmem:[%s3784_s8 + $0x2d4] sm:$0xf] %v2751_v57  ;;  %v2755_v59 = vld [vmem:[%s3779_s7 + $0x8f4] sm:$0xf] }
  0x5c   : > { %2754 = vst [vmem:[%s3784_s8 + $0x2f0] sm:$0xf] %v2753_v58  ;;  %v2757_v60 = vld [vmem:[%s3779_s7 + $0x948] sm:$0xf]  ;;  %v2759_v61 = vld [vmem:[%s3779_s7 + $0x99c] sm:$0xf] }
  0x5d   : > { %2756 = vst [vmem:[%s3784_s8 + $0x30c] sm:$0xf] %v2755_v59  ;;  %2758 = vst [vmem:[%s3784_s8 + $0x328] sm:$0xf] %v2757_v60  ;;  %v2761_v62 = vld [vmem:[%s3779_s7 + $0x9f0] sm:$0xf] }
  0x5e   : > { %2760 = vst [vmem:[%s3784_s8 + $0x344] sm:$0xf] %v2759_v61  ;;  %v2763_v63 = vld [vmem:[%s3779_s7 + $0xa44] sm:$0xf]  ;;  %2762 = vst [vmem:[%s3784_s8 + $0x360] sm:$0xf] %v2761_v62 }
  0x5f   : > { %2764 = vst [vmem:[%s3784_s8 + $0x37c] sm:$0xf] %v2763_v63 }
  0x60 PF: > { %p2765_p7 = scmp.ge.s32.totalorder %s3696_s18, 1  ;;  %p469_p8 = scmp.lt.s32.totalorder %s3696_s18, 7 }
  0x62   : > { %p470_p9 = pnand %p2765_p7, %p469_p8 }
  0x63   : > { %s476_s9 = sand.u32 (!%p470_p9), 1, %s3672_s12   ;;  %s515_s10 = smul.u32 (!%p470_p9), 112, %s3680_s14 }
  0x64   : > { %473 = sbr.rel (%p470_p9) target bundleno = 608 (0x260), region = 54  ;;  %s2767_s21 = sshll.u32 (!%p470_p9), %s3684_s15, 5 }
  0x65   : > { %s3368_s11 = smul.u32 (!%p470_p9), 896, %s476_s9  ;;  %p516_p10 = scmp.lt.s32.totalorder (!%p470_p9), %s515_s10, 335 }
  0x66   : > { %p528_p11 = scmp.lt.s32.totalorder (!%p470_p9), %s2767_s21, 63  ;;  %p2769_p12 = scmp.ne.s32.totalorder (!%p470_p9), %s3680_s14, 0 }
  0x67   : > { %s4054_s12 = scalar_lea.vmem (!%p470_p9), [#allocation3], %s3368_s11 }
  0x6b   : > { %s4534_s10 = smov (!%p516_p10, %s515_s10), 335  ;;  %s4536_s21 = smov (!%p528_p11, %s2767_s21), 63 }
  0x6c   : > { %s2766_s22 = sshll.u32 %s4534_s10, 2  ;;  %s2768_s27 = sshll.u32 %s4536_s21, 3  ;;  %v3698_v0 = vmov (!%p2769_p12), 0.0  }
  0x6d   : > { %s4047_s26 = scalar_lea.vmem %s4518_s1, %s2766_s22  ;;  %s4052_s30 = scalar_lea.vmem %s4520_s3, %s2768_s27  ;;  %541 = vst [vmem:[#allocation2] sm:$0xff] (!%p2769_p12), %v3698_v0  ;;  %542 = vst [vmem:[#allocation2 + $0x8] sm:$0xff] (!%p2769_p12), %v3698_v0 }
  0x6e   : > { %540 = sbr.rel (%p2769_p12) target bundleno = 125 (0x7d), region = 62  ;;  %543 = vst [vmem:[#allocation2 + $0x10] sm:$0xff] (!%p2769_p12), %v3698_v0  ;;  %544 = vst [vmem:[#allocation2 + $0x18] sm:$0xff] (!%p2769_p12), %v3698_v0 }
  0x6f   : > { %545 = vst [vmem:[#allocation2 + $0x20] sm:$0xff] (!%p2769_p12), %v3698_v0  ;;  %546 = vst [vmem:[#allocation2 + $0x28] sm:$0xff] (!%p2769_p12), %v3698_v0 }
  0x70   : > { %547 = vst [vmem:[#allocation2 + $0x30] sm:$0xff] (!%p2769_p12), %v3698_v0  ;;  %548 = vst [vmem:[#allocation2 + $0x38] sm:$0xff] (!%p2769_p12), %v3698_v0 }
  0x71   : > { %549 = vst [vmem:[#allocation2 + $0x40] sm:$0xff] (!%p2769_p12), %v3698_v0  ;;  %550 = vst [vmem:[#allocation2 + $0x48] sm:$0xff] (!%p2769_p12), %v3698_v0 }
  0x72   : > { %551 = vst [vmem:[#allocation2 + $0x50] sm:$0xff] (!%p2769_p12), %v3698_v0  ;;  %552 = vst [vmem:[#allocation2 + $0x58] sm:$0xff] (!%p2769_p12), %v3698_v0 }
  0x73   : > { %553 = vst [vmem:[#allocation2 + $0x60] sm:$0xff] (!%p2769_p12), %v3698_v0  ;;  %554 = vst [vmem:[#allocation2 + $0x68] sm:$0xff] (!%p2769_p12), %v3698_v0 }
  0x74   : > { %555 = vst [vmem:[#allocation2 + $0x70] sm:$0xff] (!%p2769_p12), %v3698_v0  ;;  %556 = vst [vmem:[#allocation2 + $0x78] sm:$0xff] (!%p2769_p12), %v3698_v0 }
  0x75   : > { %557 = vst [vmem:[#allocation2 + $0x80] sm:$0xff] %v3698_v0  ;;  %558 = vst [vmem:[#allocation2 + $0x88] sm:$0xff] %v3698_v0 }
  0x76   : > { %559 = vst [vmem:[#allocation2 + $0x90] sm:$0xff] %v3698_v0  ;;  %560 = vst [vmem:[#allocation2 + $0x98] sm:$0xff] %v3698_v0 }
  0x77   : > { %561 = vst [vmem:[#allocation2 + $0xa0] sm:$0xff] %v3698_v0  ;;  %562 = vst [vmem:[#allocation2 + $0xa8] sm:$0xff] %v3698_v0 }
  0x78   : > { %563 = vst [vmem:[#allocation2 + $0xb0] sm:$0xff] %v3698_v0  ;;  %564 = vst [vmem:[#allocation2 + $0xb8] sm:$0xff] %v3698_v0 }
  0x79   : > { %565 = vst [vmem:[#allocation2 + $0xc0] sm:$0xff] %v3698_v0  ;;  %566 = vst [vmem:[#allocation2 + $0xc8] sm:$0xff] %v3698_v0 }
  0x7a   : > { %567 = vst [vmem:[#allocation2 + $0xd0] sm:$0xff] %v3698_v0  ;;  %568 = vst [vmem:[#allocation2 + $0xd8] sm:$0xff] %v3698_v0 }
  0x7b   : > { %569 = vst [vmem:[#allocation2 + $0xe0] sm:$0xff] %v3698_v0  ;;  %570 = vst [vmem:[#allocation2 + $0xe8] sm:$0xff] %v3698_v0 }
  0x7c   : > { %571 = vst [vmem:[#allocation2 + $0xf0] sm:$0xff] %v3698_v0  ;;  %572 = vst [vmem:[#allocation2 + $0xf8] sm:$0xff] %v3698_v0 }
  0x7d PF: > { %v3426_v1 = vld [vmem:[%s4047_s26 + $0x40] sm:$0xff]   ;;  %v3428_v3 = vld [vmem:[%s4047_s26 + $0x48] sm:$0xff]   ;;  %v3430_v5 = vld [vmem:[%s4047_s26 + $0x50] sm:$0xff]   ;;  %p2938_p13 = scmp.ne.s32.totalorder %s3680_s14, 2 }
  0x7e   : > { %v3427_v2 = vld [vmem:[%s4047_s26] sm:$0xff]   ;;  %2942 = vmatprep.subr.bf16.mxu0 %v3426_v1  ;;  %3350 = vmatprep.subr.bf16.mxu1 %v3426_v1  ;;  %v3429_v4 = vld [vmem:[%s4047_s26 + $0x8] sm:$0xff]   ;;  %v3431_v6 = vld [vmem:[%s4047_s26 + $0x10] sm:$0xff]  }
  0x7f   : > { %2943 = vmatpush3.bf16.msra.mxu0 %v3427_v2  ;;  %3358 = vmatpush3.bf16.msra.mxu1 %v3427_v2  ;;  %v3432_v7 = vld [vmem:[%s4047_s26 + $0x58] sm:$0xff]   ;;  %v3434_v9 = vld [vmem:[%s4047_s26 + $0x60] sm:$0xff]   ;;  %v3436_v11 = vld [vmem:[%s4047_s26 + $0x68] sm:$0xff]  }
  0x80   : > { %2944 = vmatprep.subr.bf16.mxu0 %v3428_v3  ;;  %3351 = vmatprep.subr.bf16.mxu1 %v3428_v3  ;;  %v3433_v8 = vld [vmem:[%s4047_s26 + $0x18] sm:$0xff]   ;;  %v3435_v10 = vld [vmem:[%s4047_s26 + $0x20] sm:$0xff]   ;;  %v3437_v14 = vld [vmem:[%s4047_s26 + $0x28] sm:$0xff]  }
  0x81   : > { %v3444_v12 = vld [vmem:[%s4054_s12 + $0x4] ss:$28 sps:$4 sm:$0xff]   ;;  %v3438_v15 = vld [vmem:[%s4047_s26 + $0x70] sm:$0xff]   ;;  %v3440_v17 = vld [vmem:[%s4047_s26 + $0x78] sm:$0xff]  }
  0x82   : > { %v3447_v13 = vld [vmem:[%s4054_s12 + $0x2a4] ss:$28 sps:$4 sm:$0xff]   ;;  %1789 = vmatprep.mubr.bf16.mxu0 %v3444_v12  ;;  %v3439_v16 = vld [vmem:[%s4047_s26 + $0x30] sm:$0xff]   ;;  %v3441_v18 = vld [vmem:[%s4047_s26 + $0x38] sm:$0xff]  }
  0x83   : > { %2945 = vmatpush3.bf16.msra.mxu0 %v3429_v4  ;;  %3359 = vmatpush3.bf16.msra.mxu1 %v3429_v4  ;;  %v3448_v19 = vld [vmem:[%s4047_s26 + $0xc0] sm:$0xff]   ;;  %v3452_v25 = vld [vmem:[%s4047_s26 + $0xc8] sm:$0xff]   ;;  %v3454_v26 = vld [vmem:[%s4054_s12 + $0x3c] ss:$28 sps:$4 sm:$0xff]  }
  0x84   : > { %2946 = vmatprep.subr.bf16.mxu0 %v3430_v5  ;;  %3352 = vmatprep.subr.bf16.mxu1 %v3430_v5  ;;  %v3442_v20 = vld [vmem:[%s4054_s12] ss:$28 sps:$4 sm:$0xff]   ;;  %v3463_v28 = vld [vmem:[%s4047_s26 + $0x148] sm:$0xff]   ;;  %v3458_v31 = vld [vmem:[%s4054_s12 + $0x38] ss:$28 sps:$4 sm:$0xff]  }
  0x85   : > { %1885 = vmatprep.mubr.bf16.mxu1 %v3447_v13  ;;  %v3445_v21 = vld [vmem:[%s4054_s12 + $0x2a0] ss:$28 sps:$4 sm:$0xff]   ;;  %v3453_v29 = vld [vmem:[%s4047_s26 + $0x88] sm:$0xff]   ;;  %v3459_v32 = vld [vmem:[%s4054_s12 + $0x2d8] ss:$28 sps:$4 sm:$0xff]  }
  0x86   : > { %v3449_v22 = vld [vmem:[%s4047_s26 + $0x140] sm:$0xff]   ;;  %v3456_v27 = vld [vmem:[%s4054_s12 + $0x2dc] ss:$28 sps:$4 sm:$0xff]   ;;  %v3465_v30 = vld [vmem:[%s4047_s26 + $0x108] sm:$0xff]  }
  0x87   : > { %2947 = vmatpush3.bf16.msra.mxu0 %v3431_v6  ;;  %3360 = vmatpush3.bf16.msra.mxu1 %v3431_v6  ;;  %v3450_v23 = vld [vmem:[%s4047_s26 + $0x80] sm:$0xff]   ;;  %v3460_v33 = vld [vmem:[%s4047_s26 + $0xd0] sm:$0xff]   ;;  %v3462_v35 = vld [vmem:[%s4047_s26 + $0xd8] sm:$0xff]  }
  0x88   : > { %2948 = vmatprep.subr.bf16.mxu0 %v3432_v7  ;;  %3353 = vmatprep.subr.bf16.mxu1 %v3432_v7  ;;  %v3451_v24 = vld [vmem:[%s4047_s26 + $0x100] sm:$0xff]   ;;  %v3461_v34 = vld [vmem:[%s4047_s26 + $0x90] sm:$0xff]   ;;  %v3464_v38 = vld [vmem:[%s4047_s26 + $0x98] sm:$0xff]  }
  0x89   : > { %v3466_v36 = vld [vmem:[%s4054_s12 + $0x74] ss:$28 sps:$4 sm:$0xff]   ;;  %v3472_v39 = vld [vmem:[%s4047_s26 + $0xe0] sm:$0xff]   ;;  %v3474_v44 = vld [vmem:[%s4047_s26 + $0xe8] sm:$0xff]  }
  0x8a   : > { %v3468_v37 = vld [vmem:[%s4054_s12 + $0x314] ss:$28 sps:$4 sm:$0xff]   ;;  %v3473_v43 = vld [vmem:[%s4047_s26 + $0xa0] sm:$0xff]   ;;  %v3476_v46 = vld [vmem:[%s4054_s12 + $0xac] ss:$28 sps:$4 sm:$0xff]  }
  0x8b   : > { %2949 = vmatpush3.bf16.msra.mxu0 %v3433_v8  ;;  %3361 = vmatpush3.bf16.msra.mxu1 %v3433_v8  ;;  %v3470_v40 = vld [vmem:[%s4054_s12 + $0x70] ss:$28 sps:$4 sm:$0xff]   ;;  %v3480_v50 = vld [vmem:[%s4054_s12 + $0xa8] ss:$28 sps:$4 sm:$0xff]   ;;  %v3494_v52 = vld [vmem:[%s4047_s26 + $0x158] sm:$0xff]  }
  0x8c   : > { %2950 = vmatprep.subr.bf16.mxu0 %v3434_v9  ;;  %3354 = vmatprep.subr.bf16.mxu1 %v3434_v9  ;;  %v3471_v41 = vld [vmem:[%s4054_s12 + $0x310] ss:$28 sps:$4 sm:$0xff]   ;;  %v3481_v51 = vld [vmem:[%s4054_s12 + $0x348] ss:$28 sps:$4 sm:$0xff]   ;;  %v3496_v54 = vld [vmem:[%s4047_s26 + $0x118] sm:$0xff]  }
  0x8d   : > { %v3483_v42 = vld [vmem:[%s4047_s26 + $0x150] sm:$0xff]   ;;  %v3478_v47 = vld [vmem:[%s4054_s12 + $0x34c] ss:$28 sps:$4 sm:$0xff]   ;;  %v3488_v55 = vld [vmem:[%s4054_s12 + $0xe4] ss:$28 sps:$4 sm:$0xff]  }
  0x8e   : > { %v3485_v45 = vld [vmem:[%s4047_s26 + $0x110] sm:$0xff]   ;;  %v3475_v48 = vld [vmem:[%s4047_s26 + $0xa8] sm:$0xff]   ;;  %v3486_v56 = vld [vmem:[%s4047_s26 + $0xf8] sm:$0xff]  }
  0x8f   : > { %2951 = vmatpush3.bf16.msra.mxu0 %v3435_v10  ;;  %3362 = vmatpush3.bf16.msra.mxu1 %v3435_v10  ;;  %v3482_v49 = vld [vmem:[%s4047_s26 + $0xf0] sm:$0xff]   ;;  %v3492_v57 = vld [vmem:[%s4054_s12 + $0xc] ss:$28 sps:$4 sm:$0xff]   ;;  %v3487_v58 = vld [vmem:[%s4047_s26 + $0xb8] sm:$0xff]  }
  0x90   : > { %2952 = vmatprep.subr.bf16.mxu0 %v3436_v11  ;;  %3355 = vmatprep.subr.bf16.mxu1 %v3436_v11  ;;  %v3484_v53 = vld [vmem:[%s4047_s26 + $0xb0] sm:$0xff]   ;;  %v3495_v59 = vld [vmem:[%s4047_s26 + $0x180] sm:$0xff]   ;;  %v3497_v0 = vld [vmem:[%s4054_s12 + $0x11c] ss:$28 sps:$4 sm:$0xff]  }
  0x91   : > { %v3490_v60 = vld [vmem:[%s4054_s12 + $0x8] ss:$28 sps:$4 sm:$0xff]   ;;  %v3493_v63 = vld [vmem:[%s4054_s12 + $0xe0] ss:$28 sps:$4 sm:$0xff]   ;;  %v3501_v5 = vld [vmem:[%s4054_s12 + $0x118] ss:$28 sps:$4 sm:$0xff]  }
  0x92   : > { %v3509_v61 = vld [vmem:[%s4047_s26 + $0x160] sm:$0xff]   ;;  %v3511_v2 = vld [vmem:[%s4047_s26 + $0x188] sm:$0xff]   ;;  %v3503_v7 = vld [vmem:[%s4054_s12 + $0x154] ss:$28 sps:$4 sm:$0xff]  }
  0x93   : > { %2953 = vmatpush3.bf16.msra.mxu0 %v3437_v14  ;;  %3363 = vmatpush3.bf16.msra.mxu1 %v3437_v14  ;;  %v3510_v62 = vld [vmem:[%s4047_s26 + $0x120] sm:$0xff]   ;;  %v3518_v3 = vld [vmem:[%s4047_s26 + $0x168] sm:$0xff]   ;;  %v3526_v8 = vld [vmem:[%s4047_s26 + $0x190] sm:$0xff]  }
  0x94   : > { %2954 = vmatprep.subr.bf16.mxu0 %v3438_v15  ;;  %3356 = vmatprep.subr.bf16.mxu1 %v3438_v15  ;;  %v3499_v1 = vld [vmem:[%s4054_s12 + $0x44] ss:$28 sps:$4 sm:$0xff]   ;;  %v3519_v4 = vld [vmem:[%s4047_s26 + $0x128] sm:$0xff]   ;;  %v3505_v9 = vld [vmem:[%s4054_s12 + $0x7c] ss:$28 sps:$4 sm:$0xff]  }
  0x95   : > { %v3502_v6 = vld [vmem:[%s4054_s12 + $0x40] ss:$28 sps:$4 sm:$0xff]   ;;  %v3533_v10 = vld [vmem:[%s4047_s26 + $0x170] sm:$0xff]   ;;  %v3512_v14 = vld [vmem:[%s4054_s12 + $0x18c] ss:$28 sps:$4 sm:$0xff]  }
  0x96   : > { %v3534_v11 = vld [vmem:[%s4047_s26 + $0x130] sm:$0xff]  }
  0x97   : > { %2955 = vmatpush3.bf16.msra.mxu0 %v3439_v16  ;;  %3364 = vmatpush3.bf16.msra.mxu1 %v3439_v16  ;;  %v3507_v12 = vld [vmem:[%s4054_s12 + $0x150] ss:$28 sps:$4 sm:$0xff]   ;;  %v3508_v13 = vld [vmem:[%s4054_s12 + $0x78] ss:$28 sps:$4 sm:$0xff]  }
  0x98   : > { %2956 = vmatprep.subr.bf16.mxu0 %v3440_v17  ;;  %3357 = vmatprep.subr.bf16.mxu1 %v3440_v17  ;;  %v3514_v15 = vld [vmem:[%s4054_s12 + $0xb4] ss:$28 sps:$4 sm:$0xff]   ;;  %v3541_v16 = vld [vmem:[%s4047_s26 + $0x178] sm:$0xff]  }
  0x99   : > { %v3542_v17 = vld [vmem:[%s4047_s26 + $0x198] sm:$0xff]  }
  0x9b   : > { %2957 = vmatpush3.bf16.msra.mxu0 %v3441_v18  ;;  %3365 = vmatpush3.bf16.msra.mxu1 %v3441_v18  ;;  %v3543_v18 = vld [vmem:[%s4047_s26 + $0x138] sm:$0xff]  }
  0x9c   : > { %3054 = vmatprep.subr.bf16.mxu1 %v3448_v19  ;;  %3166 = vmatprep.subr.bf16.mxu0 %v3449_v22  ;;  %v3516_v19 = vld [vmem:[%s4054_s12 + $0x188] ss:$28 sps:$4 sm:$0xff]  }
  0x9d   : > { %v3522_v22 = vld [vmem:[%s4054_s12 + $0xec] ss:$28 sps:$4 sm:$0xff]  }
  0x9e   : > { %1790 = vmatmul.mubr.bf16.vlgmr.msra.gmra.mrb[0].mxu0 %v3442_v20  ;;  %1886 = vmatmul.mubr.bf16.vlgmr.msra.gmra.mrb[0].mxu1 %v3445_v21  ;;  %v3517_v20 = vld [vmem:[%s4054_s12 + $0xb0] ss:$28 sps:$4 sm:$0xff]   ;;  %v3520_v21 = vld [vmem:[%s4054_s12 + $0x1c4] ss:$28 sps:$4 sm:$0xff]  }
  0x9f   : > { %3055 = vmatpush3.bf16.msra.mxu1 %v3450_v23  ;;  %3167 = vmatpush3.bf16.msra.mxu0 %v3451_v24  ;;  %v3556_v23 = vld [vmem:[%s4047_s26 + $0x1a0] sm:$0xff]  }
  0xa0   : > { %3056 = vmatprep.subr.bf16.mxu1 %v3452_v25  ;;  %1797 = vmatprep.mubr.bf16.mxu0 %v3454_v26  ;;  %v3524_v24 = vld [vmem:[%s4054_s12 + $0x1c0] ss:$28 sps:$4 sm:$0xff]   ;;  %v3525_v25 = vld [vmem:[%s4054_s12 + $0xe8] ss:$28 sps:$4 sm:$0xff]  }
  0xa1   : > { %1893 = vmatprep.mubr.bf16.mxu1 %v3456_v27  ;;  %3168 = vmatprep.subr.bf16.mxu0 %v3463_v28  ;;  %v3569_v26 = vld [vmem:[%s4047_s26 + $0x1a8] sm:$0xff]   ;;  %v3527_v27 = vld [vmem:[%s4054_s12 + $0x1fc] ss:$28 sps:$4 sm:$0xff]   ;;  %v3529_v28 = vld [vmem:[%s4054_s12 + $0x124] ss:$28 sps:$4 sm:$0xff]  }
  0xa3   : > { %3057 = vmatpush3.bf16.msra.mxu1 %v3453_v29  ;;  %3169 = vmatpush3.bf16.msra.mxu0 %v3465_v30  ;;  %v3582_v29 = vld [vmem:[%s4047_s26 + $0x1b0] sm:$0xff]  }
  0xa4   : > { %3058 = vmatprep.subr.bf16.mxu1 %v3460_v33  ;;  %3170 = vmatprep.subr.bf16.mxu0 %v3483_v42  ;;  %v3531_v30 = vld [vmem:[%s4054_s12 + $0x1f8] ss:$28 sps:$4 sm:$0xff]  }
  0xa5   : > { %v3537_v33 = vld [vmem:[%s4054_s12 + $0x15c] ss:$28 sps:$4 sm:$0xff]   ;;  %v3554_v42 = vld [vmem:[%s4054_s12 + $0x14] ss:$28 sps:$4 sm:$0xff]  }
  0xa6   : > { %1798 = vmatmul.mubr.bf16.gmra.mrb[4].mxu0 %v3458_v31  ;;  %1894 = vmatmul.mubr.bf16.gmra.mrb[4].mxu1 %v3459_v32  ;;  %v3532_v31 = vld [vmem:[%s4054_s12 + $0x120] ss:$28 sps:$4 sm:$0xff]   ;;  %v3535_v32 = vld [vmem:[%s4054_s12 + $0x234] ss:$28 sps:$4 sm:$0xff]  }
  0xa7   : > { %3059 = vmatpush3.bf16.msra.mxu1 %v3461_v34  ;;  %1805 = vmatprep.mubr.bf16.mxu0 %v3466_v36  ;;  %v3595_v34 = vld [vmem:[%s4047_s26 + $0x1b8] sm:$0xff]  }
  0xa8   : > { %3060 = vmatprep.subr.bf16.mxu1 %v3462_v35  ;;  %1901 = vmatprep.mubr.bf16.mxu1 %v3468_v37  ;;  %v3539_v35 = vld [vmem:[%s4054_s12 + $0x230] ss:$28 sps:$4 sm:$0xff]   ;;  %v3540_v36 = vld [vmem:[%s4054_s12 + $0x158] ss:$28 sps:$4 sm:$0xff]  }
  0xa9   : > { %3171 = vmatpush3.bf16.msra.mxu0 %v3485_v45  ;;  %v3544_v37 = vld [vmem:[%s4054_s12 + $0x26c] ss:$28 sps:$4 sm:$0xff]   ;;  %v3557_v45 = vld [vmem:[%s4054_s12 + $0x204] ss:$28 sps:$4 sm:$0xff]  }
  0xaa   : > { %3172 = vmatprep.subr.bf16.mxu0 %v3494_v52  ;;  %v3568_v52 = vld [vmem:[%s4054_s12 + $0x80] ss:$28 sps:$4 sm:$0xff]  }
  0xab   : > { %3061 = vmatpush3.bf16.msra.mxu1 %v3464_v38  ;;  %v3546_v38 = vld [vmem:[%s4054_s12 + $0x194] ss:$28 sps:$4 sm:$0xff]  }
  0xac   : > { %3062 = vmatprep.subr.bf16.mxu1 %v3472_v39  ;;  %v3548_v39 = vld [vmem:[%s4054_s12 + $0x268] ss:$28 sps:$4 sm:$0xff]  }
  0xad   : > { %3173 = vmatpush3.bf16.msra.mxu0 %v3496_v54  ;;  %v3572_v54 = vld [vmem:[%s4054_s12 + $0xbc] ss:$28 sps:$4 sm:$0xff]  }
  0xae   : > { %1806 = vmatmul.mubr.bf16.gmra.mrb[8].mxu0 %v3470_v40  ;;  %1902 = vmatmul.mubr.bf16.gmra.mrb[8].mxu1 %v3471_v41  ;;  %v3549_v40 = vld [vmem:[%s4054_s12 + $0x190] ss:$28 sps:$4 sm:$0xff]  }
  0xaf   : > { %3063 = vmatpush3.bf16.msra.mxu1 %v3473_v43  ;;  %1813 = vmatprep.mubr.bf16.mxu0 %v3476_v46  ;;  %v3550_v41 = vld [vmem:[%s4054_s12 + $0x1cc] ss:$28 sps:$4 sm:$0xff]  }
  0xb0   : > { %3064 = vmatprep.subr.bf16.mxu1 %v3474_v44  ;;  %1909 = vmatprep.mubr.bf16.mxu1 %v3478_v47  ;;  %v3552_v43 = vld [vmem:[%s4054_s12 + $0x10] ss:$28 sps:$4 sm:$0xff]   ;;  %v3555_v44 = vld [vmem:[%s4054_s12 + $0x1c8] ss:$28 sps:$4 sm:$0xff]   ;;  %v3561_v47 = vld [vmem:[%s4054_s12 + $0x200] ss:$28 sps:$4 sm:$0xff]  }
  0xb1   : > { %3174 = vmatprep.subr.bf16.mxu0 %v3509_v61  ;;  %v3559_v46 = vld [vmem:[%s4054_s12 + $0x4c] ss:$28 sps:$4 sm:$0xff]   ;;  %v3583_v61 = vld [vmem:[%s4054_s12 + $0x2e4] ss:$28 sps:$4 sm:$0xff]  }
  0xb2   : > { %3175 = vmatpush3.bf16.msra.mxu0 %v3510_v62  ;;  %v3585_v62 = vld [vmem:[%s4054_s12 + $0x12c] ss:$28 sps:$4 sm:$0xff]  }
  0xb3   : > { %3065 = vmatpush3.bf16.msra.mxu1 %v3475_v48  ;;  %3176 = vmatprep.subr.bf16.mxu0 %v3518_v3  ;;  %v3562_v48 = vld [vmem:[%s4054_s12 + $0x48] ss:$28 sps:$4 sm:$0xff]   ;;  %v3593_v3 = vld [vmem:[%s4054_s12 + $0x318] ss:$28 sps:$4 sm:$0xff]  }
  0xb4   : > { %3066 = vmatprep.subr.bf16.mxu1 %v3482_v49  ;;  %v3563_v49 = vld [vmem:[%s4054_s12 + $0x23c] ss:$28 sps:$4 sm:$0xff]  }
  0xb6   : > { %1814 = vmatmul.mubr.bf16.gmra.mrb[12].mxu0 %v3480_v50  ;;  %1910 = vmatmul.mubr.bf16.gmra.mrb[12].mxu1 %v3481_v51  ;;  %v3565_v50 = vld [vmem:[%s4054_s12 + $0x84] ss:$28 sps:$4 sm:$0xff]   ;;  %v3567_v51 = vld [vmem:[%s4054_s12 + $0x238] ss:$28 sps:$4 sm:$0xff]  }
  0xb7   : > { %3067 = vmatpush3.bf16.msra.mxu1 %v3484_v53  ;;  %1821 = vmatprep.mubr.bf16.mxu0 %v3488_v55  ;;  %v3570_v53 = vld [vmem:[%s4054_s12 + $0x274] ss:$28 sps:$4 sm:$0xff]  }
  0xb8   : > { %3068 = vmatprep.subr.bf16.mxu1 %v3486_v56  ;;  %1950 = vmatprep.mubr.bf16.mxu1 %v3492_v57  ;;  %v3574_v55 = vld [vmem:[%s4054_s12 + $0x270] ss:$28 sps:$4 sm:$0xff]   ;;  %v3575_v56 = vld [vmem:[%s4054_s12 + $0xb8] ss:$28 sps:$4 sm:$0xff]  }
  0xb9   : > { %3177 = vmatpush3.bf16.msra.mxu0 %v3519_v4  ;;  %v3576_v57 = vld [vmem:[%s4054_s12 + $0x2ac] ss:$28 sps:$4 sm:$0xff]   ;;  %v3594_v4 = vld [vmem:[%s4054_s12 + $0x160] ss:$28 sps:$4 sm:$0xff]  }
  0xba   : > { %3178 = vmatprep.subr.bf16.mxu0 %v3533_v10  ;;  %v3604_v10 = vld [vmem:[%s4054_s12 + $0x18] ss:$28 sps:$4 sm:$0xff]  }
  0xbb   : > { %3069 = vmatpush3.bf16.msra.mxu1 %v3487_v58  ;;  %v3578_v58 = vld [vmem:[%s4054_s12 + $0xf4] ss:$28 sps:$4 sm:$0xff]  }
  0xbc   : > { %3302 = vmatprep.subr.bf16.mxu1 %v3495_v59 }
  0xbd   : > { %3179 = vmatpush3.bf16.msra.mxu0 %v3534_v11  ;;  %v3605_v11 = vld [vmem:[%s4054_s12 + $0x1d0] ss:$28 sps:$4 sm:$0xff]  }
  0xbe   : > { %1822 = vmatmul.mubr.bf16.gmra.mrb[16].mxu0 %v3493_v63  ;;  %1951 = vmatmul.mubr.bf16.vlgmr.msra.gmra.mrb[16].mxu1 %v3490_v60  ;;  %v3581_v60 = vld [vmem:[%s4054_s12 + $0xf0] ss:$28 sps:$4 sm:$0xff]   ;;  %v3587_v63 = vld [vmem:[%s4054_s12 + $0x2e0] ss:$28 sps:$4 sm:$0xff]  }
  0xbf   : > { %3303 = vmatpush3.bf16.msra.mxu1 %v3495_v59  ;;  %1829 = vmatprep.mubr.bf16.mxu0 %v3497_v0  ;;  %v3580_v59 = vld [vmem:[%s4054_s12 + $0x2a8] ss:$28 sps:$4 sm:$0xff]  }
  0xc0   : > { %1958 = vmatprep.mubr.bf16.mxu1 %v3499_v1  ;;  %3304 = vmatprep.subr.bf16.mxu1 %v3511_v2  ;;  %v3588_v0 = vld [vmem:[%s4054_s12 + $0x128] ss:$28 sps:$4 sm:$0xff]   ;;  %v3589_v1 = vld [vmem:[%s4054_s12 + $0x31c] ss:$28 sps:$4 sm:$0xff]  }
  0xc1   : > { %3180 = vmatprep.subr.bf16.mxu0 %v3541_v16  ;;  %v3611_v16 = vld [vmem:[%s4054_s12 + $0xc0] ss:$28 sps:$4 sm:$0xff]  }
  0xc2   : > { %3181 = vmatpush3.bf16.msra.mxu0 %v3543_v18  ;;  %v3614_v18 = vld [vmem:[%s4054_s12 + $0xf8] ss:$28 sps:$4 sm:$0xff]  }
  0xc3   : > { %3305 = vmatpush3.bf16.msra.mxu1 %v3511_v2  ;;  %v3591_v2 = vld [vmem:[%s4054_s12 + $0x164] ss:$28 sps:$4 sm:$0xff]  }
  0xc4   : > { %3306 = vmatprep.subr.bf16.mxu1 %v3526_v8 }
  0xc6   : > { %1830 = vmatmul.mubr.bf16.gmra.mrb[20].mxu0 %v3501_v5  ;;  %1959 = vmatmul.mubr.bf16.gmra.mrb[20].mxu1 %v3502_v6  ;;  %v3596_v5 = vld [vmem:[%s4054_s12 + $0x354] ss:$28 sps:$4 sm:$0xff]   ;;  %v3598_v6 = vld [vmem:[%s4054_s12 + $0x19c] ss:$28 sps:$4 sm:$0xff]  }
  0xc7   : > { %1837 = vmatprep.mubr.bf16.mxu0 %v3503_v7  ;;  %1966 = vmatprep.mubr.bf16.mxu1 %v3505_v9  ;;  %v3600_v7 = vld [vmem:[%s4054_s12 + $0x350] ss:$28 sps:$4 sm:$0xff]  }
  0xc8   : > { %3307 = vmatpush3.bf16.msra.mxu1 %v3526_v8  ;;  %v3601_v8 = vld [vmem:[%s4054_s12 + $0x198] ss:$28 sps:$4 sm:$0xff]  }
  0xc9   : > { %3308 = vmatprep.subr.bf16.mxu1 %v3542_v17  ;;  %v3602_v9 = vld [vmem:[%s4054_s12 + $0x1d4] ss:$28 sps:$4 sm:$0xff]  }
  0xcc   : > { %3309 = vmatpush3.bf16.msra.mxu1 %v3542_v17  ;;  %v3612_v17 = vld [vmem:[%s4054_s12 + $0x244] ss:$28 sps:$4 sm:$0xff]  }
  0xcd   : > { %3310 = vmatprep.subr.bf16.mxu1 %v3556_v23 }
  0xce   : > { %1838 = vmatmul.mubr.bf16.gmra.mrb[24].mxu0 %v3507_v12  ;;  %1967 = vmatmul.mubr.bf16.gmra.mrb[24].mxu1 %v3508_v13  ;;  %v3606_v12 = vld [vmem:[%s4054_s12 + $0x50] ss:$28 sps:$4 sm:$0xff]  }
  0xcf   : > { %1845 = vmatprep.mubr.bf16.mxu0 %v3512_v14  ;;  %1974 = vmatprep.mubr.bf16.mxu1 %v3514_v15  ;;  %v3607_v13 = vld [vmem:[%s4054_s12 + $0x20c] ss:$28 sps:$4 sm:$0xff]  }
  0xd0   : > { %3311 = vmatpush3.bf16.msra.mxu1 %v3556_v23  ;;  %v3609_v14 = vld [vmem:[%s4054_s12 + $0x88] ss:$28 sps:$4 sm:$0xff]   ;;  %v3620_v23 = vld [vmem:[%s4054_s12 + $0x278] ss:$28 sps:$4 sm:$0xff]  }
  0xd1   : > { %3312 = vmatprep.subr.bf16.mxu1 %v3569_v26  ;;  %v3610_v15 = vld [vmem:[%s4054_s12 + $0x208] ss:$28 sps:$4 sm:$0xff]  }
  0xd4   : > { %3313 = vmatpush3.bf16.msra.mxu1 %v3569_v26  ;;  %v3624_v26 = vld [vmem:[%s4054_s12 + $0x1d8] ss:$28 sps:$4 sm:$0xff]  }
  0xd5   : > { %3314 = vmatprep.subr.bf16.mxu1 %v3582_v29 }
  0xd6   : > { %1846 = vmatmul.mubr.bf16.gmra.mrb[28].mxu0 %v3516_v19  ;;  %1975 = vmatmul.mubr.bf16.gmra.mrb[28].mxu1 %v3517_v20  ;;  %v3615_v19 = vld [vmem:[%s4054_s12 + $0x240] ss:$28 sps:$4 sm:$0xff]   ;;  %v3616_v20 = vld [vmem:[%s4054_s12 + $0x130] ss:$28 sps:$4 sm:$0xff]  }
  0xd7   : > { %1853 = vmatprep.mubr.bf16.mxu0 %v3520_v21  ;;  %1982 = vmatprep.mubr.bf16.mxu1 %v3522_v22  ;;  %v3617_v21 = vld [vmem:[%s4054_s12 + $0x27c] ss:$28 sps:$4 sm:$0xff]   ;;  %v3619_v22 = vld [vmem:[%s4054_s12 + $0x168] ss:$28 sps:$4 sm:$0xff]  }
  0xd8   : > { %3315 = vmatpush3.bf16.msra.mxu1 %v3582_v29  ;;  %v3627_v29 = vld [vmem:[%s4054_s12 + $0x2ec] ss:$28 sps:$4 sm:$0xff]  }
  0xd9   : > { %3316 = vmatprep.subr.bf16.mxu1 %v3595_v34 }
  0xdc   : > { %3317 = vmatpush3.bf16.msra.mxu1 %v3595_v34  ;;  %v3634_v34 = vld [vmem:[%s4054_s12 + $0x2b8] ss:$28 sps:$4 sm:$0xff]  }
  0xde   : > { %1854 = vmatmul.mubr.bf16.gmra.mrb[32].mxu0 %v3524_v24  ;;  %1983 = vmatmul.mubr.bf16.gmra.mrb[32].mxu1 %v3525_v25  ;;  %v3621_v24 = vld [vmem:[%s4054_s12 + $0x1a0] ss:$28 sps:$4 sm:$0xff]   ;;  %v3622_v25 = vld [vmem:[%s4054_s12 + $0x2b4] ss:$28 sps:$4 sm:$0xff]  }
  0xdf   : > { %1861 = vmatprep.mubr.bf16.mxu0 %v3527_v27  ;;  %1990 = vmatprep.mubr.bf16.mxu1 %v3529_v28  ;;  %v3625_v27 = vld [vmem:[%s4054_s12 + $0x2b0] ss:$28 sps:$4 sm:$0xff]  }
  0xe0   : > { %v3626_v28 = vld [vmem:[%s4054_s12 + $0x210] ss:$28 sps:$4 sm:$0xff]  }
  0xe6   : > { %1862 = vmatmul.mubr.bf16.gmra.mrb[36].mxu0 %v3531_v30  ;;  %1991 = vmatmul.mubr.bf16.gmra.mrb[36].mxu1 %v3532_v31  ;;  %v3629_v30 = vld [vmem:[%s4054_s12 + $0x248] ss:$28 sps:$4 sm:$0xff]  }
  0xe7   : > { %1869 = vmatprep.mubr.bf16.mxu0 %v3535_v32  ;;  %1998 = vmatprep.mubr.bf16.mxu1 %v3537_v33  ;;  %v3630_v31 = vld [vmem:[%s4054_s12 + $0x2e8] ss:$28 sps:$4 sm:$0xff]   ;;  %v3631_v32 = vld [vmem:[%s4054_s12 + $0x280] ss:$28 sps:$4 sm:$0xff]  }
  0xe8   : > { %v3632_v33 = vld [vmem:[%s4054_s12 + $0x324] ss:$28 sps:$4 sm:$0xff]  }
  0xee   : > { %1870 = vmatmul.mubr.bf16.gmra.mrb[40].mxu0 %v3539_v35  ;;  %1999 = vmatmul.mubr.bf16.gmra.mrb[40].mxu1 %v3540_v36  ;;  %v3635_v35 = vld [vmem:[%s4054_s12 + $0x320] ss:$28 sps:$4 sm:$0xff]   ;;  %v3636_v36 = vld [vmem:[%s4054_s12 + $0x2f0] ss:$28 sps:$4 sm:$0xff]  }
  0xef   : > { %1877 = vmatprep.mubr.bf16.mxu0 %v3544_v37  ;;  %2006 = vmatprep.mubr.bf16.mxu1 %v3546_v38  ;;  %v3637_v37 = vld [vmem:[%s4054_s12 + $0x35c] ss:$28 sps:$4 sm:$0xff]   ;;  %v3639_v38 = vld [vmem:[%s4054_s12 + $0x328] ss:$28 sps:$4 sm:$0xff]  }
  0xf6   : > { %1878 = vmatmul.mubr.bf16.gmra.mrb[44].mxu0 %v3548_v39  ;;  %2007 = vmatmul.mubr.bf16.gmra.mrb[44].mxu1 %v3549_v40 }
  0xf7   : > { %2014 = vmatprep.mubr.bf16.mxu1 %v3550_v41  ;;  %2111 = vmatprep.mubr.bf16.mxu0 %v3554_v42 }
  0xfe   : > { %2015 = vmatmul.mubr.bf16.gmra.mrb[48].mxu1 %v3555_v44  ;;  %2112 = vmatmul.mubr.bf16.vlgmr.msra.gmra.mrb[48].mxu0 %v3552_v43  ;;  %v3640_v43 = vld [vmem:[%s4054_s12 + $0x358] ss:$28 sps:$4 sm:$0xff]   ;;  %v3641_v44 = vld [vmem:[%s4054_s12 + $0x360] ss:$28 sps:$4 sm:$0xff]  }
  0xff   : > { %2022 = vmatprep.mubr.bf16.mxu1 %v3557_v45  ;;  %2119 = vmatprep.mubr.bf16.mxu0 %v3559_v46 }
 0x106   : > { %2023 = vmatmul.mubr.bf16.gmra.mrb[52].mxu1 %v3561_v47  ;;  %2120 = vmatmul.mubr.bf16.gmra.mrb[52].mxu0 %v3562_v48 }
 0x107   : > { %2030 = vmatprep.mubr.bf16.mxu1 %v3563_v49  ;;  %2127 = vmatprep.mubr.bf16.mxu0 %v3565_v50 }
 0x10e   : > { %2031 = vmatmul.mubr.bf16.gmra.mrb[56].mxu1 %v3567_v51  ;;  %2128 = vmatmul.mubr.bf16.gmra.mrb[56].mxu0 %v3568_v52 }
 0x10f   : > { %2038 = vmatprep.mubr.bf16.mxu1 %v3570_v53  ;;  %2135 = vmatprep.mubr.bf16.mxu0 %v3572_v54 }
 0x116   : > { %2039 = vmatmul.mubr.bf16.gmra.mrb[60].mxu1 %v3574_v55  ;;  %2136 = vmatmul.mubr.bf16.gmra.mrb[60].mxu0 %v3575_v56 }
 0x117   : > { %2046 = vmatprep.mubr.bf16.mxu1 %v3576_v57  ;;  %2143 = vmatprep.mubr.bf16.mxu0 %v3578_v58 }
 0x11e   : > { %2047 = vmatmul.mubr.bf16.gmra.mrb[64].mxu1 %v3580_v59  ;;  %2144 = vmatmul.mubr.bf16.gmra.mrb[64].mxu0 %v3581_v60 }
 0x11f   : > { %2054 = vmatprep.mubr.bf16.mxu1 %v3583_v61  ;;  %2151 = vmatprep.mubr.bf16.mxu0 %v3585_v62 }
 0x126   : > { %2055 = vmatmul.mubr.bf16.gmra.mrb[68].mxu1 %v3587_v63  ;;  %2152 = vmatmul.mubr.bf16.gmra.mrb[68].mxu0 %v3588_v0 }
 0x127   : > { %2062 = vmatprep.mubr.bf16.mxu1 %v3589_v1  ;;  %2159 = vmatprep.mubr.bf16.mxu0 %v3591_v2 }
 0x12e   : > { %2063 = vmatmul.mubr.bf16.gmra.mrb[72].mxu1 %v3593_v3  ;;  %2160 = vmatmul.mubr.bf16.gmra.mrb[72].mxu0 %v3594_v4 }
 0x12f   : > { %2070 = vmatprep.mubr.bf16.mxu1 %v3596_v5  ;;  %2167 = vmatprep.mubr.bf16.mxu0 %v3598_v6 }
 0x136   : > { %2071 = vmatmul.mubr.bf16.gmra.mrb[76].mxu1 %v3600_v7  ;;  %2168 = vmatmul.mubr.bf16.gmra.mrb[76].mxu0 %v3601_v8 }
 0x137   : > { %2175 = vmatprep.mubr.bf16.mxu0 %v3602_v9  ;;  %3318 = vmatprep.mubr.bf16.mxu1 %v3604_v10 }
 0x13e   : > { %2176 = vmatmul.mubr.bf16.gmra.mrb[80].mxu0 %v3605_v11  ;;  %3319 = vmatmul.mubr.bf16.vlgmr.msra.gmra.mrb[80].mxu1 %v3606_v12 }
 0x13f   : > { %2183 = vmatprep.mubr.bf16.mxu0 %v3607_v13  ;;  %3322 = vmatprep.mubr.bf16.mxu1 %v3609_v14 }
 0x146   : > { %2184 = vmatmul.mubr.bf16.gmra.mrb[84].mxu0 %v3610_v15  ;;  %3323 = vmatmul.mubr.bf16.gmra.mrb[84].mxu1 %v3611_v16 }
 0x147   : > { %2191 = vmatprep.mubr.bf16.mxu0 %v3612_v17  ;;  %3326 = vmatprep.mubr.bf16.mxu1 %v3614_v18 }
 0x14e   : > { %2192 = vmatmul.mubr.bf16.gmra.mrb[88].mxu0 %v3615_v19  ;;  %3327 = vmatmul.mubr.bf16.gmra.mrb[88].mxu1 %v3616_v20 }
 0x14f   : > { %2199 = vmatprep.mubr.bf16.mxu0 %v3617_v21  ;;  %3330 = vmatprep.mubr.bf16.mxu1 %v3619_v22 }
 0x156   : > { %2200 = vmatmul.mubr.bf16.gmra.mrb[92].mxu0 %v3620_v23  ;;  %3331 = vmatmul.mubr.bf16.gmra.mrb[92].mxu1 %v3621_v24 }
 0x157   : > { %2207 = vmatprep.mubr.bf16.mxu0 %v3622_v25  ;;  %3334 = vmatprep.mubr.bf16.mxu1 %v3624_v26 }
 0x15e   : > { %2208 = vmatmul.mubr.bf16.gmra.mrb[96].mxu0 %v3625_v27  ;;  %3335 = vmatmul.mubr.bf16.gmra.mrb[96].mxu1 %v3626_v28 }
 0x15f   : > { %2215 = vmatprep.mubr.bf16.mxu0 %v3627_v29  ;;  %3338 = vmatprep.mubr.bf16.mxu1 %v3629_v30 }
 0x166   : > { %2216 = vmatmul.mubr.bf16.gmra.mrb[100].mxu0 %v3630_v31  ;;  %3339 = vmatmul.mubr.bf16.gmra.mrb[100].mxu1 %v3631_v32 }
 0x167   : > { %2223 = vmatprep.mubr.bf16.mxu0 %v3632_v33  ;;  %3342 = vmatprep.mubr.bf16.mxu1 %v3634_v34 }
 0x16e   : > { %2224 = vmatmul.mubr.bf16.gmra.mrb[104].mxu0 %v3635_v35  ;;  %3343 = vmatmul.mubr.bf16.gmra.mrb[104].mxu1 %v3636_v36 }
 0x16f   : > { %2231 = vmatprep.mubr.bf16.mxu0 %v3637_v37  ;;  %3346 = vmatprep.mubr.bf16.mxu1 %v3639_v38 }
 0x171   : > { %v2958_v39 = vpop.f32.mrb[0].mxu0  ;;  %v3030_v40 = vpop.f32.mrb[0].mxu1 }
 0x172   : > { %v2959_v41 = vpop.f32.mrb[1].mxu0  ;;  %v3031_v42 = vpop.f32.mrb[1].mxu1 }
 0x173   : > { %v2960_v45 = vadd.f32 %v2959_v41, %v2958_v39  ;;  %v2961_v46 = vpop.f32.mrb[2].mxu0  ;;  %v4225_v47 = vadd.f32 %v3031_v42, %v3030_v40  ;;  %v3033_v48 = vpop.f32.mrb[2].mxu1 }
 0x174   : > { %v2962_v49 = vpop.f32.mrb[3].mxu0  ;;  %v3034_v50 = vpop.f32.mrb[3].mxu1 }
 0x175   : > { %v2963_v51 = vadd.f32 %v2962_v49, %v2961_v46  ;;  %v4227_v52 = vadd.f32 %v3034_v50, %v3033_v48 }
 0x176   : > { %2232 = vmatmul.mubr.bf16.gmra.mrb[108].mxu0 %v3640_v43  ;;  %3347 = vmatmul.mubr.bf16.gmra.mrb[108].mxu1 %v3641_v44 }
 0x179   : > { %v2964_v53 = vpop.f32.mrb[4].mxu0  ;;  %v3036_v54 = vpop.f32.mrb[4].mxu1 }
 0x17a   : > { %v2965_v55 = vpop.f32.mrb[5].mxu0  ;;  %v3037_v56 = vpop.f32.mrb[5].mxu1 }
 0x17b   : > { %v2966_v57 = vadd.f32 %v2965_v55, %v2964_v53  ;;  %v2967_v58 = vpop.f32.mrb[6].mxu0  ;;  %v4229_v59 = vadd.f32 %v3037_v56, %v3036_v54  ;;  %v3039_v60 = vpop.f32.mrb[6].mxu1 }
 0x17c   : > { %v2968_v61 = vpop.f32.mrb[7].mxu0  ;;  %v3040_v62 = vpop.f32.mrb[7].mxu1 }
 0x17d   : > { %v2969_v63 = vadd.f32 %v2968_v61, %v2967_v58  ;;  %v4231_v0 = vadd.f32 %v3040_v62, %v3039_v60 }
 0x181   : > { %v2970_v1 = vpop.f32.mrb[8].mxu0  ;;  %v3042_v2 = vpop.f32.mrb[8].mxu1 }
 0x182   : > { %v2971_v3 = vpop.f32.mrb[9].mxu0  ;;  %v3043_v4 = vpop.f32.mrb[9].mxu1 }
 0x183   : > { %v2972_v5 = vadd.f32 %v2971_v3, %v2970_v1  ;;  %v2973_v6 = vpop.f32.mrb[10].mxu0  ;;  %v4233_v7 = vadd.f32 %v3043_v4, %v3042_v2  ;;  %v3045_v8 = vpop.f32.mrb[10].mxu1 }
 0x184   : > { %v2974_v9 = vpop.f32.mrb[11].mxu0  ;;  %v3046_v10 = vpop.f32.mrb[11].mxu1 }
 0x185   : > { %v2975_v11 = vadd.f32 %v2974_v9, %v2973_v6  ;;  %v4235_v12 = vadd.f32 %v3046_v10, %v3045_v8 }
 0x189   : > { %v2976_v13 = vpop.f32.mrb[12].mxu0  ;;  %v3048_v14 = vpop.f32.mrb[12].mxu1 }
 0x18a   : > { %v2977_v15 = vpop.f32.mrb[13].mxu0  ;;  %v3049_v16 = vpop.f32.mrb[13].mxu1 }
 0x18b   : > { %v2978_v17 = vadd.f32 %v2977_v15, %v2976_v13  ;;  %v2979_v18 = vpop.f32.mrb[14].mxu0  ;;  %v4237_v19 = vadd.f32 %v3049_v16, %v3048_v14  ;;  %v3051_v20 = vpop.f32.mrb[14].mxu1 }
 0x18c   : > { %v2980_v21 = vpop.f32.mrb[15].mxu0  ;;  %v3052_v22 = vpop.f32.mrb[15].mxu1 }
 0x18d   : > { %v2981_v23 = vadd.f32 %v2980_v21, %v2979_v18  ;;  %v4239_v24 = vadd.f32 %v3052_v22, %v3051_v20 }
 0x191   : > { %v2982_v25 = vpop.f32.mrb[16].mxu0  ;;  %v3070_v26 = vpop.f32.mrb[16].mxu1 }
 0x192   : > { %v2983_v27 = vpop.f32.mrb[17].mxu0  ;;  %v3071_v28 = vpop.f32.mrb[17].mxu1 }
 0x193   : > { %v2984_v29 = vadd.f32 %v2983_v27, %v2982_v25  ;;  %v3072_v30 = vadd.f32 %v3071_v28, %v3070_v26  ;;  %v2985_v31 = vpop.f32.mrb[18].mxu0  ;;  %v3073_v32 = vpop.f32.mrb[18].mxu1 }
 0x194   : > { %v2986_v33 = vpop.f32.mrb[19].mxu0  ;;  %v3074_v34 = vpop.f32.mrb[19].mxu1 }
 0x195   : > { %v4241_v35 = vadd.f32 %v3072_v30, %v2960_v45  ;;  %v2987_v36 = vadd.f32 %v2986_v33, %v2985_v31  ;;  %v3075_v37 = vadd.f32 %v3074_v34, %v3073_v32 }
 0x197   : > { %v4243_v38 = vadd.f32 %v3075_v37, %v2963_v51 }
 0x199   : > { %v2988_v39 = vpop.f32.mrb[20].mxu0  ;;  %v3076_v40 = vpop.f32.mrb[20].mxu1 }
 0x19a   : > { %v2989_v41 = vpop.f32.mrb[21].mxu0  ;;  %v3077_v42 = vpop.f32.mrb[21].mxu1 }
 0x19b   : > { %v2990_v43 = vadd.f32 %v2989_v41, %v2988_v39  ;;  %v3078_v44 = vadd.f32 %v3077_v42, %v3076_v40  ;;  %v2991_v46 = vpop.f32.mrb[22].mxu0  ;;  %v3079_v48 = vpop.f32.mrb[22].mxu1 }
 0x19c   : > { %v2992_v49 = vpop.f32.mrb[23].mxu0  ;;  %v3080_v50 = vpop.f32.mrb[23].mxu1 }
 0x19d   : > { %v4245_v53 = vadd.f32 %v3078_v44, %v2966_v57  ;;  %v2993_v54 = vadd.f32 %v2992_v49, %v2991_v46  ;;  %v3081_v55 = vadd.f32 %v3080_v50, %v3079_v48 }
 0x19f   : > { %v4247_v45 = vadd.f32 %v3081_v55, %v2969_v63 }
 0x1a1   : > { %v2994_v56 = vpop.f32.mrb[24].mxu0  ;;  %v3082_v58 = vpop.f32.mrb[24].mxu1 }
 0x1a2   : > { %v2995_v51 = vpop.f32.mrb[25].mxu0  ;;  %v3083_v60 = vpop.f32.mrb[25].mxu1 }
 0x1a3   : > { %v2996_v61 = vadd.f32 %v2995_v51, %v2994_v56  ;;  %v3084_v62 = vadd.f32 %v3083_v60, %v3082_v58  ;;  %v2997_v1 = vpop.f32.mrb[26].mxu0  ;;  %v3085_v2 = vpop.f32.mrb[26].mxu1 }
 0x1a4   : > { %v2998_v3 = vpop.f32.mrb[27].mxu0  ;;  %v3086_v4 = vpop.f32.mrb[27].mxu1 }
 0x1a5   : > { %v4249_v6 = vadd.f32 %v3084_v62, %v2972_v5  ;;  %v2999_v8 = vadd.f32 %v2998_v3, %v2997_v1  ;;  %v3087_v9 = vadd.f32 %v3086_v4, %v3085_v2 }
 0x1a7   : > { %v4251_v57 = vadd.f32 %v3087_v9, %v2975_v11 }
 0x1a9   : > { %v3000_v10 = vpop.f32.mrb[28].mxu0  ;;  %v3088_v13 = vpop.f32.mrb[28].mxu1 }
 0x1aa   : > { %v3001_v63 = vpop.f32.mrb[29].mxu0  ;;  %v3089_v14 = vpop.f32.mrb[29].mxu1 }
 0x1ab   : > { %v3002_v15 = vadd.f32 %v3001_v63, %v3000_v10  ;;  %v3090_v16 = vadd.f32 %v3089_v14, %v3088_v13  ;;  %v3003_v18 = vpop.f32.mrb[30].mxu0  ;;  %v3091_v20 = vpop.f32.mrb[30].mxu1 }
 0x1ac   : > { %v3004_v21 = vpop.f32.mrb[31].mxu0  ;;  %v3092_v22 = vpop.f32.mrb[31].mxu1 }
 0x1ad   : > { %v4253_v25 = vadd.f32 %v3090_v16, %v2978_v17  ;;  %v3005_v26 = vadd.f32 %v3004_v21, %v3003_v18  ;;  %v3093_v27 = vadd.f32 %v3092_v22, %v3091_v20 }
 0x1af   : > { %v4255_v5 = vadd.f32 %v3093_v27, %v2981_v23 }
 0x1b1   : > { %v3006_v28 = vpop.f32.mrb[32].mxu0  ;;  %v3094_v30 = vpop.f32.mrb[32].mxu1 }
 0x1b2   : > { %v3007_v11 = vpop.f32.mrb[33].mxu0  ;;  %v3095_v31 = vpop.f32.mrb[33].mxu1 }
 0x1b3   : > { %v3008_v32 = vadd.f32 %v3007_v11, %v3006_v28  ;;  %v3096_v33 = vadd.f32 %v3095_v31, %v3094_v30  ;;  %v3009_v34 = vpop.f32.mrb[34].mxu0  ;;  %v3097_v37 = vpop.f32.mrb[34].mxu1 }
 0x1b4   : > { %v3010_v39 = vpop.f32.mrb[35].mxu0  ;;  %v3098_v40 = vpop.f32.mrb[35].mxu1 }
 0x1b5   : > { %v4257_v41 = vadd.f32 %v3096_v33, %v2984_v29  ;;  %v3011_v42 = vadd.f32 %v3010_v39, %v3009_v34  ;;  %v3099_v44 = vadd.f32 %v3098_v40, %v3097_v37 }
 0x1b7   : > { %v4259_v17 = vadd.f32 %v3099_v44, %v2987_v36 }
 0x1b9   : > { %v3012_v46 = vpop.f32.mrb[36].mxu0  ;;  %v3100_v48 = vpop.f32.mrb[36].mxu1 }
 0x1ba   : > { %v3013_v23 = vpop.f32.mrb[37].mxu0  ;;  %v3101_v49 = vpop.f32.mrb[37].mxu1 }
 0x1bb   : > { %v4261_v50 = vadd.f32 %v3013_v23, %v3012_v46  ;;  %v3102_v55 = vadd.f32 %v3101_v49, %v3100_v48  ;;  %v3015_v56 = vpop.f32.mrb[38].mxu0  ;;  %v3103_v58 = vpop.f32.mrb[38].mxu1 }
 0x1bc   : > { %v3016_v51 = vpop.f32.mrb[39].mxu0  ;;  %v3104_v60 = vpop.f32.mrb[39].mxu1 }
 0x1bd   : > { %v4263_v62 = vadd.f32 %v3102_v55, %v2990_v43  ;;  %v3017_v1 = vadd.f32 %v3016_v51, %v3015_v56  ;;  %v3105_v29 = vadd.f32 %v3104_v60, %v3103_v58 }
 0x1bf   : > { %v4265_v2 = vadd.f32 %v3105_v29, %v2993_v54 }
 0x1c1   : > { %v3018_v3 = vpop.f32.mrb[40].mxu0  ;;  %v3106_v36 = vpop.f32.mrb[40].mxu1 }
 0x1c2   : > { %v3019_v4 = vpop.f32.mrb[41].mxu0  ;;  %v3107_v9 = vpop.f32.mrb[41].mxu1 }
 0x1c3   : > { %v4267_v10 = vadd.f32 %v3019_v4, %v3018_v3  ;;  %v3108_v13 = vadd.f32 %v3107_v9, %v3106_v36  ;;  %v3021_v63 = vpop.f32.mrb[42].mxu0  ;;  %v3109_v14 = vpop.f32.mrb[42].mxu1 }
 0x1c4   : > { %v3022_v16 = vpop.f32.mrb[43].mxu0  ;;  %v3110_v18 = vpop.f32.mrb[43].mxu1 }
 0x1c5   : > { %v4269_v20 = vadd.f32 %v3108_v13, %v2996_v61  ;;  %v4271_v21 = vadd.f32 %v3022_v16, %v3021_v63  ;;  %v3111_v43 = vadd.f32 %v3110_v18, %v3109_v14 }
 0x1c7   : > { %v4273_v22 = vadd.f32 %v3111_v43, %v2999_v8 }
 0x1c9   : > { %v3024_v54 = vpop.f32.mrb[44].mxu0  ;;  %v3112_v27 = vpop.f32.mrb[44].mxu1 }
 0x1ca   : > { %v3025_v28 = vpop.f32.mrb[45].mxu0  ;;  %v3113_v30 = vpop.f32.mrb[45].mxu1 }
 0x1cb   : > { %v4275_v11 = vadd.f32 %v3025_v28, %v3024_v54  ;;  %v3114_v31 = vadd.f32 %v3113_v30, %v3112_v27  ;;  %v3027_v33 = vpop.f32.mrb[46].mxu0  ;;  %v3115_v34 = vpop.f32.mrb[46].mxu1 }
 0x1cc   : > { %v3028_v37 = vpop.f32.mrb[47].mxu0  ;;  %v3116_v39 = vpop.f32.mrb[47].mxu1 }
 0x1cd   : > { %v4277_v40 = vadd.f32 %v3114_v31, %v3002_v15  ;;  %v4279_v61 = vadd.f32 %v3028_v37, %v3027_v33  ;;  %v3117_v44 = vadd.f32 %v3116_v39, %v3115_v34 }
 0x1cf   : > { %v4281_v46 = vadd.f32 %v3117_v44, %v3005_v26 }
 0x1d1   : > { %v3118_v8 = vpop.f32.mrb[48].mxu1  ;;  %v3182_v48 = vpop.f32.mrb[48].mxu0 }
 0x1d2   : > { %v3119_v23 = vpop.f32.mrb[49].mxu1  ;;  %v3183_v49 = vpop.f32.mrb[49].mxu0 }
 0x1d3   : > { %v3120_v55 = vadd.f32 %v3119_v23, %v3118_v8  ;;  %v3184_v56 = vadd.f32 %v3183_v49, %v3182_v48  ;;  %v3121_v58 = vpop.f32.mrb[50].mxu1  ;;  %v3185_v51 = vpop.f32.mrb[50].mxu0 }
 0x1d4   : > { %v3122_v60 = vpop.f32.mrb[51].mxu1  ;;  %v3186_v29 = vpop.f32.mrb[51].mxu0 }
 0x1d5   : > { %v4283_v3 = vadd.f32 %v3120_v55, %v3008_v32  ;;  %v3123_v36 = vadd.f32 %v3122_v60, %v3121_v58  ;;  %v3187_v15 = vadd.f32 %v3186_v29, %v3185_v51  ;;  %v4286_v4 = vadd.f32 %v3184_v56, %v4241_v35 }
 0x1d7   : > { %v4288_v9 = vadd.f32 %v3123_v36, %v3011_v42  ;;  %v4291_v26 = vadd.f32 %v3187_v15, %v4243_v38 }
 0x1d9   : > { %v3124_v13 = vpop.f32.mrb[52].mxu1  ;;  %v3188_v63 = vpop.f32.mrb[52].mxu0 }
 0x1da   : > { %v3125_v14 = vpop.f32.mrb[53].mxu1  ;;  %v3189_v16 = vpop.f32.mrb[53].mxu0 }
 0x1db   : > { %v3126_v18 = vadd.f32 %v3125_v14, %v3124_v13  ;;  %v3190_v43 = vadd.f32 %v3189_v16, %v3188_v63  ;;  %v3127_v54 = vpop.f32.mrb[54].mxu1  ;;  %v3191_v27 = vpop.f32.mrb[54].mxu0 }
 0x1dc   : > { %v3128_v32 = vpop.f32.mrb[55].mxu1  ;;  %v3192_v28 = vpop.f32.mrb[55].mxu0 }
 0x1dd   : > { %v4294_v30 = vadd.f32 %v3126_v18, %v4261_v50  ;;  %v3129_v35 = vadd.f32 %v3128_v32, %v3127_v54  ;;  %v3193_v31 = vadd.f32 %v3192_v28, %v3191_v27  ;;  %v4297_v42 = vadd.f32 %v3190_v43, %v4245_v53 }
 0x1df   : > { %v4299_v38 = vadd.f32 %v3129_v35, %v3017_v1  ;;  %v4302_v33 = vadd.f32 %v3193_v31, %v4247_v45 }
 0x1e1   : > { %v3130_v34 = vpop.f32.mrb[56].mxu1  ;;  %v3194_v37 = vpop.f32.mrb[56].mxu0 }
 0x1e2   : > { %v3131_v39 = vpop.f32.mrb[57].mxu1  ;;  %v3195_v44 = vpop.f32.mrb[57].mxu0 }
 0x1e3   : > { %v3132_v8 = vadd.f32 %v3131_v39, %v3130_v34  ;;  %v3196_v48 = vadd.f32 %v3195_v44, %v3194_v37  ;;  %v3133_v23 = vpop.f32.mrb[58].mxu1  ;;  %v3197_v49 = vpop.f32.mrb[58].mxu0 }
 0x1e4   : > { %v3134_v50 = vpop.f32.mrb[59].mxu1  ;;  %v3198_v55 = vpop.f32.mrb[59].mxu0 }
 0x1e5   : > { %v4305_v56 = vadd.f32 %v3132_v8, %v4267_v10  ;;  %v3135_v53 = vadd.f32 %v3134_v50, %v3133_v23  ;;  %v3199_v58 = vadd.f32 %v3198_v55, %v3197_v49  ;;  %v4308_v1 = vadd.f32 %v3196_v48, %v4249_v6 }
 0x1e7   : > { %v4311_v45 = vadd.f32 %v3135_v53, %v4271_v21  ;;  %v4314_v51 = vadd.f32 %v3199_v58, %v4251_v57 }
 0x1e9   : > { %v3136_v60 = vpop.f32.mrb[60].mxu1  ;;  %v3200_v29 = vpop.f32.mrb[60].mxu0 }
 0x1ea   : > { %v3137_v36 = vpop.f32.mrb[61].mxu1  ;;  %v3201_v15 = vpop.f32.mrb[61].mxu0 }
 0x1eb   : > { %v3138_v13 = vadd.f32 %v3137_v36, %v3136_v60  ;;  %v3202_v63 = vadd.f32 %v3201_v15, %v3200_v29  ;;  %v3139_v14 = vpop.f32.mrb[62].mxu1  ;;  %v3203_v10 = vpop.f32.mrb[62].mxu0 }
 0x1ec   : > { %v3140_v16 = vpop.f32.mrb[63].mxu1  ;;  %v3204_v18 = vpop.f32.mrb[63].mxu0 }
 0x1ed   : > { %v4317_v43 = vadd.f32 %v3138_v13, %v4275_v11  ;;  %v3141_v6 = vadd.f32 %v3140_v16, %v3139_v14  ;;  %v3205_v54 = vadd.f32 %v3204_v18, %v3203_v10  ;;  %v4320_v21 = vadd.f32 %v3202_v63, %v4253_v25 }
 0x1ef   : > { %v4323_v57 = vadd.f32 %v3141_v6, %v4279_v61  ;;  %v4326_v27 = vadd.f32 %v3205_v54, %v4255_v5 }
 0x1f1   : > { %v3142_v32 = vpop.f32.mrb[64].mxu1  ;;  %v3206_v28 = vpop.f32.mrb[64].mxu0 }
 0x1f2   : > { %v3143_v35 = vpop.f32.mrb[65].mxu1  ;;  %v3207_v31 = vpop.f32.mrb[65].mxu0 }
 0x1f3   : > { %v3144_v34 = vadd.f32 %v3143_v35, %v3142_v32  ;;  %v3208_v37 = vadd.f32 %v3207_v31, %v3206_v28  ;;  %v3145_v39 = vpop.f32.mrb[66].mxu1  ;;  %v3209_v11 = vpop.f32.mrb[66].mxu0 }
 0x1f4   : > { %v3146_v44 = vpop.f32.mrb[67].mxu1  ;;  %v3210_v8 = vpop.f32.mrb[67].mxu0 }
 0x1f5   : > { %v4329_v48 = vadd.f32 %v3144_v34, %v4225_v47  ;;  %v3147_v25 = vadd.f32 %v3146_v44, %v3145_v39  ;;  %v3211_v23 = vadd.f32 %v3210_v8, %v3209_v11  ;;  %v4332_v61 = vadd.f32 %v3208_v37, %v4257_v41 }
 0x1f7   : > { %v4335_v5 = vadd.f32 %v3147_v25, %v4227_v52  ;;  %v4338_v49 = vadd.f32 %v3211_v23, %v4259_v17 }
 0x1f9   : > { %v3148_v50 = vpop.f32.mrb[68].mxu1  ;;  %v3212_v55 = vpop.f32.mrb[68].mxu0 }
 0x1fa   : > { %v3149_v53 = vpop.f32.mrb[69].mxu1  ;;  %v3213_v58 = vpop.f32.mrb[69].mxu0 }
 0x1fb   : > { %v3150_v60 = vadd.f32 %v3149_v53, %v3148_v50  ;;  %v3214_v29 = vadd.f32 %v3213_v58, %v3212_v55  ;;  %v3151_v36 = vpop.f32.mrb[70].mxu1  ;;  %v3215_v47 = vpop.f32.mrb[70].mxu0 }
 0x1fc   : > { %v3152_v15 = vpop.f32.mrb[71].mxu1  ;;  %v3216_v13 = vpop.f32.mrb[71].mxu0 }
 0x1fd   : > { %v4341_v63 = vadd.f32 %v3150_v60, %v4229_v59  ;;  %v3153_v41 = vadd.f32 %v3152_v15, %v3151_v36  ;;  %v3217_v14 = vadd.f32 %v3216_v13, %v3215_v47  ;;  %v4344_v52 = vadd.f32 %v3214_v29, %v4263_v62  ;;  %v575_v13 = vld [vmem:[#allocation2 + $0x10] sm:$0xff] }
 0x1ff   : > { %v4347_v17 = vadd.f32 %v3153_v41, %v4231_v0  ;;  %v4350_v10 = vadd.f32 %v3217_v14, %v4265_v2 }
 0x201   : > { %v3154_v16 = vpop.f32.mrb[72].mxu1  ;;  %v3218_v18 = vpop.f32.mrb[72].mxu0 }
 0x202   : > { %v3155_v6 = vpop.f32.mrb[73].mxu1  ;;  %v3219_v54 = vpop.f32.mrb[73].mxu0 }
 0x203   : > { %v3156_v32 = vadd.f32 %v3155_v6, %v3154_v16  ;;  %v3220_v28 = vadd.f32 %v3219_v54, %v3218_v18  ;;  %v3157_v35 = vpop.f32.mrb[74].mxu1  ;;  %v3221_v59 = vpop.f32.mrb[74].mxu0  ;;  %v573_v18 = vld [vmem:[#allocation2] sm:$0xff] }
 0x204   : > { %v3158_v31 = vpop.f32.mrb[75].mxu1  ;;  %v3222_v34 = vpop.f32.mrb[75].mxu0 }
 0x205   : > { %v4353_v37 = vadd.f32 %v3156_v32, %v4233_v7  ;;  %v3159_v62 = vadd.f32 %v3158_v31, %v3157_v35  ;;  %v3223_v39 = vadd.f32 %v3222_v34, %v3221_v59  ;;  %v4356_v0 = vadd.f32 %v3220_v28, %v4269_v20 }
 0x207   : > { %v4359_v2 = vadd.f32 %v3159_v62, %v4235_v12  ;;  %v4362_v11 = vadd.f32 %v3223_v39, %v4273_v22 }
 0x209   : > { %v3160_v44 = vpop.f32.mrb[76].mxu1  ;;  %v3224_v8 = vpop.f32.mrb[76].mxu0 }
 0x20a   : > { %v3161_v25 = vpop.f32.mrb[77].mxu1  ;;  %v3225_v23 = vpop.f32.mrb[77].mxu0 }
 0x20b   : > { %v3162_v50 = vadd.f32 %v3161_v25, %v3160_v44  ;;  %v3226_v55 = vadd.f32 %v3225_v23, %v3224_v8  ;;  %v3163_v53 = vpop.f32.mrb[78].mxu1  ;;  %v3227_v7 = vpop.f32.mrb[78].mxu0  ;;  %v579_v25 = vld [vmem:[#allocation2 + $0x30] sm:$0xff] }
 0x20c   : > { %v3164_v58 = vpop.f32.mrb[79].mxu1  ;;  %v3228_v60 = vpop.f32.mrb[79].mxu0 }
 0x20d   : > { %v4365_v29 = vadd.f32 %v3162_v50, %v4237_v19  ;;  %v3165_v20 = vadd.f32 %v3164_v58, %v3163_v53  ;;  %v3229_v36 = vadd.f32 %v3228_v60, %v3227_v7  ;;  %v4368_v12 = vadd.f32 %v3226_v55, %v4277_v40  ;;  %v576_v40 = vld [vmem:[#allocation2 + $0x18] sm:$0xff]  ;;  %v577_v53 = vld [vmem:[#allocation2 + $0x20] sm:$0xff] }
 0x20e   : > { %v580_v60 = vld [vmem:[#allocation2 + $0x38] sm:$0xff] }
 0x20f   : > { %v4371_v22 = vadd.f32 %v3165_v20, %v4239_v24  ;;  %v4374_v47 = vadd.f32 %v3229_v36, %v4281_v46  ;;  %v574_v46 = vld [vmem:[#allocation2 + $0x8] sm:$0xff] }
 0x211   : > { %v3230_v15 = vpop.f32.mrb[80].mxu0  ;;  %v3320_v41 = vpop.f32.mrb[80].mxu1 }
 0x212   : > { %v2283_v14 = vadd.f32 %v3320_v41, %v4297_v42  ;;  %v3231_v16 = vpop.f32.mrb[81].mxu0  ;;  %v2274_v19 = vpop.f32.mrb[81].mxu1 }
 0x213   : > { %v3232_v6 = vadd.f32 %v3231_v16, %v3230_v15  ;;  %v2275_v54 = vadd.f32 %v2274_v19, %v4286_v4  ;;  %v3233_v32 = vpop.f32.mrb[82].mxu0  ;;  %v3321_v28 = vpop.f32.mrb[82].mxu1 }
 0x214   : > { %v2403_v35 = vadd.f32 %v2283_v14, %v575_v13  ;;  %v2286_v24 = vadd.f32 %v3321_v28, %v4302_v33  ;;  %v3234_v59 = vpop.f32.mrb[83].mxu0  ;;  %v2277_v31 = vpop.f32.mrb[83].mxu1  ;;  %v578_v13 = vld [vmem:[#allocation2 + $0x28] sm:$0xff] }
 0x215   : > { %v2401_v34 = vadd.f32 %v2275_v54, %v573_v18  ;;  %v3235_v62 = vadd.f32 %v3234_v59, %v3233_v32  ;;  %v2278_v39 = vadd.f32 %v2277_v31, %v4291_v26  ;;  %v4381_v42 = vadd.f32 %v3232_v6, %v4283_v3  ;;  %v583_v54 = vld [vmem:[#allocation2 + $0x50] sm:$0xff] }
 0x216   : > { %2435 = vst [vmem:[#allocation2 + $0x10] sm:$0xff] %v2403_v35  ;;  %v2404_v44 = vadd.f32 %v2286_v24, %v576_v40  ;;  %v581_v35 = vld [vmem:[#allocation2 + $0x40] sm:$0xff] }
 0x217   : > { %2433 = vst [vmem:[#allocation2] sm:$0xff] %v2401_v34  ;;  %v2402_v4 = vadd.f32 %v2278_v39, %v574_v46  ;;  %v4384_v8 = vadd.f32 %v3235_v62, %v4288_v9  ;;  %v584_v46 = vld [vmem:[#allocation2 + $0x58] sm:$0xff]  ;;  %v582_v39 = vld [vmem:[#allocation2 + $0x48] sm:$0xff] }
 0x218   : > { %2436 = vst [vmem:[#allocation2 + $0x18] sm:$0xff] %v2404_v44 }
 0x219   : > { %2434 = vst [vmem:[#allocation2 + $0x8] sm:$0xff] %v2402_v4  ;;  %v3236_v33 = vpop.f32.mrb[84].mxu0  ;;  %v3324_v23 = vpop.f32.mrb[84].mxu1 }
 0x21a   : > { %v2299_v50 = vadd.f32 %v3324_v23, %v4320_v21  ;;  %v3237_v55 = vpop.f32.mrb[85].mxu0  ;;  %v2290_v26 = vpop.f32.mrb[85].mxu1 }
 0x21b   : > { %v3238_v7 = vadd.f32 %v3237_v55, %v3236_v33  ;;  %v2291_v3 = vadd.f32 %v2290_v26, %v4308_v1  ;;  %v3239_v58 = vpop.f32.mrb[86].mxu0  ;;  %v3325_v20 = vpop.f32.mrb[86].mxu1  ;;  %v587_v55 = vld [vmem:[#allocation2 + $0x70] sm:$0xff] }
 0x21c   : > { %v2407_v36 = vadd.f32 %v2299_v50, %v579_v25  ;;  %v2302_v9 = vadd.f32 %v3325_v20, %v4326_v27  ;;  %v3240_v15 = vpop.f32.mrb[87].mxu0  ;;  %v2293_v41 = vpop.f32.mrb[87].mxu1  ;;  %v588_v20 = vld [vmem:[#allocation2 + $0x78] sm:$0xff] }
 0x21d   : > { %v2405_v14 = vadd.f32 %v2291_v3, %v577_v53  ;;  %v3241_v16 = vadd.f32 %v3240_v15, %v3239_v58  ;;  %v2294_v18 = vadd.f32 %v2293_v41, %v4314_v51  ;;  %v4391_v21 = vadd.f32 %v3238_v7, %v4294_v30  ;;  %v585_v3 = vld [vmem:[#allocation2 + $0x60] sm:$0xff] }
 0x21e   : > { %2439 = vst [vmem:[#allocation2 + $0x30] sm:$0xff] %v2407_v36  ;;  %v2408_v19 = vadd.f32 %v2302_v9, %v580_v60 }
 0x21f   : > { %2437 = vst [vmem:[#allocation2 + $0x20] sm:$0xff] %v2405_v14  ;;  %v2406_v1 = vadd.f32 %v2294_v18, %v578_v13  ;;  %v4394_v6 = vadd.f32 %v3241_v16, %v4299_v38  ;;  %v586_v13 = vld [vmem:[#allocation2 + $0x68] sm:$0xff] }
 0x220   : > { %2440 = vst [vmem:[#allocation2 + $0x38] sm:$0xff] %v2408_v19 }
 0x221   : > { %2438 = vst [vmem:[#allocation2 + $0x28] sm:$0xff] %v2406_v1  ;;  %v3242_v27 = vpop.f32.mrb[88].mxu0  ;;  %v3328_v32 = vpop.f32.mrb[88].mxu1 }
 0x222   : > { %v2315_v40 = vadd.f32 %v3328_v32, %v4344_v52  ;;  %v3243_v28 = vpop.f32.mrb[89].mxu0  ;;  %v2306_v51 = vpop.f32.mrb[89].mxu1 }
 0x223   : > { %v3244_v24 = vadd.f32 %v3243_v28, %v3242_v27  ;;  %v2307_v30 = vadd.f32 %v2306_v51, %v4332_v61  ;;  %v3245_v59 = vpop.f32.mrb[90].mxu0  ;;  %v3329_v31 = vpop.f32.mrb[90].mxu1  ;;  %v589_v28 = vld [vmem:[#allocation2 + $0x80] sm:$0xff] }
 0x224   : > { %v2411_v34 = vadd.f32 %v2315_v40, %v583_v54  ;;  %v2318_v38 = vadd.f32 %v3329_v31, %v4350_v10  ;;  %v3246_v62 = vpop.f32.mrb[91].mxu0  ;;  %v2309_v44 = vpop.f32.mrb[91].mxu1  ;;  %v591_v54 = vld [vmem:[#allocation2 + $0x90] sm:$0xff]  ;;  %v590_v31 = vld [vmem:[#allocation2 + $0x88] sm:$0xff] }
 0x225   : > { %v2409_v4 = vadd.f32 %v2307_v30, %v581_v35  ;;  %v3247_v33 = vadd.f32 %v3246_v62, %v3245_v59  ;;  %v2310_v25 = vadd.f32 %v2309_v44, %v4338_v49  ;;  %v4401_v52 = vadd.f32 %v3244_v24, %v4305_v56  ;;  %v592_v24 = vld [vmem:[#allocation2 + $0x98] sm:$0xff] }
 0x226   : > { %2443 = vst [vmem:[#allocation2 + $0x50] sm:$0xff] %v2411_v34  ;;  %v2412_v23 = vadd.f32 %v2318_v38, %v584_v46 }
 0x227   : > { %2441 = vst [vmem:[#allocation2 + $0x40] sm:$0xff] %v2409_v4  ;;  %v2410_v61 = vadd.f32 %v2310_v25, %v582_v39  ;;  %v4404_v50 = vadd.f32 %v3247_v33, %v4311_v45  ;;  %v595_v25 = vld [vmem:[#allocation2 + $0xb0] sm:$0xff] }
 0x228   : > { %2444 = vst [vmem:[#allocation2 + $0x58] sm:$0xff] %v2412_v23 }
 0x229   : > { %2442 = vst [vmem:[#allocation2 + $0x48] sm:$0xff] %v2410_v61  ;;  %v3248_v10 = vpop.f32.mrb[92].mxu0  ;;  %v3332_v53 = vpop.f32.mrb[92].mxu1 }
 0x22a   : > { %v2331_v26 = vadd.f32 %v3332_v53, %v4368_v12  ;;  %v3249_v7 = vpop.f32.mrb[93].mxu0  ;;  %v2322_v49 = vpop.f32.mrb[93].mxu1 }
 0x22b   : > { %v3250_v58 = vadd.f32 %v3249_v7, %v3248_v10  ;;  %v2323_v56 = vadd.f32 %v2322_v49, %v4356_v0  ;;  %v3251_v60 = vpop.f32.mrb[94].mxu0  ;;  %v3333_v36 = vpop.f32.mrb[94].mxu1  ;;  %v593_v10 = vld [vmem:[#allocation2 + $0xa0] sm:$0xff] }
 0x22c   : > { %v2415_v9 = vadd.f32 %v2331_v26, %v587_v55  ;;  %v2334_v45 = vadd.f32 %v3333_v36, %v4374_v47  ;;  %v3252_v15 = vpop.f32.mrb[95].mxu0  ;;  %v2325_v41 = vpop.f32.mrb[95].mxu1 }
 0x22d   : > { %v2413_v14 = vadd.f32 %v2323_v56, %v585_v3  ;;  %v3253_v16 = vadd.f32 %v3252_v15, %v3251_v60  ;;  %v2326_v18 = vadd.f32 %v2325_v41, %v4362_v11  ;;  %v2202_v12 = vadd.f32 %v3250_v58, %v4317_v43  ;;  %v594_v56 = vld [vmem:[#allocation2 + $0xa8] sm:$0xff]  ;;  %v599_v41 = vld [vmem:[#allocation2 + $0xd0] sm:$0xff] }
 0x22e   : > { %2447 = vst [vmem:[#allocation2 + $0x70] sm:$0xff] %v2415_v9  ;;  %v2416_v19 = vadd.f32 %v2334_v45, %v588_v20 }
 0x22f   : > { %2445 = vst [vmem:[#allocation2 + $0x60] sm:$0xff] %v2413_v14  ;;  %v2414_v1 = vadd.f32 %v2326_v18, %v586_v13  ;;  %v2205_v0 = vadd.f32 %v3253_v16, %v4323_v57 }
 0x230   : > { %2448 = vst [vmem:[#allocation2 + $0x78] sm:$0xff] %v2416_v19 }
 0x231   : > { %2446 = vst [vmem:[#allocation2 + $0x68] sm:$0xff] %v2414_v1  ;;  %v3254_v27 = vpop.f32.mrb[96].mxu0  ;;  %v3336_v47 = vpop.f32.mrb[96].mxu1 }
 0x232   : > { %v2347_v32 = vadd.f32 %v3336_v47, %v4391_v21  ;;  %v3255_v40 = vpop.f32.mrb[97].mxu0  ;;  %v2338_v35 = vpop.f32.mrb[97].mxu1 }
 0x233   : > { %v3256_v51 = vadd.f32 %v3255_v40, %v3254_v27  ;;  %v2339_v11 = vadd.f32 %v2338_v35, %v4381_v42  ;;  %v3257_v43 = vpop.f32.mrb[98].mxu0  ;;  %v3337_v30 = vpop.f32.mrb[98].mxu1  ;;  %v600_v27 = vld [vmem:[#allocation2 + $0xd8] sm:$0xff]  ;;  %v598_v40 = vld [vmem:[#allocation2 + $0xc8] sm:$0xff] }
 0x234   : > { %v2419_v59 = vadd.f32 %v2347_v32, %v591_v54  ;;  %v2350_v46 = vadd.f32 %v3337_v30, %v4394_v6  ;;  %v3258_v57 = vpop.f32.mrb[99].mxu0  ;;  %v2341_v34 = vpop.f32.mrb[99].mxu1 }
 0x235   : > { %v2417_v38 = vadd.f32 %v2339_v11, %v589_v28  ;;  %v3259_v62 = vadd.f32 %v3258_v57, %v3257_v43  ;;  %v2342_v39 = vadd.f32 %v2341_v34, %v4384_v8  ;;  %v2210_v21 = vadd.f32 %v3256_v51, %v4329_v48  ;;  %v596_v48 = vld [vmem:[#allocation2 + $0xb8] sm:$0xff] }
 0x236   : > { %2451 = vst [vmem:[#allocation2 + $0x90] sm:$0xff] %v2419_v59  ;;  %v2420_v44 = vadd.f32 %v2350_v46, %v592_v24 }
 0x237   : > { %2449 = vst [vmem:[#allocation2 + $0x80] sm:$0xff] %v2417_v38  ;;  %v2418_v4 = vadd.f32 %v2342_v39, %v590_v31  ;;  %v2213_v42 = vadd.f32 %v3259_v62, %v4335_v5  ;;  %v601_v31 = vld [vmem:[#allocation2 + $0xe0] sm:$0xff] }
 0x238   : > { %2452 = vst [vmem:[#allocation2 + $0x98] sm:$0xff] %v2420_v44 }
 0x239   : > { %2450 = vst [vmem:[#allocation2 + $0x88] sm:$0xff] %v2418_v4  ;;  %v3260_v33 = vpop.f32.mrb[100].mxu0  ;;  %v3340_v6 = vpop.f32.mrb[100].mxu1  ;;  %v602_v4 = vld [vmem:[#allocation2 + $0xe8] sm:$0xff] }
 0x23a   : > { %v2363_v23 = vadd.f32 %v3340_v6, %v2202_v12  ;;  %v3261_v61 = vpop.f32.mrb[101].mxu0  ;;  %v2354_v55 = vpop.f32.mrb[101].mxu1  ;;  %v597_v12 = vld [vmem:[#allocation2 + $0xc0] sm:$0xff] }
 0x23b   : > { %v3262_v53 = vadd.f32 %v3261_v61, %v3260_v33  ;;  %v2355_v8 = vadd.f32 %v2354_v55, %v4401_v52  ;;  %v3263_v26 = vpop.f32.mrb[102].mxu0  ;;  %v3341_v7 = vpop.f32.mrb[102].mxu1  ;;  %v604_v55 = vld [vmem:[#allocation2 + $0xf8] sm:$0xff] }
 0x23c   : > { %v2423_v3 = vadd.f32 %v2363_v23, %v595_v25  ;;  %v2366_v49 = vadd.f32 %v3341_v7, %v2205_v0  ;;  %v3264_v58 = vpop.f32.mrb[103].mxu0  ;;  %v2357_v5 = vpop.f32.mrb[103].mxu1 }
 0x23d   : > { %v2421_v60 = vadd.f32 %v2355_v8, %v593_v10  ;;  %v3265_v20 = vadd.f32 %v3264_v58, %v3263_v26  ;;  %v2358_v36 = vadd.f32 %v2357_v5, %v4404_v50  ;;  %v2218_v9 = vadd.f32 %v3262_v53, %v4341_v63  ;;  %v2472_v58 = vld [vmem:[#allocation2 + $0x18] sm:$0xff] (!%p2938_p13) }
 0x23e   : > { %2455 = vst [vmem:[#allocation2 + $0xb0] sm:$0xff] %v2423_v3  ;;  %v2424_v45 = vadd.f32 %v2366_v49, %v596_v48  ;;  %v4430_v48 = vld [vmem:[%s4519_s2] ss:$0 sm:$0xff] (!%p2938_p13)  ;;  %v2471_v49 = vld [vmem:[#allocation2 + $0x10] sm:$0xff] (!%p2938_p13) }
 0x23f   : > { %2453 = vst [vmem:[#allocation2 + $0xa0] sm:$0xff] %v2421_v60  ;;  %v2422_v15 = vadd.f32 %v2358_v36, %v594_v56  ;;  %v2221_v52 = vadd.f32 %v3265_v20, %v4347_v17  ;;  %v2473_v56 = vld [vmem:[#allocation2 + $0x20] sm:$0xff] (!%p2938_p13)  ;;  %v2510_v5 = vadd.f32 (!%p2938_p13), %v4430_v48, %v2471_v49  ;;  %v2511_v60 = vadd.f32 (!%p2938_p13), %v4430_v48, %v2472_v58  ;;  %v2474_v36 = vld [vmem:[#allocation2 + $0x28] sm:$0xff] (!%p2938_p13) }
 0x240   : > { %2456 = vst [vmem:[#allocation2 + $0xb8] sm:$0xff] %v2424_v45  ;;  %v2512_v20 = vadd.f32 (!%p2938_p13), %v4430_v48, %v2473_v56  ;;  %v2476_v45 = vld [vmem:[#allocation2 + $0x38] sm:$0xff] (!%p2938_p13) }
 0x241   : > { %2454 = vst [vmem:[#allocation2 + $0xa8] sm:$0xff] %v2422_v15  ;;  %v3266_v13 = vpop.f32.mrb[104].mxu0  ;;  %v3344_v14 = vpop.f32.mrb[104].mxu1  ;;  %v2513_v15 = vadd.f32 (!%p2938_p13), %v4430_v48, %v2474_v36  ;;  %2542 = vst [vmem:[%s4052_s30 + $0x10] sm:$0xff] (!%p2938_p13), %v2510_v5 }
 0x242   : > { %v2379_v16 = vadd.f32 %v3344_v14, %v2218_v9  ;;  %v3267_v18 = vpop.f32.mrb[105].mxu0  ;;  %v2370_v19 = vpop.f32.mrb[105].mxu1  ;;  %v2475_v9 = vld [vmem:[#allocation2 + $0x30] sm:$0xff] (!%p2938_p13)  ;;  %v2478_v14 = vld [vmem:[#allocation2 + $0x48] sm:$0xff] (!%p2938_p13)  ;;  %2543 = vst [vmem:[%s4052_s30 + $0x18] sm:$0xff] (!%p2938_p13), %v2511_v60  ;;  %2544 = vst [vmem:[%s4052_s30 + $0x20] sm:$0xff] (!%p2938_p13), %v2512_v20 }
 0x243   : > { %v3268_v1 = vadd.f32 %v3267_v18, %v3266_v13  ;;  %v2371_v0 = vadd.f32 %v2370_v19, %v2210_v21  ;;  %v3269_v50 = vpop.f32.mrb[106].mxu0  ;;  %v3345_v63 = vpop.f32.mrb[106].mxu1  ;;  %v2515_v13 = vadd.f32 (!%p2938_p13), %v4430_v48, %v2476_v45  ;;  %2545 = vst [vmem:[%s4052_s30 + $0x28] sm:$0xff] (!%p2938_p13), %v2513_v15 }
 0x244   : > { %v2427_v54 = vadd.f32 %v2379_v16, %v599_v41  ;;  %v2382_v47 = vadd.f32 %v3345_v63, %v2221_v52  ;;  %v3270_v32 = vpop.f32.mrb[107].mxu0  ;;  %v2373_v28 = vpop.f32.mrb[107].mxu1  ;;  %v2514_v52 = vadd.f32 (!%p2938_p13), %v4430_v48, %v2475_v9  ;;  %v2477_v41 = vld [vmem:[#allocation2 + $0x40] sm:$0xff] (!%p2938_p13)  ;;  %v2479_v16 = vld [vmem:[#allocation2 + $0x50] sm:$0xff] (!%p2938_p13) }
 0x245   : > { %v2425_v17 = vadd.f32 %v2371_v0, %v597_v12  ;;  %v3271_v35 = vadd.f32 %v3270_v32, %v3269_v50  ;;  %v2374_v51 = vadd.f32 %v2373_v28, %v2213_v42  ;;  %v2226_v11 = vadd.f32 %v3268_v1, %v4353_v37  ;;  %v2480_v1 = vld [vmem:[#allocation2 + $0x58] sm:$0xff] (!%p2938_p13)  ;;  %v2481_v0 = vld [vmem:[#allocation2 + $0x60] sm:$0xff] (!%p2938_p13)  ;;  %v2482_v50 = vld [vmem:[#allocation2 + $0x68] sm:$0xff] (!%p2938_p13)  ;;  %2547 = vst [vmem:[%s4052_s30 + $0x38] sm:$0xff] (!%p2938_p13), %v2515_v13 }
 0x246   : > { %2459 = vst [vmem:[#allocation2 + $0xd0] sm:$0xff] %v2427_v54  ;;  %v2428_v43 = vadd.f32 %v2382_v47, %v600_v27  ;;  %v2516_v18 = vadd.f32 (!%p2938_p13), %v4430_v48, %v2477_v41  ;;  %v2517_v12 = vadd.f32 (!%p2938_p13), %v4430_v48, %v2478_v14  ;;  %v2518_v19 = vadd.f32 (!%p2938_p13), %v4430_v48, %v2479_v16  ;;  %v2483_v47 = vld [vmem:[#allocation2 + $0x70] sm:$0xff] (!%p2938_p13)  ;;  %v2484_v32 = vld [vmem:[#allocation2 + $0x78] sm:$0xff] (!%p2938_p13) }
 0x247   : > { %2457 = vst [vmem:[#allocation2 + $0xc0] sm:$0xff] %v2425_v17  ;;  %v2426_v24 = vadd.f32 %v2374_v51, %v598_v40  ;;  %v2229_v30 = vadd.f32 %v3271_v35, %v4359_v2  ;;  %v603_v2 = vld [vmem:[#allocation2 + $0xf0] sm:$0xff]  ;;  %2546 = vst [vmem:[%s4052_s30 + $0x30] sm:$0xff] (!%p2938_p13), %v2514_v52  ;;  %v2519_v27 = vadd.f32 (!%p2938_p13), %v4430_v48, %v2480_v1  ;;  %v2485_v40 = vld [vmem:[#allocation2 + $0x80] sm:$0xff] (!%p2938_p13) }
 0x248   : > { %2460 = vst [vmem:[#allocation2 + $0xd8] sm:$0xff] %v2428_v43  ;;  %v2520_v63 = vadd.f32 (!%p2938_p13), %v4430_v48, %v2481_v0  ;;  %v2521_v54 = vadd.f32 (!%p2938_p13), %v4430_v48, %v2482_v50  ;;  %2548 = vst [vmem:[%s4052_s30 + $0x40] sm:$0xff] (!%p2938_p13), %v2516_v18  ;;  %v2522_v28 = vadd.f32 (!%p2938_p13), %v4430_v48, %v2483_v47  ;;  %v2486_v51 = vld [vmem:[#allocation2 + $0x88] sm:$0xff] (!%p2938_p13)  ;;  %v2488_v43 = vld [vmem:[#allocation2 + $0x98] sm:$0xff] (!%p2938_p13) }
 0x249   : > { %2458 = vst [vmem:[#allocation2 + $0xc8] sm:$0xff] %v2426_v24  ;;  %v3272_v59 = vpop.f32.mrb[108].mxu0  ;;  %v3348_v46 = vpop.f32.mrb[108].mxu1  ;;  %2549 = vst [vmem:[%s4052_s30 + $0x48] sm:$0xff] (!%p2938_p13), %v2517_v12  ;;  %v2523_v17 = vadd.f32 (!%p2938_p13), %v4430_v48, %v2484_v32  ;;  %v2524_v35 = vadd.f32 (!%p2938_p13), %v4430_v48, %v2485_v40  ;;  %v2525_v24 = vadd.f32 (!%p2938_p13), %v4430_v48, %v2486_v51 }
 0x24a   : > { %v3273_v57 = vpop.f32.mrb[109].mxu0  ;;  %v2386_v34 = vpop.f32.mrb[109].mxu1  ;;  %2550 = vst [vmem:[%s4052_s30 + $0x50] sm:$0xff] (!%p2938_p13), %v2518_v19  ;;  %2551 = vst [vmem:[%s4052_s30 + $0x58] sm:$0xff] (!%p2938_p13), %v2519_v27 }
 0x24b   : > { %v3274_v38 = vadd.f32 %v3273_v57, %v3272_v59  ;;  %v2387_v62 = vadd.f32 %v2386_v34, %v2226_v11  ;;  %v3275_v39 = vpop.f32.mrb[110].mxu0  ;;  %v3349_v21 = vpop.f32.mrb[110].mxu1  ;;  %v2487_v11 = vld [vmem:[#allocation2 + $0x90] sm:$0xff] (!%p2938_p13)  ;;  %2552 = vst [vmem:[%s4052_s30 + $0x60] sm:$0xff] (!%p2938_p13), %v2520_v63  ;;  %2553 = vst [vmem:[%s4052_s30 + $0x68] sm:$0xff] (!%p2938_p13), %v2521_v54  ;;  %v2527_v59 = vadd.f32 (!%p2938_p13), %v4430_v48, %v2488_v43  ;;  %v2490_v57 = vld [vmem:[#allocation2 + $0xa8] sm:$0xff] (!%p2938_p13) }
 0x24c   : > { %v3276_v44 = vpop.f32.mrb[111].mxu0  ;;  %v2389_v37 = vpop.f32.mrb[111].mxu1  ;;  %2554 = vst [vmem:[%s4052_s30 + $0x70] sm:$0xff] (!%p2938_p13), %v2522_v28  ;;  %2555 = vst [vmem:[%s4052_s30 + $0x78] sm:$0xff] (!%p2938_p13), %v2523_v17 }
 0x24d   : > { %v2234_v42 = vadd.f32 %v3274_v38, %v4365_v29  ;;  %v2429_v33 = vadd.f32 %v2387_v62, %v601_v31  ;;  %v3277_v25 = vadd.f32 %v3276_v44, %v3275_v39  ;;  %v2390_v6 = vadd.f32 %v2389_v37, %v2229_v30  ;;  %v2469_v29 = vld [vmem:[#allocation2] sm:$0xff] (!%p2938_p13)  ;;  %v2491_v31 = vld [vmem:[#allocation2 + $0xb0] sm:$0xff] (!%p2938_p13)  ;;  %2556 = vst [vmem:[%s4052_s30 + $0x80] sm:$0xff] (!%p2938_p13), %v2524_v35  ;;  %v2492_v39 = vld [vmem:[#allocation2 + $0xb8] sm:$0xff] (!%p2938_p13) }
 0x24e   : > { %v2508_v7 = vadd.f32 (!%p2938_p13), %v4430_v48, %v2469_v29  ;;  %v2526_v30 = vadd.f32 (!%p2938_p13), %v4430_v48, %v2487_v11  ;;  %v2529_v38 = vadd.f32 (!%p2938_p13), %v4430_v48, %v2490_v57  ;;  %v2530_v62 = vadd.f32 (!%p2938_p13), %v4430_v48, %v2491_v31  ;;  %2557 = vst [vmem:[%s4052_s30 + $0x88] sm:$0xff] (!%p2938_p13), %v2525_v24 }
 0x24f   : > { %v2395_v23 = vadd.f32 %v3348_v46, %v2234_v42  ;;  %2461 = vst [vmem:[#allocation2 + $0xe0] sm:$0xff] %v2429_v33  ;;  %v2237_v61 = vadd.f32 %v3277_v25, %v4371_v22  ;;  %v2430_v10 = vadd.f32 %v2390_v6, %v602_v4  ;;  %2468 = sbr.rel (%p2938_p13) target bundleno = 608 (0x260), region = 66  ;;  %v2470_v22 = vld [vmem:[#allocation2 + $0x8] sm:$0xff] (!%p2938_p13)  ;;  %v2489_v46 = vld [vmem:[#allocation2 + $0xa0] sm:$0xff] (!%p2938_p13)  ;;  %2559 = vst [vmem:[%s4052_s30 + $0x98] sm:$0xff] (!%p2938_p13), %v2527_v59 }
 0x250   : > { %v2509_v3 = vadd.f32 (!%p2938_p13), %v4430_v48, %v2470_v22  ;;  %2540 = vst [vmem:[%s4052_s30] sm:$0xff] (!%p2938_p13), %v2508_v7  ;;  %v2528_v34 = vadd.f32 (!%p2938_p13), %v4430_v48, %v2489_v46  ;;  %v2494_v44 = vld [vmem:[#allocation2 + $0xc8] sm:$0xff] (!%p2938_p13)  ;;  %2558 = vst [vmem:[%s4052_s30 + $0x90] sm:$0xff] (!%p2938_p13), %v2526_v30  ;;  %v2531_v4 = vadd.f32 (!%p2938_p13), %v4430_v48, %v2492_v39  ;;  %v2495_v33 = vld [vmem:[#allocation2 + $0xd0] sm:$0xff] (!%p2938_p13) }
 0x251   : > { %v2431_v53 = vadd.f32 %v2395_v23, %v603_v2  ;;  %v2398_v8 = vadd.f32 %v3349_v21, %v2237_v61  ;;  %2462 = vst [vmem:[#allocation2 + $0xe8] sm:$0xff] %v2430_v10  ;;  %v2493_v21 = vld [vmem:[#allocation2 + $0xc0] sm:$0xff] (!%p2938_p13)  ;;  %v2533_v42 = vadd.f32 (!%p2938_p13), %v4430_v48, %v2494_v44  ;;  %v2496_v25 = vld [vmem:[#allocation2 + $0xd8] sm:$0xff] (!%p2938_p13)  ;;  %2561 = vst [vmem:[%s4052_s30 + $0xa8] sm:$0xff] (!%p2938_p13), %v2529_v38 }
 0x252   : > { %2541 = vst [vmem:[%s4052_s30 + $0x8] sm:$0xff] (!%p2938_p13), %v2509_v3  ;;  %v2532_v37 = vadd.f32 (!%p2938_p13), %v4430_v48, %v2493_v21  ;;  %2560 = vst [vmem:[%s4052_s30 + $0xa0] sm:$0xff] (!%p2938_p13), %v2528_v34  ;;  %v2534_v2 = vadd.f32 (!%p2938_p13), %v4430_v48, %v2495_v33  ;;  %v2535_v23 = vadd.f32 (!%p2938_p13), %v4430_v48, %v2496_v25 }
 0x253   : > { %2463 = vst [vmem:[#allocation2 + $0xf0] sm:$0xff] %v2431_v53  ;;  %v2432_v26 = vadd.f32 %v2398_v8, %v604_v55  ;;  %2562 = vst [vmem:[%s4052_s30 + $0xb0] sm:$0xff] (!%p2938_p13), %v2530_v62 }
 0x254   : > { %2563 = vst [vmem:[%s4052_s30 + $0xb8] sm:$0xff] (!%p2938_p13), %v2531_v4  ;;  %2564 = vst [vmem:[%s4052_s30 + $0xc0] sm:$0xff] (!%p2938_p13), %v2532_v37 }
 0x255   : > { %2464 = vst [vmem:[#allocation2 + $0xf8] sm:$0xff] %v2432_v26  ;;  %2565 = vst [vmem:[%s4052_s30 + $0xc8] sm:$0xff] (!%p2938_p13), %v2533_v42 }
 0x256   : > { %v2497_v6 = vld [vmem:[#allocation2 + $0xe0] sm:$0xff]  ;;  %2566 = vst [vmem:[%s4052_s30 + $0xd0] sm:$0xff] %v2534_v2  ;;  %2567 = vst [vmem:[%s4052_s30 + $0xd8] sm:$0xff] %v2535_v23 }
 0x257   : > { %v2536_v61 = vadd.f32 %v4430_v48, %v2497_v6 }
 0x258   : > { %v2498_v10 = vld [vmem:[#allocation2 + $0xe8] sm:$0xff] }
 0x259   : > { %v2537_v8 = vadd.f32 %v4430_v48, %v2498_v10  ;;  %2568 = vst [vmem:[%s4052_s30 + $0xe0] sm:$0xff] %v2536_v61 }
 0x25a   : > { %v2499_v55 = vld [vmem:[#allocation2 + $0xf0] sm:$0xff] }
 0x25b   : > { %v2538_v26 = vadd.f32 %v4430_v48, %v2499_v55  ;;  %2569 = vst [vmem:[%s4052_s30 + $0xe8] sm:$0xff] %v2537_v8 }
 0x25c   : > { %v2500_v53 = vld [vmem:[#allocation2 + $0xf8] sm:$0xff] }
 0x25d   : > { %v2539_v29 = vadd.f32 %v4430_v48, %v2500_v53  ;;  %2570 = vst [vmem:[%s4052_s30 + $0xf0] sm:$0xff] %v2538_v26 }
 0x25f   : > { %2571 = vst [vmem:[%s4052_s30 + $0xf8] sm:$0xff] %v2539_v29 }
 0x260 PF: > { %s13_s18 = sadd.s32 1, %s3696_s18   ;;  %s4521_s12 = smov %s3676_s13 }
 0x261   : > { %p10_p0 = scmp.ge.s32.totalorder %s13_s18, 8   ;;  %s4522_s13 = smov %s3770_s25 }
 0x262   : > { %s4523_s14 = smov %s3688_s16  ;;  %s4524_s15 = smov %s3692_s17 }
 0x263   : > { %s4525_s16 = smov %s4528_s19  ;;  %s4526_s17 = smov %s4532_s20 }
 0x264   :  { %12 = sbr.rel (!%p10_p0) target bundleno = 4 (0x4), region = 113 }

</bundles_post_ra>
